<compile_context>
chip_gen: v7x
topology: tpu7x:2x2x1
jax: 0.10.0
libtpu: 0.0.40
codegen_flags: <defaults>
</compile_context>

<pallas_src>
import jax
import jax.numpy as jnp
from jax.experimental import pallas as pl
from jax.experimental.pallas import tpu as pltpu

_VMEM_LIMIT = 48 * 1024 * 1024  # headroom below 64 MiB (v7x) / 128 MiB (v5e/v6e)


def _im2col_matmul(cols, w_ref, Ho, Wo, Cin, Cout):
    """cols: 9 f32 arrays (Ho*Wo, Cin) in (dy, dx) order -> one MXU matmul."""
    patches = jnp.concatenate(cols, axis=-1).astype(jnp.bfloat16)  # (Ho*Wo, 9*Cin)
    return jnp.dot(patches, w_ref[...],                            # w is bf16
                   preferred_element_type=jnp.float32)             # (Ho*Wo, Cout)


def _accumulate_stats(stats_ref, acc):
    """Accumulate per-channel sum / sum-of-squares across the batch grid axis."""
    @pl.when(pl.program_id(0) == 0)
    def _():
        stats_ref[...] = jnp.zeros_like(stats_ref)
    stats_ref[0:1, :] += jnp.sum(acc, axis=0, keepdims=True)
    stats_ref[1:2, :] += jnp.sum(acc * acc, axis=0, keepdims=True)


def _conv_stats_kernel(x_ref, w_ref, conv_ref, stats_ref):
    """3x3 valid conv (no bias) as one im2col matmul + BN batch-stat accumulation.

    x_ref: (H, W, Cin)  w_ref: (9*Cin, Cout) bf16
    conv_ref: (Ho, Wo, Cout) f32   stats_ref: (2, Cout) f32 (grid-resident)
    """
    H, W, Cin = x_ref.shape
    Ho, Wo = H - 2, W - 2
    Cout = conv_ref.shape[-1]
    # Slice the *ref* per tap (no full-tensor materialization followed by nine
    # value-slices); the concat builds the im2col buffer once.
    cols = [x_ref[dy:dy + Ho, dx:dx + Wo, :].reshape(Ho * Wo, Cin)
            for dy in range(3) for dx in range(3)]
    acc = _im2col_matmul(cols, w_ref, Ho, Wo, Cin, Cout)
    conv_ref[...] = acc.reshape(Ho, Wo, Cout)
    _accumulate_stats(stats_ref, acc)


def _act_conv_stats_kernel(x_ref, scale_ref, shift_ref, w_ref, conv_ref, stats_ref):
    """(BN-affine + ReLU of the previous conv) fused into this conv's prologue."""
    H, W, Cin = x_ref.shape
    Ho, Wo = H - 2, W - 2
    Cout = conv_ref.shape[-1]
    # Affine + ReLU must see the whole input once; slices of the value below are
    # the im2col build (review: acceptable as a one-shot VMEM buffer).
    x = jnp.maximum(x_ref[...] * scale_ref[...].reshape(1, 1, Cin)
                    + shift_ref[...].reshape(1, 1, Cin), 0.0)
    cols = [x[dy:dy + Ho, dx:dx + Wo, :].reshape(Ho * Wo, Cin)
            for dy in range(3) for dx in range(3)]
    acc = _im2col_matmul(cols, w_ref, Ho, Wo, Cin, Cout)
    conv_ref[...] = acc.reshape(Ho, Wo, Cout)
    _accumulate_stats(stats_ref, acc)


def _bn_relu_pool_kernel(x_ref, scale_ref, shift_ref, skip_ref, pool_ref):
    """BN-affine + ReLU, write skip connection, fused 2x2/2 max-pool (floor)."""
    Ho, Wo, C = x_ref.shape
    Hh, Wh = pool_ref.shape[0], pool_ref.shape[1]
    y = jnp.maximum(x_ref[...] * scale_ref[...].reshape(1, 1, C)
                    + shift_ref[...].reshape(1, 1, C), 0.0)
    skip_ref[...] = y
    # Dense reshape + reduce instead of stride-2 reads.
    yp = y[:2 * Hh, :2 * Wh, :].reshape(Hh, 2, Wh, 2, C)
    pool_ref[...] = jnp.max(yp, axis=(1, 3))


def conv_stats(x, w2d, act_scale=None, act_shift=None):
    """Run conv (+ optional fused input affine+ReLU) over a batch grid."""
    N, H, W, Cin = x.shape
    Cout = w2d.shape[-1]
    Ho, Wo = H - 2, W - 2
    x_spec = pl.BlockSpec((None, H, W, Cin), lambda n: (n, 0, 0, 0))
    w_spec = pl.BlockSpec((9 * Cin, Cout), lambda n: (0, 0))
    aff_spec = pl.BlockSpec((1, Cin), lambda n: (0, 0))
    conv_spec = pl.BlockSpec((None, Ho, Wo, Cout), lambda n: (n, 0, 0, 0))
    stats_spec = pl.BlockSpec((2, Cout), lambda n: (0, 0))  # resident accumulator

    if act_scale is None:
        kernel, in_specs, args = _conv_stats_kernel, [x_spec, w_spec], (x, w2d)
    else:
        kernel = _act_conv_stats_kernel
        in_specs = [x_spec, aff_spec, aff_spec, w_spec]
        args = (x, act_scale, act_shift, w2d)

    # Batch axis is the BN reduction axis for the resident stats output ->
    # must be "arbitrary".
    # TODO(synk): for full-resolution UNet inputs (572x572, 64..512 ch) add
    # spatial row tiling with a 2-row halo plus a Cout grid axis marked
    # "parallel" (v7x megacore), with tiles re-sized for 64 MiB VMEM.
    return pl.pallas_call(
        kernel,
        out_shape=(jax.ShapeDtypeStruct((N, Ho, Wo, Cout), jnp.float32),
                   jax.ShapeDtypeStruct((2, Cout), jnp.float32)),
        grid=(N,),
        in_specs=in_specs,
        out_specs=(conv_spec, stats_spec),
        compiler_params=pltpu.CompilerParams(
            dimension_semantics=("arbitrary",),
            vmem_limit_bytes=_VMEM_LIMIT),
    )(*args)


def bn_relu_pool(x, scale, shift):
    N, Ho, Wo, C = x.shape
    Hh, Wh = Ho // 2, Wo // 2
    return pl.pallas_call(
        _bn_relu_pool_kernel,
        out_shape=(jax.ShapeDtypeStruct((N, Ho, Wo, C), jnp.float32),
                   jax.ShapeDtypeStruct((N, Hh, Wh, C), jnp.float32)),
        grid=(N,),
        in_specs=[pl.BlockSpec((None, Ho, Wo, C), lambda n: (n, 0, 0, 0)),
                  pl.BlockSpec((1, C), lambda n: (0, 0)),
                  pl.BlockSpec((1, C), lambda n: (0, 0))],
        out_specs=(pl.BlockSpec((None, Ho, Wo, C), lambda n: (n, 0, 0, 0)),
                   pl.BlockSpec((None, Hh, Wh, C), lambda n: (n, 0, 0, 0))),
        compiler_params=pltpu.CompilerParams(
            dimension_semantics=("parallel",),   # both v7x TensorCores
            vmem_limit_bytes=_VMEM_LIMIT),
    )(x, scale, shift)


def _stats_to_affine(stats, count, gamma, beta, eps=1e-5):
    """Fold BatchNorm into per-channel y = x*scale + shift (tiny, plain JAX).

    Single-pass E[x^2]-E[x]^2 variance: fine for O(1) activations; a two-pass
    reduction would be numerically safer for very large activations.
    """
    mean = stats[0:1, :] / count
    var = jnp.maximum(stats[1:2, :] / count - mean * mean, 0.0)
    scale = gamma * jax.lax.rsqrt(var + eps)
    shift = beta - mean * scale
    return scale, shift


def init_params(key, in_channels, block_out_channels):
    """Deterministic synthetic parameters matching the module's shapes."""
    params = []
    cin = in_channels
    for cout in block_out_channels:
        key, k1, k2 = jax.random.split(key, 3)

        def conv_w(k, ci, co):
            # PyTorch (Cout, Cin, 3, 3) -> HWIO -> (9*Cin, Cout), bf16 operand.
            w = jax.random.normal(k, (co, ci, 3, 3), jnp.float32) * 0.1
            return w.transpose(2, 3, 1, 0).reshape(9 * ci, co).astype(jnp.bfloat16)

        w1, w2 = conv_w(k1, cin, cout), conv_w(k2, cout, cout)
        g1 = jnp.ones((1, cout), jnp.float32)
        b1 = jnp.zeros((1, cout), jnp.float32)
        g2 = jnp.ones((1, cout), jnp.float32)
        b2 = jnp.zeros((1, cout), jnp.float32)
        params.append((w1, g1, b1, w2, g2, b2))
        cin = cout
    return params


def unet_encoder(x_nchw, params):
    """Forward pass of UNetEncoder. Returns (x, skip_connections), all NCHW."""
    x = jnp.transpose(x_nchw, (0, 2, 3, 1))                 # NCHW -> NHWC
    skips = []
    for (w1, g1, b1, w2, g2, b2) in params:
        N, H, W, _ = x.shape
        # conv1 + batch statistics (single K=9*Cin MXU matmul per image).
        c1, s1 = conv_stats(x, w1)
        sc1, sh1 = _stats_to_affine(s1, N * (H - 2) * (W - 2), g1, b1)
        # BN1 + ReLU fused into conv2's prologue (one fewer HBM round trip).
        c2, s2 = conv_stats(c1, w2, act_scale=sc1, act_shift=sh1)
        sc2, sh2 = _stats_to_affine(s2, N * (H - 4) * (W - 4), g2, b2)
        # BN2 + ReLU + skip write + fused 2x2 max-pool.
        skip, x = bn_relu_pool(c2, sc2, sh2)
        skips.append(jnp.transpose(skip, (0, 3, 1, 2)))      # skip in NCHW
    # TODO(synk): BatchNorm2d running_mean/running_var buffer updates (a
    # training-mode side effect) are not reproduced; forward output unaffected.
    return jnp.transpose(x, (0, 3, 1, 2)), skips


if __name__ == "__main__":
    key = jax.random.PRNGKey(0)
    kx, kp = jax.random.split(key)

    in_channels = 3
    block_out_channels = (8, 16)
    # Small analogue of torch.rand((2, 3, 572, 572)).
    x = jax.random.uniform(kx, (2, in_channels, 20, 20), dtype=jnp.float32)

    params = init_params(kp, in_channels, block_out_channels)
    out, skips = unet_encoder(x, params)

    jax.block_until_ready(out)
    for s in skips:
        jax.block_until_ready(s)

    # Expected: out (2,16,2,2); skips [(2,8,16,16), (2,16,4,4)]
    assert out.shape == (2, block_out_channels[-1], 2, 2)
    assert skips[0].shape == (2, 8, 16, 16) and skips[1].shape == (2, 16, 4, 4)
    print("KERNEL_OK")
</pallas_src>

<mosaic_0001>
module attributes {stable_mosaic.version = 11 : i64} {
  func.func @_conv_stats_kernel(%arg0: i32, %arg1: memref<1x20x20x3xf32, #tpu.memory_space<vmem>>, %arg2: memref<27x8xbf16, #tpu.memory_space<vmem>>, %arg3: memref<1x18x18x8xf32, #tpu.memory_space<vmem>>, %arg4: memref<2x8xf32, #tpu.memory_space<vmem>>) attributes {dimension_semantics = [#tpu.dimension_semantics<arbitrary>], iteration_bounds = array<i64: 2>, scalar_prefetch = 0 : i64, scratch_operands = 0 : i64, tpu.core_type = #tpu.core_type<tc>, window_params = [{transform_indices = @transform_0, window_bounds = array<i64: 1, 20, 20, 3>}, {pipeline_mode = #tpu.pipeline_mode<synchronous>, transform_indices = @transform_1, window_bounds = array<i64: 27, 8>}, {transform_indices = @transform_2, window_bounds = array<i64: 1, 18, 18, 8>}, {pipeline_mode = #tpu.pipeline_mode<synchronous>, transform_indices = @transform_3, window_bounds = array<i64: 2, 8>}]} {
    %c0 = arith.constant 0 : index
    %c0_0 = arith.constant 0 : index
    %c0_1 = arith.constant 0 : index
    %c0_2 = arith.constant 0 : index
    %0 = vector.load %arg1[%c0, %c0_0, %c0_1, %c0_2] : memref<1x20x20x3xf32, #tpu.memory_space<vmem>>, vector<1x18x18x3xf32>
    %1 = vector.shape_cast %0 : vector<1x18x18x3xf32> to vector<18x18x3xf32>
    %2 = vector.shape_cast %1 : vector<18x18x3xf32> to vector<324x3xf32>
    %c0_3 = arith.constant 0 : index
    %c0_4 = arith.constant 0 : index
    %c1 = arith.constant 1 : index
    %c0_5 = arith.constant 0 : index
    %3 = vector.load %arg1[%c0_3, %c0_4, %c1, %c0_5] : memref<1x20x20x3xf32, #tpu.memory_space<vmem>>, vector<1x18x18x3xf32>
    %4 = vector.shape_cast %3 : vector<1x18x18x3xf32> to vector<18x18x3xf32>
    %5 = vector.shape_cast %4 : vector<18x18x3xf32> to vector<324x3xf32>
    %c0_6 = arith.constant 0 : index
    %c0_7 = arith.constant 0 : index
    %c2 = arith.constant 2 : index
    %c0_8 = arith.constant 0 : index
    %6 = vector.load %arg1[%c0_6, %c0_7, %c2, %c0_8] : memref<1x20x20x3xf32, #tpu.memory_space<vmem>>, vector<1x18x18x3xf32>
    %7 = vector.shape_cast %6 : vector<1x18x18x3xf32> to vector<18x18x3xf32>
    %8 = vector.shape_cast %7 : vector<18x18x3xf32> to vector<324x3xf32>
    %c0_9 = arith.constant 0 : index
    %c1_10 = arith.constant 1 : index
    %c0_11 = arith.constant 0 : index
    %c0_12 = arith.constant 0 : index
    %9 = vector.load %arg1[%c0_9, %c1_10, %c0_11, %c0_12] : memref<1x20x20x3xf32, #tpu.memory_space<vmem>>, vector<1x18x18x3xf32>
    %10 = vector.shape_cast %9 : vector<1x18x18x3xf32> to vector<18x18x3xf32>
    %11 = vector.shape_cast %10 : vector<18x18x3xf32> to vector<324x3xf32>
    %c0_13 = arith.constant 0 : index
    %c1_14 = arith.constant 1 : index
    %c1_15 = arith.constant 1 : index
    %c0_16 = arith.constant 0 : index
    %12 = vector.load %arg1[%c0_13, %c1_14, %c1_15, %c0_16] : memref<1x20x20x3xf32, #tpu.memory_space<vmem>>, vector<1x18x18x3xf32>
    %13 = vector.shape_cast %12 : vector<1x18x18x3xf32> to vector<18x18x3xf32>
    %14 = vector.shape_cast %13 : vector<18x18x3xf32> to vector<324x3xf32>
    %c0_17 = arith.constant 0 : index
    %c1_18 = arith.constant 1 : index
    %c2_19 = arith.constant 2 : index
    %c0_20 = arith.constant 0 : index
    %15 = vector.load %arg1[%c0_17, %c1_18, %c2_19, %c0_20] : memref<1x20x20x3xf32, #tpu.memory_space<vmem>>, vector<1x18x18x3xf32>
    %16 = vector.shape_cast %15 : vector<1x18x18x3xf32> to vector<18x18x3xf32>
    %17 = vector.shape_cast %16 : vector<18x18x3xf32> to vector<324x3xf32>
    %c0_21 = arith.constant 0 : index
    %c2_22 = arith.constant 2 : index
    %c0_23 = arith.constant 0 : index
    %c0_24 = arith.constant 0 : index
    %18 = vector.load %arg1[%c0_21, %c2_22, %c0_23, %c0_24] : memref<1x20x20x3xf32, #tpu.memory_space<vmem>>, vector<1x18x18x3xf32>
    %19 = vector.shape_cast %18 : vector<1x18x18x3xf32> to vector<18x18x3xf32>
    %20 = vector.shape_cast %19 : vector<18x18x3xf32> to vector<324x3xf32>
    %c0_25 = arith.constant 0 : index
    %c2_26 = arith.constant 2 : index
    %c1_27 = arith.constant 1 : index
    %c0_28 = arith.constant 0 : index
    %21 = vector.load %arg1[%c0_25, %c2_26, %c1_27, %c0_28] : memref<1x20x20x3xf32, #tpu.memory_space<vmem>>, vector<1x18x18x3xf32>
    %22 = vector.shape_cast %21 : vector<1x18x18x3xf32> to vector<18x18x3xf32>
    %23 = vector.shape_cast %22 : vector<18x18x3xf32> to vector<324x3xf32>
    %c0_29 = arith.constant 0 : index
    %c2_30 = arith.constant 2 : index
    %c2_31 = arith.constant 2 : index
    %c0_32 = arith.constant 0 : index
    %24 = vector.load %arg1[%c0_29, %c2_30, %c2_31, %c0_32] : memref<1x20x20x3xf32, #tpu.memory_space<vmem>>, vector<1x18x18x3xf32>
    %25 = vector.shape_cast %24 : vector<1x18x18x3xf32> to vector<18x18x3xf32>
    %26 = vector.shape_cast %25 : vector<18x18x3xf32> to vector<324x3xf32>
    %27 = tpu.concatenate %2, %5, %8, %11, %14, %17, %20, %23, %26 in 1 : vector<324x3xf32>, vector<324x3xf32>, vector<324x3xf32>, vector<324x3xf32>, vector<324x3xf32>, vector<324x3xf32>, vector<324x3xf32>, vector<324x3xf32>, vector<324x3xf32> -> vector<324x27xf32>
    %28 = arith.truncf %27 : vector<324x27xf32> to vector<324x27xbf16>
    %c0_33 = arith.constant 0 : index
    %c0_34 = arith.constant 0 : index
    %29 = vector.load %arg2[%c0_33, %c0_34] : memref<27x8xbf16, #tpu.memory_space<vmem>>, vector<27x8xbf16>
    %cst = arith.constant dense<0.000000e+00> : vector<324x8xf32>
    %30 = tpu.matmul %28, %29, %cst {dimension_numbers = #tpu.dot_dimension_numbers<[1], [0], [0], [1], [0, 0, 1, 1], [], []>} : vector<324x27xbf16>, vector<27x8xbf16>, vector<324x8xf32> -> vector<324x8xf32>
    %31 = vector.shape_cast %30 : vector<324x8xf32> to vector<18x18x8xf32>
    %c0_35 = arith.constant 0 : index
    %c0_36 = arith.constant 0 : index
    %c0_37 = arith.constant 0 : index
    %c0_38 = arith.constant 0 : index
    %32 = vector.load %arg3[%c0_35, %c0_36, %c0_37, %c0_38] : memref<1x18x18x8xf32, #tpu.memory_space<vmem>>, vector<1x18x18x8xf32>
    %33 = vector.shape_cast %32 : vector<1x18x18x8xf32> to vector<18x18x8xf32>
    %34 = vector.shape_cast %31 : vector<18x18x8xf32> to vector<1x18x18x8xf32>
    tpu.vector_store %arg3[%c0_35, %c0_36, %c0_37, %c0_38], %34 {strides = array<i32>} : memref<1x18x18x8xf32, #tpu.memory_space<vmem>>, vector<1x18x18x8xf32>,
    %c0_i32 = arith.constant 0 : i32
    %35 = arith.cmpi eq, %arg0, %c0_i32 : i32
    %36 = arith.extui %35 : i1 to i32
    %c0_i32_39 = arith.constant 0 : i32
    %37 = arith.cmpi ne, %36, %c0_i32_39 : i32
    scf.if %37 {
      %cst_50 = arith.constant 0.000000e+00 : f32
      %49 = vector.broadcast %cst_50 : f32 to vector<2x8xf32>
      %c0_51 = arith.constant 0 : index
      %c0_52 = arith.constant 0 : index
      %50 = vector.load %arg4[%c0_51, %c0_52] : memref<2x8xf32, #tpu.memory_space<vmem>>, vector<2x8xf32>
      tpu.vector_store %arg4[%c0_51, %c0_52], %49 {strides = array<i32>} : memref<2x8xf32, #tpu.memory_space<vmem>>, vector<2x8xf32>,
    } else {
    }
    %c0_40 = arith.constant 0 : index
    %c0_41 = arith.constant 0 : index
    %38 = vector.load %arg4[%c0_40, %c0_41] : memref<2x8xf32, #tpu.memory_space<vmem>>, vector<1x8xf32>
    %cst_42 = arith.constant dense<0.000000e+00> : vector<8xf32>
    %39 = vector.multi_reduction <add>, %30, %cst_42 [0] : vector<324x8xf32> to vector<8xf32>
    %40 = vector.shape_cast %39 : vector<8xf32> to vector<1x8xf32>
    %41 = arith.addf %38, %40 : vector<1x8xf32>
    %c0_43 = arith.constant 0 : index
    %c0_44 = arith.constant 0 : index
    %42 = vector.load %arg4[%c0_43, %c0_44] : memref<2x8xf32, #tpu.memory_space<vmem>>, vector<1x8xf32>
    tpu.vector_store %arg4[%c0_43, %c0_44], %41 {strides = array<i32>} : memref<2x8xf32, #tpu.memory_space<vmem>>, vector<1x8xf32>,
    %c1_45 = arith.constant 1 : index
    %c0_46 = arith.constant 0 : index
    %43 = vector.load %arg4[%c1_45, %c0_46] : memref<2x8xf32, #tpu.memory_space<vmem>>, vector<1x8xf32>
    %44 = arith.mulf %30, %30 : vector<324x8xf32>
    %cst_47 = arith.constant dense<0.000000e+00> : vector<8xf32>
    %45 = vector.multi_reduction <add>, %44, %cst_47 [0] : vector<324x8xf32> to vector<8xf32>
    %46 = vector.shape_cast %45 : vector<8xf32> to vector<1x8xf32>
    %47 = arith.addf %43, %46 : vector<1x8xf32>
    %c1_48 = arith.constant 1 : index
    %c0_49 = arith.constant 0 : index
    %48 = vector.load %arg4[%c1_48, %c0_49] : memref<2x8xf32, #tpu.memory_space<vmem>>, vector<1x8xf32>
    tpu.vector_store %arg4[%c1_48, %c0_49], %47 {strides = array<i32>} : memref<2x8xf32, #tpu.memory_space<vmem>>, vector<1x8xf32>,
    return
  }
  func.func @transform_0(%arg0: i32) -> (i32, i32, i32, i32) {
    %c0_i32 = arith.constant 0 : i32
    %c0_i32_0 = arith.constant 0 : i32
    %c0_i32_1 = arith.constant 0 : i32
    %c0_i32_2 = arith.constant 0 : i32
    return %arg0, %c0_i32, %c0_i32_0, %c0_i32_1 : i32, i32, i32, i32
  }
  func.func @transform_1(%arg0: i32) -> (i32, i32) {
    %c0_i32 = arith.constant 0 : i32
    %c0_i32_0 = arith.constant 0 : i32
    %c0_i32_1 = arith.constant 0 : i32
    return %c0_i32, %c0_i32_0 : i32, i32
  }
  func.func @transform_2(%arg0: i32) -> (i32, i32, i32, i32) {
    %c0_i32 = arith.constant 0 : i32
    %c0_i32_0 = arith.constant 0 : i32
    %c0_i32_1 = arith.constant 0 : i32
    %c0_i32_2 = arith.constant 0 : i32
    return %arg0, %c0_i32, %c0_i32_0, %c0_i32_1 : i32, i32, i32, i32
  }
  func.func @transform_3(%arg0: i32) -> (i32, i32) {
    %c0_i32 = arith.constant 0 : i32
    %c0_i32_0 = arith.constant 0 : i32
    %c0_i32_1 = arith.constant 0 : i32
    return %c0_i32, %c0_i32_0 : i32, i32
  }
}

</mosaic_0001>

<bundles_post_ra>
// kernel: tpu_custom_call.1
= control target key start
LH: loop header
LB: loop body
LE: loop exit
PB: predicated region body
PF: predicated region fallthrough
CT: control target
= control target key end

     0   :  { %9 = vsyncpa [#allocation3], 0  ;;  %s19357_s12 = smov 0   ;;  %s25052_s0 = inlined_call_operand.vmem [shape: f32[2,20,20,3], index: 0, kind: input, shape index: {}]   ;;  %s25053_s1 = inlined_call_operand.vmem [shape: bf16[27,8], index: 1, kind: input, shape index: {}]   ;;  %s25054_s2 = inlined_call_operand.vmem [shape: f32[2,18,18,8], index: 2, kind: output, shape index: {0}]   ;;  %s25055_s3 = inlined_call_operand.hbm [shape: f32[2,8], index: 3, kind: output, shape index: {1}]  }
   0x1 LB: > { %s19363_s13 = sadd.s32 4294967295, %s19321_s12   ;;  %p17535_p0 = scmp.ge.s32.totalorder %s19321_s12, 1  ;;  %s19321_s12 = sphi %s19357_s12, %s15_s12  }
   0x2   : > { %p136_p1 = scmp.lt.s32.totalorder %s19321_s12, 3 }
   0x4   : > { %p137_p2 = pnand %p17535_p0, %p136_p1 }
   0x6   : > { %140 = sbr.rel (%p137_p2) target bundleno = 1407 (0x57f), region = 28 }
   0xd   : > { %p160_p3 = scmp.lt.s32.totalorder %s19363_s13, 1  ;;  %v283_v0 = vlaneseq  ;;  %v19323_v1 = vmov 1983009808   ;;  %s19324_s19 = smov 3   ;;  %vm15004_vm0 = vcmask 23552   ;;  %vm15046_vm1 = vcmask 48128  }
   0xe   : > { %v281_v2 = vunpack.c.l.s4 %v19323_v1  ;;  %s19325_s20 = smov 6   ;;  %s19326_s21 = smov 9   ;;  %vm15088_vm2 = vcmask 72704   ;;  %vm15130_vm3 = vcmask 97280   ;;  %vm15172_vm4 = vcmask 121856  }
   0xf   : > { %s19369_s14 = scalar_select %p160_p3, %s19363_s13, 1  ;;  %v284_v3 = vshrl.u32 %v283_v0, 7  ;;  %vm15214_vm5 = vcmask 146432   ;;  %vm15256_vm6 = vcmask 171008   ;;  %vm15298_vm7 = vcmask 195584  }
  0x10   : > { %v282_v4 = vunpack.c.0.s8 %v281_v2  ;;  %s19327_s22 = smov 12   ;;  %s19328_s23 = smov 15   ;;  %vm15440_vm8 = vcmask 1044480   ;;  %vm15441_vm9 = vcmask 1045504   ;;  %vm19334_vm10 = vmmov 0  }
  0x11   : > { %s18167_s15 = smul.u32 480, %s19369_s14  ;;  %s19329_s24 = smov 21   ;;  %vm15376_vm11 = vcmask 220160   ;;  %vm17168_vm12 = vcmask 64512   ;;  %vm17171_vm13 = vcmask 58368  }
  0x12   : > { %v19372_v5 = vsub.s32 %v282_v4, %v284_v3  ;;  %s19330_s25 = smov 18   ;;  %s19331_s26 = smov 24  }
  0x13   : > { %s19377_s18 = scalar_lea.vmem %s25052_s0, %s18167_s15  ;;  %s18168_s4 = smul.u32 432, %s19369_s14 }
  0x14   : > { %v1021_v6 = vld [vmem:[%s19377_s18 + $0x21] sm:$0xff]  ;;  %v1023_v7 = vld [vmem:[%s19377_s18 + $0x31] sm:$0xff]  ;;  %v1024_v8 = vld [vmem:[%s19377_s18 + $0x39] sm:$0xff]  ;;  %p18047_p4 = scmp.ne.s32.totalorder %s19363_s13, 0 }
  0x15   : > { %v1183_v9 = vcombine.high %v1021_v6, %v1021_v6  ;;  %v1207_v10 = vcombine.high %v1023_v7, %v1023_v7  ;;  %v1214_v11 = vrot.slane %v1023_v7, %v19372_v5  ;;  %v1017_v12 = vld [vmem:[%s19377_s18 + $0x1] sm:$0xff]  ;;  %v1018_v13 = vld [vmem:[%s19377_s18 + $0x9] sm:$0xff]  ;;  %v19386_v14 = vrot.slane %v1021_v6, %v19372_v5  ;;  %v19407_v48 = vld [vmem:[%s19377_s18 + $0x51] sm:$0xff]  ;;  %s24241_s7 = scalar_lea.vmem %s25054_s2, %s18168_s4 }
  0x16   : > { %v1224_v15 = vcombine.high %v1024_v8, %v1024_v8  ;;  %v1231_v16 = vrot.slane %v1024_v8, %v19372_v5  ;;  %v1125_v17 = vcombine.high %v1017_v12, %v1017_v12  ;;  %v1132_v18 = vrot.slane %v1017_v12, %v19372_v5  ;;  %v17557_v23 = vld.sshfl [vmem:[%s19377_s18 + $0x29] sm:$0x3 pattern:$0x76325410]  ;;  %v1020_v59 = vld [vmem:[%s19377_s18 + $0x19] sm:$0xff] }
  0x17   : > { %v19391_v19 = vrot.slane %v1183_v9, %v19372_v5  ;;  %v1221_v20 = vrot.slane %v1207_v10, %v19372_v5  ;;  %v1222_v21 = vcombine.high %v1214_v11, %v1214_v11  ;;  %v1142_v22 = vcombine.high %v1018_v13, %v1018_v13  ;;  %v1026_v40 = vld [vmem:[%s19377_s18 + $0x49] sm:$0xff]  ;;  %v17558_v52 = vld.sshfl [vmem:[%s19377_s18 + $0x41] sm:$0x3 pattern:$0x76325410] }
  0x18   : > { %v1239_v24 = vcombine.high %v1231_v16, %v1231_v16  ;;  %v1139_v25 = vrot.slane %v1125_v17, %v19372_v5  ;;  %v1140_v26 = vcombine.high %v1132_v18, %v1132_v18  ;;  %v1149_v27 = vrot.slane %v1018_v13, %v19372_v5  ;;  %v17556_v7 = vld.sshfl [vmem:[%s19377_s18 + $0x11] sm:$0x3 pattern:$0x76325410]  ;;  %v1030_v10 = vld [vmem:[%s19377_s18 + $0x69] sm:$0xff] }
  0x19   : > { %v1199_v28 = vcombine.high %v19391_v19, %v19391_v19  ;;  %v1223_v29 = vcombine.high %v1221_v20, %v1221_v20  ;;  %v8585_v30 = vcombine.low %v1214_v11, %v1222_v21  ;;  %v1156_v31 = vrot.slane %v1142_v22, %v19372_v5  ;;  %v1032_v21 = vld [vmem:[%s19377_s18 + $0x79] sm:$0xff] }
  0x1a   : > { %v8602_v32 = vcombine.low %v1231_v16, %v1239_v24  ;;  %v1141_v33 = vcombine.high %v1139_v25, %v1139_v25  ;;  %v1157_v34 = vcombine.high %v1149_v27, %v1149_v27  ;;  %v8516_v35 = vcombine.low %v1132_v18, %v1140_v26 }
  0x1b   : > { %v8584_v36 = vcombine.low %v1199_v28, %v17557_v23  ;;  %v8599_v37 = vrot.slane %v8585_v30, %v19372_v5  ;;  %v8601_v38 = vcombine.low %v1221_v20, %v1223_v29  ;;  %v1158_v39 = vcombine.high %v1156_v31, %v1156_v31 }
  0x1c   : > { %v8616_v41 = vrot.slane %v8602_v32, %v19372_v5  ;;  %v8517_v42 = vcombine.low %v1139_v25, %v1141_v33  ;;  %v8524_v43 = vrot.slane %v8516_v35, %v19372_v5  ;;  %v8533_v44 = vcombine.low %v1149_v27, %v1157_v34 }
  0x1d   : > { %v8592_v45 = vrot.slane %v8584_v36, %v19372_v5  ;;  %v8609_v46 = vrot.slane %v8601_v38, %v19372_v5  ;;  %v8534_v47 = vcombine.low %v1156_v31, %v1158_v39  ;;  %v1238_v49 = vrot.slane %v1224_v15, %v19372_v5  ;;  %v17560_v36 = vld.sshfl [vmem:[%s19377_s18 + $0x71] sm:$0x3 pattern:$0x76325410] }
  0x1e   : > { %v8531_v50 = vrot.slane %v8517_v42, %v19372_v5  ;;  %v8541_v51 = vrot.slane %v8533_v44, %v19372_v5  ;;  %v1248_v53 = vcombine.high %v1026_v40, %v1026_v40  ;;  %v1255_v54 = vrot.slane %v1026_v40, %v19372_v5 }
  0x1f   : > { %v8600_v55 = vcombine.low %v8592_v45, %v8599_v37  ;;  %v8617_v56 = vcombine.low %v8609_v46, %v8616_v41  ;;  %v8548_v57 = vrot.slane %v8534_v47, %v19372_v5  ;;  %v1240_v58 = vcombine.high %v1238_v49, %v1238_v49  ;;  %v1029_v41 = vld [vmem:[%s19377_s18 + $0x61] sm:$0xff] }
  0x20   : > { %v8532_v60 = vcombine.low %v8524_v43, %v8531_v50  ;;  %v1262_v61 = vrot.slane %v1248_v53, %v19372_v5  ;;  %v1263_v62 = vcombine.high %v1255_v54, %v1255_v54  ;;  %v19419_v63 = vrot.slane %v19407_v48, %v19372_v5  ;;  %v17559_v53 = vld.sshfl [vmem:[%s19377_s18 + $0x59] sm:$0x3 pattern:$0x76325410] }
  0x21   : > { %v18207_v0 = vpack.i.bf16 %v8617_v56, %v8600_v55  ;;  %v8549_v1 = vcombine.low %v8541_v51, %v8548_v57  ;;  %v8618_v2 = vcombine.low %v1238_v49, %v1240_v58  ;;  %v8619_v3 = vcombine.low %v17558_v52, %v1255_v54  ;;  %v1035_v55 = vld [vmem:[%s19377_s18 + $0x91] sm:$0xff] }
  0x22   : > { %v1264_v4 = vcombine.high %v1262_v61, %v1262_v61  ;;  %v8635_v6 = vcombine.low %v1263_v62, %v1262_v61  ;;  %v1166_v8 = vcombine.high %v1020_v59, %v1020_v59  ;;  %v1173_v9 = vrot.slane %v1020_v59, %v19372_v5 }
  0x23   : > { %18208 = vrot.lane.b32.xlu1 %v18207_v0, %s19324_s19  ;;  %v18197_v11 = vpack.i.bf16 %v8549_v1, %v8532_v60  ;;  %v8626_v12 = vrot.slane %v8618_v2, %v19372_v5  ;;  %v8633_v13 = vrot.slane %v8619_v3, %v19372_v5  ;;  %v1198_v15 = vcombine.high %v19386_v14, %v19386_v14  ;;  %v1036_v60 = vld [vmem:[%s19377_s18 + $0x99] sm:$0xff] }
  0x24   : > { %v8636_v16 = vcombine.low %v1264_v4, %v19419_v63  ;;  %v8643_v17 = vrot.slane %v8635_v6, %v19372_v5  ;;  %v1180_v18 = vrot.slane %v1166_v8, %v19372_v5  ;;  %v1181_v20 = vcombine.high %v1173_v9, %v1173_v9  ;;  %v19466_v4 = vld [vmem:[%s19377_s18 + $0xa9] sm:$0xff] }
  0x25   : > { %18198 = vrot.lane.b32.xlu0 %v18197_v11, %s19324_s19  ;;  %v8634_v22 = vcombine.low %v8626_v12, %v8633_v13  ;;  %v8550_v23 = vcombine.low %v17556_v7, %v1173_v9  ;;  %v8568_v24 = vcombine.low %v1198_v15, %v19391_v19  ;;  %v1306_v25 = vcombine.high %v1030_v10, %v1030_v10  ;;  %v17562_v13 = vld.sshfl [vmem:[%s19377_s18 + $0xa1] sm:$0x3 pattern:$0x76325410] }
  0x26   : > { %v8650_v26 = vrot.slane %v8636_v16, %v19372_v5  ;;  %v1182_v27 = vcombine.high %v1180_v18, %v1180_v18  ;;  %v8551_v28 = vcombine.low %v1181_v20, %v1180_v18  ;;  %v1313_v29 = vrot.slane %v1030_v10, %v19372_v5 }
  0x27   : > { %v8558_v30 = vrot.slane %v8550_v23, %v19372_v5  ;;  %v8582_v31 = vrot.slane %v8568_v24, %v19372_v5  ;;  %v1320_v32 = vrot.slane %v1306_v25, %v19372_v5  ;;  %v1330_v33 = vcombine.high %v1032_v21, %v1032_v21 }
  0x28   : > { %v8651_v34 = vcombine.low %v8643_v17, %v8650_v26  ;;  %v8565_v35 = vrot.slane %v8551_v28, %v19372_v5  ;;  %v8567_v19 = vcombine.low %v1182_v27, %v19386_v14  ;;  %v1321_v37 = vcombine.high %v1313_v29, %v1313_v29 }
  0x29   : > { %v1322_v38 = vcombine.high %v1320_v32, %v1320_v32  ;;  %v1337_v39 = vrot.slane %v1032_v21, %v19372_v5  ;;  %v19445_v40 = vrot.slane %v1330_v33, %v19372_v5  ;;  %v1265_v42 = vcombine.high %v19407_v48, %v19407_v48 }
  0x2a   : > { %v18212_v43 = vpack.i.bf16 %v8651_v34, %v8634_v22  ;;  %v8566_v44 = vcombine.low %v8558_v30, %v8565_v35  ;;  %v8575_v45 = vrot.slane %v8567_v19, %v19372_v5  ;;  %v8686_v46 = vcombine.low %v1313_v29, %v1321_v37  ;;  %v1033_v22 = vld [vmem:[%s19377_s18 + $0x81] sm:$0xff] }
  0x2b   : > { %v1345_v14 = vcombine.high %v1337_v39, %v1337_v39  ;;  %v8687_v47 = vcombine.low %v1320_v32, %v1322_v38  ;;  %v8703_v49 = vcombine.low %v17560_v36, %v1337_v39  ;;  %v1279_v50 = vrot.slane %v1265_v42, %v19372_v5  ;;  %v1041_v38 = vld [vmem:[%s19377_s18 + $0xc1] sm:$0xff] }
  0x2c   : > { %18213 = vrot.lane.b32.xlu1 %v18212_v43, %s19324_s19  ;;  %v8583_v51 = vcombine.low %v8575_v45, %v8582_v31  ;;  %v8694_v52 = vrot.slane %v8686_v46, %v19372_v5  ;;  %v1280_v48 = vcombine.high %v19419_v63, %v19419_v63  ;;  %v1289_v54 = vcombine.high %v1029_v41, %v1029_v41  ;;  %v17561_v45 = vld.sshfl [vmem:[%s19377_s18 + $0x89] sm:$0x3 pattern:$0x76325410] }
  0x2d   : > { %v8701_v56 = vrot.slane %v8687_v47, %v19372_v5  ;;  %v8704_v57 = vcombine.low %v1345_v14, %v19445_v40  ;;  %v8711_v58 = vrot.slane %v8703_v49, %v19372_v5  ;;  %v1281_v59 = vcombine.high %v1279_v50, %v1279_v50  ;;  %v1042_v47 = vld [vmem:[%s19377_s18 + $0xc9] sm:$0xff] }
  0x2e   : > { %v18202_v61 = vpack.i.bf16 %v8583_v51, %v8566_v44  ;;  %v1296_v62 = vrot.slane %v1029_v41, %v19372_v5  ;;  %v1303_v0 = vrot.slane %v1289_v54, %v19372_v5  ;;  %v8652_v1 = vcombine.low %v1280_v48, %v1279_v50 }
  0x2f   : > { %v8702_v2 = vcombine.low %v8694_v52, %v8701_v56  ;;  %v8718_v63 = vrot.slane %v8704_v57, %v19372_v5  ;;  %v8653_v3 = vcombine.low %v1281_v59, %v17559_v53  ;;  %v1371_v6 = vcombine.high %v1035_v55, %v1035_v55 }
  0x30   : > { %18203 = vrot.lane.b32.xlu0 %v18202_v61, %s19324_s19  ;;  %v1304_v7 = vcombine.high %v1296_v62, %v1296_v62  ;;  %v1305_v8 = vcombine.high %v1303_v0, %v1303_v0  ;;  %v8660_v9 = vrot.slane %v8652_v1, %v19372_v5  ;;  %v1388_v10 = vcombine.high %v1036_v60, %v1036_v60 }
  0x31   : > { %v8719_v11 = vcombine.low %v8711_v58, %v8718_v63  ;;  %v8667_v12 = vrot.slane %v8653_v3, %v19372_v5  ;;  %v1385_v15 = vrot.slane %v1371_v6, %v19372_v5  ;;  %v1395_v16 = vrot.slane %v1036_v60, %v19372_v5  ;;  %v1039_v6 = vld [vmem:[%s19377_s18 + $0xb1] sm:$0xff] }
  0x32   : > { %v8669_v17 = vcombine.low %v1296_v62, %v1304_v7  ;;  %v8670_v18 = vcombine.low %v1303_v0, %v1305_v8  ;;  %v1402_v20 = vrot.slane %v1388_v10, %v19372_v5  ;;  %v19477_v21 = vrot.slane %v19466_v4, %v19372_v5 }
  0x33   : > { %v18222_v23 = vpack.i.bf16 %v8719_v11, %v8702_v2  ;;  %v8668_v24 = vcombine.low %v8660_v9, %v8667_v12  ;;  %v1387_v25 = vcombine.high %v1385_v15, %v1385_v15  ;;  %v1403_v26 = vcombine.high %v1395_v16, %v1395_v16 }
  0x34   : > { %v8677_v27 = vrot.slane %v8669_v17, %v19372_v5  ;;  %v8684_v28 = vrot.slane %v8670_v18, %v19372_v5  ;;  %v1404_v29 = vcombine.high %v1402_v20, %v1402_v20  ;;  %v8772_v30 = vcombine.low %v17562_v13, %v19477_v21 }
  0x35   : > { %18223 = vrot.lane.b32.xlu1 %v18222_v23, %s19324_s19  ;;  %v8754_v31 = vcombine.low %v1385_v15, %v1387_v25  ;;  %v8755_v32 = vcombine.low %v1395_v16, %v1403_v26  ;;  %v1346_v33 = vcombine.high %v19445_v40, %v19445_v40  ;;  %v1347_v34 = vcombine.high %v1033_v22, %v1033_v22  ;;  %v1047_v26 = vld [vmem:[%s19377_s18 + $0xf1] sm:$0xff] }
  0x36   : > { %v8685_v35 = vcombine.low %v8677_v27, %v8684_v28  ;;  %v8771_v19 = vcombine.low %v1402_v20, %v1404_v29  ;;  %v8786_v36 = vrot.slane %v8772_v30, %v19372_v5  ;;  %v1354_v37 = vrot.slane %v1033_v22, %v19372_v5  ;;  %v1045_v22 = vld [vmem:[%s19377_s18 + $0xe1] sm:$0xff] }
  0x37   : > { %v8762_v39 = vrot.slane %v8754_v31, %v19372_v5  ;;  %v8769_v41 = vrot.slane %v8755_v32, %v19372_v5  ;;  %v1361_v42 = vrot.slane %v1347_v34, %v19372_v5  ;;  %v1378_v43 = vrot.slane %v1035_v55, %v19372_v5  ;;  %v17563_v32 = vld.sshfl [vmem:[%s19377_s18 + $0xb9] sm:$0x3 pattern:$0x76325410] }
  0x38   : > { %v18217_v44 = vpack.i.bf16 %v8685_v35, %v8668_v24  ;;  %v8779_v40 = vrot.slane %v8771_v19, %v19372_v5  ;;  %v1362_v46 = vcombine.high %v1354_v37, %v1354_v37  ;;  %v8720_v14 = vcombine.low %v1346_v33, %v1354_v37  ;;  %v19523_v34 = vld [vmem:[%s19377_s18 + $0xf9] sm:$0xff] }
  0x39   : > { %v8770_v49 = vcombine.low %v8762_v39, %v8769_v41  ;;  %v1363_v50 = vcombine.high %v1361_v42, %v1361_v42  ;;  %v1386_v51 = vcombine.high %v1378_v43, %v1378_v43  ;;  %v1453_v52 = vcombine.high %v1041_v38, %v1041_v38 }
  0x3a   : > { %18218 = vrot.lane.b32.xlu0 %v18217_v44, %s19324_s19  ;;  %v8787_v53 = vcombine.low %v8779_v40, %v8786_v36  ;;  %v8721_v48 = vcombine.low %v1362_v46, %v1361_v42  ;;  %v8728_v54 = vrot.slane %v8720_v14, %v19372_v5  ;;  %v1460_v55 = vrot.slane %v1041_v38, %v19372_v5 }
  0x3b   : > { %v8737_v56 = vcombine.low %v1363_v50, %v17561_v45  ;;  %v8738_v57 = vcombine.low %v1378_v43, %v1386_v51  ;;  %v1467_v58 = vrot.slane %v1453_v52, %v19372_v5  ;;  %v1470_v59 = vcombine.high %v1042_v47, %v1042_v47  ;;  %v17565_v45 = vld.sshfl [vmem:[%s19377_s18 + $0xe9] sm:$0x3 pattern:$0x76325410] }
  0x3c   : > { %v18232_v60 = vpack.i.bf16 %v8787_v53, %v8770_v49  ;;  %v8735_v61 = vrot.slane %v8721_v48, %v19372_v5  ;;  %v1468_v62 = vcombine.high %v1460_v55, %v1460_v55  ;;  %v1477_v0 = vrot.slane %v1042_v47, %v19372_v5  ;;  %v1044_v47 = vld [vmem:[%s19377_s18 + $0xd9] sm:$0xff] }
  0x3d   : > { %v8745_v1 = vrot.slane %v8737_v56, %v19372_v5  ;;  %v8752_v2 = vrot.slane %v8738_v57, %v19372_v5  ;;  %v1469_v63 = vcombine.high %v1467_v58, %v1467_v58  ;;  %v1484_v3 = vrot.slane %v1470_v59, %v19372_v5 }
  0x3e   : > { %18233 = vrot.lane.b32.xlu1 %v18232_v60, %s19324_s19  ;;  %v8736_v7 = vcombine.low %v8728_v54, %v8735_v61  ;;  %v1485_v8 = vcombine.high %v1477_v0, %v1477_v0  ;;  %v8822_v9 = vcombine.low %v1460_v55, %v1468_v62  ;;  %v1412_v10 = vcombine.high %v19466_v4, %v19466_v4 }
  0x3f   : > { %v8753_v11 = vcombine.low %v8745_v1, %v8752_v2  ;;  %v1486_v12 = vcombine.high %v1484_v3, %v1484_v3  ;;  %v8823_v13 = vcombine.low %v1467_v58, %v1469_v63  ;;  %v1427_v15 = vcombine.high %v19477_v21, %v19477_v21 }
  0x40   : > { %v8830_v16 = vrot.slane %v8822_v9, %v19372_v5  ;;  %v8839_v17 = vcombine.low %v1477_v0, %v1485_v8  ;;  %v1426_v18 = vrot.slane %v1412_v10, %v19372_v5  ;;  %v1429_v20 = vcombine.high %v1039_v6, %v1039_v6  ;;  %v17564_v0 = vld.sshfl [vmem:[%s19377_s18 + $0xd1] sm:$0x3 pattern:$0x76325410] }
  0x41   : > { %v18227_v23 = vpack.i.bf16 %v8753_v11, %v8736_v7  ;;  %v8837_v24 = vrot.slane %v8823_v13, %v19372_v5  ;;  %v8840_v25 = vcombine.low %v1484_v3, %v1486_v12  ;;  %v1436_v4 = vrot.slane %v1039_v6, %v19372_v5  ;;  %v1051_v7 = vld [vmem:[%s19377_s18 + $0x111] sm:$0xff]  ;;  %v1053_v12 = vld [vmem:[%s19377_s18 + $0x121] sm:$0xff] }
  0x42   : > { %v8847_v27 = vrot.slane %v8839_v17, %v19372_v5  ;;  %v1428_v28 = vcombine.high %v1426_v18, %v1426_v18  ;;  %v1443_v21 = vrot.slane %v1429_v20, %v19372_v5  ;;  %v8788_v29 = vcombine.low %v1427_v15, %v1426_v18 }
  0x43   : > { %18228 = vrot.lane.b32.xlu0 %v18227_v23, %s19324_s19  ;;  %v8838_v30 = vcombine.low %v8830_v16, %v8837_v24  ;;  %v8854_v31 = vrot.slane %v8840_v25, %v19372_v5  ;;  %v1444_v33 = vcombine.high %v1436_v4, %v1436_v4  ;;  %v1511_v35 = vcombine.high %v1045_v22, %v1045_v22 }
  0x44   : > { %v1445_v19 = vcombine.high %v1443_v21, %v1443_v21  ;;  %v8789_v36 = vcombine.low %v1428_v28, %v1436_v4  ;;  %v8796_v37 = vrot.slane %v8788_v29, %v19372_v5  ;;  %v1535_v38 = vcombine.high %v1047_v26, %v1047_v26 }
  0x45   : > { %v8855_v39 = vcombine.low %v8847_v27, %v8854_v31  ;;  %v8805_v41 = vcombine.low %v1444_v33, %v1443_v21  ;;  %v1525_v42 = vrot.slane %v1511_v35, %v19372_v5  ;;  %v1542_v43 = vrot.slane %v1047_v26, %v19372_v5  ;;  %v1050_v27 = vld [vmem:[%s19377_s18 + $0x109] sm:$0xff]  ;;  %v17567_v33 = vld.sshfl [vmem:[%s19377_s18 + $0x119] sm:$0x3 pattern:$0x76325410] }
  0x46   : > { %v8803_v44 = vrot.slane %v8789_v36, %v19372_v5  ;;  %v8806_v40 = vcombine.low %v1445_v19, %v17563_v32  ;;  %v1549_v46 = vrot.slane %v1535_v38, %v19372_v5  ;;  %v1559_v14 = vrot.slane %v19523_v34, %v19372_v5 }
  0x47   : > { %v18242_v49 = vpack.i.bf16 %v8855_v39, %v8838_v30  ;;  %v8813_v50 = vrot.slane %v8805_v41, %v19372_v5  ;;  %v1527_v51 = vcombine.high %v1525_v42, %v1525_v42  ;;  %v1550_v52 = vcombine.high %v1542_v43, %v1542_v43 }
  0x48   : > { %v8804_v53 = vcombine.low %v8796_v37, %v8803_v44  ;;  %v8820_v48 = vrot.slane %v8806_v40, %v19372_v5  ;;  %v1551_v54 = vcombine.high %v1549_v46, %v1549_v46  ;;  %v1567_v55 = vcombine.high %v1559_v14, %v1559_v14  ;;  %v17566_v44 = vld.sshfl [vmem:[%s19377_s18 + $0x101] sm:$0x3 pattern:$0x76325410] }
  0x49   : > { %18243 = vrot.lane.b32.xlu1 %v18242_v49, %s19324_s19  ;;  %v8890_v56 = vcombine.low %v1527_v51, %v17565_v45  ;;  %v8891_v57 = vcombine.low %v1542_v43, %v1550_v52  ;;  %v1494_v58 = vcombine.high %v1044_v47, %v1044_v47  ;;  %v1501_v59 = vrot.slane %v1044_v47, %v19372_v5  ;;  %v1056_v49 = vld [vmem:[%s19377_s18 + $0x139] sm:$0xff] }
  0x4a   : > { %v8821_v60 = vcombine.low %v8813_v50, %v8820_v48  ;;  %v8907_v61 = vcombine.low %v1549_v46, %v1551_v54  ;;  %v8908_v62 = vcombine.low %v1559_v14, %v1567_v55  ;;  %v1518_v1 = vrot.slane %v1045_v22, %v19372_v5 }
  0x4b   : > { %v8898_v2 = vrot.slane %v8890_v56, %v19372_v5  ;;  %v8905_v63 = vrot.slane %v8891_v57, %v19372_v5  ;;  %v1508_v3 = vrot.slane %v1494_v58, %v19372_v5  ;;  %v1509_v6 = vcombine.high %v1501_v59, %v1501_v59  ;;  %v1057_v56 = vld [vmem:[%s19377_s18 + $0x141] sm:$0xff] }
  0x4c   : > { %v18237_v8 = vpack.i.bf16 %v8821_v60, %v8804_v53  ;;  %v8915_v9 = vrot.slane %v8907_v61, %v19372_v5  ;;  %v8922_v10 = vrot.slane %v8908_v62, %v19372_v5  ;;  %v1526_v11 = vcombine.high %v1518_v1, %v1518_v1  ;;  %v19573_v60 = vld [vmem:[%s19377_s18 + $0x151] sm:$0xff] }
  0x4d   : > { %v8906_v13 = vcombine.low %v8898_v2, %v8905_v63  ;;  %v1510_v15 = vcombine.high %v1508_v3, %v1508_v3  ;;  %v8856_v16 = vcombine.low %v17564_v0, %v1501_v59  ;;  %v8857_v17 = vcombine.low %v1509_v6, %v1508_v3  ;;  %v1054_v63 = vld [vmem:[%s19377_s18 + $0x129] sm:$0xff] }
  0x4e   : > { %18238 = vrot.lane.b32.xlu0 %v18237_v8, %s19324_s19  ;;  %v8923_v18 = vcombine.low %v8915_v9, %v8922_v10  ;;  %v8874_v20 = vcombine.low %v1526_v11, %v1525_v42  ;;  %v1593_v22 = vcombine.high %v1051_v7, %v1051_v7  ;;  %v1600_v23 = vrot.slane %v1051_v7, %v19372_v5 }
  0x4f   : > { %v8864_v24 = vrot.slane %v8856_v16, %v19372_v5  ;;  %v8871_v25 = vrot.slane %v8857_v17, %v19372_v5  ;;  %v8873_v4 = vcombine.low %v1510_v15, %v1518_v1  ;;  %v1617_v26 = vcombine.high %v1053_v12, %v1053_v12 }
  0x50   : > { %v18252_v28 = vpack.i.bf16 %v8923_v18, %v8906_v13  ;;  %v8888_v21 = vrot.slane %v8874_v20, %v19372_v5  ;;  %v1607_v29 = vrot.slane %v1593_v22, %v19372_v5  ;;  %v1608_v30 = vcombine.high %v1600_v23, %v1600_v23  ;;  %v17569_v22 = vld.sshfl [vmem:[%s19377_s18 + $0x149] sm:$0x3 pattern:$0x76325410] }
  0x51   : > { %v8872_v31 = vcombine.low %v8864_v24, %v8871_v25  ;;  %v8881_v32 = vrot.slane %v8873_v4, %v19372_v5  ;;  %v1624_v35 = vrot.slane %v1053_v12, %v19372_v5  ;;  %v1631_v19 = vrot.slane %v1617_v26, %v19372_v5  ;;  %v17568_v26 = vld.sshfl [vmem:[%s19377_s18 + $0x131] sm:$0x3 pattern:$0x76325410] }
  0x52   : > { %18253 = vrot.lane.b32.xlu1 %v18252_v28, %s19324_s19  ;;  %v1609_v36 = vcombine.high %v1607_v29, %v1607_v29  ;;  %v8958_v37 = vcombine.low %v1608_v30, %v1607_v29  ;;  %v1552_v38 = vcombine.high %v19523_v34, %v19523_v34  ;;  %v1576_v39 = vcombine.high %v1050_v27, %v1050_v27 }
  0x53   : > { %v8889_v41 = vcombine.low %v8881_v32, %v8888_v21  ;;  %v1632_v42 = vcombine.high %v1624_v35, %v1624_v35  ;;  %v1633_v43 = vcombine.high %v1631_v19, %v1631_v19  ;;  %v1583_v40 = vrot.slane %v1050_v27, %v19372_v5  ;;  %v1062_v32 = vld [vmem:[%s19377_s18 + $0x169] sm:$0xff] }
  0x54   : > { %v8959_v45 = vcombine.low %v1609_v36, %v17567_v33  ;;  %v8966_v46 = vrot.slane %v8958_v37, %v19372_v5  ;;  %v1566_v14 = vrot.slane %v1552_v38, %v19372_v5  ;;  %v1590_v47 = vrot.slane %v1576_v39, %v19372_v5 }
  0x55   : > { %v18247_v50 = vpack.i.bf16 %v8889_v41, %v8872_v31  ;;  %v8975_v51 = vcombine.low %v1624_v35, %v1632_v42  ;;  %v8976_v34 = vcombine.low %v1631_v19, %v1633_v43  ;;  %v1591_v52 = vcombine.high %v1583_v40, %v1583_v40 }
  0x56   : > { %v8973_v53 = vrot.slane %v8959_v45, %v19372_v5  ;;  %v1568_v48 = vcombine.high %v1566_v14, %v1566_v14  ;;  %v1592_v54 = vcombine.high %v1590_v47, %v1590_v47  ;;  %v8925_v55 = vcombine.low %v17566_v44, %v1583_v40  ;;  %v1063_v40 = vld [vmem:[%s19377_s18 + $0x171] sm:$0xff] }
  0x57   : > { %18248 = vrot.lane.b32.xlu0 %v18247_v50, %s19324_s19  ;;  %v8983_v57 = vrot.slane %v8975_v51, %v19372_v5  ;;  %v8990_v58 = vrot.slane %v8976_v34, %v19372_v5  ;;  %v8941_v59 = vcombine.low %v1591_v52, %v1590_v47  ;;  %v1658_v61 = vcombine.high %v1056_v49, %v1056_v49 }
  0x58   : > { %v8974_v62 = vcombine.low %v8966_v46, %v8973_v53  ;;  %v8924_v0 = vcombine.low %v1566_v14, %v1568_v48  ;;  %v8939_v1 = vrot.slane %v8925_v55, %v19372_v5  ;;  %v8942_v2 = vcombine.low %v1592_v54, %v1600_v23 }
  0x59   : > { %v8991_v3 = vcombine.low %v8983_v57, %v8990_v58  ;;  %v8949_v6 = vrot.slane %v8941_v59, %v19372_v5  ;;  %v1672_v7 = vrot.slane %v1658_v61, %v19372_v5  ;;  %v1675_v8 = vcombine.high %v1057_v56, %v1057_v56 }
  0x5a   : > { %v8932_v9 = vrot.slane %v8924_v0, %v19372_v5  ;;  %v8956_v10 = vrot.slane %v8942_v2, %v19372_v5  ;;  %v1682_v11 = vrot.slane %v1057_v56, %v19372_v5  ;;  %v1706_v12 = vrot.slane %v19573_v60, %v19372_v5  ;;  %v1060_v56 = vld [vmem:[%s19377_s18 + $0x159] sm:$0xff] }
  0x5b   : > { %v18262_v13 = vpack.i.bf16 %v8991_v3, %v8974_v62  ;;  %v1674_v15 = vcombine.high %v1672_v7, %v1672_v7  ;;  %v1689_v16 = vrot.slane %v1675_v8, %v19372_v5  ;;  %v1634_v17 = vcombine.high %v1054_v63, %v1054_v63  ;;  %v17571_v0 = vld.sshfl [vmem:[%s19377_s18 + $0x179] sm:$0x3 pattern:$0x76325410] }
  0x5c   : > { %v8940_v18 = vcombine.low %v8932_v9, %v8939_v1  ;;  %v8957_v20 = vcombine.low %v8949_v6, %v8956_v10  ;;  %v1690_v23 = vcombine.high %v1682_v11, %v1682_v11  ;;  %v1714_v24 = vcombine.high %v1706_v12, %v1706_v12  ;;  %v17570_v6 = vld.sshfl [vmem:[%s19377_s18 + $0x161] sm:$0x3 pattern:$0x76325410]  ;;  %v1068_v10 = vld [vmem:[%s19377_s18 + $0x199] sm:$0xff] }
  0x5d   : > { %18263 = vrot.lane.b32.xlu1 %v18262_v13, %s19324_s19  ;;  %v1691_v25 = vcombine.high %v1689_v16, %v1689_v16  ;;  %v9026_v4 = vcombine.low %v1674_v15, %v1682_v11  ;;  %v1641_v27 = vrot.slane %v1054_v63, %v19372_v5  ;;  %v1648_v28 = vrot.slane %v1634_v17, %v19372_v5 }
  0x5e   : > { %v18257_v21 = vpack.i.bf16 %v8957_v20, %v8940_v18  ;;  %v9027_v29 = vcombine.low %v1690_v23, %v1689_v16  ;;  %v9044_v30 = vcombine.low %v1706_v12, %v1714_v24  ;;  %v1665_v31 = vrot.slane %v1056_v49, %v19372_v5  ;;  %v1069_v24 = vld [vmem:[%s19377_s18 + $0x1a1] sm:$0xff] }
  0x5f   : > { %v9034_v33 = vrot.slane %v9026_v4, %v19372_v5  ;;  %v9043_v35 = vcombine.low %v1691_v25, %v17569_v22  ;;  %v1649_v19 = vcombine.high %v1641_v27, %v1641_v27  ;;  %v1650_v36 = vcombine.high %v1648_v28, %v1648_v28 }
  0x60   : > { %18258 = vrot.lane.b32.xlu0 %v18257_v21, %s19324_s19  ;;  %v9041_v37 = vrot.slane %v9027_v29, %v19372_v5  ;;  %v9058_v38 = vrot.slane %v9044_v30, %v19372_v5  ;;  %v1673_v39 = vcombine.high %v1665_v31, %v1665_v31  ;;  %v9009_v41 = vcombine.low %v17568_v26, %v1665_v31  ;;  %v17572_v30 = vld.sshfl [vmem:[%s19377_s18 + $0x191] sm:$0x3 pattern:$0x76325410] }
  0x61   : > { %v9051_v42 = vrot.slane %v9043_v35, %v19372_v5  ;;  %v8992_v43 = vcombine.low %v1641_v27, %v1649_v19  ;;  %v8993_v44 = vcombine.low %v1648_v28, %v1650_v36  ;;  %v1740_v45 = vcombine.high %v1062_v32, %v1062_v32 }
  0x62   : > { %v9042_v46 = vcombine.low %v9034_v33, %v9041_v37  ;;  %v9010_v14 = vcombine.low %v1673_v39, %v1672_v7  ;;  %v9017_v47 = vrot.slane %v9009_v41, %v19372_v5  ;;  %v1747_v49 = vrot.slane %v1062_v32, %v19372_v5 }
  0x63   : > { %v9059_v50 = vcombine.low %v9051_v42, %v9058_v38  ;;  %v9000_v51 = vrot.slane %v8992_v43, %v19372_v5  ;;  %v9007_v34 = vrot.slane %v8993_v44, %v19372_v5  ;;  %v1754_v52 = vrot.slane %v1740_v45, %v19372_v5  ;;  %v1065_v42 = vld [vmem:[%s19377_s18 + $0x181] sm:$0xff] }
  0x64   : > { %v9024_v53 = vrot.slane %v9010_v14, %v19372_v5  ;;  %v1755_v48 = vcombine.high %v1747_v49, %v1747_v49  ;;  %v1757_v54 = vcombine.high %v1063_v40, %v1063_v40  ;;  %v1764_v55 = vrot.slane %v1063_v40, %v19372_v5 }
  0x65   : > { %v18272_v57 = vpack.i.bf16 %v9059_v50, %v9042_v46  ;;  %v9008_v58 = vcombine.low %v9000_v51, %v9007_v34  ;;  %v1756_v59 = vcombine.high %v1754_v52, %v1754_v52  ;;  %v1699_v61 = vcombine.high %v19573_v60, %v19573_v60  ;;  %v1066_v46 = vld [vmem:[%s19377_s18 + $0x189] sm:$0xff] }
  0x66   : > { %v9025_v62 = vcombine.low %v9017_v47, %v9024_v53  ;;  %v1771_v1 = vrot.slane %v1757_v54, %v19372_v5  ;;  %v1772_v2 = vcombine.high %v1764_v55, %v1764_v55  ;;  %v9094_v63 = vcombine.low %v1755_v48, %v1754_v52  ;;  %v1863_v48 = vld [vmem:[%s19377_s18 + $0x2] sm:$0xff] }
  0x67   : > { %18273 = vrot.lane.b32.xlu1 %v18272_v57, %s19324_s19  ;;  %v9095_v3 = vcombine.low %v1756_v59, %v1764_v55  ;;  %v1713_v7 = vrot.slane %v1699_v61, %v19372_v5  ;;  %v1716_v8 = vcombine.high %v1060_v56, %v1060_v56  ;;  %v1723_v9 = vrot.slane %v1060_v56, %v19372_v5 }
  0x68   : > { %v18267_v11 = vpack.i.bf16 %v9025_v62, %v9008_v58  ;;  %v1773_v12 = vcombine.high %v1771_v1, %v1771_v1  ;;  %v9102_v60 = vrot.slane %v9094_v63, %v19372_v5  ;;  %v9111_v13 = vcombine.low %v1772_v2, %v1771_v1 }
  0x69   : > { %v9109_v15 = vrot.slane %v9095_v3, %v19372_v5  ;;  %v1715_v16 = vcombine.high %v1713_v7, %v1713_v7  ;;  %v1730_v17 = vrot.slane %v1716_v8, %v19372_v5  ;;  %v1731_v18 = vcombine.high %v1723_v9, %v1723_v9 }
  0x6a   : > { %18268 = vrot.lane.b32.xlu0 %v18267_v11, %s19324_s19  ;;  %v9112_v20 = vcombine.low %v1773_v12, %v17571_v0  ;;  %v9119_v22 = vrot.slane %v9111_v13, %v19372_v5  ;;  %v9078_v23 = vcombine.low %v17570_v6, %v1747_v49  ;;  %v1822_v25 = vcombine.high %v1068_v10, %v1068_v10  ;;  %v1864_v0 = vld [vmem:[%s19377_s18 + $0xa] sm:$0xff] }
  0x6b   : > { %v9110_v4 = vcombine.low %v9102_v60, %v9109_v15  ;;  %v1732_v26 = vcombine.high %v1730_v17, %v1730_v17  ;;  %v9060_v27 = vcombine.low %v1713_v7, %v1715_v16  ;;  %v9061_v28 = vcombine.low %v1723_v9, %v1731_v18 }
  0x6c   : > { %v9126_v21 = vrot.slane %v9112_v20, %v19372_v5  ;;  %v9092_v29 = vrot.slane %v9078_v23, %v19372_v5  ;;  %v1829_v31 = vrot.slane %v1068_v10, %v19372_v5  ;;  %v1836_v32 = vrot.slane %v1822_v25, %v19372_v5 }
  0x6d   : > { %v9068_v33 = vrot.slane %v9060_v27, %v19372_v5  ;;  %v9075_v35 = vrot.slane %v9061_v28, %v19372_v5  ;;  %v9077_v19 = vcombine.low %v1730_v17, %v1732_v26  ;;  %v1839_v36 = vcombine.high %v1069_v24, %v1069_v24  ;;  %v17573_v28 = vld.sshfl [vmem:[%s19377_s18 + $0x1a9] sm:$0x3 pattern:$0x76325410] }
  0x6e   : > { %v9127_v37 = vcombine.low %v9119_v22, %v9126_v21  ;;  %v1837_v38 = vcombine.high %v1829_v31, %v1829_v31  ;;  %v1838_v39 = vcombine.high %v1836_v32, %v1836_v32  ;;  %v1846_v41 = vrot.slane %v1069_v24, %v19372_v5  ;;  %v1867_v24 = vld [vmem:[%s19377_s18 + $0x22] sm:$0xff] }
  0x6f   : > { %v9076_v43 = vcombine.low %v9068_v33, %v9075_v35  ;;  %v9085_v44 = vrot.slane %v9077_v19, %v19372_v5  ;;  %v19632_v40 = vrot.slane %v1839_v36, %v19372_v5  ;;  %v9162_v45 = vcombine.low %v17572_v30, %v1829_v31 }
  0x70   : > { %v18282_v14 = vpack.i.bf16 %v9127_v37, %v9110_v4  ;;  %v1854_v47 = vcombine.high %v1846_v41, %v1846_v41  ;;  %v9163_v49 = vcombine.low %v1837_v38, %v1836_v32  ;;  %v9179_v50 = vcombine.low %v1838_v39, %v1846_v41  ;;  %v1869_v32 = vld [vmem:[%s19377_s18 + $0x32] sm:$0xff] }
  0x71   : > { %v9093_v51 = vcombine.low %v9085_v44, %v9092_v29  ;;  %v9170_v34 = vrot.slane %v9162_v45, %v19372_v5  ;;  %v1781_v52 = vcombine.high %v1065_v42, %v1065_v42  ;;  %v1788_v53 = vrot.slane %v1065_v42, %v19372_v5 }
  0x72   : > { %18283 = vrot.lane.b32.xlu1 %v18282_v14, %s19324_s19  ;;  %v9177_v54 = vrot.slane %v9163_v49, %v19372_v5  ;;  %v9180_v55 = vcombine.low %v1854_v47, %v19632_v40  ;;  %v9187_v56 = vrot.slane %v9179_v50, %v19372_v5  ;;  %v1798_v57 = vcombine.high %v1066_v46, %v1066_v46 }
  0x73   : > { %v18277_v58 = vpack.i.bf16 %v9093_v51, %v9076_v43  ;;  %v1795_v59 = vrot.slane %v1781_v52, %v19372_v5  ;;  %v1796_v61 = vcombine.high %v1788_v53, %v1788_v53  ;;  %v1805_v62 = vrot.slane %v1066_v46, %v19372_v5  ;;  %v19665_v43 = vld [vmem:[%s19377_s18 + $0x3a] sm:$0xff]  ;;  %v17575_v51 = vld.sshfl [vmem:[%s19377_s18 + $0x2a] sm:$0x3 pattern:$0x76325410] }
  0x74   : > { %v9178_v1 = vcombine.low %v9170_v34, %v9177_v54  ;;  %v9194_v2 = vrot.slane %v9180_v55, %v19372_v5  ;;  %v1812_v63 = vrot.slane %v1798_v57, %v19372_v5  ;;  %v1971_v3 = vcombine.high %v1863_v48, %v1863_v48  ;;  %v1866_v46 = vld [vmem:[%s19377_s18 + $0x1a] sm:$0xff] }
  0x75   : > { %18278 = vrot.lane.b32.xlu0 %v18277_v58, %s19324_s19  ;;  %v1797_v6 = vcombine.high %v1795_v59, %v1795_v59  ;;  %v1813_v7 = vcombine.high %v1805_v62, %v1805_v62  ;;  %v9128_v8 = vcombine.low %v1788_v53, %v1796_v61  ;;  %v1978_v9 = vrot.slane %v1863_v48, %v19372_v5 }
  0x76   : > { %v9195_v10 = vcombine.low %v9187_v56, %v9194_v2  ;;  %v1814_v11 = vcombine.high %v1812_v63, %v1812_v63  ;;  %v1985_v12 = vrot.slane %v1971_v3, %v19372_v5  ;;  %v1988_v60 = vcombine.high %v1864_v0, %v1864_v0 }
  0x77   : > { %v9129_v13 = vcombine.low %v1795_v59, %v1797_v6  ;;  %v9136_v15 = vrot.slane %v9128_v8, %v19372_v5  ;;  %v9145_v16 = vcombine.low %v1805_v62, %v1813_v7  ;;  %v1986_v17 = vcombine.high %v1978_v9, %v1978_v9  ;;  %v1873_v6 = vld [vmem:[%s19377_s18 + $0x52] sm:$0xff] }
  0x78   : > { %v18292_v18 = vpack.i.bf16 %v9195_v10, %v9178_v1  ;;  %v9146_v20 = vcombine.low %v1812_v63, %v1814_v11  ;;  %v1987_v22 = vcombine.high %v1985_v12, %v1985_v12  ;;  %v1995_v23 = vrot.slane %v1864_v0, %v19372_v5  ;;  %v17574_v0 = vld.sshfl [vmem:[%s19377_s18 + $0x12] sm:$0x3 pattern:$0x76325410] }
  0x79   : > { %v9143_v25 = vrot.slane %v9129_v13, %v19372_v5  ;;  %v9153_v4 = vrot.slane %v9145_v16, %v19372_v5  ;;  %v2002_v26 = vrot.slane %v1988_v60, %v19372_v5  ;;  %v9327_v27 = vcombine.low %v1978_v9, %v1986_v17 }
  0x7a   : > { %18293 = vrot.lane.b32.xlu1 %v18292_v18, %s19324_s19  ;;  %v9160_v21 = vrot.slane %v9146_v20, %v19372_v5  ;;  %v2003_v29 = vcombine.high %v1995_v23, %v1995_v23  ;;  %v9328_v30 = vcombine.low %v1985_v12, %v1987_v22  ;;  %v1855_v31 = vcombine.high %v19632_v40, %v19632_v40 }
  0x7b   : > { %v9144_v33 = vcombine.low %v9136_v15, %v9143_v25  ;;  %v2004_v35 = vcombine.high %v2002_v26, %v2002_v26  ;;  %v9335_v19 = vrot.slane %v9327_v27, %v19372_v5  ;;  %v2029_v36 = vcombine.high %v1867_v24, %v1867_v24  ;;  %v1875_v15 = vld [vmem:[%s19377_s18 + $0x62] sm:$0xff] }
  0x7c   : > { %v9161_v37 = vcombine.low %v9153_v4, %v9160_v21  ;;  %v9342_v38 = vrot.slane %v9328_v30, %v19372_v5  ;;  %v9344_v39 = vcombine.low %v1995_v23, %v2003_v29  ;;  %v9196_v41 = vcombine.low %v1855_v31, %v17573_v28  ;;  %v1872_v21 = vld [vmem:[%s19377_s18 + $0x4a] sm:$0xff] }
  0x7d   : > { %v9345_v42 = vcombine.low %v2002_v26, %v2004_v35  ;;  %v2043_v44 = vrot.slane %v2029_v36, %v19372_v5  ;;  %v2053_v45 = vcombine.high %v1869_v32, %v1869_v32  ;;  %v2060_v40 = vrot.slane %v1869_v32, %v19372_v5  ;;  %v17577_v32 = vld.sshfl [vmem:[%s19377_s18 + $0x5a] sm:$0x3 pattern:$0x76325410] }
  0x7e   : > { %v18287_v14 = vpack.i.bf16 %v9161_v37, %v9144_v33  ;;  %v9343_v47 = vcombine.low %v9335_v19, %v9342_v38  ;;  %v9352_v49 = vrot.slane %v9344_v39, %v19372_v5  ;;  %v9203_v50 = vrot.slane %v9196_v41, %v19372_v5 }
  0x7f   : > { %v9359_v34 = vrot.slane %v9345_v42, %v19372_v5  ;;  %v2045_v52 = vcombine.high %v2043_v44, %v2043_v44  ;;  %v2067_v53 = vrot.slane %v2053_v45, %v19372_v5  ;;  %v2068_v48 = vcombine.high %v2060_v40, %v2060_v40 }
  0x80   : > { %18288 = vrot.lane.b32.xlu0 %v18287_v14, %s19324_s19  ;;  %v2077_v54 = vrot.slane %v19665_v43, %v19372_v5  ;;  %v2012_v55 = vcombine.high %v1866_v46, %v1866_v46  ;;  %v2019_v56 = vrot.slane %v1866_v46, %v19372_v5  ;;  %v2036_v57 = vrot.slane %v1867_v24, %v19372_v5  ;;  %v17576_v46 = vld.sshfl [vmem:[%s19377_s18 + $0x42] sm:$0x3 pattern:$0x76325410] }
  0x81   : > { %v9360_v58 = vcombine.low %v9352_v49, %v9359_v34  ;;  %v2069_v59 = vcombine.high %v2067_v53, %v2067_v53  ;;  %v9395_v61 = vcombine.low %v2045_v52, %v17575_v51  ;;  %v9396_v62 = vcombine.low %v2060_v40, %v2068_v48  ;;  %v1878_v51 = vld [vmem:[%s19377_s18 + $0x7a] sm:$0xff] }
  0x82   : > { %v2085_v1 = vcombine.high %v2077_v54, %v2077_v54  ;;  %v2026_v2 = vrot.slane %v2012_v55, %v19372_v5  ;;  %v2027_v63 = vcombine.high %v2019_v56, %v2019_v56  ;;  %v2044_v3 = vcombine.high %v2036_v57, %v2036_v57 }
  0x83   : > { %v18297_v7 = vpack.i.bf16 %v9360_v58, %v9343_v47  ;;  %v9403_v8 = vrot.slane %v9395_v61, %v19372_v5  ;;  %v9410_v9 = vrot.slane %v9396_v62, %v19372_v5  ;;  %v9412_v10 = vcombine.low %v2067_v53, %v2069_v59 }
  0x84   : > { %9284 = vrot.lane.b32.xlu0 %v9203_v50, %s19324_s19  ;;  %v9413_v11 = vcombine.low %v2077_v54, %v2085_v1  ;;  %v2028_v12 = vcombine.high %v2026_v2, %v2026_v2  ;;  %v9361_v60 = vcombine.low %v17574_v0, %v2019_v56  ;;  %v9362_v13 = vcombine.low %v2027_v63, %v2026_v2  ;;  %v1879_v54 = vld [vmem:[%s19377_s18 + $0x82] sm:$0xff]  ;;  %v19715_v0 = vld [vmem:[%s19377_s18 + $0x92] sm:$0xff] }
  0x85   : > { %18298 = vrot.lane.b32.xlu1 %v18297_v7, %s19325_s20  ;;  %v9411_v16 = vcombine.low %v9403_v8, %v9410_v9  ;;  %v9420_v17 = vrot.slane %v9412_v10, %v19372_v5  ;;  %v9379_v18 = vcombine.low %v2044_v3, %v2043_v44  ;;  %v2111_v20 = vcombine.high %v1873_v6, %v1873_v6 }
  0x86   : > { %v9427_v22 = vrot.slane %v9413_v11, %v19372_v5  ;;  %v9369_v23 = vrot.slane %v9361_v60, %v19372_v5  ;;  %v9376_v24 = vrot.slane %v9362_v13, %v19372_v5  ;;  %v9378_v25 = vcombine.low %v2028_v12, %v2036_v57  ;;  %v1876_v11 = vld [vmem:[%s19377_s18 + $0x6a] sm:$0xff] }
  0x87   : > { %v9393_v4 = vrot.slane %v9379_v18, %v19372_v5  ;;  %v2118_v26 = vrot.slane %v1873_v6, %v19372_v5  ;;  %v2125_v27 = vrot.slane %v2111_v20, %v19372_v5  ;;  %v2135_v28 = vcombine.high %v1875_v15, %v1875_v15  ;;  %v17579_v18 = vld.sshfl [vmem:[%s19377_s18 + $0x8a] sm:$0x3 pattern:$0x76325410] }
  0x88   : > { %v9428_v29 = vcombine.low %v9420_v17, %v9427_v22  ;;  %v9377_v30 = vcombine.low %v9369_v23, %v9376_v24  ;;  %v9386_v31 = vrot.slane %v9378_v25, %v19372_v5  ;;  %v2142_v33 = vrot.slane %v1875_v15, %v19372_v5 }
  0x89   : > { %v2126_v35 = vcombine.high %v2118_v26, %v2118_v26  ;;  %v2127_v19 = vcombine.high %v2125_v27, %v2125_v27  ;;  %v2149_v36 = vrot.slane %v2135_v28, %v19372_v5  ;;  %v2070_v37 = vcombine.high %v19665_v43, %v19665_v43  ;;  %v17578_v28 = vld.sshfl [vmem:[%s19377_s18 + $0x72] sm:$0x3 pattern:$0x76325410] }
  0x8a   : > { %v18307_v38 = vpack.i.bf16 %v9428_v29, %v9411_v16  ;;  %v9394_v39 = vcombine.low %v9386_v31, %v9393_v4  ;;  %v2150_v41 = vcombine.high %v2142_v33, %v2142_v33  ;;  %v2094_v42 = vcombine.high %v1872_v21, %v1872_v21 }
  0x8b   : > { %v2151_v44 = vcombine.high %v2149_v36, %v2149_v36  ;;  %v9463_v45 = vcombine.low %v2126_v35, %v2125_v27  ;;  %v9464_v40 = vcombine.low %v2127_v19, %v17577_v32  ;;  %v2084_v14 = vrot.slane %v2070_v37, %v19372_v5  ;;  %v1884_v35 = vld [vmem:[%s19377_s18 + $0xaa] sm:$0xff] }
  0x8c   : > { %18308 = vrot.lane.b32.xlu1 %v18307_v38, %s19325_s20  ;;  %v18302_v47 = vpack.i.bf16 %v9394_v39, %v9377_v30  ;;  %v9480_v49 = vcombine.low %v2142_v33, %v2150_v41  ;;  %v2101_v50 = vrot.slane %v1872_v21, %v19372_v5  ;;  %v2108_v43 = vrot.slane %v2094_v42, %v19372_v5 }
  0x8d   : > { %v9471_v34 = vrot.slane %v9463_v45, %v19372_v5  ;;  %v9478_v52 = vrot.slane %v9464_v40, %v19372_v5  ;;  %v9481_v53 = vcombine.low %v2149_v36, %v2151_v44  ;;  %v2086_v48 = vcombine.high %v2084_v14, %v2084_v14  ;;  %v1885_v45 = vld [vmem:[%s19377_s18 + $0xb2] sm:$0xff] }
  0x8e   : > { %18303 = vrot.lane.b32.xlu0 %v18302_v47, %s19325_s20  ;;  %v9488_v55 = vrot.slane %v9480_v49, %v19372_v5  ;;  %v2109_v56 = vcombine.high %v2101_v50, %v2101_v50  ;;  %v2110_v57 = vcombine.high %v2108_v43, %v2108_v43  ;;  %v9430_v58 = vcombine.low %v17576_v46, %v2101_v50 }
  0x8f   : > { %v9479_v59 = vcombine.low %v9471_v34, %v9478_v52  ;;  %v9495_v61 = vrot.slane %v9481_v53, %v19372_v5  ;;  %v9429_v62 = vcombine.low %v2084_v14, %v2086_v48  ;;  %v2176_v1 = vcombine.high %v1878_v51, %v1878_v51 }
  0x90   : > { %v9444_v2 = vrot.slane %v9430_v58, %v19372_v5  ;;  %v9446_v63 = vcombine.low %v2109_v56, %v2108_v43  ;;  %v9447_v3 = vcombine.low %v2110_v57, %v2118_v26  ;;  %v2193_v6 = vcombine.high %v1879_v54, %v1879_v54 }
  0x91   : > { %v9496_v7 = vcombine.low %v9488_v55, %v9495_v61  ;;  %v9437_v8 = vrot.slane %v9429_v62, %v19372_v5  ;;  %v2190_v9 = vrot.slane %v2176_v1, %v19372_v5  ;;  %v2200_v10 = vrot.slane %v1879_v54, %v19372_v5  ;;  %v1882_v54 = vld [vmem:[%s19377_s18 + $0x9a] sm:$0xff] }
  0x92   : > { %v9454_v12 = vrot.slane %v9446_v63, %v19372_v5  ;;  %v9461_v60 = vrot.slane %v9447_v3, %v19372_v5  ;;  %v2207_v13 = vrot.slane %v2193_v6, %v19372_v5  ;;  %v2224_v15 = vrot.slane %v19715_v0, %v19372_v5  ;;  %v17581_v63 = vld.sshfl [vmem:[%s19377_s18 + $0xba] sm:$0x3 pattern:$0x76325410] }
  0x93   : > { %v18317_v16 = vpack.i.bf16 %v9496_v7, %v9479_v59  ;;  %v9445_v17 = vcombine.low %v9437_v8, %v9444_v2  ;;  %v2192_v20 = vcombine.high %v2190_v9, %v2190_v9  ;;  %v2208_v22 = vcombine.high %v2200_v10, %v2200_v10 }
  0x94   : > { %v9462_v23 = vcombine.low %v9454_v12, %v9461_v60  ;;  %v2209_v24 = vcombine.high %v2207_v13, %v2207_v13  ;;  %v2232_v25 = vcombine.high %v2224_v15, %v2224_v15  ;;  %v2152_v4 = vcombine.high %v1876_v11, %v1876_v11  ;;  %v1890_v60 = vld [vmem:[%s19377_s18 + $0xda] sm:$0xff] }
  0x95   : > { %18318 = vrot.lane.b32.xlu1 %v18317_v16, %s19325_s20  ;;  %v9531_v26 = vcombine.low %v2192_v20, %v2200_v10  ;;  %v9532_v27 = vcombine.low %v2208_v22, %v2207_v13  ;;  %v2159_v21 = vrot.slane %v1876_v11, %v19372_v5  ;;  %v2183_v29 = vrot.slane %v1878_v51, %v19372_v5  ;;  %v17580_v10 = vld.sshfl [vmem:[%s19377_s18 + $0xa2] sm:$0x3 pattern:$0x76325410] }
  0x96   : > { %v18312_v30 = vpack.i.bf16 %v9462_v23, %v9445_v17  ;;  %v9548_v31 = vcombine.low %v2209_v24, %v17579_v18  ;;  %v9549_v32 = vcombine.low %v2224_v15, %v2232_v25  ;;  %v2166_v33 = vrot.slane %v2152_v4, %v19372_v5  ;;  %v1891_v4 = vld [vmem:[%s19377_s18 + $0xe2] sm:$0xff] }
  0x97   : > { %v9539_v19 = vrot.slane %v9531_v26, %v19372_v5  ;;  %v9546_v36 = vrot.slane %v9532_v27, %v19372_v5  ;;  %v2167_v37 = vcombine.high %v2159_v21, %v2159_v21  ;;  %v2191_v38 = vcombine.high %v2183_v29, %v2183_v29 }
  0x98   : > { %18313 = vrot.lane.b32.xlu0 %v18312_v30, %s19325_s20  ;;  %v9556_v39 = vrot.slane %v9548_v31, %v19372_v5  ;;  %v9563_v41 = vrot.slane %v9549_v32, %v19372_v5  ;;  %v2168_v42 = vcombine.high %v2166_v33, %v2166_v33  ;;  %v9514_v44 = vcombine.low %v17578_v28, %v2183_v29  ;;  %v17582_v32 = vld.sshfl [vmem:[%s19377_s18 + $0xd2] sm:$0x3 pattern:$0x76325410] }
  0x99   : > { %v9547_v40 = vcombine.low %v9539_v19, %v9546_v36  ;;  %v9497_v46 = vcombine.low %v2159_v21, %v2167_v37  ;;  %v9515_v14 = vcombine.low %v2191_v38, %v2190_v9  ;;  %v2258_v47 = vcombine.high %v1884_v35, %v1884_v35 }
  0x9a   : > { %v9564_v49 = vcombine.low %v9556_v39, %v9563_v41  ;;  %v9498_v50 = vcombine.low %v2166_v33, %v2168_v42  ;;  %v9522_v43 = vrot.slane %v9514_v44, %v19372_v5  ;;  %v2265_v51 = vrot.slane %v1884_v35, %v19372_v5 }
  0x9b   : > { %v9505_v34 = vrot.slane %v9497_v46, %v19372_v5  ;;  %v9529_v52 = vrot.slane %v9515_v14, %v19372_v5  ;;  %v2272_v53 = vrot.slane %v2258_v47, %v19372_v5  ;;  %v2275_v48 = vcombine.high %v1885_v45, %v1885_v45 }
  0x9c   : > { %v18327_v55 = vpack.i.bf16 %v9564_v49, %v9547_v40  ;;  %v9512_v56 = vrot.slane %v9498_v50, %v19372_v5  ;;  %v2273_v57 = vcombine.high %v2265_v51, %v2265_v51  ;;  %v2282_v58 = vrot.slane %v1885_v45, %v19372_v5  ;;  %v1887_v45 = vld [vmem:[%s19377_s18 + $0xc2] sm:$0xff]  ;;  %v1888_v40 = vld [vmem:[%s19377_s18 + $0xca] sm:$0xff] }
  0x9d   : > { %v9530_v59 = vcombine.low %v9522_v43, %v9529_v52  ;;  %v2274_v61 = vcombine.high %v2272_v53, %v2272_v53  ;;  %v2289_v62 = vrot.slane %v2275_v48, %v19372_v5  ;;  %v2217_v1 = vcombine.high %v19715_v0, %v19715_v0 }
  0x9e   : > { %18328 = vrot.lane.b32.xlu1 %v18327_v55, %s19325_s20  ;;  %v9513_v2 = vcombine.low %v9505_v34, %v9512_v56  ;;  %v2290_v3 = vcombine.high %v2282_v58, %v2282_v58  ;;  %v9599_v6 = vcombine.low %v2273_v57, %v2272_v53  ;;  %v2234_v7 = vcombine.high %v1882_v54, %v1882_v54  ;;  %v1894_v55 = vld [vmem:[%s19377_s18 + $0xfa] sm:$0xff]  ;;  %v1896_v56 = vld [vmem:[%s19377_s18 + $0x10a] sm:$0xff] }
  0x9f   : > { %v2291_v8 = vcombine.high %v2289_v62, %v2289_v62  ;;  %v9600_v9 = vcombine.low %v2274_v61, %v2282_v58  ;;  %v2231_v11 = vrot.slane %v2217_v1, %v19372_v5  ;;  %v2241_v12 = vrot.slane %v1882_v54, %v19372_v5 }
  0xa0   : > { %v18322_v13 = vpack.i.bf16 %v9530_v59, %v9513_v2  ;;  %v9607_v15 = vrot.slane %v9599_v6, %v19372_v5  ;;  %v9616_v0 = vcombine.low %v2290_v3, %v2289_v62  ;;  %v2248_v16 = vrot.slane %v2234_v7, %v19372_v5 }
  0xa1   : > { %v9614_v17 = vrot.slane %v9600_v9, %v19372_v5  ;;  %v9617_v18 = vcombine.low %v2291_v8, %v17581_v63  ;;  %v2233_v20 = vcombine.high %v2231_v11, %v2231_v11  ;;  %v2249_v22 = vcombine.high %v2241_v12, %v2241_v12 }
  0xa2   : > { %18323 = vrot.lane.b32.xlu0 %v18322_v13, %s19325_s20  ;;  %v9624_v23 = vrot.slane %v9616_v0, %v19372_v5  ;;  %v2250_v24 = vcombine.high %v2248_v16, %v2248_v16  ;;  %v9583_v25 = vcombine.low %v17580_v10, %v2265_v51  ;;  %v2340_v26 = vcombine.high %v1890_v60, %v1890_v60  ;;  %v19791_v13 = vld [vmem:[%s19377_s18 + $0x112] sm:$0xff] }
  0xa3   : > { %v9615_v27 = vcombine.low %v9607_v15, %v9614_v17  ;;  %v9631_v28 = vrot.slane %v9617_v18, %v19372_v5  ;;  %v9565_v21 = vcombine.low %v2231_v11, %v2233_v20  ;;  %v9566_v29 = vcombine.low %v2241_v12, %v2249_v22 }
  0xa4   : > { %v9582_v30 = vcombine.low %v2248_v16, %v2250_v24  ;;  %v9597_v31 = vrot.slane %v9583_v25, %v19372_v5  ;;  %v2347_v33 = vrot.slane %v1890_v60, %v19372_v5  ;;  %v2354_v35 = vrot.slane %v2340_v26, %v19372_v5 }
  0xa5   : > { %v9632_v19 = vcombine.low %v9624_v23, %v9631_v28  ;;  %v9573_v36 = vrot.slane %v9565_v21, %v19372_v5  ;;  %v9580_v37 = vrot.slane %v9566_v29, %v19372_v5  ;;  %v2357_v38 = vcombine.high %v1891_v4, %v1891_v4  ;;  %v17584_v23 = vld.sshfl [vmem:[%s19377_s18 + $0x102] sm:$0x3 pattern:$0x76325410] }
  0xa6   : > { %v9590_v39 = vrot.slane %v9582_v30, %v19372_v5  ;;  %v2355_v41 = vcombine.high %v2347_v33, %v2347_v33  ;;  %v2356_v42 = vcombine.high %v2354_v35, %v2354_v35  ;;  %v2364_v44 = vrot.slane %v1891_v4, %v19372_v5 }
  0xa7   : > { %v18337_v46 = vpack.i.bf16 %v9632_v19, %v9615_v27  ;;  %v9581_v14 = vcombine.low %v9573_v36, %v9580_v37  ;;  %v19775_v47 = vrot.slane %v2357_v38, %v19372_v5  ;;  %v9667_v49 = vcombine.low %v17582_v32, %v2347_v33  ;;  %v1893_v27 = vld [vmem:[%s19377_s18 + $0xf2] sm:$0xff]  ;;  %v17583_v38 = vld.sshfl [vmem:[%s19377_s18 + $0xea] sm:$0x3 pattern:$0x76325410] }
  0xa8   : > { %v9598_v50 = vcombine.low %v9590_v39, %v9597_v31  ;;  %v2372_v43 = vcombine.high %v2364_v44, %v2364_v44  ;;  %v9668_v51 = vcombine.low %v2355_v41, %v2354_v35  ;;  %v9684_v34 = vcombine.low %v2356_v42, %v2364_v44  ;;  %v1900_v41 = vld [vmem:[%s19377_s18 + $0x12a] sm:$0xff] }
  0xa9   : > { %18338 = vrot.lane.b32.xlu1 %v18337_v46, %s19325_s20  ;;  %v9675_v52 = vrot.slane %v9667_v49, %v19372_v5  ;;  %v2299_v53 = vcombine.high %v1887_v45, %v1887_v45  ;;  %v2306_v48 = vrot.slane %v1887_v45, %v19372_v5  ;;  %v2316_v54 = vcombine.high %v1888_v40, %v1888_v40 }
  0xaa   : > { %v18332_v57 = vpack.i.bf16 %v9598_v50, %v9581_v14  ;;  %v9682_v58 = vrot.slane %v9668_v51, %v19372_v5  ;;  %v9685_v59 = vcombine.low %v2372_v43, %v19775_v47  ;;  %v9692_v61 = vrot.slane %v9684_v34, %v19372_v5  ;;  %v1902_v50 = vld [vmem:[%s19377_s18 + $0x13a] sm:$0xff] }
  0xab   : > { %v2313_v62 = vrot.slane %v2299_v53, %v19372_v5  ;;  %v2314_v1 = vcombine.high %v2306_v48, %v2306_v48  ;;  %v2323_v2 = vrot.slane %v1888_v40, %v19372_v5  ;;  %v2330_v63 = vrot.slane %v2316_v54, %v19372_v5 }
  0xac   : > { %18333 = vrot.lane.b32.xlu0 %v18332_v57, %s19325_s20  ;;  %v9683_v3 = vcombine.low %v9675_v52, %v9682_v58  ;;  %v9699_v6 = vrot.slane %v9685_v59, %v19372_v5  ;;  %v2398_v7 = vcombine.high %v1894_v55, %v1894_v55  ;;  %v2422_v8 = vcombine.high %v1896_v56, %v1896_v56 }
  0xad   : > { %v2315_v9 = vcombine.high %v2313_v62, %v2313_v62  ;;  %v2331_v10 = vcombine.high %v2323_v2, %v2323_v2  ;;  %v2332_v11 = vcombine.high %v2330_v63, %v2330_v63  ;;  %v9633_v12 = vcombine.low %v2306_v48, %v2314_v1 }
  0xae   : > { %v9700_v60 = vcombine.low %v9692_v61, %v9699_v6  ;;  %v2412_v15 = vrot.slane %v2398_v7, %v19372_v5  ;;  %v2429_v0 = vrot.slane %v1896_v56, %v19372_v5  ;;  %v2436_v16 = vrot.slane %v2422_v8, %v19372_v5 }
  0xaf   : > { %v9634_v17 = vcombine.low %v2313_v62, %v2315_v9  ;;  %v9641_v18 = vrot.slane %v9633_v12, %v19372_v5  ;;  %v9650_v20 = vcombine.low %v2323_v2, %v2331_v10  ;;  %v9651_v22 = vcombine.low %v2330_v63, %v2332_v11  ;;  %v17586_v2 = vld.sshfl [vmem:[%s19377_s18 + $0x132] sm:$0x3 pattern:$0x76325410]  ;;  %v1899_v12 = vld [vmem:[%s19377_s18 + $0x122] sm:$0xff] }
  0xb0   : > { %v18347_v24 = vpack.i.bf16 %v9700_v60, %v9683_v3  ;;  %v2414_v25 = vcombine.high %v2412_v15, %v2412_v15  ;;  %v2437_v4 = vcombine.high %v2429_v0, %v2429_v0  ;;  %v2438_v26 = vcombine.high %v2436_v16, %v2436_v16 }
  0xb1   : > { %v9648_v28 = vrot.slane %v9634_v17, %v19372_v5  ;;  %v9658_v21 = vrot.slane %v9650_v20, %v19372_v5  ;;  %v9665_v29 = vrot.slane %v9651_v22, %v19372_v5  ;;  %v19804_v30 = vrot.slane %v19791_v13, %v19372_v5 }
  0xb2   : > { %18348 = vrot.lane.b32.xlu1 %v18347_v24, %s19325_s20  ;;  %v9735_v31 = vcombine.low %v2412_v15, %v2414_v25  ;;  %v9736_v32 = vcombine.low %v17584_v23, %v2429_v0  ;;  %v9752_v33 = vcombine.low %v2437_v4, %v2436_v16  ;;  %v2373_v35 = vcombine.high %v19775_v47, %v19775_v47  ;;  %v1905_v24 = vld [vmem:[%s19377_s18 + $0x152] sm:$0xff] }
  0xb3   : > { %v9649_v19 = vcombine.low %v9641_v18, %v9648_v28  ;;  %v9666_v36 = vcombine.low %v9658_v21, %v9665_v29  ;;  %v9753_v37 = vcombine.low %v2438_v26, %v19804_v30  ;;  %v2381_v39 = vcombine.high %v1893_v27, %v1893_v27  ;;  %v17585_v26 = vld.sshfl [vmem:[%s19377_s18 + $0x11a] sm:$0x3 pattern:$0x76325410] }
  0xb4   : > { %v9743_v42 = vrot.slane %v9735_v31, %v19372_v5  ;;  %v9750_v44 = vrot.slane %v9736_v32, %v19372_v5  ;;  %v9760_v45 = vrot.slane %v9752_v33, %v19372_v5  ;;  %v2388_v40 = vrot.slane %v1893_v27, %v19372_v5  ;;  %v1906_v28 = vld [vmem:[%s19377_s18 + $0x15a] sm:$0xff] }
  0xb5   : > { %v18342_v46 = vpack.i.bf16 %v9666_v36, %v9649_v19  ;;  %v9767_v14 = vrot.slane %v9753_v37, %v19372_v5  ;;  %v2395_v47 = vrot.slane %v2381_v39, %v19372_v5  ;;  %v2405_v49 = vrot.slane %v1894_v55, %v19372_v5  ;;  %v19850_v19 = vld [vmem:[%s19377_s18 + $0x16a] sm:$0xff] }
  0xb6   : > { %v9751_v43 = vcombine.low %v9743_v42, %v9750_v44  ;;  %v2396_v51 = vcombine.high %v2388_v40, %v2388_v40  ;;  %v9701_v34 = vcombine.low %v2373_v35, %v17583_v38  ;;  %v2480_v52 = vcombine.high %v1900_v41, %v1900_v41 }
  0xb7   : > { %18343 = vrot.lane.b32.xlu0 %v18342_v46, %s19325_s20  ;;  %v9768_v53 = vcombine.low %v9760_v45, %v9767_v14  ;;  %v2397_v48 = vcombine.high %v2395_v47, %v2395_v47  ;;  %v2413_v54 = vcombine.high %v2405_v49, %v2405_v49  ;;  %v2487_v56 = vrot.slane %v1900_v41, %v19372_v5  ;;  %v17588_v45 = vld.sshfl [vmem:[%s19377_s18 + $0x162] sm:$0x3 pattern:$0x76325410] }
  0xb8   : > { %v9702_v57 = vcombine.low %v2388_v40, %v2396_v51  ;;  %v9709_v58 = vrot.slane %v9701_v34, %v19372_v5  ;;  %v2494_v59 = vrot.slane %v2480_v52, %v19372_v5  ;;  %v2504_v55 = vcombine.high %v1902_v50, %v1902_v50 }
  0xb9   : > { %v18357_v61 = vpack.i.bf16 %v9768_v53, %v9751_v43  ;;  %v9718_v62 = vcombine.low %v2395_v47, %v2397_v48  ;;  %v9719_v1 = vcombine.low %v2405_v49, %v2413_v54  ;;  %v2495_v63 = vcombine.high %v2487_v56, %v2487_v56  ;;  %v1903_v53 = vld [vmem:[%s19377_s18 + $0x142] sm:$0xff] }
  0xba   : > { %v9716_v3 = vrot.slane %v9702_v57, %v19372_v5  ;;  %v2496_v6 = vcombine.high %v2494_v59, %v2494_v59  ;;  %v2511_v7 = vrot.slane %v1902_v50, %v19372_v5  ;;  %v19828_v8 = vrot.slane %v2504_v55, %v19372_v5 }
  0xbb   : > { %18358 = vrot.lane.b32.xlu1 %v18357_v61, %s19325_s20  ;;  %v9726_v9 = vrot.slane %v9718_v62, %v19372_v5  ;;  %v9733_v10 = vrot.slane %v9719_v1, %v19372_v5  ;;  %v9803_v11 = vcombine.low %v2487_v56, %v2495_v63  ;;  %v2439_v60 = vcombine.high %v19791_v13, %v19791_v13 }
  0xbc   : > { %v9717_v15 = vcombine.low %v9709_v58, %v9716_v3  ;;  %v2519_v0 = vcombine.high %v2511_v7, %v2511_v7  ;;  %v9804_v16 = vcombine.low %v2494_v59, %v2496_v6  ;;  %v9820_v17 = vcombine.low %v17586_v2, %v2511_v7  ;;  %v1911_v3 = vld [vmem:[%s19377_s18 + $0x182] sm:$0xff] }
  0xbd   : > { %v9734_v18 = vcombine.low %v9726_v9, %v9733_v10  ;;  %v9811_v20 = vrot.slane %v9803_v11, %v19372_v5  ;;  %v2453_v22 = vrot.slane %v2439_v60, %v19372_v5  ;;  %v2454_v23 = vcombine.high %v19804_v30, %v19804_v30 }
  0xbe   : > { %v9818_v25 = vrot.slane %v9804_v16, %v19372_v5  ;;  %v9821_v4 = vcombine.low %v2519_v0, %v19828_v8  ;;  %v9828_v13 = vrot.slane %v9820_v17, %v19372_v5  ;;  %v2463_v27 = vcombine.high %v1899_v12, %v1899_v12  ;;  %v17587_v17 = vld.sshfl [vmem:[%s19377_s18 + $0x14a] sm:$0x3 pattern:$0x76325410] }
  0xbf   : > { %v18352_v21 = vpack.i.bf16 %v9734_v18, %v9717_v15  ;;  %v2455_v29 = vcombine.high %v2453_v22, %v2453_v22  ;;  %v2470_v31 = vrot.slane %v1899_v12, %v19372_v5  ;;  %v9769_v32 = vcombine.low %v2454_v23, %v2453_v22  ;;  %v1912_v15 = vld [vmem:[%s19377_s18 + $0x18a] sm:$0xff] }
  0xc0   : > { %v9819_v33 = vcombine.low %v9811_v20, %v9818_v25  ;;  %v9835_v35 = vrot.slane %v9821_v4, %v19372_v5  ;;  %v2477_v30 = vrot.slane %v2463_v27, %v19372_v5  ;;  %v2545_v36 = vcombine.high %v1905_v24, %v1905_v24 }
  0xc1   : > { %18353 = vrot.lane.b32.xlu0 %v18352_v21, %s19325_s20  ;;  %v2478_v37 = vcombine.high %v2470_v31, %v2470_v31  ;;  %v9770_v38 = vcombine.low %v2455_v29, %v17585_v26  ;;  %v9777_v39 = vrot.slane %v9769_v32, %v19372_v5  ;;  %v2562_v41 = vcombine.high %v1906_v28, %v1906_v28 }
  0xc2   : > { %v9836_v42 = vcombine.low %v9828_v13, %v9835_v35  ;;  %v2479_v44 = vcombine.high %v2477_v30, %v2477_v30  ;;  %v2559_v40 = vrot.slane %v2545_v36, %v19372_v5  ;;  %v2569_v46 = vrot.slane %v1906_v28, %v19372_v5  ;;  %v1909_v36 = vld [vmem:[%s19377_s18 + $0x172] sm:$0xff] }
  0xc3   : > { %v9784_v14 = vrot.slane %v9770_v38, %v19372_v5  ;;  %v9786_v47 = vcombine.low %v2470_v31, %v2478_v37  ;;  %v2576_v49 = vrot.slane %v2562_v41, %v19372_v5  ;;  %v19861_v50 = vrot.slane %v19850_v19, %v19372_v5 }
  0xc4   : > { %v18367_v43 = vpack.i.bf16 %v9836_v42, %v9819_v33  ;;  %v9787_v51 = vcombine.low %v2477_v30, %v2479_v44  ;;  %v2561_v34 = vcombine.high %v2559_v40, %v2559_v40  ;;  %v2577_v52 = vcombine.high %v2569_v46, %v2569_v46 }
  0xc5   : > { %v9785_v48 = vcombine.low %v9777_v39, %v9784_v14  ;;  %v9794_v54 = vrot.slane %v9786_v47, %v19372_v5  ;;  %v2578_v56 = vcombine.high %v2576_v49, %v2576_v49  ;;  %v9889_v57 = vcombine.low %v17588_v45, %v19861_v50 }
  0xc6   : > { %18368 = vrot.lane.b32.xlu1 %v18367_v43, %s19325_s20  ;;  %v9801_v58 = vrot.slane %v9787_v51, %v19372_v5  ;;  %v9871_v59 = vcombine.low %v2559_v40, %v2561_v34  ;;  %v9872_v55 = vcombine.low %v2569_v46, %v2577_v52  ;;  %v2520_v61 = vcombine.high %v19828_v8, %v19828_v8 }
  0xc7   : > { %v9888_v62 = vcombine.low %v2576_v49, %v2578_v56  ;;  %v9903_v1 = vrot.slane %v9889_v57, %v19372_v5  ;;  %v2521_v2 = vcombine.high %v1903_v53, %v1903_v53  ;;  %v2528_v63 = vrot.slane %v1903_v53, %v19372_v5  ;;  %v1914_v53 = vld [vmem:[%s19377_s18 + $0x19a] sm:$0xff] }
  0xc8   : > { %v9802_v6 = vcombine.low %v9794_v54, %v9801_v58  ;;  %v9879_v7 = vrot.slane %v9871_v59, %v19372_v5  ;;  %v9886_v9 = vrot.slane %v9872_v55, %v19372_v5  ;;  %v2552_v10 = vrot.slane %v1905_v24, %v19372_v5  ;;  %v17589_v59 = vld.sshfl [vmem:[%s19377_s18 + $0x17a] sm:$0x3 pattern:$0x76325410] }
  0xc9   : > { %v9896_v11 = vrot.slane %v9888_v62, %v19372_v5  ;;  %v2535_v12 = vrot.slane %v2521_v2, %v19372_v5  ;;  %v2536_v8 = vcombine.high %v2528_v63, %v2528_v63  ;;  %v9837_v60 = vcombine.low %v2520_v61, %v2528_v63 }
  0xca   : > { %v18362_v0 = vpack.i.bf16 %v9802_v6, %v9785_v48  ;;  %v9887_v16 = vcombine.low %v9879_v7, %v9886_v9  ;;  %v2560_v18 = vcombine.high %v2552_v10, %v2552_v10  ;;  %v2627_v20 = vcombine.high %v1911_v3, %v1911_v3 }
  0xcb   : > { %v9904_v22 = vcombine.low %v9896_v11, %v9903_v1  ;;  %v2537_v23 = vcombine.high %v2535_v12, %v2535_v12  ;;  %v9838_v25 = vcombine.low %v2536_v8, %v2535_v12  ;;  %v9845_v4 = vrot.slane %v9837_v60, %v19372_v5  ;;  %v17590_v8 = vld.sshfl [vmem:[%s19377_s18 + $0x192] sm:$0x3 pattern:$0x76325410] }
  0xcc   : > { %18363 = vrot.lane.b32.xlu0 %v18362_v0, %s19325_s20  ;;  %v9855_v24 = vcombine.low %v2552_v10, %v2560_v18  ;;  %v2634_v13 = vrot.slane %v1911_v3, %v19372_v5  ;;  %v2641_v26 = vrot.slane %v2627_v20, %v19372_v5  ;;  %v2644_v27 = vcombine.high %v1912_v15, %v1912_v15 }
  0xcd   : > { %v18377_v28 = vpack.i.bf16 %v9904_v22, %v9887_v16  ;;  %v9852_v21 = vrot.slane %v9838_v25, %v19372_v5  ;;  %v9854_v29 = vcombine.low %v2537_v23, %v17587_v17  ;;  %v2651_v31 = vrot.slane %v1912_v15, %v19372_v5  ;;  %v17595_v15 = vld [vmem:[%s19377_s18 + $0x30] sm:$0xff]  ;;  %v17591_v17 = vld.sshfl [vmem:[%s19377_s18 + $0x1aa] sm:$0x3 pattern:$0x76325410] }
  0xce   : > { %v9869_v32 = vrot.slane %v9855_v24, %v19372_v5  ;;  %v2642_v33 = vcombine.high %v2634_v13, %v2634_v13  ;;  %v2643_v35 = vcombine.high %v2641_v26, %v2641_v26  ;;  %v2658_v30 = vrot.slane %v2644_v27, %v19372_v5 }
  0xcf   : > { %18378 = vrot.lane.b32.xlu1 %v18377_v28, %s19325_s20  ;;  %v9853_v37 = vcombine.low %v9845_v4, %v9852_v21  ;;  %v9862_v38 = vrot.slane %v9854_v29, %v19372_v5  ;;  %v2659_v39 = vcombine.high %v2651_v31, %v2651_v31  ;;  %v2586_v41 = vcombine.high %v19850_v19, %v19850_v19  ;;  %v1915_v19 = vld [vmem:[%s19377_s18 + $0x1a2] sm:$0xff] }
  0xd0   : > { %v2660_v42 = vcombine.high %v2658_v30, %v2658_v30  ;;  %v9939_v44 = vcombine.low %v2634_v13, %v2642_v33  ;;  %v9940_v45 = vcombine.low %v2641_v26, %v2643_v35  ;;  %v2601_v40 = vcombine.high %v19861_v50, %v19861_v50 }
  0xd1   : > { %v9870_v46 = vcombine.low %v9862_v38, %v9869_v32  ;;  %v9956_v14 = vcombine.low %v2651_v31, %v2659_v39  ;;  %v2600_v47 = vrot.slane %v2586_v41, %v19372_v5  ;;  %v2603_v49 = vcombine.high %v1909_v36, %v1909_v36  ;;  %v17596_v31 = vld [vmem:[%s19377_s18 + $0x38] sm:$0xff] }
  0xd2   : > { %v9947_v43 = vrot.slane %v9939_v44, %v19372_v5  ;;  %v9954_v51 = vrot.slane %v9940_v45, %v19372_v5  ;;  %v9957_v34 = vcombine.low %v2658_v30, %v2660_v42  ;;  %v2610_v52 = vrot.slane %v1909_v36, %v19372_v5  ;;  %v19925_v36 = vld.sshfl [vmem:[%s19377_s18 + $0x28] sm:$0x3 pattern:$0x76325410]  ;;  %v17592_v44 = vld [vmem:[%s19377_s18 + $0x18] sm:$0xff] }
  0xd3   : > { %v18372_v48 = vpack.i.bf16 %v9870_v46, %v9853_v37  ;;  %v9964_v54 = vrot.slane %v9956_v14, %v19372_v5  ;;  %v2602_v56 = vcombine.high %v2600_v47, %v2600_v47  ;;  %v2617_v50 = vrot.slane %v2603_v49, %v19372_v5 }
  0xd4   : > { %v9955_v57 = vcombine.low %v9947_v43, %v9954_v51  ;;  %v9971_v58 = vrot.slane %v9957_v34, %v19372_v5  ;;  %v2618_v55 = vcombine.high %v2610_v52, %v2610_v52  ;;  %v9905_v61 = vcombine.low %v2601_v40, %v2600_v47  ;;  %v17593_v51 = vld [vmem:[%s19377_s18 + $0x20] sm:$0xff] }
  0xd5   : > { %18373 = vrot.lane.b32.xlu0 %v18372_v48, %s19325_s20  ;;  %v2619_v62 = vcombine.high %v2617_v50, %v2617_v50  ;;  %v9906_v1 = vcombine.low %v2602_v56, %v2610_v52  ;;  %v2685_v2 = vcombine.high %v1915_v19, %v1915_v19  ;;  %v2668_v63 = vcombine.high %v1914_v53, %v1914_v53 }
  0xd6   : > { %v9972_v3 = vcombine.low %v9964_v54, %v9971_v58  ;;  %v9913_v6 = vrot.slane %v9905_v61, %v19372_v5  ;;  %v9922_v7 = vcombine.low %v2618_v55, %v2617_v50  ;;  %v2675_v9 = vrot.slane %v1914_v53, %v19372_v5 }
  0xd7   : > { %v9920_v10 = vrot.slane %v9906_v1, %v19372_v5  ;;  %v9923_v11 = vcombine.low %v2619_v62, %v17589_v59  ;;  %v2699_v12 = vrot.slane %v2685_v2, %v19372_v5  ;;  %v2682_v60 = vrot.slane %v2668_v63, %v19372_v5  ;;  %v17601_v62 = vld [vmem:[%s19377_s18 + $0x60] sm:$0xff] }
  0xd8   : > { %v18387_v0 = vpack.i.bf16 %v9972_v3, %v9955_v57  ;;  %v9930_v16 = vrot.slane %v9922_v7, %v19372_v5  ;;  %v2683_v18 = vcombine.high %v2675_v9, %v2675_v9  ;;  %v2692_v20 = vrot.slane %v1915_v19, %v19372_v5  ;;  %v17599_v57 = vld [vmem:[%s19377_s18 + $0x50] sm:$0xff] }
  0xd9   : > { %v9921_v22 = vcombine.low %v9913_v6, %v9920_v10  ;;  %v9937_v23 = vrot.slane %v9923_v11, %v19372_v5  ;;  %v2701_v25 = vcombine.high %v2699_v12, %v2699_v12  ;;  %v2684_v4 = vcombine.high %v2682_v60, %v2682_v60 }
  0xda   : > { %18388 = vrot.lane.b32.xlu1 %v18387_v0, %s19325_s20  ;;  %v2700_v24 = vcombine.high %v2692_v20, %v2692_v20  ;;  %v9973_v13 = vcombine.low %v17590_v8, %v2675_v9  ;;  %v9974_v26 = vcombine.low %v2683_v18, %v2682_v60  ;;  %v2859_v27 = vcombine.high %v17595_v15, %v17595_v15  ;;  %v19997_v8 = vld [vmem:[%s19377_s18 + $0x68] sm:$0xff]  ;;  %v17648_v18 = vld.sshfl [vmem:[%s19377_s18 + $0x58] sm:$0x3 pattern:$0x76325410] }
  0xdb   : > { %v9938_v28 = vcombine.low %v9930_v16, %v9937_v23  ;;  %v10007_v21 = vcombine.low %v2701_v25, %v17591_v17  ;;  %v9990_v29 = vcombine.low %v2684_v4, %v2692_v20  ;;  %v19920_v32 = vrot.slane %v17595_v15, %v19372_v5 }
  0xdc   : > { %v9981_v33 = vrot.slane %v9973_v13, %v19372_v5  ;;  %v9988_v35 = vrot.slane %v9974_v26, %v19372_v5  ;;  %v9991_v30 = vcombine.low %v2700_v24, %v2699_v12  ;;  %v19928_v37 = vrot.slane %v2859_v27, %v19372_v5 }
  0xdd   : > { %v18382_v38 = vpack.i.bf16 %v9938_v28, %v9921_v22  ;;  %v10014_v39 = vrot.slane %v10007_v21, %v19372_v5  ;;  %v9998_v41 = vrot.slane %v9990_v29, %v19372_v5  ;;  %v19934_v42 = vcombine.high %v19920_v32, %v19920_v32  ;;  %v17598_v28 = vld [vmem:[%s19377_s18 + $0x48] sm:$0xff] }
  0xde   : > { %v9989_v45 = vcombine.low %v9981_v33, %v9988_v35  ;;  %v10005_v40 = vrot.slane %v9991_v30, %v19372_v5  ;;  %v19940_v46 = vcombine.high %v19928_v37, %v19928_v37  ;;  %v2876_v14 = vcombine.high %v17596_v31, %v17596_v31 }
  0xdf   : > { %18383 = vrot.lane.b32.xlu0 %v18382_v38, %s19325_s20  ;;  %10095 = vrot.lane.b32.xlu1 %v10014_v39, %s19325_s20  ;;  %v19945_v47 = vrot.slane %v17596_v31, %v19372_v5  ;;  %v10172_v49 = vcombine.low %v19925_v36, %v19920_v32  ;;  %v10173_v43 = vcombine.low %v19934_v42, %v19928_v37 }
  0xe0   : > { %v10006_v34 = vcombine.low %v9998_v41, %v10005_v40  ;;  %v19953_v52 = vrot.slane %v2876_v14, %v19372_v5  ;;  %v2818_v19 = vcombine.high %v17592_v44, %v17592_v44  ;;  %v19956_v53 = vrot.slane %v17592_v44, %v19372_v5  ;;  %v20023_v41 = vld.sshfl [vmem:[%s19377_s18 + $0x40] sm:$0x3 pattern:$0x76325410] }
  0xe1   : > { %v19960_v48 = vcombine.high %v19945_v47, %v19945_v47  ;;  %v10180_v54 = vrot.slane %v10172_v49, %v19372_v5  ;;  %v10187_v56 = vrot.slane %v10173_v43, %v19372_v5  ;;  %v10189_v50 = vcombine.low %v19940_v46, %v19945_v47  ;;  %v17605_v49 = vld [vmem:[%s19377_s18 + $0x80] sm:$0xff] }
  0xe2   : > { %v18392_v58 = vpack.i.bf16 %v10006_v34, %v9989_v45  ;;  %v19968_v59 = vrot.slane %v2818_v19, %v19372_v5  ;;  %v19972_v55 = vcombine.high %v19956_v53, %v19956_v53  ;;  %v2835_v61 = vcombine.high %v17593_v51, %v17593_v51 }
  0xe3   : > { %v10188_v1 = vcombine.low %v10180_v54, %v10187_v56  ;;  %v10190_v2 = vcombine.low %v19960_v48, %v19953_v52  ;;  %v10197_v63 = vrot.slane %v10189_v50, %v19372_v5  ;;  %v19979_v3 = vrot.slane %v17593_v51, %v19372_v5 }
  0xe4   : > { %18393 = vrot.lane.b32.xlu0 %v18392_v58, %s19325_s20  ;;  %v19984_v6 = vcombine.high %v19968_v59, %v19968_v59  ;;  %v19987_v7 = vrot.slane %v2835_v61, %v19372_v5  ;;  %v10138_v9 = vcombine.low %v19956_v53, %v19972_v55  ;;  %v2917_v10 = vcombine.high %v17599_v57, %v17599_v57  ;;  %v17607_v61 = vld [vmem:[%s19377_s18 + $0x90] sm:$0xff] }
  0xe5   : > { %v10204_v11 = vrot.slane %v10190_v2, %v19372_v5  ;;  %v19994_v12 = vcombine.high %v19979_v3, %v19979_v3  ;;  %v2941_v60 = vcombine.high %v17601_v62, %v17601_v62  ;;  %v2948_v15 = vrot.slane %v17601_v62, %v19372_v5 }
  0xe6   : > { %v20002_v0 = vcombine.high %v19987_v7, %v19987_v7  ;;  %v10139_v16 = vcombine.low %v19968_v59, %v19984_v6  ;;  %v10146_v17 = vrot.slane %v10138_v9, %v19372_v5  ;;  %v2931_v20 = vrot.slane %v2917_v10, %v19372_v5 }
  0xe7   : > { %v10205_v22 = vcombine.low %v10197_v63, %v10204_v11  ;;  %v10155_v23 = vcombine.low %v19979_v3, %v19994_v12  ;;  %v2955_v25 = vrot.slane %v2941_v60, %v19372_v5  ;;  %v2956_v4 = vcombine.high %v2948_v15, %v2948_v15 }
  0xe8   : > { %v10153_v24 = vrot.slane %v10139_v16, %v19372_v5  ;;  %v10156_v13 = vcombine.low %v19987_v7, %v20002_v0  ;;  %v2933_v26 = vcombine.high %v2931_v20, %v2931_v20  ;;  %v20017_v27 = vrot.slane %v19997_v8, %v19372_v5 }
  0xe9   : > { %v18402_v21 = vpack.i.bf16 %v10205_v22, %v10188_v1  ;;  %v10163_v29 = vrot.slane %v10155_v23, %v19372_v5  ;;  %v2957_v31 = vcombine.high %v2955_v25, %v2955_v25  ;;  %v10241_v33 = vcombine.low %v17648_v18, %v2948_v15  ;;  %v17650_v15 = vld.sshfl [vmem:[%s19377_s18 + $0x88] sm:$0x3 pattern:$0x76325410] }
  0xea   : > { %v10154_v35 = vcombine.low %v10146_v17, %v10153_v24  ;;  %v10170_v30 = vrot.slane %v10156_v13, %v19372_v5  ;;  %v10240_v38 = vcombine.low %v2931_v20, %v2933_v26  ;;  %v10257_v39 = vcombine.low %v2956_v4, %v2955_v25 }
  0xeb   : > { %18403 = vrot.lane.b32.xlu1 %v18402_v21, %s19326_s21  ;;  %v10255_v44 = vrot.slane %v10241_v33, %v19372_v5  ;;  %v10258_v45 = vcombine.low %v2957_v31, %v20017_v27  ;;  %v20030_v40 = vcombine.high %v19953_v52, %v19953_v52  ;;  %v2900_v14 = vcombine.high %v17598_v28, %v17598_v28  ;;  %v17604_v33 = vld [vmem:[%s19377_s18 + $0x78] sm:$0xff] }
  0xec   : > { %v10171_v43 = vcombine.low %v10163_v29, %v10170_v30  ;;  %v10248_v51 = vrot.slane %v10240_v38, %v19372_v5  ;;  %v10265_v34 = vrot.slane %v10257_v39, %v19372_v5  ;;  %v20036_v19 = vrot.slane %v17598_v28, %v19372_v5 }
  0xed   : > { %v10272_v54 = vrot.slane %v10258_v45, %v19372_v5  ;;  %v20040_v56 = vrot.slane %v2900_v14, %v19372_v5  ;;  %v20043_v50 = vrot.slane %v17599_v57, %v19372_v5  ;;  %v10206_v58 = vcombine.low %v20030_v40, %v20023_v41 }
  0xee   : > { %v18397_v62 = vpack.i.bf16 %v10171_v43, %v10154_v35  ;;  %v10256_v1 = vcombine.low %v10248_v51, %v10255_v44  ;;  %v20050_v2 = vcombine.high %v20036_v19, %v20036_v19  ;;  %v2999_v63 = vcombine.high %v17605_v49, %v17605_v49  ;;  %v17610_v44 = vld [vmem:[%s19377_s18 + $0xa8] sm:$0xff] }
  0xef   : > { %v10273_v9 = vcombine.low %v10265_v34, %v10272_v54  ;;  %v20054_v10 = vcombine.high %v20040_v56, %v20040_v56  ;;  %v20058_v57 = vcombine.high %v20043_v50, %v20043_v50  ;;  %v10214_v11 = vrot.slane %v10206_v58, %v19372_v5 }
  0xf0   : > { %18398 = vrot.lane.b32.xlu0 %v18397_v62, %s19326_s21  ;;  %v10207_v60 = vcombine.low %v20036_v19, %v20050_v2  ;;  %v3006_v16 = vrot.slane %v17605_v49, %v19372_v5  ;;  %v3013_v17 = vrot.slane %v2999_v63, %v19372_v5  ;;  %v3023_v18 = vcombine.high %v17607_v61, %v17607_v61 }
  0xf1   : > { %v18412_v20 = vpack.i.bf16 %v10273_v9, %v10256_v1  ;;  %v10223_v22 = vcombine.low %v20040_v56, %v20054_v10  ;;  %v10224_v23 = vcombine.low %v20043_v50, %v20058_v57  ;;  %v3030_v25 = vrot.slane %v17607_v61, %v19372_v5  ;;  %v17611_v61 = vld [vmem:[%s19377_s18 + $0xb0] sm:$0xff] }
  0xf2   : > { %v10221_v4 = vrot.slane %v10207_v60, %v19372_v5  ;;  %v3014_v24 = vcombine.high %v3006_v16, %v3006_v16  ;;  %v3015_v13 = vcombine.high %v3013_v17, %v3013_v17  ;;  %v20074_v26 = vrot.slane %v3023_v18, %v19372_v5  ;;  %v20093_v1 = vld.sshfl [vmem:[%s19377_s18 + $0x70] sm:$0x3 pattern:$0x76325410]  ;;  %v20107_v18 = vld [vmem:[%s19377_s18 + $0xc0] sm:$0xff] }
  0xf3   : > { %18413 = vrot.lane.b32.xlu1 %v18412_v20, %s19326_s21  ;;  %v10231_v28 = vrot.slane %v10223_v22, %v19372_v5  ;;  %v10238_v21 = vrot.slane %v10224_v23, %v19372_v5  ;;  %v3038_v29 = vcombine.high %v3030_v25, %v3030_v25  ;;  %v10325_v31 = vcombine.low %v17650_v15, %v3030_v25 }
  0xf4   : > { %v10222_v35 = vcombine.low %v10214_v11, %v10221_v4  ;;  %v10308_v30 = vcombine.low %v3006_v16, %v3014_v24  ;;  %v10309_v38 = vcombine.low %v3013_v17, %v3015_v13  ;;  %v2958_v39 = vcombine.high %v19997_v8, %v19997_v8 }
  0xf5   : > { %v10239_v45 = vcombine.low %v10231_v28, %v10238_v21  ;;  %v10326_v14 = vcombine.low %v3038_v29, %v20074_v26  ;;  %v10333_v49 = vrot.slane %v10325_v31, %v19372_v5  ;;  %v2973_v43 = vcombine.high %v20017_v27, %v20017_v27  ;;  %v17652_v21 = vld.sshfl [vmem:[%s19377_s18 + $0xb8] sm:$0x3 pattern:$0x76325410] }
  0xf6   : > { %v10316_v51 = vrot.slane %v10308_v30, %v19372_v5  ;;  %v10323_v34 = vrot.slane %v10309_v38, %v19372_v5  ;;  %v2972_v54 = vrot.slane %v2958_v39, %v19372_v5  ;;  %v2982_v58 = vcombine.high %v17604_v33, %v17604_v33  ;;  %v17608_v39 = vld [vmem:[%s19377_s18 + $0x98] sm:$0xff] }
  0xf7   : > { %v18407_v62 = vpack.i.bf16 %v10239_v45, %v10222_v35  ;;  %v10340_v8 = vrot.slane %v10326_v14, %v19372_v5  ;;  %v20096_v63 = vrot.slane %v17604_v33, %v19372_v5  ;;  %v3064_v9 = vcombine.high %v17610_v44, %v17610_v44 }
  0xf8   : > { %v10324_v11 = vcombine.low %v10316_v51, %v10323_v34  ;;  %v2974_v27 = vcombine.high %v2972_v54, %v2972_v54  ;;  %v20099_v60 = vrot.slane %v2982_v58, %v19372_v5  ;;  %v10274_v15 = vcombine.low %v2973_v43, %v2972_v54 }
  0xf9   : > { %18408 = vrot.lane.b32.xlu0 %v18407_v62, %s19326_s21  ;;  %v10341_v16 = vcombine.low %v10333_v49, %v10340_v8  ;;  %v20104_v17 = vcombine.high %v20096_v63, %v20096_v63  ;;  %v3078_v20 = vrot.slane %v3064_v9, %v19372_v5  ;;  %v3081_v22 = vcombine.high %v17611_v61, %v17611_v61 }
  0xfa   : > { %v20112_v23 = vcombine.high %v20099_v60, %v20099_v60  ;;  %v10275_v25 = vcombine.low %v2974_v27, %v20093_v1  ;;  %v10282_v4 = vrot.slane %v10274_v15, %v19372_v5  ;;  %v3088_v24 = vrot.slane %v17611_v61, %v19372_v5 }
  0xfb   : > { %v18422_v13 = vpack.i.bf16 %v10341_v16, %v10324_v11  ;;  %v10291_v28 = vcombine.low %v20096_v63, %v20104_v17  ;;  %v3080_v29 = vcombine.high %v3078_v20, %v3078_v20  ;;  %v3095_v31 = vrot.slane %v3081_v22, %v19372_v5  ;;  %v17616_v11 = vld [vmem:[%s19377_s18 + $0xd8] sm:$0xff] }
  0xfc   : > { %v10289_v33 = vrot.slane %v10275_v25, %v19372_v5  ;;  %v10292_v35 = vcombine.low %v20099_v60, %v20112_v23  ;;  %v3096_v30 = vcombine.high %v3088_v24, %v3088_v24  ;;  %v20126_v38 = vrot.slane %v20107_v18, %v19372_v5 }
  0xfd   : > { %18423 = vrot.lane.b32.xlu1 %v18422_v13, %s19326_s21  ;;  %v10299_v45 = vrot.slane %v10291_v28, %v19372_v5  ;;  %v3097_v14 = vcombine.high %v3095_v31, %v3095_v31  ;;  %v10376_v49 = vcombine.low %v3078_v20, %v3080_v29  ;;  %v3039_v43 = vcombine.high %v20074_v26, %v20074_v26 }
  0xfe   : > { %v10290_v51 = vcombine.low %v10282_v4, %v10289_v33  ;;  %v10306_v34 = vrot.slane %v10292_v35, %v19372_v5  ;;  %v10377_v54 = vcombine.low %v3088_v24, %v3096_v30  ;;  %v10394_v58 = vcombine.low %v17652_v21, %v20126_v38  ;;  %v17617_v24 = vld [vmem:[%s19377_s18 + $0xe0] sm:$0xff] }
  0xff   : > { %v10384_v61 = vrot.slane %v10376_v49, %v19372_v5  ;;  %v10393_v62 = vcombine.low %v3095_v31, %v3097_v14  ;;  %v3040_v8 = vcombine.high %v17608_v39, %v17608_v39  ;;  %v20137_v9 = vrot.slane %v17608_v39, %v19372_v5  ;;  %v17651_v21 = vld.sshfl [vmem:[%s19377_s18 + $0xa0] sm:$0x3 pattern:$0x76325410] }
 0x100   : > { %v10307_v27 = vcombine.low %v10299_v45, %v10306_v34  ;;  %v10391_v15 = vrot.slane %v10377_v54, %v19372_v5  ;;  %v10408_v26 = vrot.slane %v10394_v58, %v19372_v5  ;;  %v3071_v16 = vrot.slane %v17610_v44, %v19372_v5 }
 0x101   : > { %v10401_v20 = vrot.slane %v10393_v62, %v19372_v5  ;;  %v20145_v22 = vrot.slane %v3040_v8, %v19372_v5  ;;  %v20149_v25 = vcombine.high %v20137_v9, %v20137_v9  ;;  %v10342_v4 = vcombine.low %v3039_v43, %v20137_v9 }
 0x102   : > { %v18417_v13 = vpack.i.bf16 %v10307_v27, %v10290_v51  ;;  %v10392_v28 = vcombine.low %v10384_v61, %v10391_v15  ;;  %v3079_v29 = vcombine.high %v3071_v16, %v3071_v16  ;;  %v3146_v31 = vcombine.high %v17616_v11, %v17616_v11  ;;  %v17614_v27 = vld [vmem:[%s19377_s18 + $0xc8] sm:$0xff] }
 0x103   : > { %v10409_v33 = vcombine.low %v10401_v20, %v10408_v26  ;;  %v20156_v44 = vcombine.high %v20145_v22, %v20145_v22  ;;  %v10343_v35 = vcombine.low %v20149_v25, %v20145_v22  ;;  %v10350_v30 = vrot.slane %v10342_v4, %v19372_v5 }
 0x104   : > { %18418 = vrot.lane.b32.xlu0 %v18417_v13, %s19326_s21  ;;  %v10360_v39 = vcombine.low %v3071_v16, %v3079_v29  ;;  %v3153_v45 = vrot.slane %v17616_v11, %v19372_v5  ;;  %v3160_v14 = vrot.slane %v3146_v31, %v19372_v5  ;;  %v3163_v49 = vcombine.high %v17617_v24, %v17617_v24 }
 0x105   : > { %v18432_v43 = vpack.i.bf16 %v10409_v33, %v10392_v28  ;;  %v10357_v51 = vrot.slane %v10343_v35, %v19372_v5  ;;  %v10359_v34 = vcombine.low %v20156_v44, %v17651_v21  ;;  %v3170_v54 = vrot.slane %v17617_v24, %v19372_v5 }
 0x106   : > { %v10374_v58 = vrot.slane %v10360_v39, %v19372_v5  ;;  %v3161_v61 = vcombine.high %v3153_v45, %v3153_v45  ;;  %v3162_v62 = vcombine.high %v3160_v14, %v3160_v14  ;;  %v3177_v8 = vrot.slane %v3163_v49, %v19372_v5  ;;  %v17620_v39 = vld [vmem:[%s19377_s18 + $0xf8] sm:$0xff] }
 0x107   : > { %18433 = vrot.lane.b32.xlu1 %v18432_v43, %s19326_s21  ;;  %v10358_v11 = vcombine.low %v10350_v30, %v10357_v51  ;;  %v10367_v15 = vrot.slane %v10359_v34, %v19372_v5  ;;  %v3178_v26 = vcombine.high %v3170_v54, %v3170_v54  ;;  %v3105_v16 = vcombine.high %v20107_v18, %v20107_v18 }
 0x108   : > { %v3179_v20 = vcombine.high %v3177_v8, %v3177_v8  ;;  %v10444_v4 = vcombine.low %v3153_v45, %v3161_v61  ;;  %v10445_v24 = vcombine.low %v3160_v14, %v3162_v62  ;;  %v3120_v13 = vcombine.high %v20126_v38, %v20126_v38  ;;  %v17622_v45 = vld [vmem:[%s19377_s18 + $0x108] sm:$0xff] }
 0x109   : > { %v10375_v28 = vcombine.low %v10367_v15, %v10374_v58  ;;  %v10461_v21 = vcombine.low %v3170_v54, %v3178_v26  ;;  %v3119_v29 = vrot.slane %v3105_v16, %v19372_v5  ;;  %v3122_v31 = vcombine.high %v17614_v27, %v17614_v27  ;;  %v17653_v54 = vld.sshfl [vmem:[%s19377_s18 + $0xd0] sm:$0x3 pattern:$0x76325410] }
 0x10a   : > { %v10452_v33 = vrot.slane %v10444_v4, %v19372_v5  ;;  %v10459_v35 = vrot.slane %v10445_v24, %v19372_v5  ;;  %v10462_v30 = vcombine.low %v3177_v8, %v3179_v20  ;;  %v3129_v18 = vrot.slane %v17614_v27, %v19372_v5  ;;  %v20188_v27 = vld [vmem:[%s19377_s18 + $0x110] sm:$0xff] }
 0x10b   : > { %v18427_v14 = vpack.i.bf16 %v10375_v28, %v10358_v11  ;;  %v10469_v49 = vrot.slane %v10461_v21, %v19372_v5  ;;  %v3121_v38 = vcombine.high %v3119_v29, %v3119_v29  ;;  %v3136_v43 = vrot.slane %v3122_v31, %v19372_v5 }
 0x10c   : > { %v10460_v51 = vcombine.low %v10452_v33, %v10459_v35  ;;  %v10476_v34 = vrot.slane %v10462_v30, %v19372_v5  ;;  %v3137_v58 = vcombine.high %v3129_v18, %v3129_v18  ;;  %v10410_v61 = vcombine.low %v3120_v13, %v3119_v29  ;;  %v17619_v29 = vld [vmem:[%s19377_s18 + $0xf0] sm:$0xff]  ;;  %v17655_v35 = vld.sshfl [vmem:[%s19377_s18 + $0x100] sm:$0x3 pattern:$0x76325410] }
 0x10d   : > { %18428 = vrot.lane.b32.xlu0 %v18427_v14, %s19326_s21  ;;  %v3138_v62 = vcombine.high %v3136_v43, %v3136_v43  ;;  %v10411_v8 = vcombine.low %v3121_v38, %v3129_v18  ;;  %v3204_v11 = vcombine.high %v17620_v39, %v17620_v39  ;;  %v3228_v15 = vcombine.high %v17622_v45, %v17622_v45 }
 0x10e   : > { %v10477_v26 = vcombine.low %v10469_v49, %v10476_v34  ;;  %v10418_v16 = vrot.slane %v10410_v61, %v19372_v5  ;;  %v10427_v20 = vcombine.low %v3137_v58, %v3136_v43  ;;  %v3235_v4 = vrot.slane %v17622_v45, %v19372_v5 }
 0x10f   : > { %v10425_v24 = vrot.slane %v10411_v8, %v19372_v5  ;;  %v10428_v28 = vcombine.low %v3138_v62, %v17653_v54  ;;  %v3218_v13 = vrot.slane %v3204_v11, %v19372_v5  ;;  %v3242_v21 = vrot.slane %v3228_v15, %v19372_v5  ;;  %v17654_v8 = vld.sshfl [vmem:[%s19377_s18 + $0xe8] sm:$0x3 pattern:$0x76325410] }
 0x110   : > { %v18442_v31 = vpack.i.bf16 %v10477_v26, %v10460_v51  ;;  %v10435_v33 = vrot.slane %v10427_v20, %v19372_v5  ;;  %v3243_v30 = vcombine.high %v3235_v4, %v3235_v4  ;;  %v3252_v18 = vrot.slane %v20188_v27, %v19372_v5 }
 0x111   : > { %v10426_v14 = vcombine.low %v10418_v16, %v10425_v24  ;;  %v10442_v45 = vrot.slane %v10428_v28, %v19372_v5  ;;  %v3220_v49 = vcombine.high %v3218_v13, %v3218_v13  ;;  %v3244_v38 = vcombine.high %v3242_v21, %v3242_v21  ;;  %v17626_v24 = vld [vmem:[%s19377_s18 + $0x128] sm:$0xff] }
 0x112   : > { %18443 = vrot.lane.b32.xlu1 %v18442_v31, %s19326_s21  ;;  %v3260_v43 = vcombine.high %v3252_v18, %v3252_v18  ;;  %v10513_v34 = vcombine.low %v3235_v4, %v3243_v30  ;;  %v3187_v54 = vcombine.high %v17619_v29, %v17619_v29  ;;  %v3194_v51 = vrot.slane %v17619_v29, %v19372_v5 }
 0x113   : > { %v10443_v58 = vcombine.low %v10435_v33, %v10442_v45  ;;  %v10512_v61 = vcombine.low %v3220_v49, %v17655_v35  ;;  %v10529_v62 = vcombine.low %v3242_v21, %v3244_v38  ;;  %v3211_v11 = vrot.slane %v17620_v39, %v19372_v5  ;;  %v17628_v39 = vld [vmem:[%s19377_s18 + $0x138] sm:$0xff] }
 0x114   : > { %v10527_v15 = vrot.slane %v10513_v34, %v19372_v5  ;;  %v10530_v26 = vcombine.low %v3252_v18, %v3260_v43  ;;  %v3201_v16 = vrot.slane %v3187_v54, %v19372_v5  ;;  %v3202_v20 = vcombine.high %v3194_v51, %v3194_v51 }
 0x115   : > { %v18437_v28 = vpack.i.bf16 %v10443_v58, %v10426_v14  ;;  %v10520_v4 = vrot.slane %v10512_v61, %v19372_v5  ;;  %v10537_v31 = vrot.slane %v10529_v62, %v19372_v5  ;;  %v3219_v29 = vcombine.high %v3211_v11, %v3211_v11 }
 0x116   : > { %v10544_v33 = vrot.slane %v10530_v26, %v19372_v5  ;;  %v3203_v21 = vcombine.high %v3201_v16, %v3201_v16  ;;  %v10478_v35 = vcombine.low %v17654_v8, %v3194_v51  ;;  %v10479_v30 = vcombine.low %v3202_v20, %v3201_v16  ;;  %v17625_v8 = vld [vmem:[%s19377_s18 + $0x120] sm:$0xff]  ;;  %v17657_v16 = vld.sshfl [vmem:[%s19377_s18 + $0x130] sm:$0x3 pattern:$0x76325410] }
 0x117   : > { %18438 = vrot.lane.b32.xlu0 %v18437_v28, %s19326_s21  ;;  %v10528_v18 = vcombine.low %v10520_v4, %v10527_v15  ;;  %v10496_v45 = vcombine.low %v3219_v29, %v3218_v13  ;;  %v3286_v49 = vcombine.high %v17626_v24, %v17626_v24  ;;  %v3293_v14 = vrot.slane %v17626_v24, %v19372_v5 }
 0x118   : > { %v10545_v38 = vcombine.low %v10537_v31, %v10544_v33  ;;  %v10486_v43 = vrot.slane %v10478_v35, %v19372_v5  ;;  %v10493_v34 = vrot.slane %v10479_v30, %v19372_v5  ;;  %v10495_v54 = vcombine.low %v3203_v21, %v3211_v11  ;;  %v17656_v33 = vld.sshfl [vmem:[%s19377_s18 + $0x118] sm:$0x3 pattern:$0x76325410] }
 0x119   : > { %v10510_v58 = vrot.slane %v10496_v45, %v19372_v5  ;;  %v3300_v51 = vrot.slane %v3286_v49, %v19372_v5  ;;  %v3301_v61 = vcombine.high %v3293_v14, %v3293_v14  ;;  %v3310_v62 = vcombine.high %v17628_v39, %v17628_v39  ;;  %v17631_v49 = vld [vmem:[%s19377_s18 + $0x150] sm:$0xff] }
 0x11a   : > { %v18452_v15 = vpack.i.bf16 %v10545_v38, %v10528_v18  ;;  %v10494_v26 = vcombine.low %v10486_v43, %v10493_v34  ;;  %v10503_v13 = vrot.slane %v10495_v54, %v19372_v5  ;;  %v3317_v20 = vrot.slane %v17628_v39, %v19372_v5 }
 0x11b   : > { %v3302_v24 = vcombine.high %v3300_v51, %v3300_v51  ;;  %v3324_v28 = vrot.slane %v3310_v62, %v19372_v5  ;;  %v10580_v11 = vcombine.low %v3301_v61, %v3300_v51  ;;  %v3245_v4 = vcombine.high %v20188_v27, %v20188_v27  ;;  %v17632_v62 = vld [vmem:[%s19377_s18 + $0x158] sm:$0xff] }
 0x11c   : > { %18453 = vrot.lane.b32.xlu1 %v18452_v15, %s19326_s21  ;;  %v10511_v31 = vcombine.low %v10503_v13, %v10510_v58  ;;  %v3325_v29 = vcombine.high %v3317_v20, %v3317_v20  ;;  %v3269_v21 = vcombine.high %v17625_v8, %v17625_v8  ;;  %v3276_v35 = vrot.slane %v17625_v8, %v19372_v5 }
 0x11d   : > { %v3326_v30 = vcombine.high %v3324_v28, %v3324_v28  ;;  %v10581_v18 = vcombine.low %v3302_v24, %v17657_v16  ;;  %v10588_v39 = vrot.slane %v10580_v11, %v19372_v5  ;;  %v3259_v45 = vrot.slane %v3245_v4, %v19372_v5  ;;  %v20237_v16 = vld [vmem:[%s19377_s18 + $0x168] sm:$0xff] }
 0x11e   : > { %v18447_v38 = vpack.i.bf16 %v10511_v31, %v10494_v26  ;;  %v10597_v43 = vcombine.low %v3317_v20, %v3325_v29  ;;  %v3283_v27 = vrot.slane %v3269_v21, %v19372_v5  ;;  %v3284_v34 = vcombine.high %v3276_v35, %v3276_v35 }
 0x11f   : > { %v10595_v54 = vrot.slane %v10581_v18, %v19372_v5  ;;  %v10598_v58 = vcombine.low %v3324_v28, %v3326_v30  ;;  %v3261_v51 = vcombine.high %v3259_v45, %v3259_v45  ;;  %v10547_v61 = vcombine.low %v17656_v33, %v3276_v35  ;;  %v17629_v28 = vld [vmem:[%s19377_s18 + $0x140] sm:$0xff] }
 0x120   : > { %18448 = vrot.lane.b32.xlu0 %v18447_v38, %s19326_s21  ;;  %v10605_v8 = vrot.slane %v10597_v43, %v19372_v5  ;;  %v3285_v15 = vcombine.high %v3283_v27, %v3283_v27  ;;  %v10563_v13 = vcombine.low %v3284_v34, %v3283_v27  ;;  %v3351_v26 = vcombine.high %v17631_v49, %v17631_v49 }
 0x121   : > { %v10596_v20 = vcombine.low %v10588_v39, %v10595_v54  ;;  %v10612_v24 = vrot.slane %v10598_v58, %v19372_v5  ;;  %v10546_v11 = vcombine.low %v3259_v45, %v3261_v51  ;;  %v10561_v4 = vrot.slane %v10547_v61, %v19372_v5  ;;  %v17659_v54 = vld.sshfl [vmem:[%s19377_s18 + $0x160] sm:$0x3 pattern:$0x76325410] }
 0x122   : > { %v10564_v31 = vcombine.low %v3285_v15, %v3293_v14  ;;  %v10571_v29 = vrot.slane %v10563_v13, %v19372_v5  ;;  %v3365_v33 = vrot.slane %v3351_v26, %v19372_v5  ;;  %v3368_v21 = vcombine.high %v17632_v62, %v17632_v62 }
 0x123   : > { %v10613_v35 = vcombine.low %v10605_v8, %v10612_v24  ;;  %v10554_v30 = vrot.slane %v10546_v11, %v19372_v5  ;;  %v3375_v18 = vrot.slane %v17632_v62, %v19372_v5  ;;  %v3399_v39 = vrot.slane %v20237_v16, %v19372_v5  ;;  %v17658_v24 = vld.sshfl [vmem:[%s19377_s18 + $0x148] sm:$0x3 pattern:$0x76325410] }
 0x124   : > { %v10578_v45 = vrot.slane %v10564_v31, %v19372_v5  ;;  %v3367_v38 = vcombine.high %v3365_v33, %v3365_v33  ;;  %v3382_v43 = vrot.slane %v3368_v21, %v19372_v5  ;;  %v3327_v14 = vcombine.high %v17629_v28, %v17629_v28 }
 0x125   : > { %v18462_v27 = vpack.i.bf16 %v10613_v35, %v10596_v20  ;;  %v10562_v34 = vcombine.low %v10554_v30, %v10561_v4  ;;  %v3383_v58 = vcombine.high %v3375_v18, %v3375_v18  ;;  %v3407_v51 = vcombine.high %v3399_v39, %v3399_v39 }
 0x126   : > { %v10579_v61 = vcombine.low %v10571_v29, %v10578_v45  ;;  %v3384_v8 = vcombine.high %v3382_v43, %v3382_v43  ;;  %v10648_v15 = vcombine.low %v3367_v38, %v3375_v18  ;;  %v3334_v62 = vrot.slane %v17629_v28, %v19372_v5 }
 0x127   : > { %18463 = vrot.lane.b32.xlu1 %v18462_v27, %s19326_s21  ;;  %v10649_v13 = vcombine.low %v3383_v58, %v3382_v43  ;;  %v10666_v26 = vcombine.low %v3399_v39, %v3407_v51  ;;  %v3341_v11 = vrot.slane %v3327_v14, %v19372_v5  ;;  %v3358_v31 = vrot.slane %v17631_v49, %v19372_v5 }
 0x128   : > { %v18457_v21 = vpack.i.bf16 %v10579_v61, %v10562_v34  ;;  %v10656_v20 = vrot.slane %v10648_v15, %v19372_v5  ;;  %v10665_v4 = vcombine.low %v3384_v8, %v17659_v54  ;;  %v3342_v35 = vcombine.high %v3334_v62, %v3334_v62 }
 0x129   : > { %v10663_v29 = vrot.slane %v10649_v13, %v19372_v5  ;;  %v10680_v30 = vrot.slane %v10666_v26, %v19372_v5  ;;  %v3343_v18 = vcombine.high %v3341_v11, %v3341_v11  ;;  %v3366_v28 = vcombine.high %v3358_v31, %v3358_v31  ;;  %v17638_v26 = vld [vmem:[%s19377_s18 + $0x188] sm:$0xff] }
 0x12a   : > { %18458 = vrot.lane.b32.xlu0 %v18457_v21, %s19326_s21  ;;  %v10673_v39 = vrot.slane %v10665_v4, %v19372_v5  ;;  %v10614_v45 = vcombine.low %v3334_v62, %v3342_v35  ;;  %v10631_v38 = vcombine.low %v17658_v24, %v3358_v31  ;;  %v17637_v62 = vld [vmem:[%s19377_s18 + $0x180] sm:$0xff]  ;;  %v3450_v21 = vcombine.high %v17638_v26, %v17638_v26  ;;  %v17635_v35 = vld [vmem:[%s19377_s18 + $0x170] sm:$0xff] }
 0x12b   : > { %v10664_v49 = vcombine.low %v10656_v20, %v10663_v29  ;;  %v10615_v43 = vcombine.low %v3341_v11, %v3343_v18  ;;  %v10632_v14 = vcombine.low %v3366_v28, %v3365_v33  ;;  %v3433_v33 = vcombine.high %v17637_v62, %v17637_v62  ;;  %v17661_v18 = vld.sshfl [vmem:[%s19377_s18 + $0x190] sm:$0x3 pattern:$0x76325410] }
 0x12c   : > { %v10681_v27 = vcombine.low %v10673_v39, %v10680_v30  ;;  %v10622_v34 = vrot.slane %v10614_v45, %v19372_v5  ;;  %v10639_v54 = vrot.slane %v10631_v38, %v19372_v5  ;;  %v3440_v24 = vrot.slane %v17637_v62, %v19372_v5 }
 0x12d   : > { %v10629_v58 = vrot.slane %v10615_v43, %v19372_v5  ;;  %v10646_v51 = vrot.slane %v10632_v14, %v19372_v5  ;;  %v3447_v11 = vrot.slane %v3433_v33, %v19372_v5  ;;  %v3457_v4 = vrot.slane %v17638_v26, %v19372_v5 }
 0x12e   : > { %v18472_v61 = vpack.i.bf16 %v10681_v27, %v10664_v49  ;;  %v3448_v31 = vcombine.high %v3440_v24, %v3440_v24  ;;  %v3464_v29 = vrot.slane %v3450_v21, %v19372_v5  ;;  %v3392_v45 = vcombine.high %v20237_v16, %v20237_v16 }
 0x12f   : > { %v10630_v8 = vcombine.low %v10622_v34, %v10629_v58  ;;  %v10647_v15 = vcombine.low %v10639_v54, %v10646_v51  ;;  %v3449_v20 = vcombine.high %v3447_v11, %v3447_v11  ;;  %v3465_v28 = vcombine.high %v3457_v4, %v3457_v4  ;;  %v17660_v58 = vld.sshfl [vmem:[%s19377_s18 + $0x178] sm:$0x3 pattern:$0x76325410] }
 0x130   : > { %18473 = vrot.lane.b32.xlu1 %v18472_v61, %s19326_s21  ;;  %v10716_v30 = vcombine.low %v3448_v31, %v3447_v11  ;;  %v3466_v38 = vcombine.high %v3464_v29, %v3464_v29  ;;  %v3409_v43 = vcombine.high %v17635_v35, %v17635_v35  ;;  %v3406_v34 = vrot.slane %v3392_v45, %v19372_v5  ;;  %v17644_v45 = vld [vmem:[%s19377_s18 + $0x1b8] sm:$0xff] }
 0x131   : > { %v18467_v13 = vpack.i.bf16 %v10647_v15, %v10630_v8  ;;  %v10717_v39 = vcombine.low %v3449_v20, %v3457_v4  ;;  %v10733_v27 = vcombine.low %v3465_v28, %v3464_v29  ;;  %v3416_v51 = vrot.slane %v17635_v35, %v19372_v5  ;;  %v17643_v28 = vld [vmem:[%s19377_s18 + $0x1b0] sm:$0xff] }
 0x132   : > { %v10724_v49 = vrot.slane %v10716_v30, %v19372_v5  ;;  %v10734_v54 = vcombine.low %v3466_v38, %v17661_v18  ;;  %v3423_v61 = vrot.slane %v3409_v43, %v19372_v5  ;;  %v3408_v15 = vcombine.high %v3406_v34, %v3406_v34  ;;  %v17640_v43 = vld [vmem:[%s19377_s18 + $0x198] sm:$0xff] }
 0x133   : > { %18468 = vrot.lane.b32.xlu0 %v18467_v13, %s19326_s21  ;;  %v10731_v14 = vrot.slane %v10717_v39, %v19372_v5  ;;  %v10741_v8 = vrot.slane %v10733_v27, %v19372_v5  ;;  %v3424_v13 = vcombine.high %v3416_v51, %v3416_v51  ;;  %v10700_v11 = vcombine.low %v17660_v58, %v3440_v24 }
 0x134   : > { %v10748_v62 = vrot.slane %v10734_v54, %v19372_v5  ;;  %v3425_v26 = vcombine.high %v3423_v61, %v3423_v61  ;;  %v10682_v33 = vcombine.low %v3406_v34, %v3408_v15  ;;  %v3522_v27 = vrot.slane %v17643_v28, %v19372_v5 }
 0x135   : > { %v10732_v16 = vcombine.low %v10724_v49, %v10731_v14  ;;  %v10683_v21 = vcombine.low %v3416_v51, %v3424_v13  ;;  %v10714_v35 = vrot.slane %v10700_v11, %v19372_v5  ;;  %v3515_v49 = vcombine.high %v17643_v28, %v17643_v28  ;;  %v17662_v14 = vld.sshfl [vmem:[%s19377_s18 + $0x1a8] sm:$0x3 pattern:$0x76325410] }
 0x136   : > { %v10749_v31 = vcombine.low %v10741_v8, %v10748_v62  ;;  %v10699_v20 = vcombine.low %v3423_v61, %v3425_v26  ;;  %v10690_v4 = vrot.slane %v10682_v33, %v19372_v5  ;;  %v3532_v54 = vcombine.high %v17644_v45, %v17644_v45 }
 0x137   : > { %v10697_v30 = vrot.slane %v10683_v21, %v19372_v5  ;;  %v3529_v34 = vrot.slane %v3515_v49, %v19372_v5  ;;  %v3539_v58 = vrot.slane %v17644_v45, %v19372_v5  ;;  %v3474_v51 = vcombine.high %v17640_v43, %v17640_v43 }
 0x138   : > { %v18482_v29 = vpack.i.bf16 %v10749_v31, %v10732_v16  ;;  %v10707_v18 = vrot.slane %v10699_v20, %v19372_v5  ;;  %v3530_v61 = vcombine.high %v3522_v27, %v3522_v27  ;;  %v3546_v15 = vrot.slane %v3532_v54, %v19372_v5  ;;  %v17641_v16 = vld [vmem:[%s19377_s18 + $0x1a0] sm:$0xff] }
 0x139   : > { %v10698_v39 = vcombine.low %v10690_v4, %v10697_v30  ;;  %v3531_v8 = vcombine.high %v3529_v34, %v3529_v34  ;;  %v3547_v62 = vcombine.high %v3539_v58, %v3539_v58  ;;  %v10784_v13 = vcombine.low %v17662_v14, %v3522_v27 }
 0x13a   : > { %18483 = vrot.lane.b32.xlu1 %v18482_v29, %s19326_s21  ;;  %v10715_v24 = vcombine.low %v10707_v18, %v10714_v35  ;;  %v3481_v26 = vrot.slane %v17640_v43, %v19372_v5  ;;  %v10785_v33 = vcombine.low %v3530_v61, %v3529_v34  ;;  %v3488_v31 = vrot.slane %v3474_v51, %v19372_v5 }
 0x13b   : > { %v10801_v11 = vcombine.low %v3531_v8, %v3539_v58  ;;  %v10792_v21 = vrot.slane %v10784_v13, %v19372_v5  ;;  %v10802_v20 = vcombine.low %v3547_v62, %v3546_v15  ;;  %v3491_v35 = vcombine.high %v17641_v16, %v17641_v16  ;;  %v17664_v13 = vld [vmem:[%s19377_s18 + $0x19] sm:$0xff] }
 0x13c   : > { %v18477_v38 = vpack.i.bf16 %v10715_v24, %v10698_v39  ;;  %v3489_v4 = vcombine.high %v3481_v26, %v3481_v26  ;;  %v10799_v29 = vrot.slane %v10785_v33, %v19372_v5  ;;  %v3490_v18 = vcombine.high %v3488_v31, %v3488_v31  ;;  %v17665_v33 = vld [vmem:[%s19377_s18 + $0x21] sm:$0xff] }
 0x13d   : > { %v10809_v30 = vrot.slane %v10801_v11, %v19372_v5  ;;  %v3498_v28 = vrot.slane %v17641_v16, %v19372_v5  ;;  %v10816_v39 = vrot.slane %v10802_v20, %v19372_v5  ;;  %v3505_v24 = vrot.slane %v3491_v35, %v19372_v5  ;;  %v171_v35 = vld [vmem:[%s19377_s18] sm:$0xff] }
 0x13e   : > { %18478 = vrot.lane.b32.xlu0 %v18477_v38, %s19326_s21  ;;  %v10750_v45 = vcombine.low %v3481_v26, %v3489_v4  ;;  %v10800_v38 = vcombine.low %v10792_v21, %v10799_v29  ;;  %v10751_v43 = vcombine.low %v3488_v31, %v3490_v18  ;;  %v3664_v11 = vcombine.high %v17664_v13, %v17664_v13 }
 0x13f   : > { %v3506_v49 = vcombine.high %v3498_v28, %v3498_v28  ;;  %v10817_v14 = vcombine.low %v10809_v30, %v10816_v39  ;;  %v3507_v27 = vcombine.high %v3505_v24, %v3505_v24  ;;  %v3671_v21 = vrot.slane %v17664_v13, %v19372_v5 }
 0x140   : > { %v10758_v34 = vrot.slane %v10750_v45, %v19372_v5  ;;  %v10765_v54 = vrot.slane %v10751_v43, %v19372_v5  ;;  %v3678_v20 = vrot.slane %v3664_v11, %v19372_v5  ;;  %v3681_v4 = vcombine.high %v17665_v33, %v17665_v33  ;;  %v17663_v45 = vld.sshfl [vmem:[%s19377_s18 + $0x1c0] sm:$0x3 pattern:$0x76325410] }
 0x141   : > { %v10767_v58 = vcombine.low %v3498_v28, %v3506_v49  ;;  %v18492_v51 = vpack.i.bf16 %v10817_v14, %v10800_v38  ;;  %v10768_v61 = vcombine.low %v3505_v24, %v3507_v27  ;;  %v3679_v29 = vcombine.high %v3671_v21, %v3671_v21  ;;  %v172_v28 = vld [vmem:[%s19377_s18 + $0x8] sm:$0xff] }
 0x142   : > { %v10766_v16 = vcombine.low %v10758_v34, %v10765_v54  ;;  %v3680_v30 = vcombine.high %v3678_v20, %v3678_v20  ;;  %v3688_v18 = vrot.slane %v17665_v33, %v19372_v5  ;;  %v3695_v39 = vrot.slane %v3681_v4, %v19372_v5 }
 0x143   : > { %v10775_v8 = vrot.slane %v10767_v58, %v19372_v5  ;;  %18493 = vrot.lane.b32.xlu1 %v18492_v51, %s19326_s21  ;;  %v10782_v62 = vrot.slane %v10768_v61, %v19372_v5  ;;  %v10949_v24 = vcombine.low %v3671_v21, %v3679_v29  ;;  %v279_v38 = vcombine.high %v171_v35, %v171_v35  ;;  %v17668_v29 = vld [vmem:[%s19377_s18 + $0x39] sm:$0xff] }
 0x144   : > { %v3696_v49 = vcombine.high %v3688_v18, %v3688_v18  ;;  %v10950_v43 = vcombine.low %v3678_v20, %v3680_v30  ;;  %v3548_v14 = vcombine.high %v3546_v15, %v3546_v15  ;;  %v3697_v27 = vcombine.high %v3695_v39, %v3695_v39 }
 0x145   : > { %v10783_v26 = vcombine.low %v10775_v8, %v10782_v62  ;;  %v10957_v34 = vrot.slane %v10949_v24, %v19372_v5  ;;  %v296_v54 = vcombine.high %v172_v28, %v172_v28  ;;  %v286_v8 = vrot.slane %v171_v35, %v19372_v5  ;;  %v20357_v24 = vpop.permute.xlu0 %18198 }
 0x146   : > { %v10964_v58 = vrot.slane %v10950_v43, %v19372_v5  ;;  %v10966_v51 = vcombine.low %v3688_v18, %v3696_v49  ;;  %v10818_v61 = vcombine.low %v3548_v14, %v17663_v45  ;;  %v293_v62 = vrot.slane %v279_v38, %v19372_v5 }
 0x147   : > { %v18487_v31 = vpack.i.bf16 %v10783_v26, %v10766_v16  ;;  %v10967_v16 = vcombine.low %v3695_v39, %v3697_v27  ;;  %v303_v13 = vrot.slane %v172_v28, %v19372_v5  ;;  %v7855_v33 = vcombine.low %v20002_v0, %v19925_v36  ;;  %v17670_v28 = vld [vmem:[%s19377_s18 + $0x49] sm:$0xff]  ;;  %v20343_v39 = vpop.permute.xlu1 %18208 }
 0x148   : > { %v10974_v26 = vrot.slane %v10966_v51, %v19372_v5  ;;  %v10825_v15 = vrot.slane %v10818_v61, %v19372_v5  ;;  %v10965_v11 = vcombine.low %v10957_v34, %v10964_v58  ;;  %v7856_v21 = vcombine.low %v19920_v32, %v19934_v42  ;;  %v17719_v58 = vld.sshfl [vmem:[%s19377_s18 + $0x41] sm:$0x3 pattern:$0x76325410]  ;;  %v20367_v51 = vld [vmem:[%s19377_s18 + $0x51] sm:$0xff] }
 0x149   : > { %18488 = vrot.lane.b32.xlu0 %v18487_v31, %s19326_s21  ;;  %v10981_v31 = vrot.slane %v10967_v16, %v19372_v5  ;;  %v7872_v20 = vcombine.low %v19928_v37, %v19940_v46  ;;  %v7873_v4 = vcombine.low %v19945_v47, %v19960_v48  ;;  %v310_v35 = vrot.slane %v296_v54, %v19372_v5 }
 0x14a   : > { %v294_v30 = vcombine.high %v286_v8, %v286_v8  ;;  %v295_v36 = vcombine.high %v293_v62, %v293_v62  ;;  %v311_v0 = vcombine.high %v303_v13, %v303_v13  ;;  %v20346_v32 = vrot.slane %v7855_v33, %v19372_v5 }
 0x14b   : > { %v10982_v18 = vcombine.low %v10974_v26, %v10981_v31  ;;  %v3722_v37 = vcombine.high %v17668_v29, %v17668_v29  ;;  %v20349_v46 = vrot.slane %v7856_v21, %v19372_v5  ;;  %v20352_v47 = vrot.slane %v7872_v20, %v19372_v5 }
 0x14c   : > { %v20355_v48 = vrot.slane %v7873_v4, %v19372_v5  ;;  %v312_v45 = vcombine.high %v310_v35, %v310_v35  ;;  %v7787_v38 = vcombine.low %v286_v8, %v294_v30  ;;  %v3746_v43 = vcombine.high %v17670_v28, %v17670_v28 }
 0x14d   : > { %10906 = vrot.lane.b32.xlu0 %v10825_v15, %s19326_s21  ;;  %v18497_v42 = vpack.i.bf16 %v10982_v18, %v10965_v11  ;;  %v20361_v49 = vrot.slane %v3722_v37, %v19372_v5  ;;  %v18211_v14 = vunpack.i.h.bf16 %v20343_v39  ;;  %v18210_v27 = vunpack.i.l.bf16 %v20343_v39  ;;  %v17667_v15 = vld [vmem:[%s19377_s18 + $0x31] sm:$0xff] }
 0x14e   : > { %v7788_v34 = vcombine.low %v293_v62, %v295_v36  ;;  %v7804_v54 = vcombine.low %v303_v13, %v311_v0  ;;  %v18201_v61 = vunpack.i.h.bf16 %v20357_v24  ;;  %v18200_v8 = vunpack.i.l.bf16 %v20357_v24 }
 0x14f   : > { %18498 = vrot.lane.b32.xlu1 %v18497_v42, %s19327_s22  ;;  %v20373_v16 = vcombine.high %v20361_v49, %v20361_v49  ;;  %v3753_v26 = vrot.slane %v17670_v28, %v19372_v5  ;;  %v7871_v62 = vcombine.low %v20346_v32, %v20349_v46  ;;  %v7888_v13 = vcombine.low %v20352_v47, %v20355_v48  ;;  %v17718_v42 = vld.sshfl [vmem:[%s19377_s18 + $0x29] sm:$0x3 pattern:$0x76325410] }
 0x150   : > { %v7805_v33 = vcombine.low %v310_v35, %v312_v45  ;;  %v3760_v11 = vrot.slane %v3746_v43, %v19372_v5  ;;  %v7795_v31 = vrot.slane %v7787_v38, %v19372_v5  ;;  %v3770_v20 = vrot.slane %v20367_v51, %v19372_v5 }
 0x151   : > { %v3761_v21 = vcombine.high %v3753_v26, %v3753_v26  ;;  %v11017_v4 = vcombine.low %v20373_v16, %v17719_v58  ;;  %v7802_v30 = vrot.slane %v7788_v34, %v19372_v5  ;;  %v7812_v18 = vrot.slane %v7804_v54, %v19372_v5 }
 0x152   : > { %v3762_v36 = vcombine.high %v3760_v11, %v3760_v11  ;;  %v3705_v0 = vcombine.high %v17667_v15, %v17667_v15  ;;  %v3778_v28 = vcombine.high %v3770_v20, %v3770_v20  ;;  %v20391_v37 = vrot.slane %v17667_v15, %v19372_v5 }
 0x153   : > { %v11018_v32 = vcombine.low %v3753_v26, %v3761_v21  ;;  %v11025_v35 = vrot.slane %v11017_v4, %v19372_v5  ;;  %v7819_v46 = vrot.slane %v7805_v33, %v19372_v5  ;;  %v7889_v47 = vcombine.low %v19953_v52, %v20030_v40 }
 0x154   : > { %v11034_v48 = vcombine.low %v3760_v11, %v3762_v36  ;;  %v20397_v45 = vrot.slane %v3705_v0, %v19372_v5  ;;  %v11035_v43 = vcombine.low %v3770_v20, %v3778_v28  ;;  %v20402_v34 = vcombine.high %v20391_v37, %v20391_v37  ;;  %v17538_v36 = vld.sshfl [vmem:[%s19377_s18 + $0x10] sm:$0x3 pattern:$0x76325410] }
 0x155   : > { %v11032_v38 = vrot.slane %v11018_v32, %v19372_v5  ;;  %v20405_v54 = vrot.slane %v17668_v29, %v19372_v5  ;;  %v7890_v58 = vcombine.low %v20023_v41, %v20036_v19  ;;  %v10983_v26 = vcombine.low %v17718_v42, %v20391_v37  ;;  %v18214_v42 = vpop.permute.xlu1 %18213 }
 0x156   : > { %v11042_v52 = vrot.slane %v11034_v48, %v19372_v5  ;;  %v20412_v40 = vcombine.high %v20397_v45, %v20397_v45  ;;  %v11049_v33 = vrot.slane %v11035_v43, %v19372_v5  ;;  %v10984_v29 = vcombine.low %v20402_v34, %v20397_v45 }
 0x157   : > { %v11033_v15 = vcombine.low %v11025_v35, %v11032_v38  ;;  %v20418_v11 = vcombine.high %v20405_v54, %v20405_v54  ;;  %v7906_v41 = vcombine.low %v20050_v2, %v20040_v56  ;;  %v7907_v19 = vcombine.low %v20054_v10, %v20043_v50  ;;  %v184_v50 = vld [vmem:[%s19377_s18 + $0x68] sm:$0xff] }
 0x158   : > { %v10991_v21 = vrot.slane %v10983_v26, %v19372_v5  ;;  %v11000_v20 = vcombine.low %v20412_v40, %v20405_v54  ;;  %v7803_v4 = vcombine.low %v7795_v31, %v7802_v30  ;;  %v11050_v0 = vcombine.low %v11042_v52, %v11049_v33  ;;  %v17674_v33 = vld [vmem:[%s19377_s18 + $0x69] sm:$0xff] }
 0x159   : > { %v10998_v28 = vrot.slane %v10984_v29, %v19372_v5  ;;  %v11001_v32 = vcombine.low %v20418_v11, %v20361_v49  ;;  %v20434_v35 = vsel %vm15004_vm0, %v7871_v62, %v18210_v27  ;;  %v7820_v56 = vcombine.low %v7812_v18, %v7819_v46  ;;  %v18224_v24 = vpop.permute.xlu1 %18223 }
 0x15a   : > { %v7897_v2 = vrot.slane %v7889_v47, %v19372_v5  ;;  %v11008_v10 = vrot.slane %v11000_v20, %v19372_v5  ;;  %v7904_v48 = vrot.slane %v7890_v58, %v19372_v5  ;;  %v18507_v31 = vpack.i.bf16 %v11050_v0, %v11033_v15  ;;  %v20454_v47 = vpop.permute.xlu0 %18203 }
 0x15b   : > { %v10999_v30 = vcombine.low %v10991_v21, %v10998_v28  ;;  %v11015_v38 = vrot.slane %v11001_v32, %v19372_v5  ;;  %v7914_v43 = vrot.slane %v7906_v41, %v19372_v5  ;;  %v7921_v52 = vrot.slane %v7907_v19, %v19372_v5  ;;  %v183_v19 = vld [vmem:[%s19377_s18 + $0x60] sm:$0xff] }
 0x15c   : > { %v7821_v27 = vcombine.low %v17538_v36, %v19956_v53  ;;  %v7822_v62 = vcombine.low %v19972_v55, %v19968_v59  ;;  %v20449_v18 = vsel %vm15004_vm0, %v7888_v13, %v18211_v14  ;;  %v20452_v46 = vsel %vm15004_vm0, %v7803_v4, %v18200_v8  ;;  %18508 = vrot.lane.b32.xlu1 %v18507_v31, %s19327_s22  ;;  %v17676_v36 = vld [vmem:[%s19377_s18 + $0x79] sm:$0xff]  ;;  %v17721_v31 = vld.sshfl [vmem:[%s19377_s18 + $0x71] sm:$0x3 pattern:$0x76325410] }
 0x15d   : > { %v460_v58 = vcombine.high %v184_v50, %v184_v50  ;;  %v11016_v26 = vcombine.low %v11008_v10, %v11015_v38  ;;  %v20460_v53 = vsel %vm15004_vm0, %v7820_v56, %v18201_v61  ;;  %v18216_v59 = vunpack.i.h.bf16 %v18214_v42  ;;  %v17673_v38 = vld [vmem:[%s19377_s18 + $0x61] sm:$0xff] }
 0x15e   : > { %v18215_v55 = vunpack.i.l.bf16 %v18214_v42  ;;  %v467_v39 = vrot.slane %v184_v50, %v19372_v5  ;;  %v7905_v14 = vcombine.low %v7897_v2, %v7904_v48  ;;  %v7838_v8 = vcombine.low %v19984_v6, %v19979_v3 }
 0x15f   : > { %v7839_v13 = vcombine.low %v19994_v12, %v19987_v7  ;;  %v18502_v15 = vpack.i.bf16 %v11016_v26, %v10999_v30  ;;  %v7922_v29 = vcombine.low %v7914_v43, %v7921_v52  ;;  %v20470_v61 = vrot.slane %v7821_v27, %v19372_v5  ;;  %v19266_v7 = vld [vmem:[%s19377_s18 + $0x50] sm:$0xff] }
 0x160   : > { %v20473_v41 = vrot.slane %v7822_v62, %v19372_v5  ;;  %v18205_v21 = vunpack.i.l.bf16 %v20454_v47  ;;  %v474_v3 = vrot.slane %v460_v58, %v19372_v5  ;;  %v7974_v6 = vcombine.low %v20093_v1, %v20096_v63 }
 0x161   : > { %v419_v12 = vcombine.high %v19266_v7, %v19266_v7  ;;  %18503 = vrot.lane.b32.xlu0 %v18502_v15, %s19327_s22  ;;  %v475_v20 = vcombine.high %v467_v39, %v467_v39  ;;  %v7975_v4 = vcombine.low %v20104_v17, %v20099_v60  ;;  %v3804_v0 = vcombine.high %v17674_v33, %v17674_v33 }
 0x162   : > { %v3811_v28 = vrot.slane %v17674_v33, %v19372_v5  ;;  %v20487_v32 = vsel %vm15004_vm0, %v7905_v14, %v18215_v55  ;;  %v20490_v56 = vrot.slane %v7838_v8, %v19372_v5  ;;  %v20493_v1 = vrot.slane %v7839_v13, %v19372_v5 }
 0x163   : > { %25111 = vst [vmem:[#allocation5_spill] sm:$0xff] %v20487_v32  ;;  %v443_v63 = vcombine.high %v183_v19, %v183_v19  ;;  %v20496_v2 = vsel %vm15004_vm0, %v7922_v29, %v18216_v59  ;;  %v7837_v60 = vcombine.low %v20470_v61, %v20473_v41  ;;  %v3818_v17 = vrot.slane %v3804_v0, %v19372_v5  ;;  %v17679_v41 = vld [vmem:[%s19377_s18 + $0x91] sm:$0xff] }
 0x164   : > { %25112 = vst [vmem:[#allocation6_spill] sm:$0xff] %v20496_v2  ;;  %v3819_v50 = vcombine.high %v3811_v28, %v3811_v28  ;;  %v476_v10 = vcombine.high %v474_v3, %v474_v3  ;;  %v20502_v42 = vrot.slane %v7974_v6, %v19372_v5  ;;  %v433_v48 = vrot.slane %v419_v12, %v19372_v5 }
 0x165   : > { %v3828_v30 = vcombine.high %v17676_v36, %v17676_v36  ;;  %v20507_v43 = vcombine.low %v467_v39, %v475_v20  ;;  %v20510_v52 = vrot.slane %v7975_v4, %v19372_v5  ;;  %v3820_v27 = vcombine.high %v3818_v17, %v3818_v17 }
 0x166   : > { %v3835_v62 = vrot.slane %v17676_v36, %v19372_v5  ;;  %v450_v58 = vrot.slane %v183_v19, %v19372_v5  ;;  %v457_v26 = vrot.slane %v443_v63, %v19372_v5  ;;  %v11085_v55 = vcombine.low %v3819_v50, %v3818_v17  ;;  %v17720_v19 = vld.sshfl [vmem:[%s19377_s18 + $0x59] sm:$0x3 pattern:$0x76325410] }
 0x167   : > { %v3842_v59 = vrot.slane %v3828_v30, %v19372_v5  ;;  %v11086_v8 = vcombine.low %v3820_v27, %v17721_v31  ;;  %v3763_v39 = vcombine.high %v20367_v51, %v20367_v51  ;;  %v3787_v13 = vcombine.high %v17673_v38, %v17673_v38  ;;  %v17541_v36 = vld.sshfl [vmem:[%s19377_s18 + $0x58] sm:$0x3 pattern:$0x76325410] }
 0x168   : > { %v3843_v14 = vcombine.high %v3835_v62, %v3835_v62  ;;  %v435_v15 = vcombine.high %v433_v48, %v433_v48  ;;  %v11093_v29 = vrot.slane %v11085_v55, %v19372_v5  ;;  %v3794_v20 = vrot.slane %v17673_v38, %v19372_v5 }
 0x169   : > { %v3844_v33 = vcombine.high %v3842_v59, %v3842_v59  ;;  %v11100_v6 = vrot.slane %v11086_v8, %v19372_v5  ;;  %v3777_v12 = vrot.slane %v3763_v39, %v19372_v5  ;;  %v7958_v4 = vcombine.low %v474_v3, %v476_v10  ;;  %v199_v39 = vld [vmem:[%s19377_s18 + $0xe0] sm:$0xff] }
 0x16a   : > { %v11102_v7 = vcombine.low %v3835_v62, %v3843_v14  ;;  %v458_v0 = vcombine.high %v450_v58, %v450_v58  ;;  %v3801_v51 = vrot.slane %v3787_v13, %v19372_v5  ;;  %v459_v17 = vcombine.high %v457_v26, %v457_v26 }
 0x16b   : > { %v11103_v63 = vcombine.low %v3842_v59, %v3844_v33  ;;  %v3779_v31 = vcombine.high %v3777_v12, %v3777_v12  ;;  %v3802_v30 = vcombine.high %v3794_v20, %v3794_v20  ;;  %v11101_v27 = vcombine.low %v11093_v29, %v11100_v6 }
 0x16c   : > { %v11110_v50 = vrot.slane %v11102_v7, %v19372_v5  ;;  %v3803_v55 = vcombine.high %v3801_v51, %v3801_v51  ;;  %v11052_v14 = vcombine.low %v17720_v19, %v3794_v20  ;;  %v7923_v8 = vcombine.low %v20058_v57, %v433_v48 }
 0x16d   : > { %v11117_v62 = vrot.slane %v11103_v63, %v19372_v5  ;;  %v7924_v38 = vcombine.low %v435_v15, %v17541_v36  ;;  %v11051_v3 = vcombine.low %v3777_v12, %v3779_v31  ;;  %v11068_v10 = vcombine.low %v3802_v30, %v3801_v51  ;;  %v198_v36 = vld [vmem:[%s19377_s18 + $0xd8] sm:$0xff]  ;;  %v20549_v51 = vpop.permute.xlu0 %18218 }
 0x16e   : > { %v7965_v59 = vrot.slane %v20507_v43, %v19372_v5  ;;  %v11066_v33 = vrot.slane %v11052_v14, %v19372_v5  ;;  %v11069_v7 = vcombine.low %v3803_v55, %v3811_v28  ;;  %v7972_v29 = vrot.slane %v7958_v4, %v19372_v5  ;;  %v20566_v14 = vpop.permute.xlu1 %18233 }
 0x16f   : > { %v11118_v13 = vcombine.low %v11110_v50, %v11117_v62  ;;  %v7940_v6 = vcombine.low %v450_v58, %v458_v0  ;;  %v11059_v19 = vrot.slane %v11051_v3, %v19372_v5  ;;  %v11076_v57 = vrot.slane %v11068_v10, %v19372_v5 }
 0x170   : > { %v7941_v48 = vcombine.low %v457_v26, %v459_v17  ;;  %v11083_v12 = vrot.slane %v11069_v7, %v19372_v5  ;;  %v665_v20 = vcombine.high %v199_v39, %v199_v39  ;;  %v7854_v43 = vcombine.low %v20490_v56, %v20493_v1  ;;  %v20552_v17 = vld [vmem:[%s19377_s18 + $0x90] sm:$0xff] }
 0x171   : > { %v18517_v15 = vpack.i.bf16 %v11118_v13, %v11101_v27  ;;  %v7931_v28 = vrot.slane %v7923_v8, %v19372_v5  ;;  %v7938_v4 = vrot.slane %v7924_v38, %v19372_v5  ;;  %v11067_v58 = vcombine.low %v11059_v19, %v11066_v33  ;;  %v17680_v27 = vld [vmem:[%s19377_s18 + $0x99] sm:$0xff]  ;;  %v20587_v33 = vld [vmem:[%s19377_s18 + $0xa8] sm:$0xff] }
 0x172   : > { %v20547_v26 = vsel %vm15004_vm0, %v7837_v60, %v18205_v21  ;;  %v18226_v0 = vunpack.i.h.bf16 %v18224_v24  ;;  %v18225_v63 = vunpack.i.l.bf16 %v18224_v24  ;;  %v11084_v56 = vcombine.low %v11076_v57, %v11083_v12  ;;  %v20596_v57 = vld [vmem:[%s19377_s18 + $0xa9] sm:$0xff] }
 0x173   : > { %18518 = vrot.lane.b32.xlu1 %v18517_v15, %s19327_s22  ;;  %v7973_v1 = vcombine.low %v7965_v59, %v7972_v29  ;;  %v7990_v50 = vcombine.low %v20502_v42, %v20510_v52  ;;  %v7948_v31 = vrot.slane %v7940_v6, %v19372_v5  ;;  %v648_v61 = vcombine.high %v198_v36, %v198_v36 }
 0x174   : > { %v7955_v21 = vrot.slane %v7941_v48, %v19372_v5  ;;  %v18512_v60 = vpack.i.bf16 %v11084_v56, %v11067_v58  ;;  %v20561_v24 = vrot.slane %v665_v20, %v19372_v5  ;;  %v672_v30 = vrot.slane %v199_v39, %v19372_v5 }
 0x175   : > { %v18220_v62 = vunpack.i.l.bf16 %v20549_v51  ;;  %v7939_v55 = vcombine.low %v7931_v28, %v7938_v4  ;;  %v525_v42 = vcombine.high %v20552_v17, %v20552_v17  ;;  %v20571_v52 = vrot.slane %v648_v61, %v19372_v5  ;;  %v187_v4 = vld [vmem:[%s19377_s18 + $0x80] sm:$0xff] }
 0x176   : > { %v25114_v8 = vunpack.i.h.bf16 %v20454_v47  ;;  %v18221_v3 = vunpack.i.h.bf16 %v20549_v51  ;;  %18513 = vrot.lane.b32.xlu0 %v18512_v60, %s19327_s22  ;;  %v680_v10 = vcombine.high %v672_v30, %v672_v30  ;;  %v3869_v39 = vcombine.high %v17679_v41, %v17679_v41 }
 0x177   : > { %25113 = vst [vmem:[#allocation7_spill] sm:$0xff] %v20571_v52  ;;  %v20581_v59 = vsel %vm15004_vm0, %v7973_v1, %v18225_v63  ;;  %v20584_v13 = vsel %vm15004_vm0, %v7990_v50, %v18226_v0  ;;  %v664_v47 = vcombine.high %v20571_v52, %v20571_v52  ;;  %v3886_v7 = vcombine.high %v17680_v27, %v17680_v27  ;;  %v17723_v50 = vld.sshfl [vmem:[%s19377_s18 + $0xa1] sm:$0x3 pattern:$0x76325410]  ;;  %v20725_v52 = vpop.permute.xlu0 %18228 }
 0x178   : > { %v20576_v38 = vsel %vm15004_vm0, %v7854_v43, %v25114_v8  ;;  %25115 = vst [vmem:[#allocation8_spill] sm:$0xff] %v20581_v59  ;;  %25116 = vst [vmem:[#allocation9_spill] sm:$0xff] %v20584_v13  ;;  %v20591_v29 = vcombine.low %v7948_v31, %v7955_v21  ;;  %v8145_v19 = vcombine.low %v680_v10, %v20561_v24  ;;  %v17677_v43 = vld [vmem:[%s19377_s18 + $0x81] sm:$0xff]  ;;  %v20727_v13 = vpop.permute.xlu1 %18243 }
 0x179   : > { %v3883_v48 = vrot.slane %v3869_v39, %v19372_v5  ;;  %v20600_v15 = vsel %vm15004_vm0, %v7939_v55, %v18220_v62  ;;  %v539_v12 = vrot.slane %v525_v42, %v19372_v5  ;;  %v8144_v20 = vcombine.low %v664_v47, %v672_v30  ;;  %v17722_v10 = vld.sshfl [vmem:[%s19377_s18 + $0x89] sm:$0x3 pattern:$0x76325410]  ;;  %25120 = vst [vmem:[#allocation13_spill] sm:$0xff] %v20727_v13 }
 0x17a   : > { %25117 = vst [vmem:[#allocation10_spill] sm:$0xff] %v20600_v15  ;;  %v3893_v36 = vrot.slane %v17680_v27, %v19372_v5  ;;  %v20607_v28 = vrot.slane %v20587_v33, %v19372_v5  ;;  %v8159_v58 = vrot.slane %v8145_v19, %v19372_v5  ;;  %v3900_v63 = vrot.slane %v3886_v7, %v19372_v5 }
 0x17b   : > { %v3885_v0 = vcombine.high %v3883_v48, %v3883_v48  ;;  %v8042_v56 = vcombine.low %v20145_v22, %v20156_v44  ;;  %v8152_v1 = vrot.slane %v8144_v20, %v19372_v5  ;;  %v3917_v61 = vrot.slane %v20596_v57, %v19372_v5 }
 0x17c   : > { %v3901_v31 = vcombine.high %v3893_v36, %v3893_v36  ;;  %v3902_v21 = vcombine.high %v3900_v63, %v3900_v63  ;;  %v3845_v30 = vcombine.high %v17677_v43, %v17677_v43  ;;  %v3852_v27 = vrot.slane %v17677_v43, %v19372_v5 }
 0x17d   : > { %v11153_v60 = vcombine.low %v3885_v0, %v3893_v36  ;;  %v501_v62 = vcombine.high %v187_v4, %v187_v4  ;;  %v20619_v55 = vcombine.low %v8152_v1, %v8159_v58  ;;  %v3925_v42 = vcombine.high %v3917_v61, %v3917_v61  ;;  %v193_v1 = vld [vmem:[%s19377_s18 + $0xb0] sm:$0xff] }
 0x17e   : > { %v11154_v8 = vcombine.low %v3901_v31, %v3900_v63  ;;  %v11170_v44 = vcombine.low %v3902_v21, %v17723_v50  ;;  %v3859_v39 = vrot.slane %v3845_v30, %v19372_v5  ;;  %v3860_v47 = vcombine.high %v3852_v27, %v3852_v27 }
 0x17f   : > { %25118 = vst [vmem:[#allocation11_spill] sm:$0xff] %v20619_v55  ;;  %v11161_v22 = vrot.slane %v11153_v60, %v19372_v5  ;;  %v508_v7 = vrot.slane %v187_v4, %v19372_v5  ;;  %v11171_v20 = vcombine.low %v3917_v61, %v3925_v42  ;;  %v3876_v36 = vrot.slane %v17679_v41, %v19372_v5 }
 0x180   : > { %v11168_v19 = vrot.slane %v11154_v8, %v19372_v5  ;;  %v532_v43 = vrot.slane %v20552_v17, %v19372_v5  ;;  %v11178_v58 = vrot.slane %v11170_v44, %v19372_v5  ;;  %v3861_v0 = vcombine.high %v3859_v39, %v3859_v39  ;;  %v19267_v44 = vld.sshfl [vmem:[%s19377_s18 + $0xa0] sm:$0x3 pattern:$0x76325410] }
 0x181   : > { %v11119_v63 = vcombine.low %v3852_v27, %v3860_v47  ;;  %v11185_v31 = vrot.slane %v11171_v20, %v19372_v5  ;;  %v3884_v21 = vcombine.high %v3876_v36, %v3876_v36  ;;  %v11136_v60 = vcombine.low %v17722_v10, %v3876_v36 }
 0x182   : > { %v11169_v50 = vcombine.low %v11161_v22, %v11168_v19  ;;  %v541_v4 = vcombine.high %v539_v12, %v539_v12  ;;  %v515_v30 = vrot.slane %v501_v62, %v19372_v5  ;;  %v11120_v61 = vcombine.low %v3859_v39, %v3861_v0 }
 0x183   : > { %v11127_v41 = vrot.slane %v11119_v63, %v19372_v5  ;;  %v566_v17 = vcombine.high %v20587_v33, %v20587_v33  ;;  %v11186_v42 = vcombine.low %v11178_v58, %v11185_v31  ;;  %v11137_v8 = vcombine.low %v3884_v21, %v3883_v48  ;;  %v17543_v63 = vld.sshfl [vmem:[%s19377_s18 + $0x88] sm:$0x3 pattern:$0x76325410] }
 0x184   : > { %v11144_v27 = vrot.slane %v11136_v60, %v19372_v5  ;;  %v8043_v22 = vcombine.low %v19267_v44, %v20607_v28  ;;  %v583_v47 = vcombine.high %v193_v1, %v193_v1  ;;  %v11134_v10 = vrot.slane %v11120_v61, %v19372_v5  ;;  %v201_v60 = vld [vmem:[%s19377_s18 + $0xf0] sm:$0xff] }
 0x185   : > { %v516_v19 = vcombine.high %v508_v7, %v508_v7  ;;  %v540_v62 = vcombine.high %v532_v43, %v532_v43  ;;  %v18527_v39 = vpack.i.bf16 %v11186_v42, %v11169_v50  ;;  %v11151_v20 = vrot.slane %v11137_v8, %v19372_v5 }
 0x186   : > { %v8026_v48 = vcombine.low %v20137_v9, %v20149_v25  ;;  %v517_v36 = vcombine.high %v515_v30, %v515_v30  ;;  %v11135_v58 = vcombine.low %v11127_v41, %v11134_v10  ;;  %v20644_v0 = vcombine.low %v539_v12, %v541_v4  ;;  %v17685_v12 = vld [vmem:[%s19377_s18 + $0xc1] sm:$0xff] }
 0x187   : > { %v580_v31 = vrot.slane %v566_v17, %v19372_v5  ;;  %v590_v21 = vrot.slane %v193_v1, %v19372_v5  ;;  %18528 = vrot.lane.b32.xlu1 %v18527_v39, %s19327_s22  ;;  %v11152_v50 = vcombine.low %v11144_v27, %v11151_v20  ;;  %v20652_v61 = vrot.slane %v8042_v56, %v19372_v5  ;;  %v17547_v10 = vld.sshfl [vmem:[%s19377_s18 + $0xe8] sm:$0x3 pattern:$0x76325410] }
 0x188   : > { %v20655_v42 = vrot.slane %v8043_v22, %v19372_v5  ;;  %v7991_v9 = vcombine.low %v20112_v23, %v508_v7  ;;  %v597_v25 = vrot.slane %v583_v47, %v19372_v5  ;;  %v20664_v1 = vsel %vm15004_vm0, %v20591_v29, %v18221_v3  ;;  %v17686_v22 = vld [vmem:[%s19377_s18 + $0xc9] sm:$0xff] }
 0x189   : > { %25119 = vst [vmem:[#allocation12_spill] sm:$0xff] %v20664_v1  ;;  %v20666_v4 = vcombine.low %v516_v19, %v515_v30  ;;  %v20668_v41 = vcombine.low %v532_v43, %v540_v62  ;;  %v18522_v56 = vpack.i.bf16 %v11152_v50, %v11135_v58  ;;  %v20671_v17 = vrot.slane %v8026_v48, %v19372_v5  ;;  %v17545_v19 = vld.sshfl [vmem:[%s19377_s18 + $0xb8] sm:$0x3 pattern:$0x76325410] }
 0x18a   : > { %v20673_v23 = vcombine.low %v517_v36, %v17543_v63  ;;  %v581_v51 = vcombine.high %v20607_v28, %v20607_v28  ;;  %v689_v7 = vcombine.high %v201_v60, %v201_v60  ;;  %v582_v29 = vcombine.high %v580_v31, %v580_v31  ;;  %v20693_v62 = vld [vmem:[%s19377_s18 + $0xf8] sm:$0xff] }
 0x18b   : > { %v598_v30 = vcombine.high %v590_v21, %v590_v21  ;;  %18523 = vrot.lane.b32.xlu0 %v18522_v56, %s19327_s22  ;;  %v3951_v43 = vcombine.high %v17685_v12, %v17685_v12  ;;  %v20683_v27 = vrot.slane %v7991_v9, %v19372_v5  ;;  %v599_v44 = vcombine.high %v597_v25, %v597_v25  ;;  %v17683_v50 = vld [vmem:[%s19377_s18 + $0xb1] sm:$0xff]  ;;  %v17724_v48 = vld.sshfl [vmem:[%s19377_s18 + $0xb9] sm:$0x3 pattern:$0x76325410] }
 0x18c   : > { %v3958_v28 = vrot.slane %v17685_v12, %v19372_v5  ;;  %v696_v39 = vrot.slane %v201_v60, %v19372_v5  ;;  %v20699_v36 = vcombine.low %v581_v51, %v580_v31  ;;  %v703_v58 = vrot.slane %v689_v7, %v19372_v5  ;;  %v17725_v7 = vld.sshfl [vmem:[%s19377_s18 + $0xd1] sm:$0x3 pattern:$0x76325410] }
 0x18d   : > { %v3965_v20 = vrot.slane %v3951_v43, %v19372_v5  ;;  %v20703_v9 = vcombine.low %v582_v29, %v590_v21  ;;  %v20705_v12 = vcombine.low %v598_v30, %v597_v25  ;;  %v3968_v60 = vcombine.high %v17686_v22, %v17686_v22 }
 0x18e   : > { %v3966_v63 = vcombine.high %v3958_v28, %v3958_v28  ;;  %v20707_v33 = vcombine.low %v599_v44, %v17545_v19  ;;  %v713_v43 = vrot.slane %v20693_v62, %v19372_v5  ;;  %v3975_v31 = vrot.slane %v17686_v22, %v19372_v5 }
 0x18f   : > { %v3967_v56 = vcombine.high %v3965_v20, %v3965_v20  ;;  %v704_v8 = vcombine.high %v696_v39, %v696_v39  ;;  %v3982_v6 = vrot.slane %v3968_v60, %v19372_v5  ;;  %v3910_v21 = vcombine.high %v20596_v57, %v20596_v57 }
 0x190   : > { %v11221_v51 = vcombine.low %v3966_v63, %v3965_v20  ;;  %v3927_v25 = vcombine.high %v17683_v50, %v17683_v50  ;;  %v681_v29 = vcombine.high %v20561_v24, %v20561_v24  ;;  %v705_v30 = vcombine.high %v703_v58, %v703_v58 }
 0x191   : > { %v3983_v44 = vcombine.high %v3975_v31, %v3975_v31  ;;  %v11222_v19 = vcombine.low %v3967_v56, %v3975_v31  ;;  %v3984_v47 = vcombine.high %v3982_v6, %v3982_v6  ;;  %v3924_v20 = vrot.slane %v3910_v21, %v19372_v5 }
 0x192   : > { %v11229_v22 = vrot.slane %v11221_v51, %v19372_v5  ;;  %v3934_v63 = vrot.slane %v17683_v50, %v19372_v5  ;;  %v721_v60 = vcombine.high %v713_v43, %v713_v43  ;;  %v3941_v55 = vrot.slane %v3927_v25, %v19372_v5 }
 0x193   : > { %v11236_v3 = vrot.slane %v11222_v19, %v19372_v5  ;;  %v11238_v57 = vcombine.low %v3983_v44, %v3982_v6  ;;  %v11239_v24 = vcombine.low %v3984_v47, %v17725_v7  ;;  %v3926_v59 = vcombine.high %v3924_v20, %v3924_v20  ;;  %v18254_v7 = vpop.permute.xlu1 %18253 }
 0x194   : > { %v3942_v56 = vcombine.high %v3934_v63, %v3934_v63  ;;  %v11205_v31 = vcombine.low %v17724_v48, %v3958_v28  ;;  %v8161_v32 = vcombine.low %v681_v29, %v17547_v10  ;;  %v8162_v51 = vcombine.low %v696_v39, %v704_v8 }
 0x195   : > { %v11246_v21 = vrot.slane %v11238_v57, %v19372_v5  ;;  %v3943_v2 = vcombine.high %v3941_v55, %v3941_v55  ;;  %v11237_v50 = vcombine.low %v11229_v22, %v11236_v3  ;;  %v11253_v1 = vrot.slane %v11239_v24, %v19372_v5  ;;  %v205_v24 = vld [vmem:[%s19377_s18 + $0x110] sm:$0xff] }
 0x196   : > { %v11187_v19 = vcombine.low %v3924_v20, %v3926_v59  ;;  %v11188_v6 = vcombine.low %v3934_v63, %v3942_v56  ;;  %v8178_v44 = vcombine.low %v703_v58, %v705_v30  ;;  %v8179_v25 = vcombine.low %v713_v43, %v721_v60 }
 0x197   : > { %v11204_v15 = vcombine.low %v3941_v55, %v3943_v2  ;;  %v11219_v47 = vrot.slane %v11205_v31, %v19372_v5  ;;  %v8067_v28 = vrot.slane %v20699_v36, %v19372_v5  ;;  %v11254_v48 = vcombine.low %v11246_v21, %v11253_v1  ;;  %v18239_v55 = vpop.permute.xlu0 %18238 }
 0x198   : > { %v11195_v10 = vrot.slane %v11187_v19, %v19372_v5  ;;  %v11202_v8 = vrot.slane %v11188_v6, %v19372_v5  ;;  %v8074_v3 = vrot.slane %v20703_v9, %v19372_v5  ;;  %v8084_v59 = vrot.slane %v20705_v12, %v19372_v5 }
 0x199   : > { %v8091_v39 = vrot.slane %v20707_v33, %v19372_v5  ;;  %v11212_v2 = vrot.slane %v11204_v15, %v19372_v5  ;;  %v8169_v1 = vrot.slane %v8161_v32, %v19372_v5  ;;  %v8176_v36 = vrot.slane %v8162_v51, %v19372_v5 }
 0x19a   : > { %v18537_v58 = vpack.i.bf16 %v11254_v48, %v11237_v50  ;;  %v11203_v43 = vcombine.low %v11195_v10, %v11202_v8  ;;  %v18231_v9 = vunpack.i.h.bf16 %v20725_v52  ;;  %v8186_v12 = vrot.slane %v8178_v44, %v19372_v5 }
 0x19b   : > { %v8193_v33 = vrot.slane %v8179_v25, %v19372_v5  ;;  %v11220_v29 = vcombine.low %v11212_v2, %v11219_v47  ;;  %v25121_v15 = vrot.slane %v20644_v0, %v19372_v5  ;;  %v18230_v32 = vunpack.i.l.bf16 %v20725_v52  ;;  %v17736_v0 = vld [vmem:[%s19377_s18 + $0x1a] sm:$0xff] }
 0x19c   : > { %v25122_v22 = vrot.slane %v20666_v4, %v19372_v5  ;;  %v25123_v63 = vrot.slane %v20668_v41, %v19372_v5  ;;  %v25124_v60 = vrot.slane %v20673_v23, %v19372_v5  ;;  %18538 = vrot.lane.b32.xlu1 %v18537_v58, %s19327_s22  ;;  %v25126_v52 = vcombine.low %v20652_v61, %v20655_v42  ;;  %v20778_v23 = vld [vmem:[%s19377_s18 + $0xc8] sm:$0xff]  ;;  %v207_v25 = vld [vmem:[%s19377_s18 + $0x120] sm:$0xff] }
 0x19d   : > { %v8041_v30 = vcombine.low %v25121_v15, %v20671_v17  ;;  %v25125_v17 = vunpack.i.h.bf16 %v20566_v14  ;;  %v18240_v41 = vunpack.i.l.bf16 %v18239_v55  ;;  %v8075_v56 = vcombine.low %v8067_v28, %v8074_v3  ;;  %25129 = vst [vmem:[#allocation16_spill] sm:$0xff] %v20778_v23  ;;  %v211_v3 = vld [vmem:[%s19377_s18 + $0x140] sm:$0xff] }
 0x19e   : > { %v8007_v20 = vcombine.low %v20683_v27, %v25122_v22  ;;  %v8024_v57 = vcombine.low %v25124_v60, %v25123_v63  ;;  %v20775_v27 = vld [vmem:[%s19377_s18 + $0xc0] sm:$0xff]  ;;  %v18532_v31 = vpack.i.bf16 %v11220_v29, %v11203_v43  ;;  %v18241_v51 = vunpack.i.h.bf16 %v18239_v55 }
 0x19f   : > { %v20772_v4 = vsel %vm15004_vm0, %v25126_v52, %v25125_v17  ;;  %25128 = vst [vmem:[#allocation15_spill] sm:$0xff] %v20775_v27  ;;  %v8092_v21 = vcombine.low %v8084_v59, %v8091_v39  ;;  %v18255_v50 = vunpack.i.l.bf16 %v18254_v7  ;;  %v8177_v19 = vcombine.low %v8169_v1, %v8176_v36  ;;  %v20800_v39 = vpop.permute.xlu1 %18263 }
 0x1a0   : > { %25127 = vst [vmem:[#allocation14_spill] sm:$0xff] %v20772_v4  ;;  %v18256_v6 = vunpack.i.h.bf16 %v18254_v7  ;;  %v8194_v44 = vcombine.low %v8186_v12, %v8193_v33  ;;  %v747_v47 = vcombine.high %v205_v24, %v205_v24  ;;  %18533 = vrot.lane.b32.xlu0 %v18532_v31, %s19327_s22  ;;  %v4510_v61 = vcombine.high %v17736_v0, %v17736_v0 }
 0x1a1   : > { %v25130_v42 = vunpack.i.l.bf16 %v20566_v14  ;;  %v20788_v48 = vsel %vm15004_vm0, %v8007_v20, %v18230_v32  ;;  %v20791_v10 = vsel %vm15004_vm0, %v8024_v57, %v18231_v9  ;;  %v20798_v59 = vsel %vm15004_vm0, %v8075_v56, %v18240_v41  ;;  %v17737_v14 = vld [vmem:[%s19377_s18 + $0x22] sm:$0xff]  ;;  %v17688_v9 = vld [vmem:[%s19377_s18 + $0xd9] sm:$0xff] }
 0x1a2   : > { %v4517_v2 = vrot.slane %v17736_v0, %v19372_v5  ;;  %v4524_v55 = vrot.slane %v4510_v61, %v19372_v5  ;;  %v20806_v1 = vsel %vm15004_vm0, %v8092_v21, %v18241_v51  ;;  %v20809_v36 = vsel %vm15004_vm0, %v8177_v19, %v18255_v50  ;;  %v17689_v41 = vld [vmem:[%s19377_s18 + $0xe1] sm:$0xff]  ;;  %v20835_v61 = vld [vmem:[%s19377_s18 + $0x138] sm:$0xff] }
 0x1a3   : > { %v20785_v28 = vsel %vm15004_vm0, %v8041_v30, %v25130_v42  ;;  %25132 = vst [vmem:[#allocation18_spill] sm:$0xff] %v20809_v36  ;;  %v20812_v58 = vrot.slane %v205_v24, %v19372_v5  ;;  %v771_v43 = vcombine.high %v207_v25, %v207_v25  ;;  %v20816_v7 = vsel %vm15004_vm0, %v8194_v44, %v18256_v6  ;;  %v204_v50 = vld [vmem:[%s19377_s18 + $0x108] sm:$0xff] }
 0x1a4   : > { %25131 = vst [vmem:[#allocation17_spill] sm:$0xff] %v20785_v28  ;;  %25133 = vst [vmem:[#allocation19_spill] sm:$0xff] %v20816_v7  ;;  %v761_v12 = vrot.slane %v747_v47, %v19372_v5  ;;  %v4525_v33 = vcombine.high %v4517_v2, %v4517_v2  ;;  %v4526_v29 = vcombine.high %v4524_v55, %v4524_v55 }
 0x1a5   : > { %v778_v30 = vrot.slane %v207_v25, %v19372_v5  ;;  %v4527_v32 = vcombine.high %v17737_v14, %v17737_v14  ;;  %v4534_v22 = vrot.slane %v17737_v14, %v19372_v5  ;;  %v3992_v60 = vcombine.high %v17688_v9, %v17688_v9 }
 0x1a6   : > { %v11760_v20 = vcombine.low %v4517_v2, %v4525_v33  ;;  %v11761_v63 = vcombine.low %v4524_v55, %v4526_v29  ;;  %v3999_v57 = vrot.slane %v17688_v9, %v19372_v5  ;;  %v762_v24 = vcombine.high %v20812_v58, %v20812_v58  ;;  %v17549_v33 = vld.sshfl [vmem:[%s19377_s18 + $0x118] sm:$0x3 pattern:$0x76325410] }
 0x1a7   : > { %v785_v0 = vrot.slane %v771_v43, %v19372_v5  ;;  %v4541_v17 = vrot.slane %v4527_v32, %v19372_v5  ;;  %v4542_v52 = vcombine.high %v4534_v22, %v4534_v22  ;;  %v763_v56 = vcombine.high %v761_v12, %v761_v12 }
 0x1a8   : > { %v706_v31 = vcombine.high %v20693_v62, %v20693_v62  ;;  %v4006_v51 = vrot.slane %v3992_v60, %v19372_v5  ;;  %v4007_v21 = vcombine.high %v3999_v57, %v3999_v57  ;;  %v11768_v6 = vrot.slane %v11760_v20, %v19372_v5 }
 0x1a9   : > { %v4543_v19 = vcombine.high %v4541_v17, %v4541_v17  ;;  %v11775_v44 = vrot.slane %v11761_v63, %v19372_v5  ;;  %v11777_v25 = vcombine.low %v4534_v22, %v4542_v52  ;;  %v786_v47 = vcombine.high %v778_v30, %v778_v30 }
 0x1aa   : > { %v4008_v42 = vcombine.high %v4006_v51, %v4006_v51  ;;  %v4009_v14 = vcombine.high %v17689_v41, %v17689_v41  ;;  %v4016_v2 = vrot.slane %v17689_v41, %v19372_v5  ;;  %v787_v62 = vcombine.high %v785_v0, %v785_v0 }
 0x1ab   : > { %v11778_v55 = vcombine.low %v4541_v17, %v4543_v19  ;;  %v11785_v43 = vrot.slane %v11777_v25, %v19372_v5  ;;  %v11255_v9 = vcombine.low %v3999_v57, %v4007_v21  ;;  %v730_v29 = vcombine.high %v204_v50, %v204_v50 }
 0x1ac   : > { %v4023_v32 = vrot.slane %v4009_v14, %v19372_v5  ;;  %v4024_v20 = vcombine.high %v4016_v2, %v4016_v2  ;;  %v11256_v22 = vcombine.low %v4006_v51, %v4008_v42  ;;  %v720_v63 = vrot.slane %v706_v31, %v19372_v5 }
 0x1ad   : > { %v812_v60 = vcombine.high %v20835_v61, %v20835_v61  ;;  %v11776_v52 = vcombine.low %v11768_v6, %v11775_v44  ;;  %v11792_v41 = vrot.slane %v11778_v55, %v19372_v5  ;;  %v11263_v57 = vrot.slane %v11255_v9, %v19372_v5  ;;  %v17548_v6 = vld.sshfl [vmem:[%s19377_s18 + $0x100] sm:$0x3 pattern:$0x76325410] }
 0x1ae   : > { %v4025_v17 = vcombine.high %v4023_v32, %v4023_v32  ;;  %v11270_v21 = vrot.slane %v11256_v22, %v19372_v5  ;;  %v11272_v19 = vcombine.low %v4016_v2, %v4024_v20  ;;  %v20848_v25 = vcombine.low %v762_v24, %v761_v12  ;;  %v208_v12 = vld [vmem:[%s19377_s18 + $0x128] sm:$0xff] }
 0x1af   : > { %v20850_v14 = vcombine.low %v763_v56, %v17549_v33  ;;  %v737_v31 = vrot.slane %v204_v50, %v19372_v5  ;;  %v11793_v51 = vcombine.low %v11785_v43, %v11792_v41  ;;  %v20853_v42 = vcombine.low %v778_v30, %v786_v47 }
 0x1b0   : > { %v744_v44 = vrot.slane %v730_v29, %v19372_v5  ;;  %v11273_v55 = vcombine.low %v4023_v32, %v4025_v17  ;;  %v11280_v8 = vrot.slane %v11272_v19, %v19372_v5  ;;  %v20858_v9 = vcombine.low %v785_v0, %v787_v62  ;;  %v20870_v62 = vld [vmem:[%s19377_s18 + $0x150] sm:$0xff] }
 0x1b1   : > { %v722_v22 = vcombine.high %v720_v63, %v720_v63  ;;  %v829_v2 = vcombine.high %v211_v3, %v211_v3  ;;  %v18547_v24 = vpack.i.bf16 %v11793_v51, %v11776_v52  ;;  %v20862_v56 = vrot.slane %v812_v60, %v19372_v5 }
 0x1b2   : > { %v836_v50 = vrot.slane %v211_v3, %v19372_v5  ;;  %v11271_v30 = vcombine.low %v11263_v57, %v11270_v21  ;;  %v11287_v47 = vrot.slane %v11273_v55, %v19372_v5  ;;  %v745_v29 = vcombine.high %v737_v31, %v737_v31 }
 0x1b3   : > { %v8196_v0 = vcombine.low %v17548_v6, %v737_v31  ;;  %18548 = vrot.lane.b32.xlu1 %v18547_v24, %s19328_s23  ;;  %v746_v20 = vcombine.high %v744_v44, %v744_v44  ;;  %v788_v3 = vcombine.high %v208_v12, %v208_v12  ;;  %v20879_v17 = vcombine.low %v720_v63, %v722_v22 }
 0x1b4   : > { %v11288_v60 = vcombine.low %v11280_v8, %v11287_v47  ;;  %v843_v57 = vrot.slane %v829_v2, %v19372_v5  ;;  %v828_v21 = vcombine.high %v20862_v56, %v20862_v56  ;;  %v844_v19 = vcombine.high %v836_v50, %v836_v50 }
 0x1b5   : > { %v860_v31 = vrot.slane %v20870_v62, %v19372_v5  ;;  %v20887_v51 = vrot.slane %v8196_v0, %v19372_v5  ;;  %v20889_v6 = vcombine.low %v745_v29, %v744_v44  ;;  %v795_v55 = vrot.slane %v208_v12, %v19372_v5  ;;  %v20910_v29 = vpop.permute.xlu0 %18248  ;;  %v17550_v12 = vld.sshfl [vmem:[%s19377_s18 + $0x130] sm:$0x3 pattern:$0x76325410] }
 0x1b6   : > { %v18542_v8 = vpack.i.bf16 %v11288_v60, %v11271_v30  ;;  %v13382_v63 = vcombine.low %v20391_v37, %v20402_v34  ;;  %v20895_v22 = vcombine.low %v746_v20, %v20812_v58  ;;  %v802_v2 = vrot.slane %v788_v3, %v19372_v5  ;;  %v17808_v30 = vld [vmem:[%s19377_s18 + $0x30] sm:$0xff]  ;;  %v17809_v58 = vld [vmem:[%s19377_s18 + $0x38] sm:$0xff]  ;;  %25134 = vst [vmem:[#allocation20_spill] sm:$0xff] %v20910_v29 }
 0x1b7   : > { %v819_v24 = vrot.slane %v20835_v61, %v19372_v5  ;;  %v13383_v44 = vcombine.low %v20397_v45, %v20412_v40  ;;  %v845_v47 = vcombine.high %v843_v57, %v843_v57  ;;  %v13399_v34 = vcombine.low %v20405_v54, %v20418_v11  ;;  %v17551_v40 = vld.sshfl [vmem:[%s19377_s18 + $0x148] sm:$0x3 pattern:$0x76325410] }
 0x1b8   : > { %18543 = vrot.lane.b32.xlu0 %v18542_v8, %s19327_s22  ;;  %v13390_v37 = vrot.slane %v13382_v63, %v19372_v5  ;;  %v868_v61 = vcombine.high %v860_v31, %v860_v31  ;;  %v20912_v0 = vcombine.low %v828_v21, %v836_v50  ;;  %v20914_v20 = vcombine.low %v844_v19, %v843_v57 }
 0x1b9   : > { %v13397_v45 = vrot.slane %v13383_v44, %v19372_v5  ;;  %v803_v3 = vcombine.high %v795_v55, %v795_v55  ;;  %v13400_v60 = vcombine.low %v20361_v49, %v20373_v16  ;;  %v13407_v8 = vrot.slane %v13399_v34, %v19372_v5  ;;  %v18259_v29 = vpop.permute.xlu0 %18258 }
 0x1ba   : > { %v5357_v63 = vcombine.high %v17808_v30, %v17808_v30  ;;  %v804_v54 = vcombine.high %v802_v2, %v802_v2  ;;  %v827_v11 = vcombine.high %v819_v24, %v819_v24  ;;  %v5364_v15 = vrot.slane %v17808_v30, %v19372_v5 }
 0x1bb   : > { %v5374_v43 = vcombine.high %v17809_v58, %v17809_v58  ;;  %v13398_v50 = vcombine.low %v13390_v37, %v13397_v45  ;;  %v13414_v57 = vrot.slane %v13400_v60, %v19372_v5  ;;  %v5381_v19 = vrot.slane %v17809_v58, %v19372_v5 }
 0x1bc   : > { %v5371_v21 = vrot.slane %v5357_v63, %v19372_v5  ;;  %v8314_v44 = vcombine.low %v845_v47, %v17551_v40  ;;  %v8315_v52 = vcombine.low %v860_v31, %v868_v61  ;;  %v5372_v41 = vcombine.high %v5364_v15, %v5364_v15 }
 0x1bd   : > { %v5388_v49 = vrot.slane %v5374_v43, %v19372_v5  ;;  %v8263_v16 = vcombine.low %v795_v55, %v803_v3  ;;  %v13415_v34 = vcombine.low %v13407_v8, %v13414_v57  ;;  %v5389_v32 = vcombine.high %v5381_v19, %v5381_v19  ;;  %v18269_v3 = vpop.permute.xlu0 %18268 }
 0x1be   : > { %v5373_v33 = vcombine.high %v5371_v21, %v5371_v21  ;;  %v8264_v30 = vcombine.low %v802_v2, %v804_v54  ;;  %v8280_v13 = vcombine.low %v17550_v12, %v819_v24  ;;  %v12571_v37 = vcombine.low %v5364_v15, %v5372_v41 }
 0x1bf   : > { %v5390_v23 = vcombine.high %v5388_v49, %v5388_v49  ;;  %v8281_v45 = vcombine.low %v827_v11, %v20862_v56  ;;  %v18557_v60 = vpack.i.bf16 %v13415_v34, %v13398_v50  ;;  %v12588_v27 = vcombine.low %v5381_v19, %v5389_v32  ;;  %v18274_v32 = vpop.permute.xlu1 %18273  ;;  %v17739_v19 = vld [vmem:[%s19377_s18 + $0x32] sm:$0xff] }
 0x1c0   : > { %v12572_v63 = vcombine.low %v5371_v21, %v5373_v33  ;;  %v8220_v31 = vrot.slane %v20889_v6, %v19372_v5  ;;  %v8227_v43 = vrot.slane %v20895_v22, %v19372_v5  ;;  %v12579_v55 = vrot.slane %v12571_v37, %v19372_v5  ;;  %v216_v21 = vld [vmem:[%s19377_s18 + $0x168] sm:$0xff]  ;;  %v217_v37 = vld [vmem:[%s19377_s18 + $0x170] sm:$0xff] }
 0x1c1   : > { %v12589_v47 = vcombine.low %v5388_v49, %v5390_v23  ;;  %v8305_v2 = vrot.slane %v20912_v0, %v19372_v5  ;;  %v8312_v15 = vrot.slane %v20914_v20, %v19372_v5  ;;  %18558 = vrot.lane.b32.xlu1 %v18557_v60, %s19329_s24  ;;  %v12596_v33 = vrot.slane %v12588_v27, %v19372_v5 }
 0x1c2   : > { %v12586_v56 = vrot.slane %v12572_v63, %v19372_v5  ;;  %v8322_v41 = vrot.slane %v8314_v44, %v19372_v5  ;;  %v8329_v6 = vrot.slane %v8315_v52, %v19372_v5  ;;  %v20943_v23 = vrot.slane %v8263_v16, %v19372_v5 }
 0x1c3   : > { %v12603_v22 = vrot.slane %v12589_v47, %v19372_v5  ;;  %v8278_v24 = vrot.slane %v8264_v30, %v19372_v5  ;;  %v8288_v12 = vrot.slane %v8280_v13, %v19372_v5  ;;  %v8295_v58 = vrot.slane %v8281_v45, %v19372_v5 }
 0x1c4   : > { %v12587_v61 = vcombine.low %v12579_v55, %v12586_v56  ;;  %v25135_v27 = vrot.slane %v20850_v14, %v19372_v5  ;;  %v25136_v52 = vrot.slane %v20848_v25, %v19372_v5  ;;  %v18261_v20 = vunpack.i.h.bf16 %v18259_v29 }
 0x1c5   : > { %v18260_v40 = vunpack.i.l.bf16 %v18259_v29  ;;  %v12604_v8 = vcombine.low %v12596_v33, %v12603_v22  ;;  %v25137_v54 = vrot.slane %v20858_v9, %v19372_v5  ;;  %v25138_v13 = vrot.slane %v20853_v42, %v19372_v5 }
 0x1c6   : > { %v8245_v0 = vcombine.low %v25136_v52, %v25135_v27  ;;  %v25139_v14 = vrot.slane %v20879_v17, %v19372_v5  ;;  %v8228_v57 = vcombine.low %v8220_v31, %v8227_v43  ;;  %v18276_v25 = vunpack.i.h.bf16 %v18274_v32 }
 0x1c7   : > { %v8262_v11 = vcombine.low %v25138_v13, %v25137_v54  ;;  %v18275_v29 = vunpack.i.l.bf16 %v18274_v32  ;;  %v8313_v44 = vcombine.low %v8305_v2, %v8312_v15  ;;  %v8330_v49 = vcombine.low %v8322_v41, %v8329_v6  ;;  %v17740_v15 = vld [vmem:[%s19377_s18 + $0x3a] sm:$0xff] }
 0x1c8   : > { %v8211_v50 = vcombine.low %v25139_v14, %v20887_v51  ;;  %v18552_v16 = vpack.i.bf16 %v12604_v8, %v12587_v61  ;;  %v18271_v34 = vunpack.i.h.bf16 %v18269_v3  ;;  %v18270_v9 = vunpack.i.l.bf16 %v18269_v3  ;;  %v20974_v51 = vpop.permute.xlu1 %18283 }
 0x1c9   : > { %v8279_v30 = vcombine.low %v20943_v23, %v8278_v24  ;;  %v8296_v42 = vcombine.low %v8288_v12, %v8295_v58  ;;  %v25140_v45 = vunpack.i.l.bf16 %v20800_v39  ;;  %v894_v60 = vcombine.high %v216_v21, %v216_v21 }
 0x1ca   : > { %v20977_v63 = vrot.slane %v216_v21, %v19372_v5  ;;  %18553 = vrot.lane.b32.xlu0 %v18552_v16, %s19330_s25  ;;  %v4551_v31 = vcombine.high %v17739_v19, %v17739_v19  ;;  %v25142_v43 = vunpack.i.h.bf16 %v20800_v39  ;;  %v20986_v47 = vsel %vm15004_vm0, %v8211_v50, %v18260_v40  ;;  %v17790_v39 = vld.sshfl [vmem:[%s19377_s18 + $0x2a] sm:$0x3 pattern:$0x76325410] }
 0x1cb   : > { %v20972_v17 = vsel %vm15004_vm0, %v8245_v0, %v25140_v45  ;;  %25144 = vst [vmem:[#allocation23_spill] sm:$0xff] %v20986_v47  ;;  %v20989_v2 = vsel %vm15004_vm0, %v8228_v57, %v18261_v20  ;;  %v4558_v56 = vrot.slane %v17739_v19, %v19372_v5  ;;  %v20994_v33 = vsel %vm15004_vm0, %v8313_v44, %v18275_v29  ;;  %v21022_v29 = vpop.permute.xlu0 %18278 }
 0x1cc   : > { %25141 = vst [vmem:[#allocation21_spill] sm:$0xff] %v20972_v17  ;;  %v20983_v55 = vsel %vm15004_vm0, %v8262_v11, %v25142_v43  ;;  %25145 = vst [vmem:[#allocation24_spill] sm:$0xff] %v20989_v2  ;;  %v20997_v32 = vsel %vm15004_vm0, %v8330_v49, %v18276_v25  ;;  %v911_v41 = vcombine.high %v217_v37, %v217_v37  ;;  %v17883_v43 = vld [vmem:[%s19377_s18 + $0x49] sm:$0xff] }
 0x1cd   : > { %25143 = vst [vmem:[#allocation22_spill] sm:$0xff] %v20983_v55  ;;  %25146 = vst [vmem:[#allocation25_spill] sm:$0xff] %v20994_v33  ;;  %v4565_v6 = vrot.slane %v4551_v31, %v19372_v5  ;;  %v21002_v22 = vsel %vm15004_vm0, %v8279_v30, %v18270_v9  ;;  %v21005_v24 = vsel %vm15004_vm0, %v8296_v42, %v18271_v34  ;;  %v17764_v55 = vld [vmem:[%s19377_s18 + $0xfa] sm:$0xff] }
 0x1ce   : > { %25147 = vst [vmem:[#allocation26_spill] sm:$0xff] %v20997_v32  ;;  %25148 = vst [vmem:[#allocation27_spill] sm:$0xff] %v21002_v22  ;;  %v4566_v58 = vcombine.high %v4558_v56, %v4558_v56  ;;  %v908_v61 = vrot.slane %v894_v60, %v19372_v5  ;;  %v909_v27 = vcombine.high %v20977_v63, %v20977_v63  ;;  %v17838_v32 = vld [vmem:[%s19377_s18 + $0x120] sm:$0xff] }
 0x1cf   : > { %25149 = vst [vmem:[#allocation28_spill] sm:$0xff] %v21005_v24  ;;  %v4567_v52 = vcombine.high %v4565_v6, %v4565_v6  ;;  %v4568_v0 = vcombine.high %v17740_v15, %v17740_v15  ;;  %v21012_v20 = vrot.slane %v217_v37, %v19372_v5  ;;  %v4575_v40 = vrot.slane %v17740_v15, %v19372_v5 }
 0x1d0   : > { %v11794_v3 = vcombine.low %v17790_v39, %v4558_v56  ;;  %v11795_v8 = vcombine.low %v4566_v58, %v4565_v6  ;;  %v21016_v54 = vrot.slane %v911_v41, %v19372_v5  ;;  %v14193_v11 = vcombine.low %v4558_v56, %v4566_v58  ;;  %v21040_v41 = vld [vmem:[%s19377_s18 + $0x158] sm:$0xff] }
 0x1d1   : > { %v4582_v13 = vrot.slane %v4568_v0, %v19372_v5  ;;  %v14194_v14 = vcombine.low %v4565_v6, %v4567_v52  ;;  %v4583_v57 = vcombine.high %v4575_v40, %v4575_v40  ;;  %v910_v19 = vcombine.high %v908_v61, %v908_v61  ;;  %v17884_v58 = vld [vmem:[%s19377_s18 + $0x51] sm:$0xff] }
 0x1d2   : > { %v11802_v25 = vrot.slane %v11794_v3, %v19372_v5  ;;  %v11809_v21 = vrot.slane %v11795_v8, %v19372_v5  ;;  %v11811_v44 = vcombine.low %v4567_v52, %v4575_v40  ;;  %v14201_v16 = vrot.slane %v14193_v11, %v19372_v5  ;;  %v17934_v8 = vld.sshfl [vmem:[%s19377_s18 + $0x41] sm:$0x3 pattern:$0x76325410] }
 0x1d3   : > { %v21024_v49 = vcombine.high %v4582_v13, %v4582_v13  ;;  %v926_v34 = vcombine.high %v21012_v20, %v21012_v20  ;;  %v21029_v9 = vcombine.low %v909_v27, %v908_v61  ;;  %v11812_v30 = vcombine.low %v4583_v57, %v4582_v13 }
 0x1d4   : > { %v14208_v42 = vrot.slane %v14194_v14, %v19372_v5  ;;  %v927_v37 = vcombine.high %v21016_v54, %v21016_v54  ;;  %v11819_v45 = vrot.slane %v11811_v44, %v19372_v5  ;;  %v14210_v60 = vcombine.low %v4575_v40, %v4583_v57 }
 0x1d5   : > { %v14211_v31 = vcombine.low %v4582_v13, %v21024_v49  ;;  %v11810_v39 = vcombine.low %v11802_v25, %v11809_v21  ;;  %v11826_v6 = vrot.slane %v11812_v30, %v19372_v5  ;;  %v21045_v61 = vcombine.low %v910_v19, %v21012_v20  ;;  %v17811_v19 = vld [vmem:[%s19377_s18 + $0x48] sm:$0xff] }
 0x1d6   : > { %v14209_v27 = vcombine.low %v14201_v16, %v14208_v42  ;;  %v14218_v52 = vrot.slane %v14210_v60, %v19372_v5  ;;  %v6244_v13 = vcombine.high %v17883_v43, %v17883_v43  ;;  %v6251_v11 = vrot.slane %v17883_v43, %v19372_v5 }
 0x1d7   : > { %v14225_v0 = vrot.slane %v14211_v31, %v19372_v5  ;;  %v11827_v3 = vcombine.low %v11819_v45, %v11826_v6  ;;  %v853_v14 = vcombine.high %v20870_v62, %v20870_v62  ;;  %v870_v57 = vcombine.high %v21040_v41, %v21040_v41  ;;  %v17812_v45 = vld [vmem:[%s19377_s18 + $0x50] sm:$0xff] }
 0x1d8   : > { %v6261_v21 = vcombine.high %v17884_v58, %v17884_v58  ;;  %v6258_v16 = vrot.slane %v6244_v13, %v19372_v5  ;;  %v6259_v30 = vcombine.high %v6251_v11, %v6251_v11  ;;  %v6268_v42 = vrot.slane %v17884_v58, %v19372_v5 }
 0x1d9   : > { %v14226_v25 = vcombine.low %v14218_v52, %v14225_v0  ;;  %v18567_v44 = vpack.i.bf16 %v11827_v3, %v11810_v39  ;;  %v877_v60 = vrot.slane %v21040_v41, %v19372_v5  ;;  %v13416_v43 = vcombine.low %v17934_v8, %v6251_v11  ;;  %v17862_v0 = vld.sshfl [vmem:[%s19377_s18 + $0x40] sm:$0x3 pattern:$0x76325410] }
 0x1da   : > { %v21064_v62 = vrot.slane %v6261_v21, %v19372_v5  ;;  %v6260_v6 = vcombine.high %v6258_v16, %v6258_v16  ;;  %v6276_v52 = vcombine.high %v6268_v42, %v6268_v42  ;;  %v13417_v39 = vcombine.low %v6259_v30, %v6258_v16 }
 0x1db   : > { %v18562_v31 = vpack.i.bf16 %v14226_v25, %v14209_v27  ;;  %18568 = vrot.lane.b32.xlu1 %v18567_v44, %s19328_s23  ;;  %v5398_v3 = vcombine.high %v17811_v19, %v17811_v19  ;;  %v21069_v58 = vrot.slane %v853_v14, %v19372_v5  ;;  %v13424_v41 = vrot.slane %v13416_v43, %v19372_v5  ;;  %v17553_v44 = vld.sshfl [vmem:[%s19377_s18 + $0x178] sm:$0x3 pattern:$0x76325410] }
 0x1dc   : > { %v5405_v27 = vrot.slane %v17811_v19, %v19372_v5  ;;  %v5415_v8 = vcombine.high %v17812_v45, %v17812_v45  ;;  %v13431_v13 = vrot.slane %v13417_v39, %v19372_v5  ;;  %v13433_v11 = vcombine.low %v6260_v6, %v6268_v42  ;;  %v21083_v43 = vld.sshfl [vmem:[%s19377_s18 + $0x160] sm:$0x3 pattern:$0x76325410] }
 0x1dd   : > { %18563 = vrot.lane.b32.xlu0 %v18562_v31, %s19331_s26  ;;  %v13434_v25 = vcombine.low %v6276_v52, %v21064_v62  ;;  %v5412_v21 = vrot.slane %v5398_v3, %v19372_v5  ;;  %v5422_v14 = vrot.slane %v17812_v45, %v19372_v5  ;;  %v885_v52 = vcombine.high %v877_v60, %v877_v60 }
 0x1de   : > { %v5413_v16 = vcombine.high %v5405_v27, %v5405_v27  ;;  %v21080_v30 = vrot.slane %v5415_v8, %v19372_v5  ;;  %v12605_v31 = vcombine.low %v17862_v0, %v5405_v27  ;;  %v13432_v19 = vcombine.low %v13424_v41, %v13431_v13  ;;  %v17692_v13 = vld [vmem:[%s19377_s18 + $0xf9] sm:$0xff] }
 0x1df   : > { %v13441_v15 = vrot.slane %v13433_v11, %v19372_v5  ;;  %v13448_v42 = vrot.slane %v13434_v25, %v19372_v5  ;;  %v5414_v6 = vcombine.high %v5412_v21, %v5412_v21  ;;  %v5430_v39 = vcombine.high %v5422_v14, %v5422_v14 }
 0x1e0   : > { %v12606_v3 = vcombine.low %v5413_v16, %v5412_v21  ;;  %v12613_v45 = vrot.slane %v12605_v31, %v19372_v5  ;;  %v21092_v0 = vcombine.low %v926_v34, %v21016_v54  ;;  %v21097_v41 = vcombine.low %v927_v37, %v17553_v44  ;;  %v17694_v34 = vld [vmem:[%s19377_s18 + $0x109] sm:$0xff]  ;;  %v21108_v16 = vld [vmem:[%s19377_s18 + $0x111] sm:$0xff] }
 0x1e1   : > { %v13449_v27 = vcombine.low %v13441_v15, %v13448_v42  ;;  %v12622_v8 = vcombine.low %v5414_v6, %v5422_v14  ;;  %v12623_v20 = vcombine.low %v5430_v39, %v21080_v30  ;;  %v17955_v54 = vld [vmem:[%s19377_s18 + $0x4a] sm:$0xff]  ;;  %v869_v37 = vcombine.high %v21069_v58, %v21069_v58  ;;  %v17956_v31 = vld [vmem:[%s19377_s18 + $0x52] sm:$0xff] }
 0x1e2   : > { %v12620_v21 = vrot.slane %v12606_v3, %v19372_v5  ;;  %v21114_v15 = vrot.slane %v870_v57, %v19372_v5  ;;  %v21118_v42 = vcombine.low %v877_v60, %v885_v52  ;;  %v4050_v3 = vcombine.high %v17692_v13, %v17692_v13 }
 0x1e3   : > { %v18577_v44 = vpack.i.bf16 %v13449_v27, %v13432_v19  ;;  %v12630_v14 = vrot.slane %v12622_v8, %v19372_v5  ;;  %v12637_v39 = vrot.slane %v12623_v20, %v19372_v5  ;;  %v4074_v56 = vcombine.high %v17694_v34, %v17694_v34  ;;  %v17727_v27 = vld.sshfl [vmem:[%s19377_s18 + $0x101] sm:$0x3 pattern:$0x76325410] }
 0x1e4   : > { %v12621_v6 = vcombine.low %v12613_v45, %v12620_v21  ;;  %v4081_v12 = vrot.slane %v17694_v34, %v19372_v5  ;;  %v4098_v57 = vrot.slane %v21108_v16, %v19372_v5  ;;  %v7090_v50 = vcombine.high %v17955_v54, %v17955_v54  ;;  %v21134_v20 = vld.sshfl [vmem:[%s19377_s18 + $0x42] sm:$0x3 pattern:$0x76325410] }
 0x1e5   : > { %18578 = vrot.lane.b32.xlu1 %v18577_v44, %s19329_s24  ;;  %v12638_v19 = vcombine.low %v12630_v14, %v12637_v39  ;;  %v21127_v8 = vrot.slane %v4050_v3, %v19372_v5  ;;  %v21130_v60 = vrot.slane %v17955_v54, %v19372_v5  ;;  %v7107_v52 = vcombine.high %v17956_v31, %v17956_v31 }
 0x1e6   : > { %v4088_v45 = vrot.slane %v4074_v56, %v19372_v5  ;;  %v4089_v13 = vcombine.high %v4081_v12, %v4081_v12  ;;  %v4106_v21 = vcombine.high %v4098_v57, %v4098_v57  ;;  %v21137_v34 = vrot.slane %v7090_v50, %v19372_v5 }
 0x1e7   : > { %25150 = vst [vmem:[#allocation29_spill] sm:$0xff] %v21127_v8  ;;  %v18572_v44 = vpack.i.bf16 %v12638_v19, %v12621_v6  ;;  %v4066_v14 = vcombine.high %v21127_v8, %v21127_v8  ;;  %v21143_v39 = vcombine.high %v21130_v60, %v21130_v60  ;;  %v21146_v54 = vrot.slane %v17956_v31, %v19372_v5 }
 0x1e8   : > { %v4090_v3 = vcombine.high %v4088_v45, %v4088_v45  ;;  %v11324_v56 = vcombine.low %v4081_v12, %v4089_v13  ;;  %v11341_v25 = vcombine.low %v4098_v57, %v4106_v21  ;;  %v21150_v40 = vcombine.high %v21137_v34, %v21137_v34 }
 0x1e9   : > { %18573 = vrot.lane.b32.xlu0 %v18572_v44, %s19330_s25  ;;  %v11323_v50 = vcombine.low %v4066_v14, %v17727_v27  ;;  %v21154_v6 = vrot.slane %v7107_v52, %v19372_v5  ;;  %v21158_v19 = vcombine.high %v21146_v54, %v21146_v54  ;;  %v14227_v31 = vcombine.low %v21134_v20, %v21130_v60 }
 0x1ea   : > { %v11338_v12 = vrot.slane %v11324_v56, %v19372_v5  ;;  %v11340_v57 = vcombine.low %v4088_v45, %v4090_v3  ;;  %v11355_v13 = vrot.slane %v11341_v25, %v19372_v5  ;;  %v14228_v27 = vcombine.low %v21143_v39, %v21137_v34 }
 0x1eb   : > { %v11331_v52 = vrot.slane %v11323_v50, %v19372_v5  ;;  %v14235_v21 = vrot.slane %v14227_v31, %v19372_v5  ;;  %v14244_v44 = vcombine.low %v21150_v40, %v21146_v54  ;;  %v14245_v14 = vcombine.low %v21158_v19, %v21154_v6  ;;  %v17836_v50 = vld [vmem:[%s19377_s18 + $0x110] sm:$0xff] }
 0x1ec   : > { %v8390_v45 = vrot.slane %v21092_v0, %v19372_v5  ;;  %v8397_v25 = vrot.slane %v21097_v41, %v19372_v5  ;;  %v11348_v3 = vrot.slane %v11340_v57, %v19372_v5  ;;  %v14242_v56 = vrot.slane %v14228_v27, %v19372_v5 }
 0x1ed   : > { %v886_v31 = vcombine.high %v21114_v15, %v21114_v15  ;;  %v11339_v11 = vcombine.low %v11331_v52, %v11338_v12  ;;  %v14252_v8 = vrot.slane %v14244_v44, %v19372_v5  ;;  %v14259_v33 = vrot.slane %v14245_v14, %v19372_v5  ;;  %v17766_v44 = vld [vmem:[%s19377_s18 + $0x10a] sm:$0xff] }
 0x1ee   : > { %v25151_v0 = vrot.slane %v21045_v61, %v19372_v5  ;;  %v25152_v41 = vrot.slane %v21029_v9, %v19372_v5  ;;  %v25153_v27 = vcombine.low %v21083_v43, %v20977_v63  ;;  %v11356_v12 = vcombine.low %v11348_v3, %v11355_v13 }
 0x1ef   : > { %v14243_v52 = vcombine.low %v14235_v21, %v14242_v56  ;;  %v8331_v14 = vcombine.low %v21069_v58, %v869_v37  ;;  %v8346_v24 = vrot.slane %v21118_v42, %v19372_v5  ;;  %v14260_v22 = vcombine.low %v14252_v8, %v14259_v33  ;;  %v17871_v37 = vld.sshfl [vmem:[%s19377_s18 + $0x118] sm:$0x3 pattern:$0x76325410] }
 0x1f0   : > { %v8381_v57 = vcombine.low %v25152_v41, %v25151_v0  ;;  %v8363_v17 = vrot.slane %v25153_v27, %v19372_v5  ;;  %v5743_v61 = vcombine.high %v17836_v50, %v17836_v50  ;;  %v18587_v36 = vpack.i.bf16 %v11356_v12, %v11339_v11  ;;  %v21201_v0 = vld [vmem:[%s19377_s18 + $0x112] sm:$0xff] }
 0x1f1   : > { %v5767_v7 = vcombine.high %v17838_v32, %v17838_v32  ;;  %v5774_v9 = vrot.slane %v17838_v32, %v19372_v5  ;;  %v4896_v63 = vcombine.high %v17764_v55, %v17764_v55  ;;  %v8348_v43 = vcombine.low %v21114_v15, %v886_v31  ;;  %v17799_v15 = vld.sshfl [vmem:[%s19377_s18 + $0x102] sm:$0x3 pattern:$0x76325410] }
 0x1f2   : > { %v18582_v13 = vpack.i.bf16 %v14260_v22, %v14243_v52  ;;  %v21205_v21 = vrot.slane %v5743_v61, %v19372_v5  ;;  %v4920_v58 = vcombine.high %v17766_v44, %v17766_v44  ;;  %18588 = vrot.lane.b32.xlu1 %v18587_v36, %s19327_s22  ;;  %v4927_v32 = vrot.slane %v17766_v44, %v19372_v5 }
 0x1f3   : > { %v5781_v33 = vrot.slane %v5767_v7, %v19372_v5  ;;  %v5782_v11 = vcombine.high %v5774_v9, %v5774_v9  ;;  %v21211_v42 = vrot.slane %v4896_v63, %v19372_v5  ;;  %v8339_v55 = vrot.slane %v8331_v14, %v19372_v5 }
 0x1f4   : > { %25154 = vst [vmem:[#allocation30_spill] sm:$0xff] %v21205_v21  ;;  %18583 = vrot.lane.b32.xlu0 %v18582_v13, %s19331_s26  ;;  %v5759_v22 = vcombine.high %v21205_v21, %v21205_v21  ;;  %v4934_v8 = vrot.slane %v4920_v58, %v19372_v5  ;;  %v4944_v36 = vrot.slane %v21201_v0, %v19372_v5 }
 0x1f5   : > { %25155 = vst [vmem:[#allocation31_spill] sm:$0xff] %v21211_v42  ;;  %v5783_v7 = vcombine.high %v5781_v33, %v5781_v33  ;;  %v12946_v3 = vcombine.low %v5774_v9, %v5782_v11  ;;  %v4912_v56 = vcombine.high %v21211_v42, %v21211_v42  ;;  %v4935_v50 = vcombine.high %v4927_v32, %v4927_v32 }
 0x1f6   : > { %v8356_v31 = vrot.slane %v8348_v43, %v19372_v5  ;;  %v12945_v41 = vcombine.low %v5759_v22, %v17871_v37  ;;  %v4936_v27 = vcombine.high %v4934_v8, %v4934_v8  ;;  %v4952_v12 = vcombine.high %v4944_v36, %v4944_v36  ;;  %v219_v43 = vld [vmem:[%s19377_s18 + $0x180] sm:$0xff] }
 0x1f7   : > { %v12960_v52 = vrot.slane %v12946_v3, %v19372_v5  ;;  %v12962_v44 = vcombine.low %v5781_v33, %v5783_v7  ;;  %v12134_v14 = vcombine.low %v4912_v56, %v17799_v15  ;;  %v12135_v61 = vcombine.low %v4927_v32, %v4935_v50  ;;  %v17910_v15 = vld [vmem:[%s19377_s18 + $0x121] sm:$0xff] }
 0x1f8   : > { %v8398_v63 = vcombine.low %v8390_v45, %v8397_v25  ;;  %v12953_v9 = vrot.slane %v12945_v41, %v19372_v5  ;;  %v12151_v13 = vcombine.low %v4934_v8, %v4936_v27  ;;  %v12152_v58 = vcombine.low %v4944_v36, %v4952_v12  ;;  %v21240_v8 = vld [vmem:[%s19377_s18 + $0x129] sm:$0xff] }
 0x1f9   : > { %v25156_v11 = vunpack.i.l.bf16 %v20974_v51  ;;  %v12970_v37 = vrot.slane %v12962_v44, %v19372_v5  ;;  %v12142_v22 = vrot.slane %v12134_v14, %v19372_v5  ;;  %v12149_v33 = vrot.slane %v12135_v61, %v19372_v5 }
 0x1fa   : > { %v8347_v7 = vcombine.low %v8339_v55, %v8346_v24  ;;  %v12961_v32 = vcombine.low %v12953_v9, %v12960_v52  ;;  %v12159_v45 = vrot.slane %v12151_v13, %v19372_v5  ;;  %v12166_v25 = vrot.slane %v12152_v58, %v19372_v5  ;;  %v220_v58 = vld [vmem:[%s19377_s18 + $0x188] sm:$0xff] }
 0x1fb   : > { %v21230_v21 = vsel %vm15004_vm0, %v8381_v57, %v25156_v11  ;;  %v8364_v36 = vcombine.low %v8356_v31, %v8363_v17  ;;  %v12978_v57 = vcombine.low %v12970_v37, %v20943_v23  ;;  %v12150_v3 = vcombine.low %v12142_v22, %v12149_v33 }
 0x1fc   : > { %25157 = vst [vmem:[#allocation32_spill] sm:$0xff] %v21230_v21  ;;  %v6589_v56 = vcombine.high %v21108_v16, %v21108_v16  ;;  %v935_v50 = vcombine.high %v219_v43, %v219_v43  ;;  %v12167_v41 = vcombine.low %v12159_v45, %v12166_v25  ;;  %v6613_v27 = vcombine.high %v17910_v15, %v17910_v15  ;;  %v21259_v16 = vld.sshfl [vmem:[%s19377_s18 + $0x119] sm:$0x3 pattern:$0x76325410] }
 0x1fd   : > { %v21246_v24 = vrot.slane %v17910_v15, %v19372_v5  ;;  %v21249_v55 = vrot.slane %v219_v43, %v19372_v5  ;;  %v18597_v12 = vpack.i.bf16 %v12978_v57, %v12961_v32  ;;  %v21256_v23 = vrot.slane %v21240_v8, %v19372_v5 }
 0x1fe   : > { %v21252_v52 = vrot.slane %v6589_v56, %v19372_v5  ;;  %v18592_v17 = vpack.i.bf16 %v12167_v41, %v12150_v3  ;;  %v21262_v31 = vrot.slane %v6613_v27, %v19372_v5  ;;  %v11829_v9 = vcombine.low %v21130_v60, %v21143_v39  ;;  %v21316_v56 = vpop.permute.xlu1 %18293 }
 0x1ff   : > { %v21266_v44 = vcombine.high %v21246_v24, %v21246_v24  ;;  %18598 = vrot.lane.b32.xlu1 %v18597_v12, %s19330_s25  ;;  %v21275_v61 = vcombine.high %v21256_v23, %v21256_v23  ;;  %v11845_v13 = vcombine.low %v21137_v34, %v21150_v40  ;;  %v11828_v37 = vcombine.low %v21024_v49, %v21134_v20  ;;  %v17982_v12 = vld [vmem:[%s19377_s18 + $0x122] sm:$0xff] }
 0x200   : > { %25158 = vst [vmem:[#allocation33_spill] sm:$0xff] %v21252_v52  ;;  %v21271_v14 = vcombine.high %v21252_v52, %v21252_v52  ;;  %18593 = vrot.lane.b32.xlu0 %v18592_v17, %s19328_s23  ;;  %v21285_v11 = vcombine.high %v21262_v31, %v21262_v31  ;;  %v11846_v22 = vcombine.low %v21146_v54, %v21158_v19  ;;  %v25160_v19 = vunpack.i.h.bf16 %v20974_v51 }
 0x201   : > { %25159 = vst [vmem:[#allocation34_spill] sm:$0xff] %v21275_v61  ;;  %v13757_v43 = vcombine.low %v21246_v24, %v21266_v44  ;;  %v13774_v40 = vcombine.low %v21256_v23, %v21275_v61  ;;  %v11843_v34 = vrot.slane %v11829_v9, %v19372_v5  ;;  %v11853_v39 = vrot.slane %v11845_v13, %v19372_v5 }
 0x202   : > { %v13756_v60 = vcombine.low %v21271_v14, %v21259_v16  ;;  %v13773_v49 = vcombine.low %v21262_v31, %v21285_v11  ;;  %v11836_v20 = vrot.slane %v11828_v37, %v19372_v5  ;;  %v11860_v54 = vrot.slane %v11846_v22, %v19372_v5  ;;  %25164 = vst [vmem:[#allocation37_spill] sm:$0xff] %v21316_v56  ;;  %v17814_v37 = vld [vmem:[%s19377_s18 + $0x60] sm:$0xff] }
 0x203   : > { %v13771_v33 = vrot.slane %v13757_v43, %v19372_v5  ;;  %v21307_v15 = vsel %vm15004_vm0, %v8398_v63, %v25160_v19  ;;  %v952_v32 = vcombine.high %v220_v58, %v220_v58  ;;  %v13788_v25 = vrot.slane %v13774_v40, %v19372_v5  ;;  %v21321_v63 = vld [vmem:[%s19377_s18 + $0x12a] sm:$0xff]  ;;  %v21359_v19 = vpop.permute.xlu0 %18288 }
 0x204   : > { %25161 = vst [vmem:[#allocation35_spill] sm:$0xff] %v21307_v15  ;;  %v13764_v45 = vrot.slane %v13756_v60, %v19372_v5  ;;  %v25162_v57 = vunpack.i.l.bf16 %v21022_v29  ;;  %v13781_v41 = vrot.slane %v13773_v49, %v19372_v5  ;;  %v11844_v27 = vcombine.low %v11836_v20, %v11843_v34  ;;  %25165 = vst [vmem:[#allocation38_spill] sm:$0xff] %v21321_v63 }
 0x205   : > { %v11861_v51 = vcombine.low %v11853_v39, %v11860_v54  ;;  %v25166_v17 = vunpack.i.h.bf16 %v21022_v29  ;;  %v21329_v13 = vrot.slane %v935_v50, %v19372_v5  ;;  %v950_v22 = vcombine.high %v21249_v55, %v21249_v55  ;;  %v17863_v39 = vld.sshfl [vmem:[%s19377_s18 + $0x58] sm:$0x3 pattern:$0x76325410]  ;;  %25172 = vst [vmem:[#allocation44_spill] sm:$0xff] %v21359_v19 }
 0x206   : > { %v21314_v3 = vsel %vm15004_vm0, %v8347_v7, %v25162_v57  ;;  %v21332_v7 = vrot.slane %v220_v58, %v19372_v5  ;;  %v13772_v43 = vcombine.low %v13764_v45, %v13771_v33  ;;  %v13789_v60 = vcombine.low %v13781_v41, %v13788_v25  ;;  %v21351_v33 = vld [vmem:[%s19377_s18 + $0x68] sm:$0xff] }
 0x207   : > { %25163 = vst [vmem:[#allocation36_spill] sm:$0xff] %v21314_v3  ;;  %v21326_v9 = vsel %vm15004_vm0, %v8364_v36, %v25166_v17  ;;  %25168 = vst [vmem:[#allocation40_spill] sm:$0xff] %v21329_v13  ;;  %v18602_v40 = vpack.i.bf16 %v11861_v51, %v11844_v27  ;;  %v7435_v29 = vcombine.high %v21201_v0, %v21201_v0  ;;  %v21376_v27 = vpop.permute.xlu1 %18298 }
 0x208   : > { %25167 = vst [vmem:[#allocation39_spill] sm:$0xff] %v21326_v9  ;;  %25169 = vst [vmem:[#allocation41_spill] sm:$0xff] %v21332_v7  ;;  %v21340_v36 = vrot.slane %v952_v32, %v19372_v5  ;;  %v7459_v34 = vcombine.high %v17982_v12, %v17982_v12  ;;  %v21343_v50 = vrot.slane %v17982_v12, %v19372_v5  ;;  %v21362_v32 = vld.sshfl [vmem:[%s19377_s18 + $0x11a] sm:$0x3 pattern:$0x76325410] }
 0x209   : > { %v21347_v58 = vrot.slane %v21321_v63, %v19372_v5  ;;  %v18607_v49 = vpack.i.bf16 %v13789_v60, %v13772_v43  ;;  %18603 = vrot.lane.b32.xlu0 %v18602_v40, %s19328_s23  ;;  %v21355_v20 = vrot.slane %v7435_v29, %v19372_v5  ;;  %v5431_v0 = vcombine.high %v21080_v30, %v21080_v30 }
 0x20a   : > { %25170 = vst [vmem:[#allocation42_spill] sm:$0xff] %v21340_v36  ;;  %v5439_v54 = vcombine.high %v17814_v37, %v17814_v37  ;;  %v21365_v45 = vrot.slane %v7459_v34, %v19372_v5  ;;  %v21369_v25 = vcombine.high %v21343_v50, %v21343_v50  ;;  %v5446_v41 = vrot.slane %v17814_v37, %v19372_v5 }
 0x20b   : > { %25171 = vst [vmem:[#allocation43_spill] sm:$0xff] %v21355_v20  ;;  %v21373_v57 = vcombine.high %v21347_v58, %v21347_v58  ;;  %18608 = vrot.lane.b32.xlu1 %v18607_v49, %s19329_s24  ;;  %v21381_v30 = vcombine.high %v21355_v20, %v21355_v20  ;;  %v5463_v12 = vrot.slane %v21351_v33, %v19372_v5 }
 0x20c   : > { %v5453_v51 = vrot.slane %v5439_v54, %v19372_v5  ;;  %v12639_v17 = vcombine.low %v5431_v0, %v17863_v39  ;;  %v21388_v43 = vcombine.high %v21365_v45, %v21365_v45  ;;  %v14568_v37 = vcombine.low %v21343_v50, %v21369_v25 }
 0x20d   : > { %25173 = vst [vmem:[#allocation45_spill] sm:$0xff] %v21373_v57  ;;  %v14585_v60 = vcombine.low %v21347_v58, %v21373_v57  ;;  %v5454_v40 = vcombine.high %v5446_v41, %v5446_v41  ;;  %v14567_v29 = vcombine.low %v21381_v30, %v21362_v32  ;;  %v5471_v49 = vcombine.high %v5463_v12, %v5463_v12  ;;  %v21422_v57 = vld.sshfl [vmem:[%s19377_s18 + $0x5a] sm:$0x3 pattern:$0x76325410] }
 0x20e   : > { %v5455_v34 = vcombine.high %v5453_v51, %v5453_v51  ;;  %v12647_v54 = vrot.slane %v12639_v17, %v19372_v5  ;;  %v14582_v39 = vrot.slane %v14568_v37, %v19372_v5  ;;  %v14584_v0 = vcombine.low %v21365_v45, %v21388_v43  ;;  %v21409_v37 = vpop.permute.xlu0 %9284 }
 0x20f   : > { %v14599_v56 = vrot.slane %v14585_v60, %v19372_v5  ;;  %v12640_v19 = vcombine.low %v5446_v41, %v5454_v40  ;;  %v14575_v15 = vrot.slane %v14567_v29, %v19372_v5  ;;  %v12657_v3 = vcombine.low %v5463_v12, %v5471_v49  ;;  %25175 = vst [vmem:[#allocation47_spill] sm:$0xff] %v21409_v37  ;;  %v17958_v40 = vld [vmem:[%s19377_s18 + $0x62] sm:$0xff]  ;;  %v21416_v12 = vpop.permute.xlu1 %18308 }
 0x210   : > { %v12656_v21 = vcombine.low %v5453_v51, %v5455_v34  ;;  %v21407_v17 = vcombine.low %v21249_v55, %v950_v22  ;;  %v14592_v60 = vrot.slane %v14584_v0, %v19372_v5  ;;  %v18301_v55 = vunpack.i.h.bf16 %v21376_v27 }
 0x211   : > { %v12654_v41 = vrot.slane %v12640_v19, %v19372_v5  ;;  %v14583_v29 = vcombine.low %v14575_v15, %v14582_v39  ;;  %v12671_v49 = vrot.slane %v12657_v3, %v19372_v5  ;;  %v21425_v19 = vld [vmem:[%s19377_s18 + $0x6a] sm:$0xff]  ;;  %v18300_v51 = vunpack.i.l.bf16 %v21376_v27  ;;  %v17886_v3 = vld [vmem:[%s19377_s18 + $0x61] sm:$0xff] }
 0x212   : > { %25174 = vst [vmem:[#allocation46_spill] sm:$0xff] %v21407_v17  ;;  %v12664_v34 = vrot.slane %v12656_v21, %v19372_v5  ;;  %v14600_v22 = vcombine.low %v14592_v60, %v14599_v56  ;;  %25176 = vst [vmem:[#allocation48_spill] sm:$0xff] %v21425_v19  ;;  %v21430_v15 = vcombine.high %v21154_v6, %v21154_v6  ;;  %v18311_v39 = vunpack.i.h.bf16 %v21416_v12  ;;  %v21439_v60 = vld [vmem:[%s19377_s18 + $0x69] sm:$0xff]  ;;  %v21451_v36 = vpop.permute.xlu0 %18303 }
 0x213   : > { %v12655_v0 = vcombine.low %v12647_v54, %v12654_v41  ;;  %v7131_v21 = vcombine.high %v17958_v40, %v17958_v40  ;;  %v18310_v37 = vunpack.i.l.bf16 %v21416_v12  ;;  %v21436_v54 = vrot.slane %v17958_v40, %v19372_v5  ;;  %25177 = vst [vmem:[#allocation49_spill] sm:$0xff] %v21439_v60  ;;  %v17935_v17 = vld.sshfl [vmem:[%s19377_s18 + $0x59] sm:$0x3 pattern:$0x76325410] }
 0x214   : > { %v12672_v42 = vcombine.low %v12664_v34, %v12671_v49  ;;  %v18617_v56 = vpack.i.bf16 %v14600_v22, %v14583_v29  ;;  %v21446_v34 = vrot.slane %v21425_v19, %v19372_v5  ;;  %v14261_v49 = vcombine.low %v21430_v15, %v21422_v57 }
 0x215   : > { %v21442_v27 = vrot.slane %v7131_v21, %v19372_v5  ;;  %v21456_v40 = vcombine.high %v21436_v54, %v21436_v54  ;;  %v6285_v12 = vcombine.high %v17886_v3, %v17886_v3  ;;  %v6292_v29 = vrot.slane %v17886_v3, %v19372_v5 }
 0x216   : > { %v18612_v41 = vpack.i.bf16 %v12672_v42, %v12655_v0  ;;  %18618 = vrot.lane.b32.xlu1 %v18617_v56, %s19331_s26  ;;  %v6277_v42 = vcombine.high %v21064_v62, %v21064_v62  ;;  %v21468_v0 = vcombine.high %v21446_v34, %v21446_v34  ;;  %v14269_v21 = vrot.slane %v14261_v49, %v19372_v5 }
 0x217   : > { %v21464_v22 = vcombine.high %v21442_v27, %v21442_v27  ;;  %v6309_v56 = vrot.slane %v21439_v60, %v19372_v5  ;;  %v14262_v62 = vcombine.low %v21436_v54, %v21456_v40  ;;  %v6299_v3 = vrot.slane %v6285_v12, %v19372_v5 }
 0x218   : > { %18613 = vrot.lane.b32.xlu0 %v18612_v41, %s19330_s25  ;;  %25178 = vst [vmem:[#allocation50_spill] sm:$0xff] %v21468_v0  ;;  %v6300_v13 = vcombine.high %v6292_v29, %v6292_v29  ;;  %v13450_v41 = vcombine.low %v6277_v42, %v17935_v17  ;;  %v18306_v7 = vunpack.i.h.bf16 %v21451_v36  ;;  %v14279_v61 = vcombine.low %v21446_v34, %v21468_v0  ;;  %v18319_v0 = vpop.permute.xlu1 %18318 }
 0x219   : > { %v14278_v9 = vcombine.low %v21442_v27, %v21464_v22  ;;  %v6317_v2 = vcombine.high %v6309_v56, %v6309_v56  ;;  %v14276_v49 = vrot.slane %v14262_v62, %v19372_v5  ;;  %v6301_v47 = vcombine.high %v6299_v3, %v6299_v3 }
 0x21a   : > { %v13451_v60 = vcombine.low %v6292_v29, %v6300_v13  ;;  %v13458_v63 = vrot.slane %v13450_v41, %v19372_v5  ;;  %v21485_v12 = vsel %vm15046_vm1, %v20460_v53, %v18301_v55  ;;  %v14293_v42 = vrot.slane %v14279_v61, %v19372_v5  ;;  %v21508_v61 = vpop.permute.xlu0 %18313 }
 0x21b   : > { %v14286_v17 = vrot.slane %v14278_v9, %v19372_v5  ;;  %v13468_v19 = vcombine.low %v6309_v56, %v6317_v2  ;;  %v21491_v28 = vsel %vm15046_vm1, %v20452_v46, %v18300_v51  ;;  %v14277_v4 = vcombine.low %v14269_v21, %v14276_v49 }
 0x21c   : > { %v13465_v62 = vrot.slane %v13451_v60, %v19372_v5  ;;  %v13467_v13 = vcombine.low %v6299_v3, %v6301_v47  ;;  %v21496_v29 = vsel %vm15046_vm1, %v20449_v18, %v18311_v39  ;;  %v18305_v53 = vunpack.i.l.bf16 %v21451_v36  ;;  %v25179_v3 = vld [vmem:[#allocation10_spill] sm:$0xff] }
 0x21d   : > { %v14294_v55 = vcombine.low %v14286_v17, %v14293_v42  ;;  %v13482_v9 = vrot.slane %v13468_v19, %v19372_v5  ;;  %v21502_v2 = vsel %vm15046_vm1, %v20434_v35, %v18310_v37  ;;  %v21506_v46 = vsel %vm15046_vm1, %v20576_v38, %v18306_v7  ;;  %v25180_v17 = vld [vmem:[#allocation12_spill] sm:$0xff] }
 0x21e   : > { %v13466_v47 = vcombine.low %v13458_v63, %v13465_v62  ;;  %v13475_v51 = vrot.slane %v13467_v13, %v19372_v5  ;;  %v18321_v18 = vunpack.i.h.bf16 %v18319_v0  ;;  %v12168_v36 = vcombine.low %v21355_v20, %v21381_v30 }
 0x21f   : > { %v18627_v39 = vpack.i.bf16 %v14294_v55, %v14277_v4  ;;  %v12169_v19 = vcombine.low %v21362_v32, %v21343_v50  ;;  %v18320_v60 = vunpack.i.l.bf16 %v18319_v0  ;;  %v12185_v37 = vcombine.low %v21369_v25, %v21365_v45  ;;  %v17841_v55 = vld [vmem:[%s19377_s18 + $0x138] sm:$0xff] }
 0x220   : > { %v13483_v35 = vcombine.low %v13475_v51, %v13482_v9  ;;  %v12186_v38 = vcombine.low %v21388_v43, %v21347_v58  ;;  %v18316_v63 = vunpack.i.h.bf16 %v21508_v61  ;;  %v12176_v4 = vrot.slane %v12168_v36, %v19372_v5  ;;  %v18329_v58 = vpop.permute.xlu1 %18328 }
 0x221   : > { %18628 = vrot.lane.b32.xlu1 %v18627_v39, %s19331_s26  ;;  %v12183_v7 = vrot.slane %v12169_v19, %v19372_v5  ;;  %v11357_v30 = vcombine.low %v21252_v52, %v21271_v14  ;;  %v12193_v32 = vrot.slane %v12185_v37, %v19372_v5  ;;  %v11358_v45 = vcombine.low %v21259_v16, %v21246_v24  ;;  %v18324_v24 = vpop.permute.xlu0 %18323  ;;  %v21566_v19 = vld [vmem:[%s19377_s18 + $0x140] sm:$0xff] }
 0x222   : > { %v18622_v50 = vpack.i.bf16 %v13483_v35, %v13466_v47  ;;  %v12200_v0 = vrot.slane %v12186_v38, %v19372_v5  ;;  %v11374_v21 = vcombine.low %v21266_v44, %v21262_v31  ;;  %v11375_v56 = vcombine.low %v21285_v11, %v21256_v23  ;;  %v25181_v11 = vld [vmem:[#allocation6_spill] sm:$0xff] }
 0x223   : > { %v12184_v25 = vcombine.low %v12176_v4, %v12183_v7  ;;  %v11365_v43 = vrot.slane %v11357_v30, %v19372_v5  ;;  %v21536_v14 = vsel %vm15046_vm1, %v20547_v26, %v18305_v53  ;;  %v21540_v41 = vsel %vm15046_vm1, %v25179_v3, %v18320_v60  ;;  %v19268_v60 = vld [vmem:[%s19377_s18 + $0x128] sm:$0xff] }
 0x224   : > { %18623 = vrot.lane.b32.xlu0 %v18622_v50, %s19329_s24  ;;  %v12201_v16 = vcombine.low %v12193_v32, %v12200_v0  ;;  %v11372_v49 = vrot.slane %v11358_v45, %v19372_v5  ;;  %v21546_v31 = vsel %vm15046_vm1, %v25180_v17, %v18321_v18  ;;  %v18315_v23 = vunpack.i.l.bf16 %v21508_v61  ;;  %v18339_v4 = vpop.permute.xlu1 %18338 }
 0x225   : > { %v11382_v26 = vrot.slane %v11374_v21, %v19372_v5  ;;  %v11389_v44 = vrot.slane %v11375_v56, %v19372_v5  ;;  %v21553_v42 = vsel %vm15046_vm1, %v25181_v11, %v18316_v63  ;;  %v18331_v62 = vunpack.i.h.bf16 %v18329_v58  ;;  %v17872_v63 = vld.sshfl [vmem:[%s19377_s18 + $0x130] sm:$0x3 pattern:$0x76325410] }
 0x226   : > { %v18637_v13 = vpack.i.bf16 %v12201_v16, %v12184_v25  ;;  %v11373_v53 = vcombine.low %v11365_v43, %v11372_v49  ;;  %v18330_v9 = vunpack.i.l.bf16 %v18329_v58  ;;  %v18326_v47 = vunpack.i.h.bf16 %v18324_v24  ;;  %v25182_v58 = vld [vmem:[#allocation5_spill] sm:$0xff] }
 0x227   : > { %v11390_v51 = vcombine.low %v11382_v26, %v11389_v44  ;;  %v11862_v61 = vcombine.low %v21154_v6, %v21430_v15  ;;  %v11863_v18 = vcombine.low %v21422_v57, %v21436_v54  ;;  %v11879_v39 = vcombine.low %v21456_v40, %v21442_v27  ;;  %v17817_v26 = vld [vmem:[%s19377_s18 + $0x78] sm:$0xff]  ;;  %v25184_v44 = vld [vmem:[#allocation9_spill] sm:$0xff] }
 0x228   : > { %18638 = vrot.lane.b32.xlu1 %v18637_v13, %s19328_s23  ;;  %v11880_v36 = vcombine.low %v21464_v22, %v21446_v34  ;;  %v5784_v35 = vcombine.high %v19268_v60, %v19268_v60  ;;  %v5808_v6 = vcombine.high %v17841_v55, %v17841_v55  ;;  %v5815_v15 = vrot.slane %v17841_v55, %v19372_v5 }
 0x229   : > { %v18632_v37 = vpack.i.bf16 %v11390_v51, %v11373_v53  ;;  %v11870_v38 = vrot.slane %v11862_v61, %v19372_v5  ;;  %v11877_v57 = vrot.slane %v11863_v18, %v19372_v5  ;;  %v11887_v54 = vrot.slane %v11879_v39, %v19372_v5  ;;  %v25185_v53 = vld [vmem:[#allocation8_spill] sm:$0xff]  ;;  %v17864_v39 = vld.sshfl [vmem:[%s19377_s18 + $0x70] sm:$0x3 pattern:$0x76325410] }
 0x22a   : > { %v11894_v27 = vrot.slane %v11880_v36, %v19372_v5  ;;  %v5798_v34 = vrot.slane %v5784_v35, %v19372_v5  ;;  %v18325_v40 = vunpack.i.l.bf16 %v18324_v24  ;;  %v5822_v22 = vrot.slane %v5808_v6, %v19372_v5  ;;  %v21590_v24 = vpop.permute.xlu0 %18333  ;;  %v17913_v35 = vld [vmem:[%s19377_s18 + $0x139] sm:$0xff] }
 0x22b   : > { %18633 = vrot.lane.b32.xlu0 %v18632_v37, %s19327_s22  ;;  %v5823_v7 = vcombine.high %v5815_v15, %v5815_v15  ;;  %v21580_v30 = vrot.slane %v21566_v19, %v19372_v5  ;;  %v11878_v50 = vcombine.low %v11870_v38, %v11877_v57  ;;  %v12980_v45 = vcombine.low %v17872_v63, %v5815_v15 }
 0x22c   : > { %v11895_v32 = vcombine.low %v11887_v54, %v11894_v27  ;;  %v5800_v0 = vcombine.high %v5798_v34, %v5798_v34  ;;  %v21584_v25 = vsel %vm15046_vm1, %v25182_v58, %v18315_v23  ;;  %v21588_v43 = vsel %vm15046_vm1, %v20788_v48, %v18330_v9  ;;  %v21608_v9 = vpop.permute.xlu1 %18348 }
 0x22d   : > { %v5824_v21 = vcombine.high %v5822_v22, %v5822_v22  ;;  %v12996_v56 = vcombine.low %v5823_v7, %v5822_v22  ;;  %v18340_v3 = vunpack.i.l.bf16 %v18339_v4  ;;  %v12994_v17 = vrot.slane %v12980_v45, %v19372_v5  ;;  %25186 = vst [vmem:[#allocation12_spill] sm:$0xff] %v21608_v9 }
 0x22e   : > { %v18647_v16 = vpack.i.bf16 %v11895_v32, %v11878_v50  ;;  %v12979_v49 = vcombine.low %v5798_v34, %v5800_v0  ;;  %v21596_v23 = vsel %vm15046_vm1, %v20791_v10, %v18331_v62  ;;  %v21600_v48 = vsel %vm15046_vm1, %v25184_v44, %v18326_v47  ;;  %v21615_v62 = vld [vmem:[%s19377_s18 + $0x80] sm:$0xff]  ;;  %v21634_v57 = vpop.permute.xlu0 %18343 }
 0x22f   : > { %25183 = vst [vmem:[#allocation10_spill] sm:$0xff] %v21596_v23  ;;  %v12997_v11 = vcombine.low %v5824_v21, %v21580_v30  ;;  %v13004_v13 = vrot.slane %v12996_v56, %v19372_v5  ;;  %v21606_v55 = vsel %vm15046_vm1, %v25185_v53, %v18325_v40  ;;  %v4132_v51 = vcombine.high %v21240_v8, %v21240_v8  ;;  %v21644_v32 = vld [vmem:[%s19377_s18 + $0x141] sm:$0xff]  ;;  %v21648_v21 = vld.sshfl [vmem:[%s19377_s18 + $0x131] sm:$0x3 pattern:$0x76325410] }
 0x230   : > { %18648 = vrot.lane.b32.xlu1 %v18647_v16, %s19328_s23  ;;  %v12987_v10 = vrot.slane %v12979_v49, %v19372_v5  ;;  %v5456_v47 = vcombine.high %v21351_v33, %v21351_v33  ;;  %v18341_v61 = vunpack.i.h.bf16 %v18339_v4  ;;  %v5480_v36 = vcombine.high %v17817_v26, %v17817_v26  ;;  %25188 = vst [vmem:[#allocation5_spill] sm:$0xff] %v21634_v57  ;;  %v18359_v0 = vpop.permute.xlu1 %18358 }
 0x231   : > { %v13011_v18 = vrot.slane %v12997_v11, %v19372_v5  ;;  %v5487_v60 = vrot.slane %v17817_v26, %v19372_v5  ;;  %v21625_v8 = vsel %vm15046_vm1, %v20798_v59, %v18340_v3  ;;  %v18336_v37 = vunpack.i.h.bf16 %v21590_v24 }
 0x232   : > { %25187 = vst [vmem:[#allocation6_spill] sm:$0xff] %v21625_v8  ;;  %v12995_v38 = vcombine.low %v12987_v10, %v12994_v17  ;;  %v5470_v63 = vrot.slane %v5456_v47, %v19372_v5  ;;  %v5494_v33 = vrot.slane %v5480_v36, %v19372_v5  ;;  %v21632_v4 = vrot.slane %v21615_v62, %v19372_v5  ;;  %v17961_v8 = vld [vmem:[%s19377_s18 + $0x7a] sm:$0xff] }
 0x233   : > { %v13012_v6 = vcombine.low %v13004_v13, %v13011_v18  ;;  %v5495_v15 = vcombine.high %v5487_v60, %v5487_v60  ;;  %v12674_v59 = vcombine.low %v17864_v39, %v5487_v60  ;;  %v21637_v27 = vrot.slane %v4132_v51, %v19372_v5  ;;  %v25190_v60 = vld [vmem:[#allocation14_spill] sm:$0xff] }
 0x234   : > { %v5472_v54 = vcombine.high %v5470_v63, %v5470_v63  ;;  %v6654_v34 = vcombine.high %v17913_v35, %v17913_v35  ;;  %v21641_v40 = vsel %vm15046_vm1, %v20806_v1, %v18341_v61  ;;  %v5496_v7 = vcombine.high %v5494_v33, %v5494_v33  ;;  %v18354_v61 = vpop.permute.xlu0 %18353 }
 0x235   : > { %25189 = vst [vmem:[#allocation9_spill] sm:$0xff] %v21641_v40  ;;  %v18642_v22 = vpack.i.bf16 %v13012_v6, %v12995_v38  ;;  %v12690_v50 = vcombine.low %v5495_v15, %v5494_v33  ;;  %v12688_v58 = vrot.slane %v12674_v59, %v19372_v5  ;;  %v21652_v56 = vcombine.high %v21637_v27, %v21637_v27  ;;  %v17889_v33 = vld [vmem:[%s19377_s18 + $0x79] sm:$0xff]  ;;  %v25191_v15 = vld [vmem:[#allocation17_spill] sm:$0xff] }
 0x236   : > { %v12673_v45 = vcombine.low %v5470_v63, %v5472_v54  ;;  %v21655_v3 = vrot.slane %v17913_v35, %v19372_v5  ;;  %v18335_v1 = vunpack.i.l.bf16 %v21590_v24  ;;  %v12691_v16 = vcombine.low %v5496_v7, %v21632_v4  ;;  %v25192_v59 = vld [vmem:[#allocation48_spill] sm:$0xff] }
 0x237   : > { %18643 = vrot.lane.b32.xlu0 %v18642_v22, %s19330_s25  ;;  %v12698_v49 = vrot.slane %v12690_v50, %v19372_v5  ;;  %v21662_v17 = vrot.slane %v6654_v34, %v19372_v5  ;;  %v21671_v11 = vrot.slane %v21644_v32, %v19372_v5  ;;  %v13790_v24 = vcombine.low %v21637_v27, %v21652_v56  ;;  %v25193_v22 = vld [vmem:[#allocation38_spill] sm:$0xff]  ;;  %v21703_v50 = vld [vmem:[%s19377_s18 + $0x81] sm:$0xff]  ;;  %v21737_v34 = vld.sshfl [vmem:[%s19377_s18 + $0x132] sm:$0x3 pattern:$0x76325410] }
 0x238   : > { %v12681_v26 = vrot.slane %v12673_v45, %v19372_v5  ;;  %v21667_v44 = vcombine.high %v21655_v3, %v21655_v3  ;;  %v18361_v13 = vunpack.i.h.bf16 %v18359_v0  ;;  %v12705_v53 = vrot.slane %v12691_v16, %v19372_v5 }
 0x239   : > { %v21678_v51 = vcombine.high %v21662_v17, %v21662_v17  ;;  %v13791_v10 = vcombine.low %v21648_v21, %v21655_v3  ;;  %v18360_v47 = vunpack.i.l.bf16 %v18359_v0  ;;  %v13798_v39 = vrot.slane %v13790_v24, %v19372_v5  ;;  %v25196_v24 = vld [vmem:[#allocation24_spill] sm:$0xff] }
 0x23a   : > { %v12689_v18 = vcombine.low %v12681_v26, %v12688_v58  ;;  %v13807_v36 = vcombine.low %v21667_v44, %v21662_v17  ;;  %v21687_v35 = vsel %vm15046_vm1, %v25190_v60, %v18336_v37  ;;  %v12706_v38 = vcombine.low %v12698_v49, %v12705_v53  ;;  %v17985_v49 = vld [vmem:[%s19377_s18 + $0x13a] sm:$0xff]  ;;  %v25194_v26 = vld [vmem:[#allocation23_spill] sm:$0xff]  ;;  %v25198_v60 = vld [vmem:[#allocation49_spill] sm:$0xff] }
 0x23b   : > { %v13805_v63 = vrot.slane %v13791_v10, %v19372_v5  ;;  %v13808_v6 = vcombine.low %v21678_v51, %v21671_v11  ;;  %v21695_v54 = vsel %vm15046_vm1, %v25191_v15, %v18335_v1  ;;  %v4978_v7 = vcombine.high %v25193_v22, %v25193_v22  ;;  %v17936_v10 = vld.sshfl [vmem:[%s19377_s18 + $0x71] sm:$0x3 pattern:$0x76325410] }
 0x23c   : > { %v13815_v37 = vrot.slane %v13807_v36, %v19372_v5  ;;  %v18356_v0 = vunpack.i.h.bf16 %v18354_v61  ;;  %v18657_v45 = vpack.i.bf16 %v12706_v38, %v12689_v18  ;;  %v21709_v1 = vsel %vm15046_vm1, %v25194_v26, %v18360_v47  ;;  %v25199_v26 = vld [vmem:[#allocation19_spill] sm:$0xff] }
 0x23d   : > { %v13806_v58 = vcombine.low %v13798_v39, %v13805_v63  ;;  %v13822_v16 = vrot.slane %v13808_v6, %v19372_v5  ;;  %25195 = vst [vmem:[#allocation8_spill] sm:$0xff] %v21709_v1  ;;  %v21713_v53 = vsel %vm15046_vm1, %v25196_v24, %v18361_v13  ;;  %v6302_v36 = vcombine.high %v25198_v60, %v25198_v60 }
 0x23e   : > { %25197 = vst [vmem:[#allocation14_spill] sm:$0xff] %v21713_v53  ;;  %v6326_v15 = vcombine.high %v17889_v33, %v17889_v33  ;;  %v18355_v22 = vunpack.i.l.bf16 %v18354_v61  ;;  %18658 = vrot.lane.b32.xlu1 %v18657_v45, %s19330_s25  ;;  %v6333_v39 = vrot.slane %v17889_v33, %v19372_v5  ;;  %v21722_v47 = vrot.slane %v21703_v50, %v19372_v5  ;;  %v21734_v33 = vld [vmem:[%s19377_s18 + $0x142] sm:$0xff] }
 0x23f   : > { %v13823_v18 = vcombine.low %v13815_v37, %v13822_v16  ;;  %v6316_v13 = vrot.slane %v6302_v36, %v19372_v5  ;;  %v21727_v63 = vrot.slane %v4978_v7, %v19372_v5  ;;  %v7500_v6 = vcombine.high %v17985_v49, %v17985_v49 }
 0x240   : > { %v6340_v38 = vrot.slane %v6326_v15, %v19372_v5  ;;  %v21731_v61 = vsel %vm15046_vm1, %v25199_v26, %v18356_v0  ;;  %v6341_v37 = vcombine.high %v6333_v39, %v6333_v39  ;;  %v13485_v16 = vcombine.low %v17936_v10, %v6333_v39  ;;  %v25201_v15 = vld [vmem:[#allocation18_spill] sm:$0xff] }
 0x241   : > { %25200 = vst [vmem:[#allocation17_spill] sm:$0xff] %v21731_v61  ;;  %v18652_v45 = vpack.i.bf16 %v13823_v18, %v13806_v58  ;;  %v6318_v24 = vcombine.high %v6316_v13, %v6316_v13  ;;  %v21741_v36 = vcombine.high %v21727_v63, %v21727_v63  ;;  %v21744_v7 = vrot.slane %v17985_v49, %v19372_v5  ;;  %v18369_v58 = vpop.permute.xlu1 %18368 }
 0x242   : > { %v6342_v60 = vcombine.high %v6340_v38, %v6340_v38  ;;  %v21748_v0 = vsel %vm15046_vm1, %v25201_v15, %v18355_v22  ;;  %v13499_v10 = vrot.slane %v13485_v16, %v19372_v5  ;;  %v13501_v18 = vcombine.low %v6341_v37, %v6340_v38  ;;  %v18364_v15 = vpop.permute.xlu0 %18363 }
 0x243   : > { %25202 = vst [vmem:[#allocation48_spill] sm:$0xff] %v21748_v0  ;;  %18653 = vrot.lane.b32.xlu0 %v18652_v45, %s19329_s24  ;;  %v21753_v39 = vrot.slane %v7500_v6, %v19372_v5  ;;  %v13484_v26 = vcombine.low %v6316_v13, %v6318_v24  ;;  %v21758_v49 = vcombine.high %v21744_v7, %v21744_v7  ;;  %v18370_v37 = vunpack.i.l.bf16 %v18369_v58 }
 0x244   : > { %v13502_v9 = vcombine.low %v6342_v60, %v21722_v47  ;;  %v21762_v22 = vrot.slane %v21734_v33, %v19372_v5  ;;  %v13509_v45 = vrot.slane %v13501_v18, %v19372_v5  ;;  %v14601_v13 = vcombine.low %v21727_v63, %v21741_v36 }
 0x245   : > { %v21767_v38 = vcombine.high %v21753_v39, %v21753_v39  ;;  %v14602_v6 = vcombine.low %v21737_v34, %v21744_v7  ;;  %v13492_v16 = vrot.slane %v13484_v26, %v19372_v5  ;;  %v14618_v60 = vcombine.low %v21758_v49, %v21753_v39 }
 0x246   : > { %v13516_v24 = vrot.slane %v13502_v9, %v19372_v5  ;;  %v18371_v18 = vunpack.i.h.bf16 %v18369_v58  ;;  %v14609_v57 = vrot.slane %v14601_v13, %v19372_v5  ;;  %v18366_v1 = vunpack.i.h.bf16 %v18364_v15  ;;  %v25203_v58 = vld [vmem:[#allocation27_spill] sm:$0xff] }
 0x247   : > { %v14616_v20 = vrot.slane %v14602_v6, %v19372_v5  ;;  %v14619_v52 = vcombine.low %v21767_v38, %v21762_v22  ;;  %v13500_v53 = vcombine.low %v13492_v16, %v13499_v10  ;;  %v14626_v0 = vrot.slane %v14618_v60, %v19372_v5 }
 0x248   : > { %v13517_v61 = vcombine.low %v13509_v45, %v13516_v24  ;;  %v18365_v26 = vunpack.i.l.bf16 %v18364_v15  ;;  %v21786_v13 = vsel %vm15046_vm1, %v25203_v58, %v18370_v37  ;;  %v11408_v23 = vcombine.low %v21655_v3, %v21667_v44  ;;  %v25205_v45 = vld [vmem:[#allocation28_spill] sm:$0xff]  ;;  %v21796_v15 = vpop.permute.xlu1 %18378  ;;  %v21801_v24 = vld [vmem:[%s19377_s18 + $0x82] sm:$0xff]  ;;  %v21807_v44 = vld.sshfl [vmem:[%s19377_s18 + $0x72] sm:$0x3 pattern:$0x76325410] }
 0x249   : > { %v14617_v9 = vcombine.low %v14609_v57, %v14616_v20  ;;  %v14633_v40 = vrot.slane %v14619_v52, %v19372_v5  ;;  %25204 = vst [vmem:[#allocation38_spill] sm:$0xff] %v21786_v13  ;;  %v11409_v10 = vcombine.low %v21662_v17, %v21678_v51  ;;  %v21794_v16 = vsel %vm15046_vm1, %v25205_v45, %v18371_v18  ;;  %v25207_v52 = vld [vmem:[#allocation34_spill] sm:$0xff]  ;;  %v25209_v58 = vld [vmem:[#allocation21_spill] sm:$0xff]  ;;  %v18374_v45 = vpop.permute.xlu0 %18373 }
 0x24a   : > { %v18667_v6 = vpack.i.bf16 %v13517_v61, %v13500_v53  ;;  %25206 = vst [vmem:[#allocation23_spill] sm:$0xff] %v21794_v16  ;;  %v11391_v57 = vcombine.low %v25207_v52, %v21637_v27  ;;  %v11416_v53 = vrot.slane %v11408_v23, %v19372_v5  ;;  %v25208_v17 = vcombine.high %v25192_v59, %v25192_v59 }
 0x24b   : > { %v14634_v20 = vcombine.low %v14626_v0, %v14633_v40  ;;  %v11423_v3 = vrot.slane %v11409_v10, %v19372_v5  ;;  %v7172_v40 = vcombine.high %v17961_v8, %v17961_v8  ;;  %v11392_v27 = vcombine.low %v21652_v56, %v21648_v21 }
 0x24c   : > { %18668 = vrot.lane.b32.xlu1 %v18667_v6, %s19329_s24  ;;  %v21813_v51 = vrot.slane %v25208_v17, %v19372_v5  ;;  %v11399_v0 = vrot.slane %v11391_v57, %v19372_v5  ;;  %v21819_v37 = vrot.slane %v17961_v8, %v19372_v5  ;;  %v18381_v23 = vunpack.i.h.bf16 %v21796_v15  ;;  %v25211_v57 = vld [vmem:[#allocation22_spill] sm:$0xff] }
 0x24d   : > { %v18662_v61 = vpack.i.bf16 %v14634_v20, %v14617_v9  ;;  %v21827_v59 = vrot.slane %v7172_v40, %v19372_v5  ;;  %v21831_v18 = vrot.slane %v21801_v24, %v19372_v5  ;;  %v11406_v21 = vrot.slane %v11392_v27, %v19372_v5 }
 0x24e   : > { %v21824_v60 = vcombine.high %v21813_v51, %v21813_v51  ;;  %v11424_v8 = vcombine.low %v11416_v53, %v11423_v3  ;;  %v21837_v56 = vcombine.high %v21819_v37, %v21819_v37  ;;  %v14296_v9 = vcombine.low %v21807_v44, %v21819_v37 }
 0x24f   : > { %18663 = vrot.lane.b32.xlu0 %v18662_v61, %s19331_s26  ;;  %v21843_v6 = vsel %vm15046_vm1, %v25209_v58, %v18365_v26  ;;  %v5825_v10 = vcombine.high %v21566_v19, %v21566_v19  ;;  %v21849_v20 = vcombine.high %v21827_v59, %v21827_v59  ;;  %v21855_v53 = vsel %vm15046_vm1, %v25211_v57, %v18366_v1  ;;  %v17844_v19 = vld [vmem:[%s19377_s18 + $0x150] sm:$0xff] }
 0x250   : > { %25210 = vst [vmem:[#allocation24_spill] sm:$0xff] %v21843_v6  ;;  %v14295_v52 = vcombine.low %v21813_v51, %v21824_v60  ;;  %25212 = vst [vmem:[#allocation49_spill] sm:$0xff] %v21855_v53  ;;  %v11407_v3 = vcombine.low %v11399_v0, %v11406_v21  ;;  %v14310_v17 = vrot.slane %v14296_v9, %v19372_v5  ;;  %v18380_v61 = vunpack.i.l.bf16 %v21796_v15  ;;  %v25213_v1 = vld [vmem:[#allocation39_spill] sm:$0xff] }
 0x251   : > { %v14312_v26 = vcombine.low %v21837_v56, %v21827_v59  ;;  %v5840_v40 = vcombine.high %v21580_v30, %v21580_v30  ;;  %v14313_v58 = vcombine.low %v21849_v20, %v21831_v18  ;;  %v21869_v0 = vsel %vm15046_vm1, %v25213_v1, %v18381_v23 }
 0x252   : > { %v14303_v27 = vrot.slane %v14295_v52, %v19372_v5  ;;  %25214 = vst [vmem:[#allocation19_spill] sm:$0xff] %v21869_v0  ;;  %v18376_v21 = vunpack.i.h.bf16 %v18374_v45  ;;  %v18677_v9 = vpack.i.bf16 %v11424_v8, %v11407_v3  ;;  %v5839_v30 = vrot.slane %v5825_v10, %v19372_v5  ;;  %v17873_v52 = vld.sshfl [vmem:[%s19377_s18 + $0x148] sm:$0x3 pattern:$0x76325410] }
 0x253   : > { %v14320_v57 = vrot.slane %v14312_v26, %v19372_v5  ;;  %v14327_v16 = vrot.slane %v14313_v58, %v19372_v5  ;;  %v5849_v53 = vcombine.high %v17844_v19, %v17844_v19  ;;  %v18375_v15 = vunpack.i.l.bf16 %v18374_v45  ;;  %v25215_v26 = vld [vmem:[#allocation45_spill] sm:$0xff]  ;;  %v21884_v45 = vpop.permute.xlu1 %18388 }
 0x254   : > { %v14311_v13 = vcombine.low %v14303_v27, %v14310_v17  ;;  %18678 = vrot.lane.b32.xlu1 %v18677_v9, %s19327_s22  ;;  %v5856_v6 = vrot.slane %v17844_v19, %v19372_v5  ;;  %v12219_v23 = vcombine.low %v21744_v7, %v21758_v49  ;;  %v5841_v0 = vcombine.high %v5839_v30, %v5839_v30 }
 0x255   : > { %v14328_v1 = vcombine.low %v14320_v57, %v14327_v16  ;;  %v5863_v8 = vrot.slane %v5849_v53, %v19372_v5  ;;  %v13013_v3 = vcombine.low %v5840_v40, %v5839_v30  ;;  %v12202_v27 = vcombine.low %v25215_v26, %v21727_v63  ;;  %25216 = vst [vmem:[#allocation18_spill] sm:$0xff] %v21884_v45  ;;  %v25217_v57 = vld [vmem:[#allocation36_spill] sm:$0xff] }
 0x256   : > { %v5864_v17 = vcombine.high %v5856_v6, %v5856_v6  ;;  %v12220_v10 = vcombine.low %v21753_v39, %v21767_v38  ;;  %v13014_v19 = vcombine.low %v5841_v0, %v17873_v52  ;;  %v12203_v16 = vcombine.low %v21741_v36, %v21737_v34  ;;  %v18384_v39 = vpop.permute.xlu0 %18383  ;;  %v25219_v34 = vld [vmem:[#allocation26_spill] sm:$0xff] }
 0x257   : > { %v18672_v58 = vpack.i.bf16 %v14328_v1, %v14311_v13  ;;  %v5865_v9 = vcombine.high %v5863_v8, %v5863_v8  ;;  %v13021_v7 = vrot.slane %v13013_v3, %v19372_v5  ;;  %v12210_v53 = vrot.slane %v12202_v27, %v19372_v5  ;;  %v17916_v52 = vld [vmem:[%s19377_s18 + $0x151] sm:$0xff] }
 0x258   : > { %v13030_v49 = vcombine.low %v5856_v6, %v5864_v17  ;;  %v12227_v40 = vrot.slane %v12219_v23, %v19372_v5  ;;  %v6671_v63 = vcombine.high %v21644_v32, %v21644_v32  ;;  %v13028_v38 = vrot.slane %v13014_v19, %v19372_v5  ;;  %v25221_v23 = vld [vmem:[#allocation25_spill] sm:$0xff] }
 0x259   : > { %18673 = vrot.lane.b32.xlu0 %v18672_v58, %s19331_s26  ;;  %v13031_v13 = vcombine.low %v5863_v8, %v5865_v9  ;;  %v12234_v0 = vrot.slane %v12220_v10, %v19372_v5  ;;  %v21898_v6 = vsel %vm15046_vm1, %v25217_v57, %v18380_v61  ;;  %v21902_v36 = vsel %vm15046_vm1, %v25219_v34, %v18376_v21  ;;  %v21916_v10 = vpop.permute.xlu1 %10095 }
 0x25a   : > { %25218 = vst [vmem:[#allocation27_spill] sm:$0xff] %v21898_v6  ;;  %25220 = vst [vmem:[#allocation28_spill] sm:$0xff] %v21902_v36  ;;  %v13038_v30 = vrot.slane %v13030_v49, %v19372_v5  ;;  %v12217_v32 = vrot.slane %v12203_v16, %v19372_v5  ;;  %v21909_v1 = vsel %vm15046_vm1, %v25221_v23, %v18375_v15  ;;  %v18386_v21 = vunpack.i.h.bf16 %v18384_v39  ;;  %v21927_v16 = vld.sshfl [vmem:[%s19377_s18 + $0x149] sm:$0x3 pattern:$0x76325410] }
 0x25b   : > { %25222 = vst [vmem:[#allocation34_spill] sm:$0xff] %v21909_v1  ;;  %v13029_v8 = vcombine.low %v13021_v7, %v13028_v38  ;;  %v13045_v3 = vrot.slane %v13031_v13, %v19372_v5  ;;  %v12235_v17 = vcombine.low %v12227_v40, %v12234_v0  ;;  %v21914_v61 = vcombine.high %v21671_v11, %v21671_v11  ;;  %v25224_v40 = vld [vmem:[#allocation50_spill] sm:$0xff] }
 0x25c   : > { %v18385_v26 = vunpack.i.l.bf16 %v18384_v39  ;;  %v12218_v27 = vcombine.low %v12210_v53, %v12217_v32  ;;  %25223 = vst [vmem:[#allocation21_spill] sm:$0xff] %v21916_v10  ;;  %v21919_v9 = vrot.slane %v6671_v63, %v19372_v5  ;;  %v6695_v19 = vcombine.high %v17916_v52, %v17916_v52 }
 0x25d   : > { %v13046_v58 = vcombine.low %v13038_v30, %v13045_v3  ;;  %v21922_v15 = vrot.slane %v17916_v52, %v19372_v5  ;;  %v7517_v7 = vcombine.high %v21734_v33, %v21734_v33  ;;  %v11896_v39 = vcombine.low %v25224_v40, %v21813_v51  ;;  %v21968_v3 = vpop.permute.xlu1 %18403  ;;  %v25228_v40 = vld [vmem:[#allocation35_spill] sm:$0xff] }
 0x25e   : > { %v18682_v49 = vpack.i.bf16 %v12235_v17, %v12218_v27  ;;  %v11897_v53 = vcombine.low %v21824_v60, %v21807_v44  ;;  %v21935_v63 = vcombine.high %v21919_v9, %v21919_v9  ;;  %v21938_v13 = vrot.slane %v6695_v19, %v19372_v5  ;;  %v25226_v19 = vld [vmem:[#allocation32_spill] sm:$0xff] }
 0x25f   : > { %v18687_v38 = vpack.i.bf16 %v13046_v58, %v13029_v8  ;;  %v21942_v33 = vcombine.high %v21922_v15, %v21922_v15  ;;  %v13824_v51 = vcombine.low %v21914_v61, %v21919_v9  ;;  %v11904_v0 = vrot.slane %v11896_v39, %v19372_v5  ;;  %v21966_v8 = vpop.permute.xlu0 %18393 }
 0x260   : > { %18683 = vrot.lane.b32.xlu0 %v18682_v49, %s19328_s23  ;;  %v11911_v44 = vrot.slane %v11897_v53, %v19372_v5  ;;  %v11913_v60 = vcombine.low %v21819_v37, %v21837_v56  ;;  %v21954_v57 = vcombine.high %v21938_v13, %v21938_v13  ;;  %v13825_v34 = vcombine.low %v21935_v63, %v21927_v16 }
 0x261   : > { %18688 = vrot.lane.b32.xlu1 %v18687_v38, %s19330_s25  ;;  %v13841_v30 = vcombine.low %v21922_v15, %v21942_v33  ;;  %v11914_v32 = vcombine.low %v21827_v59, %v21849_v20  ;;  %v5497_v52 = vcombine.high %v21615_v62, %v21615_v62  ;;  %v13832_v37 = vrot.slane %v13824_v51, %v19372_v5  ;;  %v17988_v20 = vld [vmem:[%s19377_s18 + $0x152] sm:$0xff] }
 0x262   : > { %v11912_v56 = vcombine.low %v11904_v0, %v11911_v44  ;;  %v11921_v23 = vrot.slane %v11913_v60, %v19372_v5  ;;  %25225 = vst [vmem:[#allocation22_spill] sm:$0xff] %v21966_v8  ;;  %v13839_v17 = vrot.slane %v13825_v34, %v19372_v5  ;;  %v13842_v27 = vcombine.low %v21938_v13, %v21954_v57 }
 0x263   : > { %v13849_v59 = vrot.slane %v13841_v30, %v19372_v5  ;;  %v11928_v62 = vrot.slane %v11914_v32, %v19372_v5  ;;  %v5512_v58 = vcombine.high %v21632_v4, %v21632_v4  ;;  %v21980_v49 = vsel %vm15046_vm1, %v25226_v19, %v18385_v26  ;;  %v17820_v4 = vld [vmem:[%s19377_s18 + $0x90] sm:$0xff] }
 0x264   : > { %25227 = vst [vmem:[#allocation39_spill] sm:$0xff] %v21980_v49  ;;  %v21984_v39 = vsel %vm15046_vm1, %v25228_v40, %v18386_v21  ;;  %v21988_v53 = vcombine.high %v21762_v22, %v21762_v22  ;;  %v13840_v38 = vcombine.low %v13832_v37, %v13839_v17  ;;  %v13856_v51 = vrot.slane %v13842_v27, %v19372_v5  ;;  %v21998_v21 = vld.sshfl [vmem:[%s19377_s18 + $0x14a] sm:$0x3 pattern:$0x76325410] }
 0x265   : > { %25229 = vst [vmem:[#allocation45_spill] sm:$0xff] %v21984_v39  ;;  %v11929_v0 = vcombine.low %v11921_v23, %v11928_v62  ;;  %v21992_v44 = vrot.slane %v7517_v7, %v19372_v5  ;;  %v18406_v26 = vunpack.i.h.bf16 %v21968_v3  ;;  %v18405_v60 = vunpack.i.l.bf16 %v21968_v3  ;;  %v18399_v62 = vpop.permute.xlu0 %18398 }
 0x266   : > { %v7541_v34 = vcombine.high %v17988_v20, %v17988_v20  ;;  %v13857_v30 = vcombine.low %v13849_v59, %v13856_v51  ;;  %v22005_v23 = vrot.slane %v17988_v20, %v19372_v5  ;;  %v5511_v3 = vrot.slane %v5497_v52, %v19372_v5  ;;  %v17865_v20 = vld.sshfl [vmem:[%s19377_s18 + $0x88] sm:$0x3 pattern:$0x76325410] }
 0x267   : > { %v18692_v32 = vpack.i.bf16 %v11929_v0, %v11912_v56  ;;  %v22002_v37 = vcombine.high %v21992_v44, %v21992_v44  ;;  %v14635_v17 = vcombine.low %v21988_v53, %v21992_v44  ;;  %v5521_v27 = vcombine.high %v17820_v4, %v17820_v4 }
 0x268   : > { %v22008_v7 = vrot.slane %v7541_v34, %v19372_v5  ;;  %v18697_v19 = vpack.i.bf16 %v13857_v30, %v13840_v38  ;;  %v22016_v56 = vcombine.high %v22005_v23, %v22005_v23  ;;  %v5528_v40 = vrot.slane %v17820_v4, %v19372_v5 }
 0x269   : > { %18693 = vrot.lane.b32.xlu0 %v18692_v32, %s19328_s23  ;;  %v14636_v59 = vcombine.low %v22002_v37, %v21998_v21  ;;  %v14643_v52 = vrot.slane %v14635_v17, %v19372_v5  ;;  %v5513_v0 = vcombine.high %v5511_v3, %v5511_v3  ;;  %v5535_v38 = vrot.slane %v5521_v27, %v19372_v5 }
 0x26a   : > { %v22024_v51 = vcombine.high %v22008_v7, %v22008_v7  ;;  %18698 = vrot.lane.b32.xlu1 %v18697_v19, %s19329_s24  ;;  %v14652_v30 = vcombine.low %v22005_v23, %v22016_v56  ;;  %v5536_v32 = vcombine.high %v5528_v40, %v5528_v40  ;;  %v12707_v10 = vcombine.low %v5512_v58, %v5511_v3 }
 0x26b   : > { %v14650_v34 = vrot.slane %v14636_v59, %v19372_v5  ;;  %v18401_v8 = vunpack.i.h.bf16 %v18399_v62  ;;  %v5537_v45 = vcombine.high %v5535_v38, %v5535_v38  ;;  %v12708_v6 = vcombine.low %v5513_v0, %v17865_v20 }
 0x26c   : > { %25230 = vst [vmem:[#allocation36_spill] sm:$0xff] %v22024_v51  ;;  %v14653_v4 = vcombine.low %v22008_v7, %v22024_v51  ;;  %v18400_v17 = vunpack.i.l.bf16 %v18399_v62  ;;  %v14660_v39 = vrot.slane %v14652_v30, %v19372_v5  ;;  %v12715_v27 = vrot.slane %v12707_v10, %v19372_v5  ;;  %v17964_v10 = vld [vmem:[%s19377_s18 + $0x92] sm:$0xff] }
 0x26d   : > { %v12724_v19 = vcombine.low %v5528_v40, %v5536_v32  ;;  %v14651_v59 = vcombine.low %v14643_v52, %v14650_v34  ;;  %v12722_v36 = vrot.slane %v12708_v6, %v19372_v5  ;;  %v12725_v58 = vcombine.low %v5535_v38, %v5537_v45 }
 0x26e   : > { %v14667_v49 = vrot.slane %v14653_v4, %v19372_v5  ;;  %v6343_v3 = vcombine.high %v21703_v50, %v21703_v50  ;;  %v6358_v51 = vcombine.high %v21722_v47, %v21722_v47  ;;  %v22044_v62 = vsel %vm15088_vm2, %v21536_v14, %v18405_v60  ;;  %v17892_v50 = vld [vmem:[%s19377_s18 + $0x91] sm:$0xff]  ;;  %v22062_v60 = vpop.permute.xlu1 %18413 }
 0x26f   : > { %25231 = vst [vmem:[#allocation26_spill] sm:$0xff] %v22044_v62  ;;  %v12732_v20 = vrot.slane %v12724_v19, %v19372_v5  ;;  %v22050_v40 = vsel %vm15088_vm2, %v21506_v46, %v18406_v26  ;;  %v12723_v45 = vcombine.low %v12715_v27, %v12722_v36  ;;  %v12739_v52 = vrot.slane %v12725_v58, %v19372_v5  ;;  %v22074_v26 = vld.sshfl [vmem:[%s19377_s18 + $0x8a] sm:$0x3 pattern:$0x76325410]  ;;  %v18409_v27 = vpop.permute.xlu0 %18408 }
 0x270   : > { %25232 = vst [vmem:[#allocation25_spill] sm:$0xff] %v22050_v40  ;;  %v14668_v6 = vcombine.low %v14660_v39, %v14667_v49  ;;  %v22056_v47 = vsel %vm15088_vm2, %v21491_v28, %v18400_v17  ;;  %v22060_v14 = vsel %vm15088_vm2, %v21485_v12, %v18401_v8  ;;  %v7189_v0 = vcombine.high %v21801_v24, %v21801_v24  ;;  %v17937_v17 = vld.sshfl [vmem:[%s19377_s18 + $0x89] sm:$0x3 pattern:$0x76325410] }
 0x271   : > { %25233 = vst [vmem:[#allocation50_spill] sm:$0xff] %v22056_v47  ;;  %25234 = vst [vmem:[#allocation32_spill] sm:$0xff] %v22060_v14  ;;  %v22068_v46 = vcombine.high %v21831_v18, %v21831_v18  ;;  %v12740_v49 = vcombine.low %v12732_v20, %v12739_v52  ;;  %v7213_v39 = vcombine.high %v17964_v10, %v17964_v10  ;;  %v18416_v34 = vunpack.i.h.bf16 %v22062_v60 }
 0x272   : > { %v18707_v36 = vpack.i.bf16 %v14668_v6, %v14651_v59  ;;  %v22071_v28 = vrot.slane %v17964_v10, %v19372_v5  ;;  %v22077_v12 = vrot.slane %v7189_v0, %v19372_v5  ;;  %v6357_v8 = vrot.slane %v6343_v3, %v19372_v5  ;;  %v18424_v40 = vpop.permute.xlu1 %18423 }
 0x273   : > { %v6367_v38 = vcombine.high %v17892_v50, %v17892_v50  ;;  %v6374_v24 = vrot.slane %v17892_v50, %v19372_v5  ;;  %v18702_v30 = vpack.i.bf16 %v12740_v49, %v12723_v45  ;;  %v22084_v32 = vrot.slane %v7213_v39, %v19372_v5 }
 0x274   : > { %18708 = vrot.lane.b32.xlu1 %v18707_v36, %s19331_s26  ;;  %v22088_v4 = vcombine.high %v22071_v28, %v22071_v28  ;;  %v22093_v19 = vcombine.high %v22077_v12, %v22077_v12  ;;  %v14329_v59 = vcombine.low %v22068_v46, %v22077_v12  ;;  %v6359_v58 = vcombine.high %v6357_v8, %v6357_v8 }
 0x275   : > { %v6381_v3 = vrot.slane %v6367_v38, %v19372_v5  ;;  %18703 = vrot.lane.b32.xlu0 %v18702_v30, %s19330_s25  ;;  %v22101_v20 = vcombine.high %v22084_v32, %v22084_v32  ;;  %v6382_v6 = vcombine.high %v6374_v24, %v6374_v24  ;;  %v13518_v45 = vcombine.low %v6358_v51, %v6357_v8 }
 0x276   : > { %v14346_v10 = vcombine.low %v22071_v28, %v22088_v4  ;;  %v14330_v52 = vcombine.low %v22093_v19, %v22074_v26  ;;  %v14337_v50 = vrot.slane %v14329_v59, %v19372_v5  ;;  %v13519_v36 = vcombine.low %v6359_v58, %v17937_v17 }
 0x277   : > { %25235 = vst [vmem:[#allocation35_spill] sm:$0xff] %v22101_v20  ;;  %v6383_v0 = vcombine.high %v6381_v3, %v6381_v3  ;;  %v14347_v49 = vcombine.low %v22084_v32, %v22101_v20  ;;  %v13526_v38 = vrot.slane %v13518_v45, %v19372_v5  ;;  %v13535_v30 = vcombine.low %v6374_v24, %v6382_v6  ;;  %v18419_v45 = vpop.permute.xlu0 %18418 }
 0x278   : > { %v14354_v39 = vrot.slane %v14346_v10, %v19372_v5  ;;  %v18415_v62 = vunpack.i.l.bf16 %v22062_v60  ;;  %v14344_v51 = vrot.slane %v14330_v52, %v19372_v5  ;;  %v13533_v8 = vrot.slane %v13519_v36, %v19372_v5 }
 0x279   : > { %v13536_v47 = vcombine.low %v6381_v3, %v6383_v0  ;;  %v22117_v59 = vsel %vm15088_vm2, %v21553_v42, %v18416_v34  ;;  %v18411_v17 = vunpack.i.h.bf16 %v18409_v27  ;;  %v14361_v58 = vrot.slane %v14347_v49, %v19372_v5 }
 0x27a   : > { %v13543_v10 = vrot.slane %v13535_v30, %v19372_v5  ;;  %v18410_v14 = vunpack.i.l.bf16 %v18409_v27  ;;  %v14345_v24 = vcombine.low %v14337_v50, %v14344_v51  ;;  %v13534_v6 = vcombine.low %v13526_v38, %v13533_v8  ;;  %v17847_v51 = vld [vmem:[%s19377_s18 + $0x168] sm:$0xff] }
 0x27b   : > { %v13550_v60 = vrot.slane %v13536_v47, %v19372_v5  ;;  %v18426_v20 = vunpack.i.h.bf16 %v18424_v40  ;;  %v18425_v52 = vunpack.i.l.bf16 %v18424_v40  ;;  %v14362_v1 = vcombine.low %v14354_v39, %v14361_v58  ;;  %v17845_v39 = vld [vmem:[%s19377_s18 + $0x158] sm:$0xff] }
 0x27c   : > { %v12236_v3 = vcombine.low %v21762_v22, %v21988_v53  ;;  %v12237_v42 = vcombine.low %v21992_v44, %v22002_v37  ;;  %v12253_v34 = vcombine.low %v21998_v21, %v22005_v23  ;;  %v12254_v27 = vcombine.low %v22016_v56, %v22008_v7 }
 0x27d   : > { %v13551_v0 = vcombine.low %v13543_v10, %v13550_v60  ;;  %v18420_v50 = vunpack.i.l.bf16 %v18419_v45  ;;  %v18717_v36 = vpack.i.bf16 %v14362_v1, %v14345_v24  ;;  %v11425_v40 = vcombine.low %v21671_v11, %v21914_v61 }
 0x27e   : > { %v12244_v47 = vrot.slane %v12236_v3, %v19372_v5  ;;  %v12251_v22 = vrot.slane %v12237_v42, %v19372_v5  ;;  %v12261_v53 = vrot.slane %v12253_v34, %v19372_v5  ;;  %v12268_v44 = vrot.slane %v12254_v27, %v19372_v5 }
 0x27f   : > { %v18712_v49 = vpack.i.bf16 %v13551_v0, %v13534_v6  ;;  %18718 = vrot.lane.b32.xlu1 %v18717_v36, %s19331_s26  ;;  %v11426_v21 = vcombine.low %v21919_v9, %v21935_v63  ;;  %v11433_v37 = vrot.slane %v11425_v40, %v19372_v5  ;;  %v11442_v1 = vcombine.low %v21927_v16, %v21922_v15  ;;  %v18434_v16 = vpop.permute.xlu1 %18433  ;;  %v17874_v6 = vld.sshfl [vmem:[%s19377_s18 + $0x160] sm:$0x3 pattern:$0x76325410] }
 0x280   : > { %v11443_v11 = vcombine.low %v21942_v33, %v21938_v13  ;;  %v22146_v61 = vsel %vm15088_vm2, %v21584_v25, %v18415_v62  ;;  %v22150_v23 = vsel %vm15088_vm2, %v21496_v29, %v18411_v17  ;;  %v12252_v9 = vcombine.low %v12244_v47, %v12251_v22 }
 0x281   : > { %18713 = vrot.lane.b32.xlu0 %v18712_v49, %s19329_s24  ;;  %v12269_v63 = vcombine.low %v12261_v53, %v12268_v44  ;;  %v22155_v15 = vsel %vm15088_vm2, %v21502_v2, %v18410_v14  ;;  %v11440_v13 = vrot.slane %v11426_v21, %v19372_v5  ;;  %v11450_v33 = vrot.slane %v11442_v1, %v19372_v5  ;;  %v22173_v14 = vpop.permute.xlu0 %18428  ;;  %v17823_v53 = vld [vmem:[%s19377_s18 + $0xa8] sm:$0xff] }
 0x282   : > { %v11457_v25 = vrot.slane %v11443_v11, %v19372_v5  ;;  %v22162_v29 = vsel %vm15088_vm2, %v21606_v55, %v18425_v52  ;;  %v22166_v7 = vsel %vm15088_vm2, %v21600_v48, %v18426_v20  ;;  %v18421_v56 = vunpack.i.h.bf16 %v18419_v45  ;;  %v17917_v11 = vld [vmem:[%s19377_s18 + $0x159] sm:$0xff] }
 0x283   : > { %v18727_v62 = vpack.i.bf16 %v12269_v63, %v12252_v9  ;;  %v22171_v2 = vsel %vm15088_vm2, %v21540_v41, %v18420_v50  ;;  %v11441_v38 = vcombine.low %v11433_v37, %v11440_v13  ;;  %v11930_v55 = vcombine.low %v21831_v18, %v22068_v46  ;;  %v17821_v50 = vld [vmem:[%s19377_s18 + $0x98] sm:$0xff]  ;;  %v22210_v49 = vpop.permute.xlu1 %18443 }
 0x284   : > { %v11458_v30 = vcombine.low %v11450_v33, %v11457_v25  ;;  %v18436_v8 = vunpack.i.h.bf16 %v18434_v16  ;;  %v11931_v48 = vcombine.low %v22077_v12, %v22093_v19  ;;  %v11947_v20 = vcombine.low %v22074_v26, %v22071_v28  ;;  %25237 = vst [vmem:[#allocation52_spill] sm:$0xff] %v22210_v49  ;;  %v17866_v25 = vld.sshfl [vmem:[%s19377_s18 + $0xa0] sm:$0x3 pattern:$0x76325410] }
 0x285   : > { %18728 = vrot.lane.b32.xlu1 %v18727_v62, %s19328_s23  ;;  %v11948_v41 = vcombine.low %v22088_v4, %v22084_v32  ;;  %v11938_v58 = vrot.slane %v11930_v55, %v19372_v5  ;;  %v5866_v10 = vcombine.high %v17845_v39, %v17845_v39  ;;  %v5873_v45 = vrot.slane %v17845_v39, %v19372_v5  ;;  %v22201_v0 = vpop.permute.xlu0 %18438 }
 0x286   : > { %v18722_v17 = vpack.i.bf16 %v11458_v30, %v11441_v38  ;;  %v11945_v18 = vrot.slane %v11931_v48, %v19372_v5  ;;  %v11955_v46 = vrot.slane %v11947_v20, %v19372_v5  ;;  %v5890_v12 = vcombine.high %v17847_v51, %v17847_v51  ;;  %v17919_v38 = vld [vmem:[%s19377_s18 + $0x169] sm:$0xff] }
 0x287   : > { %v11962_v24 = vrot.slane %v11948_v41, %v19372_v5  ;;  %v22193_v28 = vsel %vm15088_vm2, %v21546_v31, %v18421_v56  ;;  %v5880_v26 = vrot.slane %v5866_v10, %v19372_v5  ;;  %v5881_v32 = vcombine.high %v5873_v45, %v5873_v45  ;;  %v22234_v20 = vpop.permute.xlu1 %18453 }
 0x288   : > { %18723 = vrot.lane.b32.xlu0 %v18722_v17, %s19327_s22  ;;  %v5897_v4 = vrot.slane %v17847_v51, %v19372_v5  ;;  %v18435_v19 = vunpack.i.l.bf16 %v18434_v16  ;;  %v11946_v60 = vcombine.low %v11938_v58, %v11945_v18  ;;  %v22199_v3 = vrot.slane %v5890_v12, %v19372_v5 }
 0x289   : > { %v11963_v52 = vcombine.low %v11955_v46, %v11962_v24  ;;  %v5882_v42 = vcombine.high %v5880_v26, %v5880_v26  ;;  %v13047_v34 = vcombine.low %v5873_v45, %v5881_v32  ;;  %v22206_v36 = vsel %vm15088_vm2, %v21687_v35, %v18436_v8  ;;  %v22246_v32 = vld.sshfl [vmem:[%s19377_s18 + $0x161] sm:$0x3 pattern:$0x76325410] }
 0x28a   : > { %v5905_v31 = vcombine.high %v5897_v4, %v5897_v4  ;;  %v13064_v27 = vcombine.low %v17874_v6, %v5897_v4  ;;  %25236 = vst [vmem:[#allocation51_spill] sm:$0xff] %v22206_v36  ;;  %v18431_v47 = vunpack.i.h.bf16 %v22173_v14  ;;  %v18430_v40 = vunpack.i.l.bf16 %v22173_v14 }
 0x28b   : > { %v18737_v22 = vpack.i.bf16 %v11963_v52, %v11946_v60  ;;  %v13048_v44 = vcombine.low %v5880_v26, %v5882_v42  ;;  %v13055_v21 = vrot.slane %v13047_v34, %v19372_v5  ;;  %v22219_v35 = vsel %vm15088_vm2, %v21695_v54, %v18435_v19 }
 0x28c   : > { %v13065_v37 = vcombine.low %v5905_v31, %v22199_v3  ;;  %v13072_v1 = vrot.slane %v13064_v27, %v19372_v5  ;;  %v18441_v9 = vunpack.i.h.bf16 %v22201_v0  ;;  %v5538_v63 = vcombine.high %v17821_v50, %v17821_v50  ;;  %v25238_v31 = vld [vmem:[#allocation10_spill] sm:$0xff] }
 0x28d   : > { %18738 = vrot.lane.b32.xlu1 %v18737_v22, %s19328_s23  ;;  %v5545_v16 = vrot.slane %v17821_v50, %v19372_v5  ;;  %v13062_v13 = vrot.slane %v13048_v44, %v19372_v5  ;;  %v5562_v56 = vcombine.high %v17823_v53, %v17823_v53  ;;  %v5569_v62 = vrot.slane %v17823_v53, %v19372_v5 }
 0x28e   : > { %v13079_v33 = vrot.slane %v13065_v37, %v19372_v5  ;;  %v18440_v39 = vunpack.i.l.bf16 %v22201_v0  ;;  %v5552_v54 = vrot.slane %v5538_v63, %v19372_v5  ;;  %v6712_v30 = vcombine.high %v17917_v11, %v17917_v11  ;;  %v25241_v37 = vld [vmem:[#allocation9_spill] sm:$0xff] }
 0x28f   : > { %v5553_v14 = vcombine.high %v5545_v16, %v5545_v16  ;;  %v13063_v55 = vcombine.low %v13055_v21, %v13062_v13  ;;  %v22232_v8 = vrot.slane %v5562_v56, %v19372_v5  ;;  %v5577_v48 = vcombine.high %v5569_v62, %v5569_v62  ;;  %v17895_v13 = vld [vmem:[%s19377_s18 + $0xa9] sm:$0xff] }
 0x290   : > { %v13080_v51 = vcombine.low %v13072_v1, %v13079_v33  ;;  %v5554_v41 = vcombine.high %v5552_v54, %v5552_v54  ;;  %v12758_v58 = vcombine.low %v17866_v25, %v5569_v62  ;;  %v22237_v10 = vrot.slane %v17917_v11, %v19372_v5  ;;  %v18464_v11 = vpop.permute.xlu1 %18463 }
 0x291   : > { %v12741_v17 = vcombine.low %v5545_v16, %v5553_v14  ;;  %v12759_v18 = vcombine.low %v5577_v48, %v22232_v8  ;;  %v22241_v46 = vrot.slane %v6712_v30, %v19372_v5  ;;  %v6736_v24 = vcombine.high %v17919_v38, %v17919_v38  ;;  %v17938_v48 = vld.sshfl [vmem:[%s19377_s18 + $0xa1] sm:$0x3 pattern:$0x76325410] }
 0x292   : > { %v18732_v45 = vpack.i.bf16 %v13080_v51, %v13063_v55  ;;  %v12742_v6 = vcombine.low %v5552_v54, %v5554_v41  ;;  %v12766_v26 = vrot.slane %v12758_v58, %v19372_v5  ;;  %v22250_v4 = vcombine.high %v22237_v10, %v22237_v10 }
 0x293   : > { %v12749_v12 = vrot.slane %v12741_v17, %v19372_v5  ;;  %v12773_v19 = vrot.slane %v12759_v18, %v19372_v5  ;;  %v22256_v60 = vcombine.high %v22241_v46, %v22241_v46  ;;  %v22259_v52 = vrot.slane %v17919_v38, %v19372_v5  ;;  %v17989_v38 = vld [vmem:[%s19377_s18 + $0x15a] sm:$0xff]  ;;  %v22304_v17 = vpop.permute.xlu0 %18448 }
 0x294   : > { %18733 = vrot.lane.b32.xlu0 %v18732_v45, %s19330_s25  ;;  %v22262_v0 = vrot.slane %v6736_v24, %v19372_v5  ;;  %v22266_v42 = vsel %vm15088_vm2, %v21588_v43, %v18430_v40  ;;  %v22270_v34 = vsel %vm15088_vm2, %v25238_v31, %v18431_v47  ;;  %v12756_v27 = vrot.slane %v12742_v6, %v19372_v5  ;;  %v17893_v40 = vld [vmem:[%s19377_s18 + $0x99] sm:$0xff]  ;;  %v25239_v47 = vld [vmem:[#allocation6_spill] sm:$0xff] }
 0x295   : > { %v13858_v50 = vcombine.low %v22237_v10, %v22250_v4  ;;  %v12774_v22 = vcombine.low %v12766_v26, %v12773_v19  ;;  %v22277_v53 = vcombine.high %v22259_v52, %v22259_v52  ;;  %v13859_v44 = vcombine.low %v22241_v46, %v22256_v60  ;;  %25243 = vst [vmem:[#allocation9_spill] sm:$0xff] %v22304_v17  ;;  %v17991_v24 = vld [vmem:[%s19377_s18 + $0x16a] sm:$0xff] }
 0x296   : > { %v13875_v43 = vcombine.low %v22246_v32, %v22259_v52  ;;  %v22286_v21 = vsel %vm15088_vm2, %v25239_v47, %v18440_v39  ;;  %v22290_v1 = vsel %vm15088_vm2, %v25241_v37, %v18441_v9  ;;  %v12757_v63 = vcombine.low %v12749_v12, %v12756_v27 }
 0x297   : > { %25240 = vst [vmem:[#allocation10_spill] sm:$0xff] %v22286_v21  ;;  %25242 = vst [vmem:[#allocation6_spill] sm:$0xff] %v22290_v1  ;;  %v13866_v16 = vrot.slane %v13858_v50, %v19372_v5  ;;  %v18456_v33 = vunpack.i.h.bf16 %v22234_v20  ;;  %v13873_v25 = vrot.slane %v13859_v44, %v19372_v5  ;;  %v13876_v56 = vcombine.low %v22277_v53, %v22262_v0 }
 0x298   : > { %v13883_v62 = vrot.slane %v13875_v43, %v19372_v5  ;;  %v18455_v39 = vunpack.i.l.bf16 %v22234_v20  ;;  %v18747_v9 = vpack.i.bf16 %v12774_v22, %v12757_v63  ;;  %v6384_v54 = vcombine.high %v17893_v40, %v17893_v40 }
 0x299   : > { %v6391_v14 = vrot.slane %v17893_v40, %v19372_v5  ;;  %v18466_v30 = vunpack.i.h.bf16 %v18464_v11  ;;  %v13874_v55 = vcombine.low %v13866_v16, %v13873_v25  ;;  %v13890_v51 = vrot.slane %v13876_v56, %v19372_v5 }
 0x29a   : > { %v6408_v41 = vcombine.high %v17895_v13, %v17895_v13  ;;  %v18465_v58 = vunpack.i.l.bf16 %v18464_v11  ;;  %18748 = vrot.lane.b32.xlu1 %v18747_v9, %s19330_s25  ;;  %v6398_v45 = vrot.slane %v6384_v54, %v19372_v5  ;;  %v6415_v18 = vrot.slane %v17895_v13, %v19372_v5  ;;  %v22327_v13 = vld.sshfl [vmem:[%s19377_s18 + $0x162] sm:$0x3 pattern:$0x76325410]  ;;  %v25244_v54 = vld [vmem:[#allocation48_spill] sm:$0xff] }
 0x29b   : > { %v6399_v20 = vcombine.high %v6391_v14, %v6391_v14  ;;  %v13891_v6 = vcombine.low %v13883_v62, %v13890_v51  ;;  %v7558_v26 = vcombine.high %v17989_v38, %v17989_v38  ;;  %v22314_v19 = vrot.slane %v17989_v38, %v19372_v5  ;;  %v25246_v38 = vld [vmem:[#allocation17_spill] sm:$0xff]  ;;  %v18459_v51 = vpop.permute.xlu0 %18458 }
 0x29c   : > { %v22311_v12 = vrot.slane %v6408_v41, %v19372_v5  ;;  %v6400_v31 = vcombine.high %v6398_v45, %v6398_v45  ;;  %v6423_v27 = vcombine.high %v6415_v18, %v6415_v18  ;;  %v13569_v22 = vcombine.low %v17938_v48, %v6415_v18 }
 0x29d   : > { %v13552_v50 = vcombine.low %v6391_v14, %v6399_v20  ;;  %v18742_v44 = vpack.i.bf16 %v13891_v6, %v13874_v55  ;;  %v22317_v43 = vrot.slane %v7558_v26, %v19372_v5  ;;  %v22321_v40 = vcombine.high %v22314_v19, %v22314_v19  ;;  %v25250_v6 = vld [vmem:[#allocation49_spill] sm:$0xff] }
 0x29e   : > { %v7582_v47 = vcombine.high %v17991_v24, %v17991_v24  ;;  %v13553_v37 = vcombine.low %v6398_v45, %v6400_v31  ;;  %v13570_v63 = vcombine.low %v6423_v27, %v22311_v12  ;;  %v13577_v16 = vrot.slane %v13569_v22, %v19372_v5  ;;  %v18474_v31 = vpop.permute.xlu1 %18473 }
 0x29f   : > { %v13560_v11 = vrot.slane %v13552_v50, %v19372_v5  ;;  %18743 = vrot.lane.b32.xlu0 %v18742_v44, %s19329_s24  ;;  %v22332_v25 = vcombine.high %v22317_v43, %v22317_v43  ;;  %v22335_v56 = vrot.slane %v17991_v24, %v19372_v5  ;;  %v14669_v9 = vcombine.low %v22314_v19, %v22321_v40 }
 0x2a0   : > { %v22338_v62 = vrot.slane %v7582_v47, %v19372_v5  ;;  %v22344_v14 = vsel %vm15088_vm2, %v25244_v54, %v18455_v39  ;;  %v22348_v55 = vsel %vm15088_vm2, %v25246_v38, %v18456_v33  ;;  %v13567_v48 = vrot.slane %v13553_v37, %v19372_v5  ;;  %v25248_v33 = vld [vmem:[#allocation24_spill] sm:$0xff] }
 0x2a1   : > { %25245 = vst [vmem:[#allocation48_spill] sm:$0xff] %v22344_v14  ;;  %25247 = vst [vmem:[#allocation17_spill] sm:$0xff] %v22348_v55  ;;  %v13584_v41 = vrot.slane %v13570_v63, %v19372_v5  ;;  %v22354_v45 = vcombine.high %v22335_v56, %v22335_v56  ;;  %v14670_v20 = vcombine.low %v22317_v43, %v22332_v25  ;;  %v18461_v22 = vunpack.i.h.bf16 %v18459_v51  ;;  %v17965_v54 = vld [vmem:[%s19377_s18 + $0x9a] sm:$0xff]  ;;  %v17968_v55 = vld [vmem:[%s19377_s18 + $0xb2] sm:$0xff] }
 0x2a2   : > { %v14677_v39 = vrot.slane %v14669_v9, %v19372_v5  ;;  %v14686_v18 = vcombine.low %v22327_v13, %v22335_v56  ;;  %v22363_v24 = vsel %vm15088_vm2, %v25248_v33, %v18465_v58  ;;  %v22367_v26 = vsel %vm15088_vm2, %v25250_v6, %v18466_v30 }
 0x2a3   : > { %25249 = vst [vmem:[#allocation24_spill] sm:$0xff] %v22363_v24  ;;  %25251 = vst [vmem:[#allocation49_spill] sm:$0xff] %v22367_v26  ;;  %v13568_v27 = vcombine.low %v13560_v11, %v13567_v48  ;;  %v13585_v50 = vcombine.low %v13577_v16, %v13584_v41  ;;  %v14684_v44 = vrot.slane %v14670_v20, %v19372_v5  ;;  %v18460_v63 = vunpack.i.l.bf16 %v18459_v51  ;;  %v17967_v41 = vld [vmem:[%s19377_s18 + $0xaa] sm:$0xff] }
 0x2a4   : > { %v14687_v47 = vcombine.low %v22354_v45, %v22338_v62  ;;  %v14694_v37 = vrot.slane %v14686_v18, %v19372_v5  ;;  %v11459_v58 = vcombine.low %v21954_v57, %v22237_v10  ;;  %v11460_v30 = vcombine.low %v22250_v4, %v22241_v46  ;;  %v22389_v4 = vld.sshfl [vmem:[%s19377_s18 + $0xa2] sm:$0x3 pattern:$0x76325410] }
 0x2a5   : > { %v18757_v9 = vpack.i.bf16 %v13585_v50, %v13568_v27  ;;  %v18476_v11 = vunpack.i.h.bf16 %v18474_v31  ;;  %v14685_v16 = vcombine.low %v14677_v39, %v14684_v44  ;;  %v11476_v48 = vcombine.low %v22256_v60, %v22246_v32  ;;  %v25252_v27 = vld [vmem:[#allocation14_spill] sm:$0xff] }
 0x2a6   : > { %v14701_v38 = vrot.slane %v14687_v47, %v19372_v5  ;;  %v18475_v20 = vunpack.i.l.bf16 %v18474_v31  ;;  %v11467_v51 = vrot.slane %v11459_v58, %v19372_v5  ;;  %v11474_v18 = vrot.slane %v11460_v30, %v19372_v5  ;;  %v18469_v47 = vpop.permute.xlu0 %18468  ;;  %v25254_v30 = vld [vmem:[#allocation8_spill] sm:$0xff] }
 0x2a7   : > { %18758 = vrot.lane.b32.xlu1 %v18757_v9, %s19329_s24  ;;  %v11477_v57 = vcombine.low %v22259_v52, %v22277_v53  ;;  %v11484_v46 = vrot.slane %v11476_v48, %v19372_v5  ;;  %v7230_v39 = vcombine.high %v17965_v54, %v17965_v54  ;;  %v22392_v33 = vrot.slane %v17965_v54, %v19372_v5  ;;  %v18484_v48 = vpop.permute.xlu1 %18483 }
 0x2a8   : > { %v14702_v10 = vcombine.low %v14694_v37, %v14701_v38  ;;  %v11475_v32 = vcombine.low %v11467_v51, %v11474_v18  ;;  %v7254_v6 = vcombine.high %v17967_v41, %v17967_v41  ;;  %v22396_v31 = vrot.slane %v17967_v41, %v19372_v5  ;;  %v17848_v18 = vld [vmem:[%s19377_s18 + $0x170] sm:$0xff] }
 0x2a9   : > { %v11491_v60 = vrot.slane %v11477_v57, %v19372_v5  ;;  %v22400_v52 = vsel %vm15088_vm2, %v25252_v27, %v18461_v22  ;;  %v22403_v50 = vrot.slane %v7230_v39, %v19372_v5  ;;  %v22407_v44 = vcombine.high %v22392_v33, %v22392_v33  ;;  %v25258_v57 = vld [vmem:[#allocation28_spill] sm:$0xff] }
 0x2aa   : > { %25253 = vst [vmem:[#allocation14_spill] sm:$0xff] %v22400_v52  ;;  %v18752_v53 = vpack.i.bf16 %v14702_v10, %v14685_v16  ;;  %v22410_v9 = vrot.slane %v7254_v6, %v19372_v5  ;;  %v22414_v58 = vcombine.high %v22396_v31, %v22396_v31  ;;  %v14380_v22 = vcombine.low %v22389_v4, %v22396_v31  ;;  %v25256_v16 = vld [vmem:[#allocation34_spill] sm:$0xff]  ;;  %v22442_v39 = vld [vmem:[%s19377_s18 + $0x180] sm:$0xff]  ;;  %v22455_v17 = vpop.permute.xlu0 %18478 }
 0x2ab   : > { %v11492_v37 = vcombine.low %v11484_v46, %v11491_v60  ;;  %v22420_v54 = vsel %vm15088_vm2, %v25254_v30, %v18460_v63  ;;  %v22424_v38 = vsel %vm15088_vm2, %v25256_v16, %v18475_v20  ;;  %v22429_v41 = vcombine.high %v22403_v50, %v22403_v50  ;;  %v22463_v36 = vpop.permute.xlu1 %18493 }
 0x2ac   : > { %25255 = vst [vmem:[#allocation8_spill] sm:$0xff] %v22420_v54  ;;  %25257 = vst [vmem:[#allocation34_spill] sm:$0xff] %v22424_v38  ;;  %18753 = vrot.lane.b32.xlu0 %v18752_v53, %s19331_s26  ;;  %v14363_v51 = vcombine.low %v22392_v33, %v22407_v44  ;;  %v22436_v10 = vsel %vm15088_vm2, %v25258_v57, %v18476_v11  ;;  %v14381_v20 = vcombine.low %v22414_v58, %v22410_v9 }
 0x2ad   : > { %25259 = vst [vmem:[#allocation28_spill] sm:$0xff] %v22436_v10  ;;  %v18767_v63 = vpack.i.bf16 %v11492_v37, %v11475_v32  ;;  %v14388_v46 = vrot.slane %v14380_v22, %v19372_v5  ;;  %v18471_v60 = vunpack.i.h.bf16 %v18469_v47  ;;  %v18470_v6 = vunpack.i.l.bf16 %v18469_v47 }
 0x2ae   : > { %v14364_v27 = vcombine.low %v22403_v50, %v22429_v41  ;;  %v14371_v53 = vrot.slane %v14363_v51, %v19372_v5  ;;  %v18486_v30 = vunpack.i.h.bf16 %v18484_v48  ;;  %v14395_v11 = vrot.slane %v14381_v20, %v19372_v5 }
 0x2af   : > { %18768 = vrot.lane.b32.xlu1 %v18767_v63, %s19327_s22  ;;  %v5906_v32 = vcombine.high %v22199_v3, %v22199_v3  ;;  %v5907_v37 = vcombine.high %v17848_v18, %v17848_v18  ;;  %v18485_v22 = vunpack.i.l.bf16 %v18484_v48  ;;  %v5914_v47 = vrot.slane %v17848_v18, %v19372_v5  ;;  %v25260_v63 = vld [vmem:[#allocation36_spill] sm:$0xff]  ;;  %v17875_v48 = vld.sshfl [vmem:[%s19377_s18 + $0x178] sm:$0x3 pattern:$0x76325410] }
 0x2b0   : > { %v14378_v16 = vrot.slane %v14364_v27, %v19372_v5  ;;  %v5938_v57 = vrot.slane %v22442_v39, %v19372_v5  ;;  %v14396_v51 = vcombine.low %v14388_v46, %v14395_v11  ;;  %v12270_v20 = vcombine.low %v25260_v63, %v22314_v19  ;;  %25261 = vst [vmem:[#allocation36_spill] sm:$0xff] %v22463_v36 }
 0x2b1   : > { %v5921_v49 = vrot.slane %v5907_v37, %v19372_v5  ;;  %v12271_v3 = vcombine.low %v22321_v40, %v22317_v43  ;;  %v5922_v1 = vcombine.high %v5914_v47, %v5914_v47  ;;  %v13081_v18 = vcombine.low %v5906_v32, %v5914_v47 }
 0x2b2   : > { %v14379_v21 = vcombine.low %v14371_v53, %v14378_v16  ;;  %v5946_v27 = vcombine.high %v5938_v57, %v5938_v57  ;;  %v12278_v38 = vrot.slane %v12270_v20, %v19372_v5  ;;  %v12287_v11 = vcombine.low %v22332_v25, %v22327_v13  ;;  %v25262_v53 = vld [vmem:[#allocation23_spill] sm:$0xff] }
 0x2b3   : > { %v5923_v10 = vcombine.high %v5921_v49, %v5921_v49  ;;  %v12285_v46 = vrot.slane %v12271_v3, %v19372_v5  ;;  %v13082_v37 = vcombine.low %v5922_v1, %v5921_v49  ;;  %v13089_v43 = vrot.slane %v13081_v18, %v19372_v5  ;;  %v17920_v20 = vld [vmem:[%s19377_s18 + $0x171] sm:$0xff] }
 0x2b4   : > { %v18762_v19 = vpack.i.bf16 %v14396_v51, %v14379_v21  ;;  %v13099_v40 = vcombine.low %v5938_v57, %v5946_v27  ;;  %v22472_v16 = vsel %vm15088_vm2, %v25262_v53, %v18471_v60  ;;  %v12288_v47 = vcombine.low %v22335_v56, %v22354_v45  ;;  %v25264_v3 = vld [vmem:[#allocation38_spill] sm:$0xff]  ;;  %v25266_v49 = vld [vmem:[#allocation39_spill] sm:$0xff]  ;;  %v22493_v45 = vpop.permute.xlu0 %18488  ;;  %v22498_v51 = vld [vmem:[%s19377_s18 + $0x181] sm:$0xff] }
 0x2b5   : > { %25263 = vst [vmem:[#allocation23_spill] sm:$0xff] %v22472_v16  ;;  %v13098_v32 = vcombine.low %v5923_v10, %v17875_v48  ;;  %v12295_v63 = vrot.slane %v12287_v11, %v19372_v5  ;;  %v22480_v13 = vsel %vm15088_vm2, %v25264_v3, %v18470_v6  ;;  %v22484_v21 = vsel %vm15088_vm2, %v25266_v49, %v18485_v22  ;;  %v25268_v10 = vld [vmem:[#allocation45_spill] sm:$0xff] }
 0x2b6   : > { %25265 = vst [vmem:[#allocation38_spill] sm:$0xff] %v22480_v13  ;;  %25267 = vst [vmem:[#allocation39_spill] sm:$0xff] %v22484_v21  ;;  %18763 = vrot.lane.b32.xlu0 %v18762_v19, %s19331_s26  ;;  %v13096_v1 = vrot.slane %v13082_v37, %v19372_v5  ;;  %v13113_v25 = vrot.slane %v13099_v40, %v19372_v5  ;;  %v22491_v56 = vsel %vm15088_vm2, %v25268_v10, %v18486_v30  ;;  %v22506_v37 = vpop.permute.xlu1 %18498  ;;  %v25272_v40 = vld [vmem:[#allocation35_spill] sm:$0xff] }
 0x2b7   : > { %25269 = vst [vmem:[#allocation45_spill] sm:$0xff] %v22491_v56  ;;  %25270 = vst [vmem:[#allocation53_spill] sm:$0xff] %v22493_v45  ;;  %v13106_v60 = vrot.slane %v13098_v32, %v19372_v5  ;;  %v12286_v6 = vcombine.low %v12278_v38, %v12285_v46  ;;  %v12302_v57 = vrot.slane %v12288_v47, %v19372_v5  ;;  %v18481_v22 = vunpack.i.h.bf16 %v22455_v17 }
 0x2b8   : > { %25271 = vst [vmem:[#allocation54_spill] sm:$0xff] %v22498_v51  ;;  %v13097_v48 = vcombine.low %v13089_v43, %v13096_v1  ;;  %v22503_v27 = vcombine.high %v22262_v0, %v22262_v0  ;;  %v6753_v18 = vcombine.high %v17920_v20, %v17920_v20  ;;  %v18480_v30 = vunpack.i.l.bf16 %v22455_v17 }
 0x2b9   : > { %v13114_v11 = vcombine.low %v13106_v60, %v13113_v25  ;;  %v12303_v19 = vcombine.low %v12295_v63, %v12302_v57  ;;  %v22509_v38 = vrot.slane %v17920_v20, %v19372_v5  ;;  %v22516_v43 = vrot.slane %v22498_v51, %v19372_v5  ;;  %v22523_v63 = vld.sshfl [vmem:[%s19377_s18 + $0x179] sm:$0x3 pattern:$0x76325410]  ;;  %v22544_v25 = vpop.permute.xlu0 %10906 }
 0x2ba   : > { %v22512_v46 = vrot.slane %v6753_v18, %v19372_v5  ;;  %v11964_v53 = vcombine.low %v25272_v40, %v22392_v33  ;;  %v11965_v17 = vcombine.low %v22407_v44, %v22403_v50  ;;  %v18501_v1 = vunpack.i.h.bf16 %v22506_v37  ;;  %25274 = vst [vmem:[#allocation55_spill] sm:$0xff] %v22544_v25  ;;  %v25277_v40 = vld [vmem:[#allocation19_spill] sm:$0xff] }
 0x2bb   : > { %v18777_v32 = vpack.i.bf16 %v13114_v11, %v13097_v48  ;;  %v18772_v47 = vpack.i.bf16 %v12303_v19, %v12286_v6  ;;  %v22527_v20 = vcombine.high %v22509_v38, %v22509_v38  ;;  %v13892_v3 = vcombine.low %v22503_v27, %v22509_v38  ;;  %v25275_v11 = vld [vmem:[#allocation27_spill] sm:$0xff] }
 0x2bc   : > { %v22533_v49 = vcombine.high %v22512_v46, %v22512_v46  ;;  %v22537_v33 = vcombine.high %v22516_v43, %v22516_v43  ;;  %v11972_v50 = vrot.slane %v11964_v53, %v19372_v5  ;;  %v11979_v44 = vrot.slane %v11965_v17, %v19372_v5  ;;  %v18509_v17 = vpop.permute.xlu1 %18508 }
 0x2bd   : > { %18778 = vrot.lane.b32.xlu1 %v18777_v32, %s19330_s25  ;;  %18773 = vrot.lane.b32.xlu0 %v18772_v47, %s19328_s23  ;;  %v13893_v10 = vcombine.low %v22527_v20, %v22512_v46  ;;  %v13900_v60 = vrot.slane %v13892_v3, %v19372_v5  ;;  %v11981_v6 = vcombine.low %v22429_v41, %v22389_v4  ;;  %v17992_v32 = vld [vmem:[%s19377_s18 + $0x172] sm:$0xff]  ;;  %v18504_v36 = vpop.permute.xlu0 %18503 }
 0x2be   : > { %25273 = vst [vmem:[#allocation35_spill] sm:$0xff] %v22537_v33  ;;  %v13909_v57 = vcombine.low %v22533_v49, %v22523_v63  ;;  %v13910_v48 = vcombine.low %v22516_v43, %v22537_v33  ;;  %v11982_v18 = vcombine.low %v22396_v31, %v22414_v58  ;;  %v22559_v19 = vsel %vm15088_vm2, %v25275_v11, %v18480_v30  ;;  %v22572_v30 = vld [vmem:[%s19377_s18 + $0x182] sm:$0xff] }
 0x2bf   : > { %25276 = vst [vmem:[#allocation27_spill] sm:$0xff] %v22559_v19  ;;  %v22563_v53 = vsel %vm15088_vm2, %v25277_v40, %v18481_v22  ;;  %v13907_v4 = vrot.slane %v13893_v10, %v19372_v5  ;;  %v11989_v41 = vrot.slane %v11981_v6, %v19372_v5  ;;  %v11980_v31 = vcombine.low %v11972_v50, %v11979_v44  ;;  %v25280_v22 = vld [vmem:[#allocation32_spill] sm:$0xff] }
 0x2c0   : > { %25278 = vst [vmem:[#allocation19_spill] sm:$0xff] %v22563_v53  ;;  %v13917_v47 = vrot.slane %v13909_v57, %v19372_v5  ;;  %v13924_v3 = vrot.slane %v13910_v48, %v19372_v5  ;;  %v11996_v58 = vrot.slane %v11982_v18, %v19372_v5  ;;  %25279 = vst [vmem:[#allocation56_spill] sm:$0xff] %v22572_v30  ;;  %v18500_v11 = vunpack.i.l.bf16 %v22506_v37  ;;  %v17824_v57 = vld [vmem:[%s19377_s18 + $0xb0] sm:$0xff] }
 0x2c1   : > { %v22577_v40 = vsel %vm15130_vm3, %v25280_v22, %v18501_v1  ;;  %v13908_v10 = vcombine.low %v13900_v60, %v13907_v4  ;;  %v22581_v6 = vcombine.high %v22338_v62, %v22338_v62  ;;  %v18511_v44 = vunpack.i.h.bf16 %v18509_v17  ;;  %v22592_v1 = vld [vmem:[%s19377_s18 + $0xc0] sm:$0xff] }
 0x2c2   : > { %v13925_v48 = vcombine.low %v13917_v47, %v13924_v3  ;;  %v11997_v50 = vcombine.low %v11989_v41, %v11996_v58  ;;  %v7599_v25 = vcombine.high %v17992_v32, %v17992_v32  ;;  %v18510_v18 = vunpack.i.l.bf16 %v18509_v17  ;;  %v22600_v47 = vld.sshfl [vmem:[%s19377_s18 + $0x17a] sm:$0x3 pattern:$0x76325410] }
 0x2c3   : > { %v22585_v45 = vrot.slane %v17992_v32, %v19372_v5  ;;  %v22589_v37 = vrot.slane %v22572_v30, %v19372_v5  ;;  %v5578_v60 = vcombine.high %v22232_v8, %v22232_v8  ;;  %v5579_v17 = vcombine.high %v17824_v57, %v17824_v57 }
 0x2c4   : > { %v18787_v4 = vpack.i.bf16 %v13925_v48, %v13908_v10  ;;  %v18782_v22 = vpack.i.bf16 %v11997_v50, %v11980_v31  ;;  %v22597_v41 = vrot.slane %v7599_v25, %v19372_v5  ;;  %v5586_v31 = vrot.slane %v17824_v57, %v19372_v5 }
 0x2c5   : > { %v22604_v32 = vcombine.high %v22585_v45, %v22585_v45  ;;  %v22608_v3 = vcombine.high %v22589_v37, %v22589_v37  ;;  %v14703_v8 = vcombine.low %v22581_v6, %v22585_v45  ;;  %v18506_v25 = vunpack.i.h.bf16 %v18504_v36 }
 0x2c6   : > { %18788 = vrot.lane.b32.xlu1 %v18787_v4, %s19329_s24  ;;  %18783 = vrot.lane.b32.xlu0 %v18782_v22, %s19328_s23  ;;  %v22617_v58 = vcombine.high %v22597_v41, %v22597_v41  ;;  %v5593_v10 = vrot.slane %v5579_v17, %v19372_v5  ;;  %v5610_v48 = vrot.slane %v22592_v1, %v19372_v5  ;;  %v17867_v4 = vld.sshfl [vmem:[%s19377_s18 + $0xb8] sm:$0x3 pattern:$0x76325410]  ;;  %v18505_v16 = vunpack.i.l.bf16 %v18504_v36 }
 0x2c7   : > { %25281 = vst [vmem:[#allocation32_spill] sm:$0xff] %v22608_v3  ;;  %v14704_v50 = vcombine.low %v22604_v32, %v22597_v41  ;;  %v14711_v56 = vrot.slane %v14703_v8, %v19372_v5  ;;  %v14721_v57 = vcombine.low %v22589_v37, %v22608_v3  ;;  %v5594_v22 = vcombine.high %v5586_v31, %v5586_v31  ;;  %v25282_v3 = vld [vmem:[#allocation50_spill] sm:$0xff] }
 0x2c8   : > { %v14720_v21 = vcombine.low %v22617_v58, %v22600_v47  ;;  %v5595_v19 = vcombine.high %v5593_v10, %v5593_v10  ;;  %v5618_v53 = vcombine.high %v5610_v48, %v5610_v48  ;;  %v12775_v17 = vcombine.low %v5578_v60, %v5586_v31 }
 0x2c9   : > { %v14718_v13 = vrot.slane %v14704_v50, %v19372_v5  ;;  %v14735_v26 = vrot.slane %v14721_v57, %v19372_v5  ;;  %v12776_v24 = vcombine.low %v5594_v22, %v5593_v10  ;;  %v22637_v33 = vsel %vm15130_vm3, %v25282_v3, %v18500_v11  ;;  %v22651_v11 = vld [vmem:[%s19377_s18 + $0xc2] sm:$0xff]  ;;  %v22683_v22 = vld.sshfl [vmem:[%s19377_s18 + $0xba] sm:$0x3 pattern:$0x76325410] }
 0x2ca   : > { %v14728_v8 = vrot.slane %v14720_v21, %v19372_v5  ;;  %v12783_v54 = vrot.slane %v12775_v17, %v19372_v5  ;;  %v12792_v52 = vcombine.low %v5595_v19, %v17867_v4  ;;  %v12793_v14 = vcombine.low %v5610_v48, %v5618_v53  ;;  %v18519_v48 = vpop.permute.xlu1 %18518  ;;  %25285 = vst [vmem:[#allocation58_spill] sm:$0xff] %v22651_v11  ;;  %v25286_v3 = vld [vmem:[#allocation25_spill] sm:$0xff] }
 0x2cb   : > { %v22641_v36 = vsel %vm15130_vm3, %v22150_v23, %v18511_v44  ;;  %v14719_v60 = vcombine.low %v14711_v56, %v14718_v13  ;;  %v12790_v31 = vrot.slane %v12776_v24, %v19372_v5  ;;  %v22646_v21 = vsel %vm15130_vm3, %v22155_v15, %v18510_v18  ;;  %v17896_v56 = vld [vmem:[%s19377_s18 + $0xb1] sm:$0xff]  ;;  %v22670_v50 = vld [vmem:[%s19377_s18 + $0xc1] sm:$0xff] }
 0x2cc   : > { %25283 = vst [vmem:[#allocation50_spill] sm:$0xff] %v22641_v36  ;;  %25284 = vst [vmem:[#allocation57_spill] sm:$0xff] %v22646_v21  ;;  %v14736_v19 = vcombine.low %v14728_v8, %v14735_v26  ;;  %v12800_v53 = vrot.slane %v12792_v52, %v19372_v5  ;;  %v12807_v10 = vrot.slane %v12793_v14, %v19372_v5  ;;  %v25288_v26 = vld [vmem:[#allocation26_spill] sm:$0xff] }
 0x2cd   : > { %v22655_v23 = vsel %vm15130_vm3, %v25286_v3, %v18506_v25  ;;  %v12791_v13 = vcombine.low %v12783_v54, %v12790_v31  ;;  %v22659_v24 = vcombine.high %v22410_v9, %v22410_v9  ;;  %v7271_v15 = vcombine.high %v17968_v55, %v17968_v55  ;;  %25290 = vst [vmem:[#allocation59_spill] sm:$0xff] %v22670_v50 }
 0x2ce   : > { %25287 = vst [vmem:[#allocation25_spill] sm:$0xff] %v22655_v23  ;;  %v22664_v52 = vsel %vm15130_vm3, %v25288_v26, %v18505_v16  ;;  %v18797_v14 = vpack.i.bf16 %v14736_v19, %v14719_v60  ;;  %v12808_v44 = vcombine.low %v12800_v53, %v12807_v10  ;;  %v22667_v18 = vrot.slane %v17968_v55, %v19372_v5  ;;  %v22691_v60 = vpop.permute.xlu0 %18513  ;;  %v18529_v30 = vpop.permute.xlu1 %18528 }
 0x2cf   : > { %25289 = vst [vmem:[#allocation26_spill] sm:$0xff] %v22664_v52  ;;  %v18520_v25 = vunpack.i.l.bf16 %v18519_v48  ;;  %v22673_v54 = vrot.slane %v7271_v15, %v19372_v5  ;;  %v22677_v57 = vrot.slane %v22651_v11, %v19372_v5  ;;  %v6424_v4 = vcombine.high %v22311_v12, %v22311_v12 }
 0x2d0   : > { %18798 = vrot.lane.b32.xlu1 %v18797_v14, %s19331_s26  ;;  %v18792_v16 = vpack.i.bf16 %v12808_v44, %v12791_v13  ;;  %v22687_v55 = vcombine.high %v22667_v18, %v22667_v18  ;;  %v14397_v17 = vcombine.low %v22659_v24, %v22667_v18  ;;  %v6425_v8 = vcombine.high %v17896_v56, %v17896_v56 }
 0x2d1   : > { %v22695_v31 = vcombine.high %v22673_v54, %v22673_v54  ;;  %v22699_v12 = vcombine.high %v22677_v57, %v22677_v57  ;;  %v6432_v19 = vrot.slane %v17896_v56, %v19372_v5  ;;  %v6456_v53 = vrot.slane %v22670_v50, %v19372_v5  ;;  %v17939_v56 = vld.sshfl [vmem:[%s19377_s18 + $0xb9] sm:$0x3 pattern:$0x76325410] }
 0x2d2   : > { %18793 = vrot.lane.b32.xlu0 %v18792_v16, %s19330_s25  ;;  %v18521_v10 = vunpack.i.h.bf16 %v18519_v48  ;;  %v14398_v3 = vcombine.low %v22687_v55, %v22673_v54  ;;  %v14405_v13 = vrot.slane %v14397_v17, %v19372_v5  ;;  %v6439_v15 = vrot.slane %v6425_v8, %v19372_v5 }
 0x2d3   : > { %25291 = vst [vmem:[#allocation60_spill] sm:$0xff] %v22699_v12  ;;  %v14414_v26 = vcombine.low %v22695_v31, %v22683_v22  ;;  %v14415_v14 = vcombine.low %v22677_v57, %v22699_v12  ;;  %v6440_v44 = vcombine.high %v6432_v19, %v6432_v19  ;;  %v6464_v36 = vcombine.high %v6456_v53, %v6456_v53 }
 0x2d4   : > { %v22716_v16 = vsel %vm15130_vm3, %v22171_v2, %v18520_v25  ;;  %v14412_v48 = vrot.slane %v14398_v3, %v19372_v5  ;;  %v6441_v21 = vcombine.high %v6439_v15, %v6439_v15  ;;  %v13586_v11 = vcombine.low %v6424_v4, %v6432_v19 }
 0x2d5   : > { %25292 = vst [vmem:[#allocation61_spill] sm:$0xff] %v22716_v16  ;;  %v14422_v17 = vrot.slane %v14414_v26, %v19372_v5  ;;  %v14429_v8 = vrot.slane %v14415_v14, %v19372_v5  ;;  %v13587_v52 = vcombine.low %v6440_v44, %v6439_v15  ;;  %v13604_v23 = vcombine.low %v6456_v53, %v6464_v36  ;;  %v18524_v26 = vpop.permute.xlu0 %18523 }
 0x2d6   : > { %v22723_v12 = vsel %vm15130_vm3, %v22193_v28, %v18521_v10  ;;  %v14413_v50 = vcombine.low %v14405_v13, %v14412_v48  ;;  %v13594_v51 = vrot.slane %v13586_v11, %v19372_v5  ;;  %v13603_v2 = vcombine.low %v6441_v21, %v17939_v56 }
 0x2d7   : > { %25293 = vst [vmem:[#allocation62_spill] sm:$0xff] %v22723_v12  ;;  %v18516_v25 = vunpack.i.h.bf16 %v22691_v60  ;;  %v14430_v3 = vcombine.low %v14422_v17, %v14429_v8  ;;  %v13601_v4 = vrot.slane %v13587_v52, %v19372_v5  ;;  %v13618_v19 = vrot.slane %v13604_v23, %v19372_v5  ;;  %v17851_v8 = vld [vmem:[%s19377_s18 + $0x188] sm:$0xff] }
 0x2d8   : > { %v18515_v15 = vunpack.i.l.bf16 %v22691_v60  ;;  %v13611_v36 = vrot.slane %v13603_v2, %v19372_v5  ;;  %v18531_v53 = vunpack.i.h.bf16 %v18529_v30  ;;  %v12304_v28 = vcombine.low %v22338_v62, %v22581_v6 }
 0x2d9   : > { %v18807_v10 = vpack.i.bf16 %v14430_v3, %v14413_v50  ;;  %v13602_v13 = vcombine.low %v13594_v51, %v13601_v4  ;;  %v12305_v21 = vcombine.low %v22585_v45, %v22604_v32  ;;  %v12321_v11 = vcombine.low %v22597_v41, %v22617_v58  ;;  %v22792_v3 = vld [vmem:[%s19377_s18 + $0x198] sm:$0xff] }
 0x2da   : > { %v13619_v52 = vcombine.low %v13611_v36, %v13618_v19  ;;  %v18530_v14 = vunpack.i.l.bf16 %v18529_v30  ;;  %v18525_v23 = vunpack.i.l.bf16 %v18524_v26  ;;  %v12312_v56 = vrot.slane %v12304_v28, %v19372_v5 }
 0x2db   : > { %18808 = vrot.lane.b32.xlu1 %v18807_v10, %s19331_s26  ;;  %v12319_v60 = vrot.slane %v12305_v21, %v19372_v5  ;;  %v12322_v62 = vcombine.low %v22600_v47, %v22589_v37  ;;  %v12329_v51 = vrot.slane %v12321_v11, %v19372_v5  ;;  %v11493_v45 = vcombine.low %v22262_v0, %v22503_v27  ;;  %v22753_v47 = vpop.permute.xlu1 %18538 }
 0x2dc   : > { %v18802_v6 = vpack.i.bf16 %v13619_v52, %v13602_v13  ;;  %v11494_v41 = vcombine.low %v22509_v38, %v22527_v20  ;;  %v11510_v30 = vcombine.low %v22512_v46, %v22533_v49  ;;  %v11511_v32 = vcombine.low %v22523_v63, %v22516_v43  ;;  %25294 = vst [vmem:[#allocation63_spill] sm:$0xff] %v22753_v47 }
 0x2dd   : > { %v18526_v58 = vunpack.i.h.bf16 %v18524_v26  ;;  %v12320_v50 = vcombine.low %v12312_v56, %v12319_v60  ;;  %v12336_v44 = vrot.slane %v12322_v62, %v19372_v5  ;;  %v11501_v37 = vrot.slane %v11493_v45, %v19372_v5  ;;  %v17876_v26 = vld.sshfl [vmem:[%s19377_s18 + $0x190] sm:$0x3 pattern:$0x76325410]  ;;  %v17827_v60 = vld [vmem:[%s19377_s18 + $0xc8] sm:$0xff] }
 0x2de   : > { %v22757_v0 = vsel %vm15130_vm3, %v22117_v59, %v18516_v25  ;;  %18803 = vrot.lane.b32.xlu0 %v18802_v6, %s19329_s24  ;;  %v11508_v27 = vrot.slane %v11494_v41, %v19372_v5  ;;  %v11518_v38 = vrot.slane %v11510_v30, %v19372_v5  ;;  %v11525_v46 = vrot.slane %v11511_v32, %v19372_v5  ;;  %v22787_v25 = vpop.permute.xlu0 %18533  ;;  %v22824_v41 = vld [vmem:[%s19377_s18 + $0xd8] sm:$0xff] }
 0x2df   : > { %v22765_v43 = vsel %vm15130_vm3, %v22146_v61, %v18515_v15  ;;  %v22769_v63 = vsel %vm15130_vm3, %v22266_v42, %v18530_v14  ;;  %v22773_v59 = vsel %vm15130_vm3, %v22270_v34, %v18531_v53  ;;  %v12337_v20 = vcombine.low %v12329_v51, %v12336_v44  ;;  %25300 = vst [vmem:[#allocation69_spill] sm:$0xff] %v22787_v25  ;;  %v18549_v36 = vpop.permute.xlu1 %18548  ;;  %v25307_v51 = vld [vmem:[#allocation26_spill] sm:$0xff] }
 0x2e0   : > { %25295 = vst [vmem:[#allocation64_spill] sm:$0xff] %v22765_v43  ;;  %25296 = vst [vmem:[#allocation65_spill] sm:$0xff] %v22769_v63  ;;  %v22777_v49 = vsel %vm15130_vm3, %v22162_v29, %v18525_v23  ;;  %v11509_v48 = vcombine.low %v11501_v37, %v11508_v27  ;;  %v11526_v17 = vcombine.low %v11518_v38, %v11525_v46  ;;  %v18535_v53 = vunpack.i.l.bf16 %v22787_v25  ;;  %v17868_v37 = vld.sshfl [vmem:[%s19377_s18 + $0xd0] sm:$0x3 pattern:$0x76325410] }
 0x2e1   : > { %25297 = vst [vmem:[#allocation66_spill] sm:$0xff] %v22773_v59  ;;  %25298 = vst [vmem:[#allocation67_spill] sm:$0xff] %v22777_v49  ;;  %v11998_v61 = vcombine.low %v22410_v9, %v22659_v24  ;;  %v22784_v42 = vsel %vm15130_vm3, %v22166_v7, %v18526_v58  ;;  %v18817_v2 = vpack.i.bf16 %v12337_v20, %v12320_v50  ;;  %v18550_v11 = vunpack.i.l.bf16 %v18549_v36  ;;  %v17923_v46 = vld [vmem:[%s19377_s18 + $0x189] sm:$0xff] }
 0x2e2   : > { %25299 = vst [vmem:[#allocation68_spill] sm:$0xff] %v22784_v42  ;;  %v11999_v29 = vcombine.low %v22667_v18, %v22687_v55  ;;  %v18812_v4 = vpack.i.bf16 %v11526_v17, %v11509_v48  ;;  %v12015_v9 = vcombine.low %v22673_v54, %v22695_v31  ;;  %v12016_v7 = vcombine.low %v22683_v22, %v22677_v57 }
 0x2e3   : > { %v12006_v19 = vrot.slane %v11998_v61, %v19372_v5  ;;  %18818 = vrot.lane.b32.xlu1 %v18817_v2, %s19328_s23  ;;  %v5931_v15 = vcombine.high %v22442_v39, %v22442_v39  ;;  %v5948_v18 = vcombine.high %v17851_v8, %v17851_v8  ;;  %v5955_v55 = vrot.slane %v17851_v8, %v19372_v5  ;;  %v22842_v61 = vpop.permute.xlu0 %18543 }
 0x2e4   : > { %v12013_v24 = vrot.slane %v11999_v29, %v19372_v5  ;;  %18813 = vrot.lane.b32.xlu0 %v18812_v4, %s19327_s22  ;;  %v12023_v54 = vrot.slane %v12015_v9, %v19372_v5  ;;  %v12030_v57 = vrot.slane %v12016_v7, %v19372_v5  ;;  %v22811_v22 = vrot.slane %v22792_v3, %v19372_v5  ;;  %v25303_v29 = vld [vmem:[#allocation54_spill] sm:$0xff] }
 0x2e5   : > { %v5945_v39 = vrot.slane %v5931_v15, %v19372_v5  ;;  %v5962_v28 = vrot.slane %v5948_v18, %v19372_v5  ;;  %v5963_v10 = vcombine.high %v5955_v55, %v5955_v55  ;;  %v18551_v56 = vunpack.i.h.bf16 %v18549_v36  ;;  %25302 = vst [vmem:[#allocation71_spill] sm:$0xff] %v22842_v61  ;;  %v22854_v18 = vld [vmem:[%s19377_s18 + $0x199] sm:$0xff]  ;;  %v22859_v36 = vpop.permute.xlu1 %18558 }
 0x2e6   : > { %v12014_v31 = vcombine.low %v12006_v19, %v12013_v24  ;;  %v12031_v13 = vcombine.low %v12023_v54, %v12030_v57  ;;  %v13133_v21 = vcombine.low %v17876_v26, %v22811_v22  ;;  %v22821_v45 = vsel %vm15130_vm3, %v22219_v35, %v18535_v53 }
 0x2e7   : > { %v5947_v52 = vcombine.high %v5945_v39, %v5945_v39  ;;  %v5964_v14 = vcombine.high %v5962_v28, %v5962_v28  ;;  %v13116_v23 = vcombine.low %v5955_v55, %v5963_v10  ;;  %25301 = vst [vmem:[#allocation70_spill] sm:$0xff] %v22821_v45  ;;  %v22831_v44 = vsel %vm15172_vm4, %v22637_v33, %v18550_v11 }
 0x2e8   : > { %v18827_v6 = vpack.i.bf16 %v12031_v13, %v12014_v31  ;;  %v13147_v50 = vrot.slane %v13133_v21, %v19372_v5  ;;  %v5603_v35 = vcombine.high %v22592_v1, %v22592_v1  ;;  %v5620_v27 = vcombine.high %v17827_v60, %v17827_v60  ;;  %v22870_v13 = vld.sshfl [vmem:[%s19377_s18 + $0x191] sm:$0x3 pattern:$0x76325410] }
 0x2e9   : > { %v13115_v30 = vcombine.low %v5945_v39, %v5947_v52  ;;  %v13130_v32 = vrot.slane %v13116_v23, %v19372_v5  ;;  %v13132_v58 = vcombine.low %v5962_v28, %v5964_v14  ;;  %v5627_v38 = vrot.slane %v17827_v60, %v19372_v5 }
 0x2ea   : > { %18828 = vrot.lane.b32.xlu1 %v18827_v6, %s19328_s23  ;;  %v15174_v17 = vsel %vm15172_vm4, %v22577_v40, %v18551_v56  ;;  %v22846_v33 = vrot.slane %v22824_v41, %v19372_v5  ;;  %v5617_v1 = vrot.slane %v5603_v35, %v19372_v5  ;;  %v5634_v8 = vrot.slane %v5620_v27, %v19372_v5  ;;  %v18554_v56 = vpop.permute.xlu0 %18553 }
 0x2eb   : > { %v13123_v20 = vrot.slane %v13115_v30, %v19372_v5  ;;  %v13140_v48 = vrot.slane %v13132_v58, %v19372_v5  ;;  %v5635_v2 = vcombine.high %v5627_v38, %v5627_v38  ;;  %v6777_v4 = vcombine.high %v25303_v29, %v25303_v29  ;;  %v22907_v29 = vld [vmem:[%s19377_s18 + $0xd9] sm:$0xff] }
 0x2ec   : > { %v12827_v7 = vcombine.low %v17868_v37, %v22846_v33  ;;  %v6794_v40 = vcombine.high %v17923_v46, %v17923_v46  ;;  %v5619_v24 = vcombine.high %v5617_v1, %v5617_v1  ;;  %v5636_v26 = vcombine.high %v5634_v8, %v5634_v8 }
 0x2ed   : > { %v13131_v19 = vcombine.low %v13123_v20, %v13130_v32  ;;  %v13148_v9 = vcombine.low %v13140_v48, %v13147_v50  ;;  %v12810_v15 = vcombine.low %v5627_v38, %v5635_v2  ;;  %v22857_v55 = vrot.slane %v6777_v4, %v19372_v5  ;;  %v17899_v20 = vld [vmem:[%s19377_s18 + $0xc9] sm:$0xff]  ;;  %v19229_v4 = vld [vmem:[%s25053_s1] sm:$0xff]  }
 0x2ee   : > { %v12841_v54 = vrot.slane %v12827_v7, %v19372_v5  ;;  %v22863_v57 = vrot.slane %v17923_v46, %v19372_v5  ;;  %v22866_v31 = vrot.slane %v6794_v40, %v19372_v5  ;;  %v12809_v39 = vcombine.low %v5617_v1, %v5619_v24  ;;  %v25304_v7 = vld [vmem:[#allocation59_spill] sm:$0xff]  ;;  %v17995_v24 = vld [vmem:[%s19377_s18 + $0x18a] sm:$0xff] }
 0x2ef   : > { %v18822_v53 = vpack.i.bf16 %v13148_v9, %v13131_v19  ;;  %v12824_v28 = vrot.slane %v12810_v15, %v19372_v5  ;;  %v12826_v10 = vcombine.low %v5634_v8, %v5636_v26  ;;  %v22874_v21 = vcombine.high %v22857_v55, %v22857_v55 }
 0x2f0   : > { %v22879_v11 = vcombine.high %v22863_v57, %v22863_v57  ;;  %v22883_v52 = vcombine.high %v22866_v31, %v22866_v31  ;;  %v22887_v14 = vrot.slane %v22854_v18, %v19372_v5  ;;  %v18561_v23 = vunpack.i.h.bf16 %v22859_v36 }
 0x2f1   : > { %18823 = vrot.lane.b32.xlu0 %v18822_v53, %s19330_s25  ;;  %v12817_v60 = vrot.slane %v12809_v39, %v19372_v5  ;;  %v12834_v6 = vrot.slane %v12826_v10, %v19372_v5  ;;  %v13926_v30 = vcombine.low %v22857_v55, %v22874_v21  ;;  %v18560_v32 = vunpack.i.l.bf16 %v22859_v36  ;;  %v17940_v39 = vld.sshfl [vmem:[%s19377_s18 + $0xd1] sm:$0x3 pattern:$0x76325410] }
 0x2f2   : > { %v13927_v58 = vcombine.low %v22863_v57, %v22879_v11  ;;  %v13943_v50 = vcombine.low %v22866_v31, %v22883_v52  ;;  %v13944_v37 = vcombine.low %v22870_v13, %v22887_v14  ;;  %v18556_v46 = vunpack.i.h.bf16 %v18554_v56 }
 0x2f3   : > { %v12825_v35 = vcombine.low %v12817_v60, %v12824_v28  ;;  %v12842_v27 = vcombine.low %v12834_v6, %v12841_v54  ;;  %v13934_v38 = vrot.slane %v13926_v30, %v19372_v5  ;;  %v18555_v2 = vunpack.i.l.bf16 %v18554_v56  ;;  %v22932_v60 = vld [vmem:[%s19377_s18 + $0x19a] sm:$0xff] }
 0x2f4   : > { %v13941_v48 = vrot.slane %v13927_v58, %v19372_v5  ;;  %v13951_v1 = vrot.slane %v13943_v50, %v19372_v5  ;;  %v13958_v8 = vrot.slane %v13944_v37, %v19372_v5  ;;  %v22913_v9 = vsel %vm15214_vm5, %v15174_v17, %v18556_v46  ;;  %v22942_v46 = vld.sshfl [vmem:[%s19377_s18 + $0x192] sm:$0x3 pattern:$0x76325410] }
 0x2f5   : > { %v18837_v19 = vpack.i.bf16 %v12842_v27, %v12825_v35  ;;  %v6449_v40 = vcombine.high %v25304_v7, %v25304_v7  ;;  %v22920_v53 = vsel %vm15214_vm5, %v22831_v44, %v18555_v2  ;;  %v25100_v54 = vmov 0.0   ;;  %v25305_v44 = vld [vmem:[#allocation56_spill] sm:$0xff] }
 0x2f6   : > { %v13942_v26 = vcombine.low %v13934_v38, %v13941_v48  ;;  %v13959_v15 = vcombine.low %v13951_v1, %v13958_v8  ;;  %18075 = vmatprep.subr.bf16.mxu0 %v25100_v54  ;;  %v6466_v28 = vcombine.high %v17899_v20, %v17899_v20  ;;  %v6473_v10 = vrot.slane %v17899_v20, %v19372_v5 }
 0x2f7   : > { %18838 = vrot.lane.b32.xlu1 %v18837_v19, %s19330_s25  ;;  %v6463_v17 = vrot.slane %v6449_v40, %v19372_v5  ;;  %v22929_v56 = vrot.slane %v22907_v29, %v19372_v5  ;;  %v7623_v6 = vcombine.high %v25305_v44, %v25305_v44  ;;  %v7640_v50 = vcombine.high %v17995_v24, %v17995_v24  ;;  %v18569_v19 = vpop.permute.xlu1 %18568 }
 0x2f8   : > { %v18832_v30 = vpack.i.bf16 %v13959_v15, %v13942_v26  ;;  %v6480_v58 = vrot.slane %v6466_v28, %v19372_v5  ;;  %v22938_v37 = vrot.slane %v17995_v24, %v19372_v5  ;;  %18076 = vmatpush3.bf16.msra.mxu0 %v19229_v4  ;;  %v6481_v27 = vcombine.high %v6473_v10, %v6473_v10 }
 0x2f9   : > { %v6465_v35 = vcombine.high %v6463_v17, %v6463_v17  ;;  %v13638_v38 = vcombine.low %v17940_v39, %v22929_v56  ;;  %v22945_v20 = vrot.slane %v7623_v6, %v19372_v5  ;;  %18077 = vmatprep.subr.bf16.mxu0 %v25100_v54  ;;  %v22950_v1 = vrot.slane %v7640_v50, %v19372_v5 }
 0x2fa   : > { %18833 = vrot.lane.b32.xlu0 %v18832_v30, %s19329_s24  ;;  %v6482_v48 = vcombine.high %v6480_v58, %v6480_v58  ;;  %v22954_v8 = vcombine.high %v22938_v37, %v22938_v37  ;;  %v22958_v2 = vrot.slane %v22932_v60, %v19372_v5  ;;  %v13621_v40 = vcombine.low %v6473_v10, %v6481_v27 }
 0x2fb   : > { %v13620_v7 = vcombine.low %v6463_v17, %v6465_v35  ;;  %v13652_v24 = vrot.slane %v13638_v38, %v19372_v5  ;;  %v22963_v26 = vcombine.high %v22945_v20, %v22945_v20  ;;  %18163 = vmatprep.subr.bf16.mxu1 %v25100_v54  ;;  %v22968_v39 = vcombine.high %v22950_v1, %v22950_v1 }
 0x2fc   : > { %v13637_v15 = vcombine.low %v6480_v58, %v6482_v48  ;;  %v14738_v28 = vcombine.low %v22938_v37, %v22954_v8  ;;  %v14755_v17 = vcombine.low %v22942_v46, %v22958_v2  ;;  %18165 = vmatpush3.bf16.msra.mxu1 %v19229_v4  ;;  %v13635_v44 = vrot.slane %v13621_v40, %v19372_v5  ;;  %v18564_v4 = vpop.permute.xlu0 %18563  ;;  %v25306_v40 = vld [vmem:[#allocation25_spill] sm:$0xff] }
 0x2fd   : > { %v13628_v10 = vrot.slane %v13620_v7, %v19372_v5  ;;  %v14737_v6 = vcombine.low %v22945_v20, %v22963_v26  ;;  %v18571_v30 = vunpack.i.h.bf16 %v18569_v19  ;;  %18164 = vmatprep.subr.bf16.mxu1 %v25100_v54  ;;  %v14754_v35 = vcombine.low %v22950_v1, %v22968_v39 }
 0x2fe   : > { %v13645_v58 = vrot.slane %v13637_v15, %v19372_v5  ;;  %v14752_v50 = vrot.slane %v14738_v28, %v19372_v5  ;;  %v14769_v27 = vrot.slane %v14755_v17, %v19372_v5  ;;  %v18570_v7 = vunpack.i.l.bf16 %v18569_v19 }
 0x2ff   : > { %v13636_v38 = vcombine.low %v13628_v10, %v13635_v44  ;;  %v14745_v48 = vrot.slane %v14737_v6, %v19372_v5  ;;  %v22987_v62 = vsel %vm15172_vm4, %v25306_v40, %v18571_v30  ;;  %v14762_v15 = vrot.slane %v14754_v35, %v19372_v5  ;;  %v17971_v30 = vld [vmem:[%s19377_s18 + $0xca] sm:$0xff] }
 0x300   : > { %v13653_v34 = vcombine.low %v13645_v58, %v13652_v24  ;;  %v22992_v17 = vsel %vm15172_vm4, %v25307_v51, %v18570_v7  ;;  %v18566_v10 = vunpack.i.h.bf16 %v18564_v4  ;;  %v18565_v44 = vunpack.i.l.bf16 %v18564_v4 }
 0x301   : > { %v14753_v28 = vcombine.low %v14745_v48, %v14752_v50  ;;  %v14770_v6 = vcombine.low %v14762_v15, %v14769_v27  ;;  %v15257_v19 = vsel %vm15256_vm6, %v22920_v53, %v18560_v32  ;;  %v15258_v24 = vsel %vm15256_vm6, %v22913_v9, %v18561_v23  ;;  %v23014_v32 = vld [vmem:[%s19377_s18 + $0xda] sm:$0xff]  ;;  %v23023_v27 = vpop.permute.xlu1 %18578 }
 0x302   : > { %v18847_v54 = vpack.i.bf16 %v13653_v34, %v13636_v38  ;;  %v23004_v58 = vsel %vm15298_vm7, %v15257_v19, %v18565_v44  ;;  %v23007_v51 = vsel %vm15298_vm7, %v15258_v24, %v18566_v10  ;;  %v25308_v34 = vld [vmem:[#allocation35_spill] sm:$0xff]  ;;  %v11528_v35 = vcombine.low %v22874_v21, %v22863_v57 }
 0x303   : > { %v11527_v50 = vcombine.low %v25308_v34, %v22857_v55  ;;  %v18842_v36 = vpack.i.bf16 %v14770_v6, %v14753_v28  ;;  %v11544_v9 = vcombine.low %v22879_v11, %v22866_v31  ;;  %v11545_v53 = vcombine.low %v22883_v52, %v22870_v13  ;;  %v18574_v55 = vpop.permute.xlu0 %18573  ;;  %v23028_v21 = vld.sshfl [vmem:[%s19377_s18 + $0xd2] sm:$0x3 pattern:$0x76325410]  ;;  %v19232_v6 = vld [vmem:[%s25053_s1 + $0x8] sm:$0x3f]  }
 0x304   : > { %18848 = vrot.lane.b32.xlu1 %v18847_v54, %s19329_s24  ;;  %v11542_v57 = vrot.slane %v11528_v35, %v19372_v5  ;;  %v25309_v54 = vld [vmem:[#allocation58_spill] sm:$0xff]  ;;  %v7312_v48 = vcombine.high %v17971_v30, %v17971_v30  ;;  %v23036_v13 = vrot.slane %v17971_v30, %v19372_v5  ;;  %v23040_v52 = vrot.slane %v23014_v32, %v19372_v5 }
 0x305   : > { %v11535_v4 = vrot.slane %v11527_v50, %v19372_v5  ;;  %v7295_v38 = vcombine.high %v25309_v54, %v25309_v54  ;;  %18843 = vrot.lane.b32.xlu0 %v18842_v36, %s19331_s26  ;;  %v11552_v31 = vrot.slane %v11544_v9, %v19372_v5  ;;  %v11559_v11 = vrot.slane %v11545_v53, %v19372_v5  ;;  %v23069_v53 = vpop.permute.xlu1 %18588 }
 0x306   : > { %v23046_v15 = vrot.slane %v7312_v48, %v19372_v5  ;;  %v23050_v10 = vcombine.high %v23036_v13, %v23036_v13  ;;  %v14449_v44 = vcombine.low %v23028_v21, %v23040_v52  ;;  %v19333_v36 = vmov 65535  }
 0x307   : > { %v11543_v7 = vcombine.low %v11535_v4, %v11542_v57  ;;  %v23043_v40 = vrot.slane %v7295_v38, %v19372_v5  ;;  %v11560_v28 = vcombine.low %v11552_v31, %v11559_v11  ;;  %v15442_v9 = vsel %vm15440_vm8, 4294967295, %v19333_v36  ;;  %v23071_v4 = vpop.permute.xlu0 %18583 }
 0x308   : > { %v23063_v24 = vcombine.high %v23046_v15, %v23046_v15  ;;  %v14432_v50 = vcombine.low %v23036_v13, %v23050_v10  ;;  %v14463_v35 = vrot.slane %v14449_v44, %v19372_v5  ;;  %v15443_v38 = vsel %vm15441_vm9, %v15442_v9, 0  ;;  %v17854_v44 = vld [vmem:[%s19377_s18 + $0x1a0] sm:$0xff] }
 0x309   : > { %v23059_v19 = vcombine.high %v23043_v40, %v23043_v40  ;;  %v18857_v34 = vpack.i.bf16 %v11560_v28, %v11543_v7  ;;  %v18580_v48 = vunpack.i.l.bf16 %v23023_v27  ;;  %v15445_v11 = vand.u32 %v19232_v6, %v15443_v38  ;;  %v25311_v38 = vld [vmem:[#allocation32_spill] sm:$0xff] }
 0x30a   : > { %v14448_v54 = vcombine.low %v23046_v15, %v23063_v24  ;;  %v14446_v31 = vrot.slane %v14432_v50, %v19372_v5  ;;  %v18576_v7 = vunpack.i.h.bf16 %v18574_v55  ;;  %v18575_v28 = vunpack.i.l.bf16 %v18574_v55 }
 0x30b   : > { %v14431_v57 = vcombine.low %v23043_v40, %v23059_v19  ;;  %18858 = vrot.lane.b32.xlu1 %v18857_v34, %s19327_s22  ;;  %v5972_v23 = vcombine.high %v22792_v3, %v22792_v3  ;;  %18078 = vmatpush3.bf16.msra.mxu0 %v15445_v11  ;;  %v25310_v50 = vmov 0.0   ;;  %v5987_v55 = vcombine.high %v22811_v22, %v22811_v22  ;;  %v23101_v22 = vpop.permute.xlu1 %18598 }
 0x30c   : > { %v14456_v30 = vrot.slane %v14448_v54, %v19372_v5  ;;  %v15217_v9 = vsel %vm15214_vm5, %v22992_v17, %v18575_v28  ;;  %v15218_v34 = vsel %vm15214_vm5, %v22987_v62, %v18576_v7  ;;  %18079 = vmatprep.mubr.msk.bf16.mxu0 %vm19334_vm10, %v25310_v50  ;;  %v5989_v54 = vcombine.high %v17854_v44, %v17854_v44 }
 0x30d   : > { %v14439_v36 = vrot.slane %v14431_v57, %v19372_v5  ;;  %v5986_v3 = vrot.slane %v5972_v23, %v19372_v5  ;;  %18166 = vmatpush3.bf16.msra.mxu1 %v15445_v11  ;;  %v5996_v17 = vrot.slane %v17854_v44, %v19372_v5  ;;  %v12338_v62 = vcombine.low %v25311_v38, %v22945_v20 }
 0x30e   : > { %v14464_v57 = vcombine.low %v14456_v30, %v14463_v35  ;;  %v12339_v7 = vcombine.low %v22963_v26, %v22938_v37  ;;  %v12355_v28 = vcombine.low %v22954_v8, %v22950_v1  ;;  %18123 = vmatprep.mubr.msk.bf16.mxu1 %vm19334_vm10, %v25310_v50  ;;  %v6003_v35 = vrot.slane %v5989_v54, %v19372_v5  ;;  %v17877_v37 = vld.sshfl [vmem:[%s19377_s18 + $0x1a8] sm:$0x3 pattern:$0x76325410] }
 0x30f   : > { %v14447_v6 = vcombine.low %v14439_v36, %v14446_v31  ;;  %v23103_v31 = vpop.permute.xlu0 %18593  ;;  %v5988_v30 = vcombine.high %v5986_v3, %v5986_v3  ;;  %v13149_v11 = vcombine.low %v5987_v55, %v5986_v3  ;;  %v25312_v20 = vpack.c.bf16 %v23007_v51, %v23004_v58 }
 0x310   : > { %v6004_v26 = vcombine.high %v5996_v17, %v5996_v17  ;;  %v12346_v1 = vrot.slane %v12338_v62, %v19372_v5  ;;  %v12353_v8 = vrot.slane %v12339_v7, %v19372_v5  ;;  %v12356_v44 = vcombine.low %v22968_v39, %v22942_v46 }
 0x311   : > { %v18852_v23 = vpack.i.bf16 %v14464_v57, %v14447_v6  ;;  %18080 = vmatmul.mubr.msk.bf16.vlgmr.msra.gmra.mrb[0].mxu0 %vm15376_vm11, %v25312_v20  ;;  %v6005_v36 = vcombine.high %v6003_v35, %v6003_v35  ;;  %v13150_v55 = vcombine.low %v5988_v30, %v5996_v17  ;;  %v13157_v58 = vrot.slane %v13149_v11, %v19372_v5  ;;  %v23132_v11 = vpop.permute.xlu1 %18608 }
 0x312   : > { %18083 = vmatprep.mubr.msk.bf16.mxu0 %vm19334_vm10, %v25310_v50  ;;  %v12363_v51 = vrot.slane %v12355_v28, %v19372_v5  ;;  %v13166_v6 = vcombine.low %v6004_v26, %v6003_v35  ;;  %v12354_v57 = vcombine.low %v12346_v1, %v12353_v8  ;;  %v12370_v3 = vrot.slane %v12356_v44, %v19372_v5  ;;  %v17926_v35 = vld [vmem:[%s19377_s18 + $0x1a1] sm:$0xff] }
 0x313   : > { %18853 = vrot.lane.b32.xlu0 %v18852_v23, %s19331_s26  ;;  %v18591_v54 = vunpack.i.h.bf16 %v23069_v53  ;;  %v13164_v46 = vrot.slane %v13150_v55, %v19372_v5  ;;  %v13167_v39 = vcombine.low %v6005_v36, %v17877_v37  ;;  %v18590_v38 = vunpack.i.l.bf16 %v23069_v53  ;;  %v25313_v23 = vld [vmem:[#allocation17_spill] sm:$0xff]  ;;  %v23134_v20 = vpop.permute.xlu0 %18603  ;;  %v25314_v1 = vld [vmem:[#allocation48_spill] sm:$0xff] }
 0x314   : > { %v18586_v62 = vunpack.i.h.bf16 %v23071_v4  ;;  %v13174_v7 = vrot.slane %v13166_v6, %v19372_v5  ;;  %v12371_v17 = vcombine.low %v12363_v51, %v12370_v3  ;;  %v18585_v28 = vunpack.i.l.bf16 %v23071_v4 }
 0x315   : > { %v15154_v30 = vsel %vm15130_vm3, %v25313_v23, %v18591_v54  ;;  %v13165_v26 = vcombine.low %v13157_v58, %v13164_v46  ;;  %v13181_v37 = vrot.slane %v13167_v39, %v19372_v5  ;;  %v15153_v53 = vsel %vm15130_vm3, %v25314_v1, %v18590_v38 }
 0x316   : > { %v15259_v8 = vsel %vm15256_vm6, %v15217_v9, %v18580_v48  ;;  %v18862_v44 = vpack.i.bf16 %v12371_v17, %v12354_v57  ;;  %v25315_v36 = vunpack.i.h.bf16 %v23023_v27  ;;  %v6818_v58 = vcombine.high %v22854_v18, %v22854_v18 }
 0x317   : > { %v15301_v55 = vsel %vm15298_vm7, %v15259_v8, %v18585_v28  ;;  %v13182_v51 = vcombine.low %v13174_v7, %v13181_v37  ;;  %v23151_v3 = vcombine.high %v22887_v14, %v22887_v14  ;;  %v6835_v54 = vcombine.high %v17926_v35, %v17926_v35 }
 0x318   : > { %v15260_v4 = vsel %vm15256_vm6, %v15218_v34, %v25315_v36  ;;  %18863 = vrot.lane.b32.xlu0 %v18862_v44, %s19328_s23  ;;  %v23155_v27 = vrot.slane %v6818_v58, %v19372_v5  ;;  %v23158_v9 = vrot.slane %v17926_v35, %v19372_v5  ;;  %v25316_v34 = vld [vmem:[#allocation60_spill] sm:$0xff]  ;;  %v12033_v39 = vcombine.low %v23059_v19, %v23036_v13  ;;  %v23184_v13 = vpop.permute.xlu1 %18618 }
 0x319   : > { %v15302_v6 = vsel %vm15298_vm7, %v15260_v4, %v18586_v62  ;;  %v12032_v18 = vcombine.low %v25316_v34, %v23043_v40  ;;  %v18867_v57 = vpack.i.bf16 %v13182_v51, %v13165_v26  ;;  %v23163_v46 = vrot.slane %v6835_v54, %v19372_v5  ;;  %v23170_v62 = vld.sshfl [vmem:[%s19377_s18 + $0x1a9] sm:$0x3 pattern:$0x76325410] }
 0x31a   : > { %v15341_v48 = vpack.c.bf16 %v15302_v6, %v15301_v55  ;;  %v12049_v38 = vcombine.low %v23050_v10, %v23046_v15  ;;  %25317 = vst [vmem:[#allocation54_spill] sm:$0xff] %v23170_v62  ;;  %v23174_v7 = vcombine.high %v23155_v27, %v23155_v27  ;;  %v23178_v17 = vcombine.high %v23158_v9, %v23158_v9  ;;  %v23186_v15 = vpop.permute.xlu0 %18613  ;;  %v17998_v4 = vld [vmem:[%s19377_s18 + $0x1a2] sm:$0xff] }
 0x31b   : > { %v13960_v40 = vcombine.low %v23151_v3, %v23155_v27  ;;  %v12040_v23 = vrot.slane %v12032_v18, %v19372_v5  ;;  %18868 = vrot.lane.b32.xlu1 %v18867_v57, %s19330_s25  ;;  %v23191_v10 = vcombine.high %v23163_v46, %v23163_v46  ;;  %v12047_v19 = vrot.slane %v12033_v39, %v19372_v5  ;;  %v17830_v57 = vld [vmem:[%s19377_s18 + $0xe0] sm:$0xff] }
 0x31c   : > { %18084 = vmatmul.mubr.msk.bf16.gmra.mrb[4].mxu0 %vm15376_vm11, %v15341_v48  ;;  %v12050_v28 = vcombine.low %v23063_v24, %v23028_v21  ;;  %v12057_v35 = vrot.slane %v12049_v38, %v19372_v5  ;;  %v13961_v26 = vcombine.low %v23174_v7, %v23158_v9  ;;  %v13977_v1 = vcombine.low %v23178_v17, %v23163_v46 }
 0x31d   : > { %v13968_v37 = vrot.slane %v13960_v40, %v19372_v5  ;;  %18087 = vmatprep.mubr.msk.bf16.mxu0 %vm19334_vm10, %v25310_v50  ;;  %v13978_v44 = vcombine.low %v23191_v10, %v23170_v62  ;;  %v12048_v21 = vcombine.low %v12040_v23, %v12047_v19  ;;  %v18600_v36 = vunpack.i.l.bf16 %v23101_v22  ;;  %v23224_v19 = vpop.permute.xlu1 %18628 }
 0x31e   : > { %v12064_v24 = vrot.slane %v12050_v28, %v19372_v5  ;;  %v13975_v55 = vrot.slane %v13961_v26, %v19372_v5  ;;  %v13985_v58 = vrot.slane %v13977_v1, %v19372_v5  ;;  %v18596_v51 = vunpack.i.h.bf16 %v23103_v31 }
 0x31f   : > { %v18595_v6 = vunpack.i.l.bf16 %v23103_v31  ;;  %v13992_v54 = vrot.slane %v13978_v44, %v19372_v5  ;;  %v7664_v34 = vcombine.high %v22932_v60, %v22932_v60  ;;  %v23219_v18 = vcombine.high %v22958_v2, %v22958_v2  ;;  %v23226_v31 = vpop.permute.xlu0 %18623 }
 0x320   : > { %v12065_v48 = vcombine.low %v12057_v35, %v12064_v24  ;;  %v13976_v39 = vcombine.low %v13968_v37, %v13975_v55  ;;  %v15196_v40 = vsel %vm15172_vm4, %v15154_v30, %v18596_v51  ;;  %v7681_v23 = vcombine.high %v17998_v4, %v17998_v4 }
 0x321   : > { %v15195_v38 = vsel %vm15172_vm4, %v15153_v53, %v18595_v6  ;;  %v13993_v28 = vcombine.low %v13985_v58, %v13992_v54  ;;  %v23229_v60 = vrot.slane %v7664_v34, %v19372_v5  ;;  %v23232_v26 = vrot.slane %v17998_v4, %v19372_v5  ;;  %v17869_v34 = vld.sshfl [vmem:[%s19377_s18 + $0xe8] sm:$0x3 pattern:$0x76325410] }
 0x322   : > { %v18872_v35 = vpack.i.bf16 %v12065_v48, %v12048_v21  ;;  %v23235_v37 = vrot.slane %v7681_v23, %v19372_v5  ;;  %v5644_v53 = vcombine.high %v22824_v41, %v22824_v41  ;;  %v5659_v30 = vcombine.high %v22846_v33, %v22846_v33  ;;  %v23243_v21 = vld.sshfl [vmem:[%s19377_s18 + $0x1aa] sm:$0x3 pattern:$0x76325410] }
 0x323   : > { %v5661_v1 = vcombine.high %v17830_v57, %v17830_v57  ;;  %v18877_v44 = vpack.i.bf16 %v13993_v28, %v13976_v39  ;;  %25318 = vst [vmem:[#allocation59_spill] sm:$0xff] %v23243_v21  ;;  %v23247_v24 = vcombine.high %v23229_v60, %v23229_v60  ;;  %v23251_v4 = vcombine.high %v23232_v26, %v23232_v26 }
 0x324   : > { %18873 = vrot.lane.b32.xlu0 %v18872_v35, %s19328_s23  ;;  %v14771_v41 = vcombine.low %v23219_v18, %v23229_v60  ;;  %v23257_v33 = vcombine.high %v23235_v37, %v23235_v37  ;;  %v5658_v55 = vrot.slane %v5644_v53, %v19372_v5  ;;  %v5668_v58 = vrot.slane %v17830_v57, %v19372_v5  ;;  %v23272_v53 = vpop.permute.xlu1 %18638 }
 0x325   : > { %v5675_v51 = vrot.slane %v5661_v1, %v19372_v5  ;;  %18878 = vrot.lane.b32.xlu1 %v18877_v44, %s19329_s24  ;;  %v14772_v6 = vcombine.low %v23247_v24, %v23232_v26  ;;  %v14788_v48 = vcombine.low %v23251_v4, %v23235_v37  ;;  %v18611_v39 = vunpack.i.h.bf16 %v23132_v11  ;;  %v23274_v1 = vpop.permute.xlu0 %18633 }
 0x326   : > { %v14779_v54 = vrot.slane %v14771_v41, %v19372_v5  ;;  %v14789_v23 = vcombine.low %v23257_v33, %v23243_v21  ;;  %v5660_v28 = vcombine.high %v5658_v55, %v5658_v55  ;;  %v5676_v57 = vcombine.high %v5668_v58, %v5668_v58 }
 0x327   : > { %v5677_v35 = vcombine.high %v5675_v51, %v5675_v51  ;;  %v14786_v44 = vrot.slane %v14772_v6, %v19372_v5  ;;  %v14796_v41 = vrot.slane %v14788_v48, %v19372_v5  ;;  %v12843_v8 = vcombine.low %v5659_v30, %v5658_v55 }
 0x328   : > { %v18610_v61 = vunpack.i.l.bf16 %v23132_v11  ;;  %v14803_v47 = vrot.slane %v14789_v23, %v19372_v5  ;;  %v12844_v45 = vcombine.low %v5660_v28, %v5668_v58  ;;  %v12860_v25 = vcombine.low %v5676_v57, %v5675_v51  ;;  %v17974_v58 = vld [vmem:[%s19377_s18 + $0xe2] sm:$0xff] }
 0x329   : > { %v12861_v63 = vcombine.low %v5677_v35, %v17869_v34  ;;  %v14787_v59 = vcombine.low %v14779_v54, %v14786_v44  ;;  %v12851_v49 = vrot.slane %v12843_v8, %v19372_v5  ;;  %v15237_v42 = vsel %vm15214_vm5, %v15195_v38, %v18600_v36  ;;  %v23325_v35 = vld.sshfl [vmem:[%s19377_s18 + $0xea] sm:$0x3 pattern:$0x76325410] }
 0x32a   : > { %v25319_v12 = vunpack.i.h.bf16 %v23101_v22  ;;  %v14804_v16 = vcombine.low %v14796_v41, %v14803_v47  ;;  %v12858_v30 = vrot.slane %v12844_v45, %v19372_v5  ;;  %v12868_v11 = vrot.slane %v12860_v25, %v19372_v5  ;;  %v17902_v47 = vld [vmem:[%s19377_s18 + $0xe1] sm:$0xff]  ;;  %v23296_v45 = vpop.permute.xlu1 %18648  ;;  %25322 = vst [vmem:[#allocation56_spill] sm:$0xff] %v23325_v35 }
 0x32b   : > { %v12875_v55 = vrot.slane %v12861_v63, %v19372_v5  ;;  %v15279_v51 = vsel %vm15256_vm6, %v15237_v42, %v18610_v61  ;;  %v18606_v8 = vunpack.i.h.bf16 %v23134_v20  ;;  %v18605_v36 = vunpack.i.l.bf16 %v23134_v20  ;;  %v23298_v63 = vpop.permute.xlu0 %18643  ;;  %v25320_v25 = vld [vmem:[#allocation57_spill] sm:$0xff]  ;;  %v25321_v61 = vld [vmem:[#allocation50_spill] sm:$0xff] }
 0x32c   : > { %v15238_v6 = vsel %vm15214_vm5, %v15196_v40, %v25319_v12  ;;  %v18887_v38 = vpack.i.bf16 %v14804_v16, %v14787_v59  ;;  %v12859_v22 = vcombine.low %v12851_v49, %v12858_v30  ;;  %v7336_v12 = vcombine.high %v23014_v32, %v23014_v32 }
 0x32d   : > { %v15280_v54 = vsel %vm15256_vm6, %v15238_v6, %v18611_v39  ;;  %v12876_v48 = vcombine.low %v12868_v11, %v12875_v55  ;;  %v15177_v42 = vsel %vm15172_vm4, %v25320_v25, %v18605_v36  ;;  %v15178_v40 = vsel %vm15172_vm4, %v25321_v61, %v18606_v8 }
 0x32e   : > { %v23306_v16 = vcombine.high %v23040_v52, %v23040_v52  ;;  %v7353_v59 = vcombine.high %v17974_v58, %v17974_v58  ;;  %18888 = vrot.lane.b32.xlu1 %v18887_v38, %s19331_s26  ;;  %v23310_v32 = vrot.slane %v7336_v12, %v19372_v5  ;;  %v23313_v20 = vrot.slane %v17974_v58, %v19372_v5  ;;  %v23350_v38 = vld.sshfl [vmem:[%s19377_s18 + $0xe9] sm:$0x3 pattern:$0x76325410] }
 0x32f   : > { %v18882_v49 = vpack.i.bf16 %v12876_v48, %v12859_v22  ;;  %v6490_v34 = vcombine.high %v22907_v29, %v22907_v29  ;;  %v6505_v23 = vcombine.high %v22929_v56, %v22929_v56  ;;  %v6507_v28 = vcombine.high %v17902_v47, %v17902_v47  ;;  %v23352_v48 = vpop.permute.xlu1 %18658  ;;  %v23354_v12 = vpop.permute.xlu0 %18653 }
 0x330   : > { %v23318_v39 = vrot.slane %v7353_v59, %v19372_v5  ;;  %v6514_v57 = vrot.slane %v17902_v47, %v19372_v5  ;;  %v23329_v44 = vcombine.high %v23310_v32, %v23310_v32  ;;  %v23333_v29 = vcombine.high %v23313_v20, %v23313_v20  ;;  %25323 = vst [vmem:[#allocation25_spill] sm:$0xff] %v23352_v48 }
 0x331   : > { %18883 = vrot.lane.b32.xlu0 %v18882_v49, %s19330_s25  ;;  %v14465_v41 = vcombine.low %v23306_v16, %v23310_v32  ;;  %v6504_v56 = vrot.slane %v6490_v34, %v19372_v5  ;;  %v6521_v30 = vrot.slane %v6507_v28, %v19372_v5  ;;  %v18621_v55 = vunpack.i.h.bf16 %v23184_v13  ;;  %25324 = vst [vmem:[#allocation26_spill] sm:$0xff] %v23354_v12 }
 0x332   : > { %v23340_v6 = vcombine.high %v23318_v39, %v23318_v39  ;;  %v6522_v11 = vcombine.high %v6514_v57, %v6514_v57  ;;  %v14466_v58 = vcombine.low %v23329_v44, %v23313_v20  ;;  %v14482_v36 = vcombine.low %v23333_v29, %v23318_v39 }
 0x333   : > { %v14473_v8 = vrot.slane %v14465_v41, %v19372_v5  ;;  %v6506_v22 = vcombine.high %v6504_v56, %v6504_v56  ;;  %v6523_v25 = vcombine.high %v6521_v30, %v6521_v30  ;;  %v13654_v61 = vcombine.low %v6505_v23, %v6504_v56 }
 0x334   : > { %v14483_v47 = vcombine.low %v23340_v6, %v23325_v35  ;;  %v13671_v59 = vcombine.low %v6522_v11, %v6521_v30  ;;  %v14480_v49 = vrot.slane %v14466_v58, %v19372_v5  ;;  %v14490_v34 = vrot.slane %v14482_v36, %v19372_v5 }
 0x335   : > { %v13655_v28 = vcombine.low %v6506_v22, %v6514_v57  ;;  %v18620_v41 = vunpack.i.l.bf16 %v23184_v13  ;;  %v13662_v62 = vrot.slane %v13654_v61, %v19372_v5  ;;  %v13672_v48 = vcombine.low %v6523_v25, %v23350_v38 }
 0x336   : > { %v14497_v21 = vrot.slane %v14483_v47, %v19372_v5  ;;  %v13679_v12 = vrot.slane %v13671_v59, %v19372_v5  ;;  %v14481_v43 = vcombine.low %v14473_v8, %v14480_v49  ;;  %v15322_v56 = vsel %vm15298_vm7, %v15280_v54, %v18621_v55  ;;  %v23375_v47 = vpop.permute.xlu1 %18668  ;;  %v17856_v49 = vld [vmem:[%s19377_s18 + $0x1b0] sm:$0xff] }
 0x337   : > { %v13669_v35 = vrot.slane %v13655_v28, %v19372_v5  ;;  %v15321_v23 = vsel %vm15298_vm7, %v15279_v51, %v18620_v41  ;;  %v13686_v57 = vrot.slane %v13672_v48, %v19372_v5  ;;  %v18616_v13 = vunpack.i.h.bf16 %v23186_v15  ;;  %v23377_v51 = vpop.permute.xlu0 %18663 }
 0x338   : > { %v14498_v30 = vcombine.low %v14490_v34, %v14497_v21  ;;  %v15351_v11 = vpack.c.bf16 %v15322_v56, %v15321_v23  ;;  %v18615_v36 = vunpack.i.l.bf16 %v23186_v15  ;;  %v12372_v22 = vcombine.low %v22958_v2, %v23219_v18  ;;  %v17857_v56 = vld [vmem:[%s19377_s18 + $0x1b8] sm:$0xff] }
 0x339   : > { %v13670_v58 = vcombine.low %v13662_v62, %v13669_v35  ;;  %v12373_v8 = vcombine.low %v23229_v60, %v23247_v24  ;;  %v13687_v21 = vcombine.low %v13679_v12, %v13686_v57  ;;  %v15220_v55 = vsel %vm15214_vm5, %v15178_v40, %v18616_v13 }
 0x33a   : > { %v18897_v54 = vpack.i.bf16 %v14498_v30, %v14481_v43  ;;  %v12389_v48 = vcombine.low %v23232_v26, %v23251_v4  ;;  %18124 = vmatmul.mubr.msk.bf16.vlgmr.msra.gmra.mrb[0].mxu1 %vm15376_vm11, %v15351_v11  ;;  %v15219_v62 = vsel %vm15214_vm5, %v15177_v42, %v18615_v36  ;;  %v12380_v2 = vrot.slane %v12372_v22, %v19372_v5  ;;  %v17832_v36 = vld [vmem:[%s19377_s18 + $0xf0] sm:$0xff] }
 0x33b   : > { %v12387_v15 = vrot.slane %v12373_v8, %v19372_v5  ;;  %v12390_v18 = vcombine.low %v23235_v37, %v23257_v33  ;;  %18127 = vmatprep.mubr.msk.bf16.mxu1 %vm19334_vm10, %v25310_v50  ;;  %v18892_v43 = vpack.i.bf16 %v13687_v21, %v13670_v58  ;;  %v11561_v26 = vcombine.low %v22887_v14, %v23151_v3 }
 0x33c   : > { %18898 = vrot.lane.b32.xlu1 %v18897_v54, %s19331_s26  ;;  %v12397_v60 = vrot.slane %v12389_v48, %v19372_v5  ;;  %v11562_v24 = vcombine.low %v23155_v27, %v23174_v7  ;;  %v11578_v37 = vcombine.low %v23158_v9, %v23178_v17  ;;  %v11579_v33 = vcombine.low %v23163_v46, %v23191_v10  ;;  %v23409_v46 = vpop.permute.xlu1 %18678  ;;  %v23411_v10 = vpop.permute.xlu0 %18673 }
 0x33d   : > { %v12388_v4 = vcombine.low %v12380_v2, %v12387_v15  ;;  %v12404_v42 = vrot.slane %v12390_v18, %v19372_v5  ;;  %18893 = vrot.lane.b32.xlu0 %v18892_v43, %s19329_s24  ;;  %v11569_v40 = vrot.slane %v11561_v26, %v19372_v5  ;;  %v18631_v14 = vunpack.i.h.bf16 %v23224_v19 }
 0x33e   : > { %v11576_v35 = vrot.slane %v11562_v24, %v19372_v5  ;;  %v18630_v3 = vunpack.i.l.bf16 %v23224_v19  ;;  %v11586_v7 = vrot.slane %v11578_v37, %v19372_v5  ;;  %v11593_v9 = vrot.slane %v11579_v33, %v19372_v5  ;;  %v25325_v37 = vld [vmem:[#allocation14_spill] sm:$0xff] }
 0x33f   : > { %v12405_v27 = vcombine.low %v12397_v60, %v12404_v42  ;;  %v18626_v17 = vunpack.i.h.bf16 %v23226_v31  ;;  %v18625_v25 = vunpack.i.l.bf16 %v23226_v31  ;;  %v12066_v61 = vcombine.low %v23040_v52, %v23306_v16  ;;  %v17833_v60 = vld [vmem:[%s19377_s18 + $0xf8] sm:$0xff] }
 0x340   : > { %v11577_v12 = vcombine.low %v11569_v40, %v11576_v35  ;;  %v12067_v59 = vcombine.low %v23310_v32, %v23329_v44  ;;  %v11594_v28 = vcombine.low %v11586_v7, %v11593_v9  ;;  %v12083_v23 = vcombine.low %v23313_v20, %v23333_v29  ;;  %v23442_v54 = vpop.permute.xlu1 %18688  ;;  %v23444_v21 = vpop.permute.xlu0 %18683  ;;  %v17928_v40 = vld [vmem:[%s19377_s18 + $0x1b1] sm:$0xff]  ;;  %v25326_v7 = vld [vmem:[#allocation8_spill] sm:$0xff] }
 0x341   : > { %v18907_v34 = vpack.i.bf16 %v12405_v27, %v12388_v4  ;;  %v23420_v41 = vsel %vm15256_vm6, %v15220_v55, %v18626_v17  ;;  %v23426_v30 = vsel %vm15256_vm6, %v15219_v62, %v18625_v25  ;;  %v12074_v31 = vrot.slane %v12066_v61, %v19372_v5 }
 0x342   : > { %v12081_v52 = vrot.slane %v12067_v59, %v19372_v5  ;;  %v12084_v16 = vcombine.low %v23318_v39, %v23340_v6  ;;  %v18902_v32 = vpack.i.bf16 %v11594_v28, %v11577_v12  ;;  %v12091_v44 = vrot.slane %v12083_v23, %v19372_v5 }
 0x343   : > { %18908 = vrot.lane.b32.xlu1 %v18907_v34, %s19328_s23  ;;  %v6013_v57 = vcombine.high %v17856_v49, %v17856_v49  ;;  %v6020_v11 = vrot.slane %v17856_v49, %v19372_v5  ;;  %v6030_v13 = vcombine.high %v17857_v56, %v17857_v56  ;;  %v6037_v58 = vrot.slane %v17857_v56, %v19372_v5 }
 0x344   : > { %v12082_v20 = vcombine.low %v12074_v31, %v12081_v52  ;;  %v12098_v29 = vrot.slane %v12084_v16, %v19372_v5  ;;  %18903 = vrot.lane.b32.xlu0 %v18902_v32, %s19327_s22  ;;  %v18641_v22 = vunpack.i.h.bf16 %v23272_v53  ;;  %v18640_v8 = vunpack.i.l.bf16 %v23272_v53  ;;  %v23466_v23 = vpop.permute.xlu1 %18698  ;;  %v23468_v56 = vpop.permute.xlu0 %18693  ;;  %v17929_v32 = vld [vmem:[%s19377_s18 + $0x1b9] sm:$0xff] }
 0x345   : > { %v6027_v39 = vrot.slane %v6013_v57, %v19372_v5  ;;  %v6028_v6 = vcombine.high %v6020_v11, %v6020_v11  ;;  %v6044_v48 = vrot.slane %v6030_v13, %v19372_v5  ;;  %v6045_v62 = vcombine.high %v6037_v58, %v6037_v58 }
 0x346   : > { %v12099_v55 = vcombine.low %v12091_v44, %v12098_v29  ;;  %v18636_v2 = vunpack.i.h.bf16 %v23274_v1  ;;  %v18635_v43 = vunpack.i.l.bf16 %v23274_v1  ;;  %v5685_v26 = vcombine.high %v17832_v36, %v17832_v36 }
 0x347   : > { %v6029_v15 = vcombine.high %v6027_v39, %v6027_v39  ;;  %v13183_v18 = vcombine.low %v6020_v11, %v6028_v6  ;;  %v6046_v4 = vcombine.high %v6044_v48, %v6044_v48  ;;  %v13200_v42 = vcombine.low %v6037_v58, %v6045_v62 }
 0x348   : > { %v18917_v24 = vpack.i.bf16 %v12099_v55, %v12082_v20  ;;  %v23452_v33 = vsel %vm15130_vm3, %v25325_v37, %v18636_v2  ;;  %v23458_v9 = vsel %vm15130_vm3, %v25326_v7, %v18635_v43  ;;  %v5692_v1 = vrot.slane %v17832_v36, %v19372_v5  ;;  %v23502_v37 = vpop.permute.xlu0 %18703 }
 0x349   : > { %v13184_v35 = vcombine.low %v6027_v39, %v6029_v15  ;;  %v13191_v27 = vrot.slane %v13183_v18, %v19372_v5  ;;  %v13201_v17 = vcombine.low %v6044_v48, %v6046_v4  ;;  %v13208_v12 = vrot.slane %v13200_v42, %v19372_v5  ;;  %v23500_v42 = vpop.permute.xlu1 %18708 }
 0x34a   : > { %18918 = vrot.lane.b32.xlu1 %v18917_v24, %s19328_s23  ;;  %v5699_v25 = vrot.slane %v5685_v26, %v19372_v5  ;;  %v5702_v61 = vcombine.high %v17833_v60, %v17833_v60  ;;  %v5700_v49 = vcombine.high %v5692_v1, %v5692_v1  ;;  %v5709_v34 = vrot.slane %v17833_v60, %v19372_v5 }
 0x34b   : > { %v13198_v59 = vrot.slane %v13184_v35, %v19372_v5  ;;  %v6859_v28 = vcombine.high %v17928_v40, %v17928_v40  ;;  %v13215_v31 = vrot.slane %v13201_v17, %v19372_v5  ;;  %v23474_v44 = vrot.slane %v17928_v40, %v19372_v5 }
 0x34c   : > { %v5701_v52 = vcombine.high %v5699_v25, %v5699_v25  ;;  %v5716_v16 = vrot.slane %v5702_v61, %v19372_v5  ;;  %v5717_v11 = vcombine.high %v5709_v34, %v5709_v34  ;;  %v12877_v20 = vcombine.low %v5692_v1, %v5700_v49 }
 0x34d   : > { %v13199_v57 = vcombine.low %v13191_v27, %v13198_v59  ;;  %v23477_v29 = vrot.slane %v6859_v28, %v19372_v5  ;;  %v13216_v13 = vcombine.low %v13208_v12, %v13215_v31  ;;  %v23481_v39 = vcombine.high %v23474_v44, %v23474_v44  ;;  %v17904_v31 = vld [vmem:[%s19377_s18 + $0xf1] sm:$0xff] }
 0x34e   : > { %v5718_v58 = vcombine.high %v5716_v16, %v5716_v16  ;;  %v12878_v36 = vcombine.low %v5699_v25, %v5701_v52  ;;  %v12885_v6 = vrot.slane %v12877_v20, %v19372_v5  ;;  %v12894_v55 = vcombine.low %v5709_v34, %v5717_v11  ;;  %v25327_v20 = vld [vmem:[#allocation64_spill] sm:$0xff] }
 0x34f   : > { %v23486_v48 = vcombine.high %v23477_v29, %v23477_v29  ;;  %v6876_v62 = vcombine.high %v17929_v32, %v17929_v32  ;;  %v18912_v2 = vpack.i.bf16 %v13216_v13, %v13199_v57  ;;  %v23490_v43 = vrot.slane %v17929_v32, %v19372_v5  ;;  %v17905_v32 = vld [vmem:[%s19377_s18 + $0xf9] sm:$0xff] }
 0x350   : > { %v12892_v15 = vrot.slane %v12878_v36, %v19372_v5  ;;  %v12895_v18 = vcombine.low %v5716_v16, %v5718_v58  ;;  %v12902_v60 = vrot.slane %v12894_v55, %v19372_v5  ;;  %v13994_v24 = vcombine.low %v23474_v44, %v23481_v39  ;;  %v18000_v57 = vld [vmem:[%s19377_s18 + $0x1b2] sm:$0xff]  ;;  %v23555_v36 = vpop.permute.xlu0 %18713 }
 0x351   : > { %v23494_v26 = vrot.slane %v6876_v62, %v19372_v5  ;;  %v13995_v4 = vcombine.low %v23477_v29, %v23486_v48  ;;  %18913 = vrot.lane.b32.xlu0 %v18912_v2, %s19330_s25  ;;  %v23508_v27 = vcombine.high %v23490_v43, %v23490_v43  ;;  %v15303_v7 = vsel %vm15298_vm7, %v23426_v30, %v18630_v3 }
 0x352   : > { %v12893_v40 = vcombine.low %v12885_v6, %v12892_v15  ;;  %v12909_v35 = vrot.slane %v12895_v18, %v19372_v5  ;;  %v14002_v17 = vrot.slane %v13994_v24, %v19372_v5  ;;  %v15304_v25 = vsel %vm15298_vm7, %v23420_v41, %v18631_v14 }
 0x353   : > { %v23516_v1 = vcombine.high %v23494_v26, %v23494_v26  ;;  %v14009_v12 = vrot.slane %v13995_v4, %v19372_v5  ;;  %v14011_v59 = vcombine.low %v23490_v43, %v23508_v27  ;;  %v15342_v3 = vpack.c.bf16 %v15304_v25, %v15303_v7 }
 0x354   : > { %v12910_v61 = vcombine.low %v12902_v60, %v12909_v35  ;;  %v18651_v30 = vunpack.i.h.bf16 %v23296_v45  ;;  %v18650_v28 = vunpack.i.l.bf16 %v23296_v45  ;;  %v18646_v19 = vunpack.i.h.bf16 %v23298_v63 }
 0x355   : > { %v14010_v49 = vcombine.low %v14002_v17, %v14009_v12  ;;  %v14012_v34 = vcombine.low %v23494_v26, %v23516_v1  ;;  %v14019_v14 = vrot.slane %v14011_v59, %v19372_v5  ;;  %18088 = vmatmul.mubr.msk.bf16.gmra.mrb[8].mxu0 %vm15376_vm11, %v15342_v3  ;;  %v18645_v16 = vunpack.i.l.bf16 %v23298_v63  ;;  %v23553_v63 = vpop.permute.xlu1 %18718 }
 0x356   : > { %v18927_v52 = vpack.i.bf16 %v12910_v61, %v12893_v40  ;;  %v15180_v41 = vsel %vm15172_vm4, %v22757_v0, %v18651_v30  ;;  %v15179_v45 = vsel %vm15172_vm4, %v25327_v20, %v18650_v28  ;;  %v15197_v13 = vsel %vm15172_vm4, %v23458_v9, %v18640_v8  ;;  %v18001_v0 = vld [vmem:[%s19377_s18 + $0x1ba] sm:$0xff]  ;;  %18091 = vmatprep.mubr.msk.bf16.mxu0 %vm19334_vm10, %v25310_v50 }
 0x357   : > { %v14026_v11 = vrot.slane %v14012_v34, %v19372_v5  ;;  %v15198_v58 = vsel %vm15172_vm4, %v23452_v33, %v18641_v22  ;;  %v23559_v6 = vsel %vm15214_vm5, %v15197_v13, %v18645_v16  ;;  %v6531_v9 = vcombine.high %v17904_v31, %v17904_v31  ;;  %v23603_v34 = vpop.permute.xlu0 %18723 }
 0x358   : > { %18928 = vrot.lane.b32.xlu1 %v18927_v52, %s19330_s25  ;;  %v15240_v8 = vsel %vm15214_vm5, %v15198_v58, %v18646_v19  ;;  %v23563_v53 = vrot.slane %v17904_v31, %v19372_v5  ;;  %v6548_v33 = vcombine.high %v17905_v32, %v17905_v32  ;;  %v6555_v55 = vrot.slane %v17905_v32, %v19372_v5  ;;  %v25328_v58 = vld [vmem:[#allocation25_spill] sm:$0xff] }
 0x359   : > { %v14027_v22 = vcombine.low %v14019_v14, %v14026_v11  ;;  %v7705_v62 = vcombine.high %v18000_v57, %v18000_v57  ;;  %v23567_v2 = vrot.slane %v6531_v9, %v19372_v5  ;;  %v23574_v18 = vrot.slane %v18000_v57, %v19372_v5 }
 0x35a   : > { %v23571_v15 = vcombine.high %v23563_v53, %v23563_v53  ;;  %v7722_v60 = vcombine.high %v18001_v0, %v18001_v0  ;;  %v6562_v4 = vrot.slane %v6548_v33, %v19372_v5  ;;  %v6563_v40 = vcombine.high %v6555_v55, %v6555_v55 }
 0x35b   : > { %v18922_v24 = vpack.i.bf16 %v14027_v22, %v14010_v49  ;;  %v23578_v35 = vrot.slane %v7705_v62, %v19372_v5  ;;  %v23582_v7 = vcombine.high %v23567_v2, %v23567_v2  ;;  %v23588_v12 = vcombine.high %v23574_v18, %v23574_v18  ;;  %v23601_v49 = vpop.permute.xlu1 %18728 }
 0x35c   : > { %v13688_v17 = vcombine.low %v23563_v53, %v23571_v15  ;;  %v23591_v25 = vrot.slane %v18001_v0, %v19372_v5  ;;  %v6564_v61 = vcombine.high %v6562_v4, %v6562_v4  ;;  %v13705_v59 = vcombine.low %v6555_v55, %v6563_v40 }
 0x35d   : > { %18923 = vrot.lane.b32.xlu0 %v18922_v24, %s19329_s24  ;;  %v23596_v3 = vcombine.high %v23578_v35, %v23578_v35  ;;  %v23599_v30 = vrot.slane %v7722_v60, %v19372_v5  ;;  %v13689_v28 = vcombine.low %v23567_v2, %v23582_v7  ;;  %v14805_v52 = vcombine.low %v23574_v18, %v23588_v12 }
 0x35e   : > { %v13696_v19 = vrot.slane %v13688_v17, %v19372_v5  ;;  %v23610_v31 = vcombine.high %v23591_v25, %v23591_v25  ;;  %v13706_v14 = vcombine.low %v6562_v4, %v6564_v61  ;;  %v13713_v16 = vrot.slane %v13705_v59, %v19372_v5  ;;  %v25329_v4 = vld [vmem:[#allocation26_spill] sm:$0xff] }
 0x35f   : > { %v23617_v32 = vcombine.high %v23599_v30, %v23599_v30  ;;  %v14806_v57 = vcombine.low %v23578_v35, %v23596_v3  ;;  %v13703_v11 = vrot.slane %v13689_v28, %v19372_v5  ;;  %v14813_v20 = vrot.slane %v14805_v52, %v19372_v5  ;;  %v17976_v52 = vld [vmem:[%s19377_s18 + $0xf2] sm:$0xff] }
 0x360   : > { %v14822_v13 = vcombine.low %v23591_v25, %v23610_v31  ;;  %v18661_v0 = vunpack.i.h.bf16 %v25328_v58  ;;  %v13720_v9 = vrot.slane %v13706_v14, %v19372_v5  ;;  %v18660_v55 = vunpack.i.l.bf16 %v25328_v58  ;;  %v23637_v14 = vpop.permute.xlu1 %18738 }
 0x361   : > { %v14820_v22 = vrot.slane %v14806_v57, %v19372_v5  ;;  %v14823_v33 = vcombine.low %v23599_v30, %v23617_v32  ;;  %v13704_v62 = vcombine.low %v13696_v19, %v13703_v11  ;;  %v18656_v40 = vunpack.i.h.bf16 %v25329_v4  ;;  %v23639_v57 = vpop.permute.xlu0 %18733 }
 0x362   : > { %v14830_v60 = vrot.slane %v14822_v13, %v19372_v5  ;;  %v15222_v24 = vsel %vm15214_vm5, %v15180_v41, %v18661_v0  ;;  %v13721_v17 = vcombine.low %v13713_v16, %v13720_v9  ;;  %v15221_v28 = vsel %vm15214_vm5, %v15179_v45, %v18660_v55  ;;  %v25330_v41 = vld [vmem:[#allocation54_spill] sm:$0xff]  ;;  %v17977_v9 = vld [vmem:[%s19377_s18 + $0xfa] sm:$0xff] }
 0x363   : > { %v14821_v61 = vcombine.low %v14813_v20, %v14820_v22  ;;  %v14837_v59 = vrot.slane %v14823_v33, %v19372_v5  ;;  %v18655_v19 = vunpack.i.l.bf16 %v25329_v4  ;;  %v15282_v11 = vsel %vm15256_vm6, %v15240_v8, %v18656_v40 }
 0x364   : > { %v11595_v13 = vcombine.low %v25330_v41, %v23474_v44  ;;  %v11596_v16 = vcombine.low %v23481_v39, %v23477_v29  ;;  %v18937_v20 = vpack.i.bf16 %v13721_v17, %v13704_v62  ;;  %v11612_v45 = vcombine.low %v23486_v48, %v23490_v43  ;;  %v23673_v17 = vpop.permute.xlu1 %18748 }
 0x365   : > { %v14838_v58 = vcombine.low %v14830_v60, %v14837_v59  ;;  %v11613_v0 = vcombine.low %v23508_v27, %v23494_v26  ;;  %v15281_v22 = vsel %vm15256_vm6, %v23559_v6, %v18655_v19  ;;  %v7377_v44 = vcombine.high %v17976_v52, %v17976_v52 }
 0x366   : > { %v11603_v8 = vrot.slane %v11595_v13, %v19372_v5  ;;  %v11610_v33 = vrot.slane %v11596_v16, %v19372_v5  ;;  %18938 = vrot.lane.b32.xlu1 %v18937_v20, %s19329_s24  ;;  %v11620_v39 = vrot.slane %v11612_v45, %v19372_v5  ;;  %v23660_v48 = vrot.slane %v17976_v52, %v19372_v5 }
 0x367   : > { %v18932_v29 = vpack.i.bf16 %v14838_v58, %v14821_v61  ;;  %v11627_v55 = vrot.slane %v11613_v0, %v19372_v5  ;;  %v23663_v26 = vrot.slane %v7377_v44, %v19372_v5  ;;  %v7394_v27 = vcombine.high %v17977_v9, %v17977_v9  ;;  %v23675_v61 = vpop.permute.xlu0 %18743  ;;  %v19277_v44 = vld.sshfl [vmem:[%s19377_s18 + $0xf9] sm:$0xff pattern:$0x76325410] }
 0x368   : > { %v11611_v43 = vcombine.low %v11603_v8, %v11610_v33  ;;  %v7401_v6 = vrot.slane %v17977_v9, %v19372_v5  ;;  %v23669_v60 = vcombine.high %v23660_v48, %v23660_v48  ;;  %v18671_v4 = vunpack.i.h.bf16 %v23375_v47 }
 0x369   : > { %18933 = vrot.lane.b32.xlu0 %v18932_v29, %s19331_s26  ;;  %v11628_v62 = vcombine.low %v11620_v39, %v11627_v55  ;;  %v18670_v40 = vunpack.i.l.bf16 %v23375_v47  ;;  %v23679_v59 = vcombine.high %v23663_v26, %v23663_v26  ;;  %v7408_v52 = vrot.slane %v7394_v27, %v19372_v5 }
 0x36a   : > { %v7409_v19 = vcombine.high %v7401_v6, %v7401_v6  ;;  %v18666_v41 = vunpack.i.h.bf16 %v23377_v51  ;;  %v14499_v16 = vcombine.low %v23660_v48, %v23669_v60  ;;  %v15264_v20 = vsel %vm15256_vm6, %v15222_v24, %v18671_v4 }
 0x36b   : > { %v18947_v13 = vpack.i.bf16 %v11628_v62, %v11611_v43  ;;  %v15263_v47 = vsel %vm15256_vm6, %v15221_v28, %v18670_v40  ;;  %v7410_v58 = vcombine.high %v7408_v52, %v7408_v52  ;;  %v14500_v45 = vcombine.low %v23663_v26, %v23679_v59  ;;  %v23702_v62 = vpop.permute.xlu1 %18758  ;;  %v25331_v40 = vld [vmem:[#allocation59_spill] sm:$0xff] }
 0x36c   : > { %v14516_v0 = vcombine.low %v7401_v6, %v7409_v19  ;;  %v18665_v9 = vunpack.i.l.bf16 %v23377_v51  ;;  %v14507_v8 = vrot.slane %v14499_v16, %v19372_v5  ;;  %v15324_v33 = vsel %vm15298_vm7, %v15282_v11, %v18666_v41  ;;  %v23704_v11 = vpop.permute.xlu0 %18753  ;;  %v25332_v19 = vld [vmem:[#allocation29_spill] sm:$0xff] }
 0x36d   : > { %18948 = vrot.lane.b32.xlu1 %v18947_v13, %s19327_s22  ;;  %v11289_v29 = vcombine.low %v23350_v38, %v23563_v53  ;;  %v14514_v28 = vrot.slane %v14500_v45, %v19372_v5  ;;  %v14517_v24 = vcombine.low %v7408_v52, %v7410_v58  ;;  %v4065_v27 = vcombine.high %v19277_v44, %v19277_v44 }
 0x36e   : > { %v14524_v39 = vrot.slane %v14516_v0, %v19372_v5  ;;  %v15323_v55 = vsel %vm15298_vm7, %v15281_v22, %v18665_v9  ;;  %v11290_v51 = vcombine.low %v23571_v15, %v23567_v2  ;;  %v11306_v53 = vcombine.low %v23582_v7, %v19277_v44 }
 0x36f   : > { %v15352_v43 = vpack.c.bf16 %v15324_v33, %v15323_v55  ;;  %v11297_v6 = vrot.slane %v11289_v29, %v19372_v5  ;;  %v14515_v4 = vcombine.low %v14507_v8, %v14514_v28  ;;  %v14531_v38 = vrot.slane %v14517_v24, %v19372_v5  ;;  %v23731_v44 = vpop.permute.xlu1 %18768  ;;  %v25333_v24 = vld [vmem:[#allocation24_spill] sm:$0xff]  ;;  %v25334_v55 = vld [vmem:[#allocation49_spill] sm:$0xff] }
 0x370   : > { %v12406_v52 = vcombine.low %v25331_v40, %v23574_v18  ;;  %v11304_v22 = vrot.slane %v11290_v51, %v19372_v5  ;;  %v11307_v41 = vcombine.low %v4065_v27, %v25332_v19  ;;  %v12407_v2 = vcombine.low %v23588_v12, %v23578_v35  ;;  %v23733_v29 = vpop.permute.xlu0 %18763  ;;  %v17859_v27 = vld [vmem:[%s19377_s18 + $0x1c8] sm:$0xff] }
 0x371   : > { %v12423_v15 = vcombine.low %v23596_v3, %v23591_v25  ;;  %18128 = vmatmul.mubr.msk.bf16.gmra.mrb[4].mxu1 %vm15376_vm11, %v15352_v43  ;;  %v14532_v13 = vcombine.low %v14524_v39, %v14531_v38  ;;  %v11314_v16 = vrot.slane %v11306_v53, %v19372_v5  ;;  %v12424_v18 = vcombine.low %v23610_v31, %v23599_v30  ;;  %v19278_v43 = vld.sshfl [vmem:[%s19377_s18 + $0xfa] sm:$0xff pattern:$0x76325410]  ;;  %v17860_v53 = vld [vmem:[%s19377_s18 + $0x1d0] sm:$0xff] }
 0x372   : > { %v12414_v7 = vrot.slane %v12406_v52, %v19372_v5  ;;  %18131 = vmatprep.mubr.msk.bf16.mxu1 %vm19334_vm10, %v25310_v50  ;;  %v11305_v58 = vcombine.low %v11297_v6, %v11304_v22  ;;  %v11321_v45 = vrot.slane %v11307_v41, %v19372_v5  ;;  %v12421_v35 = vrot.slane %v12407_v2, %v19372_v5  ;;  %v17878_v41 = vld.sshfl [vmem:[%s19377_s18 + $0x1c0] sm:$0x3 pattern:$0x76325410] }
 0x373   : > { %v12431_v12 = vrot.slane %v12423_v15, %v19372_v5  ;;  %v18942_v25 = vpack.i.bf16 %v14532_v13, %v14515_v4  ;;  %v12438_v3 = vrot.slane %v12424_v18, %v19372_v5  ;;  %v18681_v0 = vunpack.i.h.bf16 %v23409_v46  ;;  %v25335_v4 = vld [vmem:[#allocation56_spill] sm:$0xff]  ;;  %v25336_v13 = vld [vmem:[#allocation31_spill] sm:$0xff] }
 0x374   : > { %v18680_v9 = vunpack.i.l.bf16 %v23409_v46  ;;  %v11322_v30 = vcombine.low %v11314_v16, %v11321_v45  ;;  %v12422_v31 = vcombine.low %v12414_v7, %v12421_v35  ;;  %v18676_v8 = vunpack.i.h.bf16 %v23411_v10  ;;  %v23763_v35 = vpop.permute.xlu0 %18773 }
 0x375   : > { %v18675_v33 = vunpack.i.l.bf16 %v23411_v10  ;;  %18943 = vrot.lane.b32.xlu0 %v18942_v25, %s19331_s26  ;;  %v12439_v28 = vcombine.low %v12431_v12, %v12438_v3  ;;  %v15158_v46 = vsel %vm15130_vm3, %v25334_v55, %v18681_v0  ;;  %v12100_v38 = vcombine.low %v25335_v4, %v23660_v48 }
 0x376   : > { %v15157_v39 = vsel %vm15130_vm3, %v25333_v24, %v18680_v9  ;;  %v18957_v51 = vpack.i.bf16 %v11322_v30, %v11305_v58  ;;  %v15306_v10 = vsel %vm15298_vm7, %v15264_v20, %v18676_v8  ;;  %v4911_v22 = vcombine.high %v19278_v43, %v19278_v43  ;;  %v17835_v9 = vld [vmem:[%s19377_s18 + $0x108] sm:$0xff] }
 0x377   : > { %v15305_v6 = vsel %vm15298_vm7, %v15263_v47, %v18675_v33  ;;  %v18952_v40 = vpack.i.bf16 %v12439_v28, %v12422_v31  ;;  %v12101_v19 = vcombine.low %v23669_v60, %v23663_v26  ;;  %v12108_v2 = vrot.slane %v12100_v38, %v19372_v5  ;;  %v17931_v38 = vld [vmem:[%s19377_s18 + $0x1c9] sm:$0xff] }
 0x378   : > { %v15343_v52 = vpack.c.bf16 %v15306_v10, %v15305_v6  ;;  %18958 = vrot.lane.b32.xlu1 %v18957_v51, %s19327_s22  ;;  %v12117_v15 = vcombine.low %v23679_v59, %v19278_v43  ;;  %v6054_v47 = vcombine.high %v17859_v27, %v17859_v27  ;;  %v6061_v20 = vrot.slane %v17859_v27, %v19372_v5  ;;  %v23761_v59 = vpop.permute.xlu1 %18778  ;;  %v17870_v10 = vld.sshfl [vmem:[%s19377_s18 + $0x100] sm:$0x3 pattern:$0x76325410] }
 0x379   : > { %18953 = vrot.lane.b32.xlu0 %v18952_v40, %s19328_s23  ;;  %v12115_v48 = vrot.slane %v12101_v19, %v19372_v5  ;;  %v12118_v16 = vcombine.low %v4911_v22, %v25336_v13  ;;  %v6071_v7 = vcombine.high %v17860_v53, %v17860_v53  ;;  %v6078_v26 = vrot.slane %v17860_v53, %v19372_v5  ;;  %v17932_v19 = vld [vmem:[%s19377_s18 + $0x1d1] sm:$0xff] }
 0x37a   : > { %v12125_v60 = vrot.slane %v12117_v15, %v19372_v5  ;;  %v6068_v18 = vrot.slane %v6054_v47, %v19372_v5  ;;  %v6069_v58 = vcombine.high %v6061_v20, %v6061_v20  ;;  %v13217_v45 = vcombine.low %v17878_v41, %v6061_v20  ;;  %18092 = vmatmul.mubr.msk.bf16.gmra.mrb[12].mxu0 %vm15376_vm11, %v15343_v52  ;;  %v23790_v20 = vpop.permute.xlu0 %18783  ;;  %v19279_v13 = vld.sshfl [vmem:[%s19377_s18 + $0x110] sm:$0xff pattern:$0x76325410] }
 0x37b   : > { %v12116_v12 = vcombine.low %v12108_v2, %v12115_v48  ;;  %v12132_v25 = vrot.slane %v12118_v16, %v19372_v5  ;;  %v23767_v3 = vrot.slane %v6071_v7, %v19372_v5  ;;  %v6086_v0 = vcombine.high %v6078_v26, %v6078_v26  ;;  %18095 = vmatprep.mubr.msk.bf16.mxu0 %vm19334_vm10, %v25310_v50 }
 0x37c   : > { %v6070_v30 = vcombine.high %v6068_v18, %v6068_v18  ;;  %v13218_v31 = vcombine.low %v6069_v58, %v6068_v18  ;;  %v13225_v8 = vrot.slane %v13217_v45, %v19372_v5  ;;  %v18691_v33 = vunpack.i.h.bf16 %v23442_v54  ;;  %v23788_v47 = vpop.permute.xlu1 %18788 }
 0x37d   : > { %v12133_v28 = vcombine.low %v12125_v60, %v12132_v25  ;;  %v13235_v24 = vcombine.low %v6086_v0, %v23767_v3  ;;  %v18690_v55 = vunpack.i.l.bf16 %v23442_v54  ;;  %v18686_v43 = vunpack.i.h.bf16 %v23444_v21 }
 0x37e   : > { %v13232_v27 = vrot.slane %v13218_v31, %v19372_v5  ;;  %v13234_v51 = vcombine.low %v6070_v30, %v6078_v26  ;;  %v18685_v6 = vunpack.i.l.bf16 %v23444_v21  ;;  %v5726_v4 = vcombine.high %v17835_v9, %v17835_v9 }
 0x37f   : > { %v18967_v53 = vpack.i.bf16 %v12133_v28, %v12116_v12  ;;  %v13249_v40 = vrot.slane %v13235_v24, %v19372_v5  ;;  %v15200_v52 = vsel %vm15172_vm4, %v15158_v46, %v18686_v43  ;;  %v5733_v22 = vrot.slane %v17835_v9, %v19372_v5  ;;  %v23797_v12 = vld.sshfl [vmem:[%s19377_s18 + $0x1c1] sm:$0x3 pattern:$0x76325410]  ;;  %v25337_v28 = vld [vmem:[#allocation30_spill] sm:$0xff] }
 0x380   : > { %v13233_v41 = vcombine.low %v13225_v8, %v13232_v27  ;;  %v13242_v2 = vrot.slane %v13234_v51, %v19372_v5  ;;  %v15199_v15 = vsel %vm15172_vm4, %v15157_v39, %v18685_v6  ;;  %v5740_v21 = vrot.slane %v5726_v4, %v19372_v5 }
 0x381   : > { %18968 = vrot.lane.b32.xlu1 %v18967_v53, %s19328_s23  ;;  %v5741_v48 = vcombine.high %v5733_v22, %v5733_v22  ;;  %v12911_v46 = vcombine.low %v17870_v10, %v5733_v22  ;;  %v6900_v16 = vcombine.high %v17931_v38, %v17931_v38  ;;  %v6907_v60 = vrot.slane %v17931_v38, %v19372_v5  ;;  %v23809_v38 = vpop.permute.xlu1 %18798  ;;  %v23811_v53 = vpop.permute.xlu0 %18793 }
 0x382   : > { %v13250_v7 = vcombine.low %v13242_v2, %v13249_v40  ;;  %v5742_v26 = vcombine.high %v5740_v21, %v5740_v21  ;;  %v6917_v18 = vcombine.high %v17932_v19, %v17932_v19  ;;  %v5758_v58 = vcombine.high %v19279_v13, %v19279_v13 }
 0x383   : > { %v12912_v39 = vcombine.low %v5741_v48, %v5740_v21  ;;  %v12919_v45 = vrot.slane %v12911_v46, %v19372_v5  ;;  %v6914_v25 = vrot.slane %v6900_v16, %v19372_v5  ;;  %v6915_v30 = vcombine.high %v6907_v60, %v6907_v60  ;;  %v17907_v46 = vld [vmem:[%s19377_s18 + $0x109] sm:$0xff] }
 0x384   : > { %v18962_v0 = vpack.i.bf16 %v13250_v7, %v13233_v41  ;;  %v12928_v9 = vcombine.low %v5742_v26, %v19279_v13  ;;  %v6924_v31 = vrot.slane %v17932_v19, %v19372_v5  ;;  %v12929_v24 = vcombine.low %v5758_v58, %v25337_v28 }
 0x385   : > { %v12926_v8 = vrot.slane %v12912_v39, %v19372_v5  ;;  %v6916_v43 = vcombine.high %v6914_v25, %v6914_v25  ;;  %v23804_v27 = vrot.slane %v6917_v18, %v19372_v5  ;;  %v14028_v10 = vcombine.low %v23797_v12, %v6907_v60  ;;  %v18003_v18 = vld [vmem:[%s19377_s18 + $0x1ca] sm:$0xff]  ;;  %v23837_v28 = vpop.permute.xlu0 %18803 }
 0x386   : > { %18963 = vrot.lane.b32.xlu0 %v18962_v0, %s19330_s25  ;;  %v12936_v51 = vrot.slane %v12928_v9, %v19372_v5  ;;  %v6932_v6 = vcombine.high %v6924_v31, %v6924_v31  ;;  %v14029_v4 = vcombine.low %v6915_v30, %v6914_v25  ;;  %v12943_v22 = vrot.slane %v12929_v24, %v19372_v5  ;;  %v17942_v30 = vld.sshfl [vmem:[%s19377_s18 + $0x101] sm:$0x3 pattern:$0x76325410] }
 0x387   : > { %v12927_v40 = vcombine.low %v12919_v45, %v12926_v8  ;;  %v14045_v19 = vcombine.low %v6916_v43, %v6924_v31  ;;  %v18701_v41 = vunpack.i.h.bf16 %v23466_v23  ;;  %v14036_v2 = vrot.slane %v14028_v10, %v19372_v5  ;;  %v23835_v8 = vpop.permute.xlu1 %18808  ;;  %v25338_v24 = vld [vmem:[#allocation61_spill] sm:$0xff] }
 0x388   : > { %v14043_v21 = vrot.slane %v14029_v4, %v19372_v5  ;;  %v14046_v48 = vcombine.low %v6932_v6, %v23804_v27  ;;  %v18700_v13 = vunpack.i.l.bf16 %v23466_v23  ;;  %v12944_v16 = vcombine.low %v12936_v51, %v12943_v22  ;;  %v25339_v51 = vld [vmem:[#allocation62_spill] sm:$0xff] }
 0x389   : > { %v14053_v7 = vrot.slane %v14045_v19, %v19372_v5  ;;  %v15241_v26 = vsel %vm15214_vm5, %v15199_v15, %v18690_v55  ;;  %v15242_v60 = vsel %vm15214_vm5, %v15200_v52, %v18691_v33  ;;  %v18696_v0 = vunpack.i.h.bf16 %v23468_v56  ;;  %v19280_v33 = vld.sshfl [vmem:[%s19377_s18 + $0x111] sm:$0xff pattern:$0x76325410] }
 0x38a   : > { %v14044_v58 = vcombine.low %v14036_v2, %v14043_v21  ;;  %v14060_v39 = vrot.slane %v14046_v48, %v19372_v5  ;;  %v15283_v45 = vsel %vm15256_vm6, %v15241_v26, %v18700_v13  ;;  %v15284_v23 = vsel %vm15256_vm6, %v15242_v60, %v18701_v41  ;;  %v18004_v52 = vld [vmem:[%s19377_s18 + $0x1d2] sm:$0xff]  ;;  %v23847_v41 = vld.sshfl [vmem:[%s19377_s18 + $0x1c2] sm:$0x3 pattern:$0x76325410] }
 0x38b   : > { %v18977_v25 = vpack.i.bf16 %v12944_v16, %v12927_v40  ;;  %v18695_v9 = vunpack.i.l.bf16 %v23468_v56  ;;  %v6572_v31 = vcombine.high %v17907_v46, %v17907_v46  ;;  %v6579_v54 = vrot.slane %v17907_v46, %v19372_v5 }
 0x38c   : > { %v14061_v55 = vcombine.low %v14053_v7, %v14060_v39  ;;  %v7746_v15 = vcombine.high %v18003_v18, %v18003_v18  ;;  %v15182_v56 = vsel %vm15172_vm4, %v25339_v51, %v18696_v0  ;;  %v7753_v10 = vrot.slane %v18003_v18, %v19372_v5  ;;  %v25340_v7 = vld [vmem:[#allocation33_spill] sm:$0xff] }
 0x38d   : > { %18978 = vrot.lane.b32.xlu1 %v18977_v25, %s19330_s25  ;;  %v15181_v43 = vsel %vm15172_vm4, %v25338_v24, %v18695_v9  ;;  %v6586_v6 = vrot.slane %v6572_v31, %v19372_v5  ;;  %v6587_v40 = vcombine.high %v6579_v54, %v6579_v54  ;;  %v6604_v22 = vcombine.high %v19280_v33, %v19280_v33 }
 0x38e   : > { %v18972_v4 = vpack.i.bf16 %v14061_v55, %v14044_v58  ;;  %v13722_v19 = vcombine.low %v17942_v30, %v6579_v54  ;;  %v7760_v21 = vrot.slane %v7746_v15, %v19372_v5  ;;  %v7761_v48 = vcombine.high %v7753_v10, %v7753_v10  ;;  %v23860_v55 = vpop.permute.xlu1 %18818  ;;  %v23862_v54 = vpop.permute.xlu0 %18813 }
 0x38f   : > { %v6588_v2 = vcombine.high %v6586_v6, %v6586_v6  ;;  %v7763_v13 = vcombine.high %v18004_v52, %v18004_v52  ;;  %v13723_v46 = vcombine.low %v6587_v40, %v6586_v6  ;;  %v13740_v26 = vcombine.low %v6604_v22, %v25340_v7 }
 0x390   : > { %18973 = vrot.lane.b32.xlu0 %v18972_v4, %s19329_s24  ;;  %v13730_v16 = vrot.slane %v13722_v19, %v19372_v5  ;;  %v7770_v60 = vrot.slane %v18004_v52, %v19372_v5  ;;  %v7762_v58 = vcombine.high %v7760_v21, %v7760_v21  ;;  %v14839_v25 = vcombine.low %v23847_v41, %v7753_v10 }
 0x391   : > { %v13739_v18 = vcombine.low %v6588_v2, %v19280_v33  ;;  %v23855_v39 = vrot.slane %v7763_v13, %v19372_v5  ;;  %v13737_v0 = vrot.slane %v13723_v46, %v19372_v5  ;;  %v13754_v9 = vrot.slane %v13740_v26, %v19372_v5 }
 0x392   : > { %v7778_v30 = vcombine.high %v7770_v60, %v7770_v60  ;;  %v14840_v31 = vcombine.low %v7761_v48, %v7760_v21  ;;  %v14847_v33 = vrot.slane %v14839_v25, %v19372_v5  ;;  %v14856_v15 = vcombine.low %v7762_v58, %v7770_v60  ;;  %v17979_v21 = vld [vmem:[%s19377_s18 + $0x10a] sm:$0xff] }
 0x393   : > { %v13747_v52 = vrot.slane %v13739_v18, %v19372_v5  ;;  %v18711_v24 = vunpack.i.h.bf16 %v23500_v42  ;;  %v13738_v51 = vcombine.low %v13730_v16, %v13737_v0  ;;  %v18710_v4 = vunpack.i.l.bf16 %v23500_v42  ;;  %v18014_v18 = vld.sshfl [vmem:[%s19377_s18 + $0x102] sm:$0x3 pattern:$0x76325410] }
 0x394   : > { %v14854_v6 = vrot.slane %v14840_v31, %v19372_v5  ;;  %v14857_v10 = vcombine.low %v7778_v30, %v23855_v39  ;;  %v14864_v22 = vrot.slane %v14856_v15, %v19372_v5  ;;  %v18706_v2 = vunpack.i.h.bf16 %v23502_v37  ;;  %v23885_v30 = vpop.permute.xlu0 %18823 }
 0x395   : > { %v13755_v40 = vcombine.low %v13747_v52, %v13754_v9  ;;  %v15326_v19 = vsel %vm15298_vm7, %v15284_v23, %v18711_v24  ;;  %v15325_v46 = vsel %vm15298_vm7, %v15283_v45, %v18710_v4  ;;  %v18705_v16 = vunpack.i.l.bf16 %v23502_v37  ;;  %v23883_v9 = vpop.permute.xlu1 %18828  ;;  %v19281_v45 = vld.sshfl [vmem:[%s19377_s18 + $0x112] sm:$0xff pattern:$0x76325410] }
 0x396   : > { %v14855_v48 = vcombine.low %v14847_v33, %v14854_v6  ;;  %v14871_v13 = vrot.slane %v14857_v10, %v19372_v5  ;;  %v15353_v26 = vpack.c.bf16 %v15326_v19, %v15325_v46  ;;  %v15224_v42 = vsel %vm15214_vm5, %v15182_v56, %v18706_v2  ;;  %v17879_v6 = vld.sshfl [vmem:[%s19377_s18 + $0x1d8] sm:$0x3 pattern:$0x76325410] }
 0x397   : > { %v18987_v7 = vpack.i.bf16 %v13755_v40, %v13738_v51  ;;  %v11629_v60 = vcombine.low %v23516_v1, %v23797_v12  ;;  %v15223_v58 = vsel %vm15214_vm5, %v15181_v43, %v18705_v16  ;;  %v7418_v25 = vcombine.high %v17979_v21, %v17979_v21 }
 0x398   : > { %v14872_v23 = vcombine.low %v14864_v22, %v14871_v13  ;;  %v7425_v0 = vrot.slane %v17979_v21, %v19372_v5  ;;  %v18721_v56 = vunpack.i.h.bf16 %v23553_v63  ;;  %v18720_v1 = vunpack.i.l.bf16 %v23553_v63  ;;  %18132 = vmatmul.mubr.msk.bf16.gmra.mrb[8].mxu1 %vm15376_vm11, %v15353_v26  ;;  %v25341_v22 = vld [vmem:[#allocation43_spill] sm:$0xff] }
 0x399   : > { %18988 = vrot.lane.b32.xlu1 %v18987_v7, %s19329_s24  ;;  %v11636_v37 = vrot.slane %v11629_v60, %v19372_v5  ;;  %v7432_v43 = vrot.slane %v7418_v25, %v19372_v5  ;;  %18135 = vmatprep.mubr.msk.bf16.mxu1 %vm19334_vm10, %v25310_v50  ;;  %v7450_v33 = vcombine.high %v19281_v45, %v19281_v45  ;;  %v18716_v15 = vunpack.i.h.bf16 %v23555_v36  ;;  %v23912_v46 = vpop.permute.xlu1 %18838  ;;  %v17951_v60 = vld.sshfl [vmem:[%s19377_s18 + $0x1d9] sm:$0x3 pattern:$0x76325410] }
 0x39a   : > { %v18982_v12 = vpack.i.bf16 %v14872_v23, %v14855_v48  ;;  %v7433_v31 = vcombine.high %v7425_v0, %v7425_v0  ;;  %v14533_v52 = vcombine.low %v18014_v18, %v7425_v0  ;;  %v18715_v24 = vunpack.i.l.bf16 %v23555_v36  ;;  %v18023_v0 = vld.sshfl [vmem:[%s19377_s18 + $0x1da] sm:$0x3 pattern:$0x76325410] }
 0x39b   : > { %v12440_v51 = vcombine.low %v23617_v32, %v23847_v41  ;;  %v7434_v63 = vcombine.high %v7432_v43, %v7432_v43  ;;  %v6087_v40 = vcombine.high %v23767_v3, %v23767_v3  ;;  %v14551_v19 = vcombine.low %v7450_v33, %v25341_v22  ;;  %v23914_v3 = vpop.permute.xlu0 %18833 }
 0x39c   : > { %18983 = vrot.lane.b32.xlu0 %v18982_v12, %s19331_s26  ;;  %v14534_v10 = vcombine.low %v7433_v31, %v7432_v43  ;;  %v14541_v4 = vrot.slane %v14533_v52, %v19372_v5  ;;  %v15265_v36 = vsel %vm15256_vm6, %v15223_v58, %v18715_v24  ;;  %v15266_v2 = vsel %vm15256_vm6, %v15224_v42, %v18716_v15  ;;  %v25343_v12 = vld [vmem:[#allocation23_spill] sm:$0xff] }
 0x39d   : > { %11717 = vrot.lane.b32.xlu1 %v11636_v37, %s19327_s22  ;;  %v12447_v32 = vrot.slane %v12440_v51, %v19372_v5  ;;  %v14550_v21 = vcombine.low %v7434_v63, %v19281_v45  ;;  %v13251_v48 = vcombine.low %v6087_v40, %v17879_v6  ;;  %v18731_v13 = vunpack.i.h.bf16 %v23601_v49  ;;  %v25342_v37 = vld [vmem:[#allocation38_spill] sm:$0xff]  ;;  %v23942_v40 = vpop.permute.xlu1 %18848 }
 0x39e   : > { %v14548_v41 = vrot.slane %v14534_v10, %v19372_v5  ;;  %v14565_v16 = vrot.slane %v14551_v19, %v19372_v5  ;;  %v18730_v7 = vunpack.i.l.bf16 %v23601_v49  ;;  %v18726_v26 = vunpack.i.h.bf16 %v23603_v34  ;;  %v25345_v19 = vld [vmem:[#allocation67_spill] sm:$0xff] }
 0x39f   : > { %v18725_v42 = vunpack.i.l.bf16 %v23603_v34  ;;  %v14558_v23 = vrot.slane %v14550_v21, %v19372_v5  ;;  %v13258_v58 = vrot.slane %v13251_v48, %v19372_v5  ;;  %v6933_v25 = vcombine.high %v23804_v27, %v23804_v27  ;;  %v23944_v22 = vpop.permute.xlu0 %18843 }
 0x3a0   : > { %v14549_v18 = vcombine.low %v14541_v4, %v14548_v41  ;;  %v15160_v49 = vsel %vm15130_vm3, %v25343_v12, %v18726_v26  ;;  %v7779_v43 = vcombine.high %v23855_v39, %v23855_v39  ;;  %v15307_v34 = vsel %vm15298_vm7, %v15265_v36, %v18720_v1  ;;  %v25344_v39 = vld [vmem:[#allocation68_spill] sm:$0xff] }
 0x3a1   : > { %v15159_v45 = vsel %vm15130_vm3, %v25342_v37, %v18725_v42  ;;  %v14566_v31 = vcombine.low %v14558_v23, %v14565_v16  ;;  %13339 = vrot.lane.b32.xlu1 %v13258_v58, %s19330_s25  ;;  %v14062_v52 = vcombine.low %v6933_v25, %v17951_v60  ;;  %v15308_v33 = vsel %vm15298_vm7, %v15266_v2, %v18721_v56  ;;  %v23977_v12 = vpop.permute.xlu1 %18858 }
 0x3a2   : > { %v18741_v27 = vunpack.i.h.bf16 %v23637_v14  ;;  %v14873_v15 = vcombine.low %v7779_v43, %v18023_v0  ;;  %v15344_v24 = vpack.c.bf16 %v15308_v33, %v15307_v34  ;;  %v18740_v51 = vunpack.i.l.bf16 %v23637_v14  ;;  %v25347_v33 = vld [vmem:[#allocation28_spill] sm:$0xff] }
 0x3a3   : > { %v18736_v6 = vunpack.i.h.bf16 %v23639_v57  ;;  %v18992_v63 = vpack.i.bf16 %v14566_v31, %v14549_v18  ;;  %v14069_v10 = vrot.slane %v14062_v52, %v19372_v5  ;;  %v18735_v4 = vunpack.i.l.bf16 %v23639_v57 }
 0x3a4   : > { %v15184_v1 = vsel %vm15172_vm4, %v25344_v39, %v18741_v27  ;;  %v14880_v56 = vrot.slane %v14873_v15, %v19372_v5  ;;  %18096 = vmatmul.mubr.msk.bf16.gmra.mrb[16].mxu0 %vm15376_vm11, %v15344_v24  ;;  %v15183_v14 = vsel %vm15172_vm4, %v25345_v19, %v18740_v51  ;;  %v15201_v36 = vsel %vm15172_vm4, %v15159_v45, %v18730_v7 }
 0x3a5   : > { %v15202_v2 = vsel %vm15172_vm4, %v15160_v49, %v18731_v13  ;;  %18993 = vrot.lane.b32.xlu0 %v18992_v63, %s19331_s26  ;;  %v15243_v41 = vsel %vm15214_vm5, %v15201_v36, %v18735_v4  ;;  %v18751_v21 = vunpack.i.h.bf16 %v23673_v17  ;;  %v18750_v48 = vunpack.i.l.bf16 %v23673_v17  ;;  %18099 = vmatprep.mubr.msk.bf16.mxu0 %vm19334_vm10, %v25310_v50 }
 0x3a6   : > { %v15244_v57 = vsel %vm15214_vm5, %v15202_v2, %v18736_v6  ;;  %14961 = vrot.lane.b32.xlu1 %v14880_v56, %s19331_s26  ;;  %v18746_v16 = vunpack.i.h.bf16 %v23675_v61  ;;  %v18745_v7 = vunpack.i.l.bf16 %v23675_v61  ;;  %v18761_v13 = vunpack.i.h.bf16 %v23702_v62 }
 0x3a7   : > { %v18760_v26 = vunpack.i.l.bf16 %v23702_v62  ;;  %v15225_v42 = vsel %vm15214_vm5, %v15183_v14, %v18750_v48  ;;  %v15226_v60 = vsel %vm15214_vm5, %v15184_v1, %v18751_v21  ;;  %v18756_v18 = vunpack.i.h.bf16 %v23704_v11 }
 0x3a8   : > { %v18755_v17 = vunpack.i.l.bf16 %v23704_v11  ;;  %v15285_v23 = vsel %vm15256_vm6, %v15243_v41, %v18745_v7  ;;  %v15286_v58 = vsel %vm15256_vm6, %v15244_v57, %v18746_v16  ;;  %v15268_v61 = vsel %vm15256_vm6, %v15226_v60, %v18761_v13  ;;  %v23979_v11 = vpop.permute.xlu0 %18853  ;;  %v24011_v41 = vpop.permute.xlu1 %18868 }
 0x3a9   : > { %v15267_v25 = vsel %vm15256_vm6, %v15225_v42, %v18760_v26  ;;  %12528 = vrot.lane.b32.xlu0 %v12447_v32, %s19328_s23  ;;  %v15328_v0 = vsel %vm15298_vm7, %v15286_v58, %v18756_v18  ;;  %v18771_v37 = vunpack.i.h.bf16 %v23731_v44  ;;  %v18770_v45 = vunpack.i.l.bf16 %v23731_v44  ;;  %v25346_v32 = vld [vmem:[#allocation34_spill] sm:$0xff] }
 0x3aa   : > { %v15327_v62 = vsel %vm15298_vm7, %v15285_v23, %v18755_v17  ;;  %v18766_v43 = vunpack.i.h.bf16 %v23733_v29  ;;  %v18765_v34 = vunpack.i.l.bf16 %v23733_v29  ;;  %v18781_v31 = vunpack.i.h.bf16 %v23761_v59 }
 0x3ab   : > { %v15354_v49 = vpack.c.bf16 %v15328_v0, %v15327_v62  ;;  %v15161_v52 = vsel %vm15130_vm3, %v25346_v32, %v18770_v45  ;;  %v15162_v27 = vsel %vm15130_vm3, %v25347_v33, %v18771_v37  ;;  %v18780_v15 = vunpack.i.l.bf16 %v23761_v59  ;;  %v25350_v45 = vld [vmem:[#allocation19_spill] sm:$0xff]  ;;  %v25351_v32 = vld [vmem:[#allocation69_spill] sm:$0xff] }
 0x3ac   : > { %v18776_v44 = vunpack.i.h.bf16 %v23763_v35  ;;  %v15309_v24 = vsel %vm15298_vm7, %v15267_v25, %v18765_v34  ;;  %v15310_v51 = vsel %vm15298_vm7, %v15268_v61, %v18766_v43  ;;  %v18775_v29 = vunpack.i.l.bf16 %v23763_v35  ;;  %v24013_v57 = vpop.permute.xlu0 %18863  ;;  %v24045_v34 = vpop.permute.xlu1 %18878 }
 0x3ad   : > { %18136 = vmatmul.mubr.msk.bf16.gmra.mrb[12].mxu1 %vm15376_vm11, %v15354_v49  ;;  %v18791_v6 = vunpack.i.h.bf16 %v23788_v47  ;;  %14150 = vrot.lane.b32.xlu0 %v14069_v10, %s19329_s24  ;;  %v15345_v63 = vpack.c.bf16 %v15310_v51, %v15309_v24  ;;  %v18790_v1 = vunpack.i.l.bf16 %v23788_v47  ;;  %v18786_v59 = vunpack.i.h.bf16 %v23790_v20  ;;  %v25348_v47 = vld [vmem:[#allocation66_spill] sm:$0xff] }
 0x3ae   : > { %v15204_v39 = vsel %vm15172_vm4, %v15162_v27, %v18776_v44  ;;  %18139 = vmatprep.mubr.msk.bf16.mxu1 %vm19334_vm10, %v25310_v50  ;;  %v15203_v4 = vsel %vm15172_vm4, %v15161_v52, %v18775_v29  ;;  %v18785_v35 = vunpack.i.l.bf16 %v23790_v20  ;;  %v18801_v19 = vunpack.i.h.bf16 %v23809_v38  ;;  %v25349_v20 = vld [vmem:[#allocation65_spill] sm:$0xff]  ;;  %v25353_v52 = vld [vmem:[#allocation51_spill] sm:$0xff]  ;;  %v25355_v51 = vld [vmem:[#allocation70_spill] sm:$0xff] }
 0x3af   : > { %v15246_v56 = vsel %vm15214_vm5, %v15204_v39, %v18781_v31  ;;  %18100 = vmatmul.mubr.msk.bf16.gmra.mrb[20].mxu0 %vm15376_vm11, %v15345_v63  ;;  %v15245_v10 = vsel %vm15214_vm5, %v15203_v4, %v18780_v15  ;;  %v15186_v36 = vsel %vm15172_vm4, %v25348_v47, %v18786_v59  ;;  %v18800_v2 = vunpack.i.l.bf16 %v23809_v38  ;;  %v25354_v27 = vld [vmem:[#allocation27_spill] sm:$0xff] }
 0x3b0   : > { %v15288_v14 = vsel %vm15256_vm6, %v15246_v56, %v18791_v6  ;;  %v15287_v21 = vsel %vm15256_vm6, %v15245_v10, %v18790_v1  ;;  %v15185_v48 = vsel %vm15172_vm4, %v25349_v20, %v18785_v35  ;;  %v18796_v7 = vunpack.i.h.bf16 %v23811_v53  ;;  %18103 = vmatprep.mubr.msk.bf16.mxu0 %vm19334_vm10, %v25310_v50  ;;  %v24047_v31 = vpop.permute.xlu0 %18873 }
 0x3b1   : > { %v15330_v16 = vsel %vm15298_vm7, %v15288_v14, %v18801_v19  ;;  %v15329_v13 = vsel %vm15298_vm7, %v15287_v21, %v18800_v2  ;;  %v18795_v38 = vunpack.i.l.bf16 %v23811_v53  ;;  %v18811_v26 = vunpack.i.h.bf16 %v23835_v8 }
 0x3b2   : > { %v18810_v42 = vunpack.i.l.bf16 %v23835_v8  ;;  %v15355_v60 = vpack.c.bf16 %v15330_v16, %v15329_v13  ;;  %v15228_v18 = vsel %vm15214_vm5, %v15186_v36, %v18796_v7  ;;  %v18806_v17 = vunpack.i.h.bf16 %v23837_v28 }
 0x3b3   : > { %v18805_v23 = vunpack.i.l.bf16 %v23837_v28  ;;  %v15227_v58 = vsel %vm15214_vm5, %v15185_v48, %v18795_v38  ;;  %v18821_v25 = vunpack.i.h.bf16 %v23860_v55  ;;  %v18820_v61 = vunpack.i.l.bf16 %v23860_v55 }
 0x3b4   : > { %v18816_v62 = vunpack.i.h.bf16 %v23862_v54  ;;  %v15270_v0 = vsel %vm15256_vm6, %v15228_v18, %v18806_v17  ;;  %v18815_v8 = vunpack.i.l.bf16 %v23862_v54  ;;  %v18831_v37 = vunpack.i.h.bf16 %v23883_v9  ;;  %v18884_v20 = vpop.permute.xlu0 %18883 }
 0x3b5   : > { %v15269_v53 = vsel %vm15256_vm6, %v15227_v58, %v18805_v23  ;;  %18140 = vmatmul.mubr.msk.bf16.gmra.mrb[16].mxu1 %vm15376_vm11, %v15355_v60  ;;  %v15312_v43 = vsel %vm15298_vm7, %v15270_v0, %v18811_v26  ;;  %v18830_v55 = vunpack.i.l.bf16 %v23883_v9  ;;  %v25352_v54 = vunpack.i.h.bf16 %v25351_v32 }
 0x3b6   : > { %v15164_v28 = vsel %vm15130_vm3, %v25350_v45, %v18816_v62  ;;  %v15311_v49 = vsel %vm15298_vm7, %v15269_v53, %v18810_v42  ;;  %18143 = vmatprep.mubr.msk.bf16.mxu1 %vm19334_vm10, %v25310_v50  ;;  %v15163_v15 = vsel %vm15130_vm3, %v25354_v27, %v18815_v8  ;;  %v18826_v24 = vunpack.i.h.bf16 %v23885_v30  ;;  %v25357_v53 = vld [vmem:[#allocation45_spill] sm:$0xff] }
 0x3b7   : > { %v15146_v33 = vsel %vm15130_vm3, %v25353_v52, %v25352_v54  ;;  %v15346_v44 = vpack.c.bf16 %v15312_v43, %v15311_v49  ;;  %v15187_v9 = vsel %vm15172_vm4, %v25355_v51, %v18830_v55  ;;  %v18825_v6 = vunpack.i.l.bf16 %v23885_v30  ;;  %v25358_v55 = vld [vmem:[#allocation63_spill] sm:$0xff]  ;;  %v25360_v54 = vld [vmem:[#allocation6_spill] sm:$0xff] }
 0x3b8   : > { %v15188_v29 = vsel %vm15172_vm4, %v15146_v33, %v18831_v37  ;;  %v15205_v63 = vsel %vm15172_vm4, %v15163_v15, %v18820_v61  ;;  %v15206_v39 = vsel %vm15172_vm4, %v15164_v28, %v18821_v25  ;;  %v18841_v1 = vunpack.i.h.bf16 %v23912_v46 }
 0x3b9   : > { %18104 = vmatmul.mubr.msk.bf16.gmra.mrb[24].mxu0 %vm15376_vm11, %v15346_v44  ;;  %v18840_v59 = vunpack.i.l.bf16 %v23912_v46  ;;  %v18836_v4 = vunpack.i.h.bf16 %v23914_v3  ;;  %v15248_v56 = vsel %vm15214_vm5, %v15206_v39, %v18826_v24  ;;  %v18835_v35 = vunpack.i.l.bf16 %v23914_v3 }
 0x3ba   : > { %v18851_v19 = vunpack.i.h.bf16 %v23942_v40  ;;  %v18850_v30 = vunpack.i.l.bf16 %v23942_v40  ;;  %18107 = vmatprep.mubr.msk.bf16.mxu0 %vm19334_vm10, %v25310_v50  ;;  %v15247_v10 = vsel %vm15214_vm5, %v15205_v63, %v18825_v6  ;;  %v15230_v47 = vsel %vm15214_vm5, %v15188_v29, %v18841_v1  ;;  %v18889_v40 = vpop.permute.xlu1 %18888  ;;  %v25362_v29 = vld [vmem:[#allocation10_spill] sm:$0xff] }
 0x3bb   : > { %v15229_v14 = vsel %vm15214_vm5, %v15187_v9, %v18840_v59  ;;  %v18846_v46 = vunpack.i.h.bf16 %v23944_v22  ;;  %v15289_v36 = vsel %vm15256_vm6, %v15247_v10, %v18835_v35  ;;  %v15290_v2 = vsel %vm15256_vm6, %v15248_v56, %v18836_v4  ;;  %v25363_v35 = vld [vmem:[#allocation41_spill] sm:$0xff] }
 0x3bc   : > { %v15271_v3 = vsel %vm15256_vm6, %v15229_v14, %v18850_v30  ;;  %v18845_v21 = vunpack.i.l.bf16 %v23944_v22  ;;  %v18861_v16 = vunpack.i.h.bf16 %v23977_v12  ;;  %v18860_v7 = vunpack.i.l.bf16 %v23977_v12  ;;  %v25356_v22 = vld [vmem:[#allocation39_spill] sm:$0xff] }
 0x3bd   : > { %v15332_v48 = vsel %vm15298_vm7, %v15290_v2, %v18846_v46  ;;  %v18856_v13 = vunpack.i.h.bf16 %v23979_v11  ;;  %v15272_v38 = vsel %vm15256_vm6, %v15230_v47, %v18851_v19  ;;  %v18855_v42 = vunpack.i.l.bf16 %v23979_v11  ;;  %v25365_v46 = vld [vmem:[#allocation40_spill] sm:$0xff] }
 0x3be   : > { %v15331_v26 = vsel %vm15298_vm7, %v15289_v36, %v18845_v21  ;;  %v18871_v60 = vunpack.i.h.bf16 %v24011_v41  ;;  %v15165_v17 = vsel %vm15130_vm3, %v25356_v22, %v18860_v7  ;;  %v18870_v58 = vunpack.i.l.bf16 %v24011_v41  ;;  %v18899_v43 = vpop.permute.xlu1 %18898  ;;  %v19282_v7 = vld.sshfl [vmem:[%s19377_s18 + $0xc0] sm:$0xff pattern:$0x76325410] }
 0x3bf   : > { %v15356_v18 = vpack.c.bf16 %v15332_v48, %v15331_v26  ;;  %v15314_v23 = vsel %vm15298_vm7, %v15272_v38, %v18856_v13  ;;  %v15313_v12 = vsel %vm15298_vm7, %v15271_v3, %v18855_v42  ;;  %v18866_v25 = vunpack.i.h.bf16 %v24013_v57  ;;  %v25367_v3 = vld [vmem:[#allocation42_spill] sm:$0xff] }
 0x3c0   : > { %v18865_v61 = vunpack.i.l.bf16 %v24013_v57  ;;  %v18881_v62 = vunpack.i.h.bf16 %v24045_v34  ;;  %v15166_v11 = vsel %vm15130_vm3, %v25357_v53, %v18861_v16  ;;  %v15347_v0 = vpack.c.bf16 %v15314_v23, %v15313_v12  ;;  %v18894_v57 = vpop.permute.xlu0 %18893  ;;  %v19283_v13 = vld.sshfl [vmem:[%s19377_s18 + $0xc8] sm:$0xff pattern:$0x76325410] }
 0x3c1   : > { %18144 = vmatmul.mubr.msk.bf16.gmra.mrb[20].mxu1 %vm15376_vm11, %v15356_v18  ;;  %v18880_v8 = vunpack.i.l.bf16 %v24045_v34  ;;  %v18876_v37 = vunpack.i.h.bf16 %v24047_v31  ;;  %v15208_v45 = vsel %vm15172_vm4, %v15166_v11, %v18866_v25  ;;  %v18891_v28 = vunpack.i.h.bf16 %v18889_v40  ;;  %v25373_v25 = vld [vmem:[#allocation46_spill] sm:$0xff] }
 0x3c2   : > { %v15207_v41 = vsel %vm15172_vm4, %v15165_v17, %v18865_v61  ;;  %v18890_v49 = vunpack.i.l.bf16 %v18889_v40  ;;  %18147 = vmatprep.mubr.msk.bf16.mxu1 %vm19334_vm10, %v25310_v50  ;;  %v25359_v32 = vunpack.i.h.bf16 %v25358_v55  ;;  %18108 = vmatmul.mubr.msk.bf16.gmra.mrb[28].mxu0 %vm15376_vm11, %v15347_v0  ;;  %v15250_v33 = vsel %vm15214_vm5, %v15208_v45, %v18871_v60  ;;  %v25369_v60 = vld [vmem:[#allocation15_spill] sm:$0xff]  ;;  %v25371_v17 = vld [vmem:[#allocation16_spill] sm:$0xff] }
 0x3c3   : > { %v15249_v34 = vsel %vm15214_vm5, %v15207_v41, %v18870_v58  ;;  %v18875_v27 = vunpack.i.l.bf16 %v24047_v31  ;;  %v15292_v44 = vsel %vm15256_vm6, %v15250_v33, %v18881_v62  ;;  %v18886_v24 = vunpack.i.h.bf16 %v18884_v20  ;;  %18111 = vmatprep.mubr.msk.bf16.mxu0 %vm19334_vm10, %v25310_v50 }
 0x3c4   : > { %v15148_v52 = vsel %vm15130_vm3, %v25360_v54, %v25359_v32  ;;  %v15291_v15 = vsel %vm15256_vm6, %v15249_v34, %v18880_v8  ;;  %v18885_v51 = vunpack.i.l.bf16 %v18884_v20  ;;  %v25361_v9 = vunpack.i.l.bf16 %v25358_v55  ;;  %v18904_v16 = vpop.permute.xlu0 %18903  ;;  %v25375_v34 = vld [vmem:[#allocation18_spill] sm:$0xff] }
 0x3c5   : > { %v15333_v63 = vsel %vm15298_vm7, %v15291_v15, %v18890_v49  ;;  %v15334_v39 = vsel %vm15298_vm7, %v15292_v44, %v18891_v28  ;;  %v18901_v31 = vunpack.i.h.bf16 %v18899_v43  ;;  %v15190_v1 = vsel %vm15172_vm4, %v15148_v52, %v18876_v37  ;;  %v18909_v28 = vpop.permute.xlu1 %18908  ;;  %v25374_v49 = vld [vmem:[#allocation44_spill] sm:$0xff]  ;;  %v25376_v15 = vld [vmem:[#allocation53_spill] sm:$0xff] }
 0x3c6   : > { %v15147_v6 = vsel %vm15130_vm3, %v25362_v29, %v25361_v9  ;;  %v15357_v59 = vpack.c.bf16 %v15334_v39, %v15333_v63  ;;  %v18900_v4 = vunpack.i.l.bf16 %v18899_v43  ;;  %v18896_v56 = vunpack.i.h.bf16 %v18894_v57 }
 0x3c7   : > { %v25364_v19 = vcombine.high %v25363_v35, %v25363_v35  ;;  %v15189_v10 = vsel %vm15172_vm4, %v15147_v6, %v18875_v27  ;;  %v15232_v14 = vsel %vm15214_vm5, %v15190_v1, %v18886_v24  ;;  %v18895_v47 = vunpack.i.l.bf16 %v18894_v57 }
 0x3c8   : > { %v25366_v36 = vcombine.high %v25365_v46, %v25365_v46  ;;  %v25368_v21 = vcombine.high %v25367_v3, %v25367_v3  ;;  %v15231_v20 = vsel %vm15214_vm5, %v15189_v10, %v18885_v51  ;;  %v15274_v48 = vsel %vm15256_vm6, %v15232_v14, %v18896_v56  ;;  %v18914_v37 = vpop.permute.xlu0 %18913 }
 0x3c9   : > { %v8416_v30 = vcombine.low %v25363_v35, %v25364_v19  ;;  %v15273_v38 = vsel %vm15256_vm6, %v15231_v20, %v18895_v47  ;;  %18148 = vmatmul.mubr.msk.bf16.gmra.mrb[24].mxu1 %vm15376_vm11, %v15357_v59  ;;  %v15316_v26 = vsel %vm15298_vm7, %v15274_v48, %v18901_v31  ;;  %v25370_v18 = vcombine.high %v25369_v60, %v25369_v60  ;;  %v24176_v35 = vpop.permute.xlu1 %18918  ;;  %v25377_v48 = vld [vmem:[#allocation13_spill] sm:$0xff] }
 0x3ca   : > { %v8400_v2 = vcombine.low %v25365_v46, %v25366_v36  ;;  %v8417_v40 = vcombine.low %v25367_v3, %v25368_v21  ;;  %v15315_v42 = vsel %vm15298_vm7, %v15273_v38, %v18900_v4  ;;  %18151 = vmatprep.mubr.msk.bf16.mxu1 %vm19334_vm10, %v25310_v50  ;;  %v25372_v23 = vcombine.high %v25371_v17, %v25371_v17 }
 0x3cb   : > { %v621_v22 = vrot.slane %v25370_v18, %v19372_v5  ;;  %v15348_v12 = vpack.c.bf16 %v15316_v26, %v15315_v42  ;;  %v8407_v61 = vrot.slane %v25373_v25, %v19372_v5  ;;  %v8424_v53 = vrot.slane %v8416_v30, %v19372_v5 }
 0x3cc   : > { %v638_v58 = vrot.slane %v25372_v23, %v19372_v5  ;;  %v8414_v62 = vrot.slane %v8400_v2, %v19372_v5  ;;  %v8431_v11 = vrot.slane %v8417_v40, %v19372_v5  ;;  %v622_v0 = vcombine.high %v19282_v7, %v19282_v7 }
 0x3cd   : > { %v639_v8 = vcombine.high %v19283_v13, %v19283_v13  ;;  %18112 = vmatmul.mubr.msk.bf16.gmra.mrb[32].mxu0 %vm15376_vm11, %v15348_v12  ;;  %v623_v41 = vcombine.high %v621_v22, %v621_v22  ;;  %v18291_v43 = vunpack.i.h.bf16 %v25374_v49  ;;  %v18290_v57 = vunpack.i.l.bf16 %v25374_v49  ;;  %v18929_v18 = vpop.permute.xlu1 %18928 }
 0x3ce   : > { %18115 = vmatprep.mubr.msk.bf16.mxu0 %vm19334_vm10, %v25310_v50  ;;  %v640_v45 = vcombine.high %v638_v58, %v638_v58  ;;  %v8415_v55 = vcombine.low %v8407_v61, %v8414_v62  ;;  %v8432_v32 = vcombine.low %v8424_v53, %v8431_v11  ;;  %v8093_v54 = vcombine.low %v19282_v7, %v622_v0  ;;  %v25378_v61 = vld [vmem:[#allocation5_spill] sm:$0xff] }
 0x3cf   : > { %v8110_v52 = vcombine.low %v19283_v13, %v639_v8  ;;  %v18391_v33 = vunpack.i.h.bf16 %v25375_v34  ;;  %v18390_v27 = vunpack.i.l.bf16 %v25375_v34  ;;  %v18491_v44 = vunpack.i.h.bf16 %v25376_v15  ;;  %v18924_v31 = vpop.permute.xlu0 %18923  ;;  %v25379_v8 = vld [vmem:[#allocation52_spill] sm:$0xff] }
 0x3d0   : > { %v18490_v24 = vunpack.i.l.bf16 %v25376_v15  ;;  %v18906_v51 = vunpack.i.h.bf16 %v18904_v16  ;;  %v18905_v9 = vunpack.i.l.bf16 %v18904_v16  ;;  %v8094_v29 = vcombine.low %v621_v22, %v623_v41 }
 0x3d1   : > { %v8111_v6 = vcombine.low %v638_v58, %v640_v45  ;;  %v15041_v63 = vsel %vm15004_vm0, %v8415_v55, %v18290_v57  ;;  %v15042_v39 = vsel %vm15004_vm0, %v8432_v32, %v18291_v43  ;;  %v8101_v1 = vrot.slane %v8093_v54, %v19372_v5 }
 0x3d2   : > { %v8118_v59 = vrot.slane %v8110_v52, %v19372_v5  ;;  %v15083_v4 = vsel %vm15046_vm1, %v15041_v63, %v18390_v27  ;;  %v15084_v56 = vsel %vm15046_vm1, %v15042_v39, %v18391_v33  ;;  %v18911_v10 = vunpack.i.h.bf16 %v18909_v28 }
 0x3d3   : > { %v15125_v19 = vsel %vm15088_vm2, %v15083_v4, %v18490_v24  ;;  %v15126_v30 = vsel %vm15088_vm2, %v15084_v56, %v18491_v44  ;;  %v18910_v14 = vunpack.i.l.bf16 %v18909_v28  ;;  %v18916_v36 = vunpack.i.h.bf16 %v18914_v37  ;;  %v25380_v28 = vld [vmem:[#allocation71_spill] sm:$0xff] }
 0x3d4   : > { %v15167_v47 = vsel %vm15130_vm3, %v15125_v19, %v18905_v9  ;;  %v15168_v46 = vsel %vm15130_vm3, %v15126_v30, %v18906_v51  ;;  %v18915_v2 = vunpack.i.l.bf16 %v18914_v37  ;;  %v8108_v3 = vrot.slane %v8094_v29, %v19372_v5 }
 0x3d5   : > { %v8125_v21 = vrot.slane %v8111_v6, %v19372_v5  ;;  %v18926_v40 = vunpack.i.h.bf16 %v18924_v31  ;;  %v18925_v20 = vunpack.i.l.bf16 %v18924_v31  ;;  %v18246_v16 = vunpack.i.h.bf16 %v25377_v48 }
 0x3d6   : > { %v18245_v7 = vunpack.i.l.bf16 %v25377_v48  ;;  %v15209_v13 = vsel %vm15172_vm4, %v15167_v47, %v18910_v14  ;;  %v15210_v38 = vsel %vm15172_vm4, %v15168_v46, %v18911_v10  ;;  %v8109_v23 = vcombine.low %v8101_v1, %v8108_v3 }
 0x3d7   : > { %v15251_v42 = vsel %vm15214_vm5, %v15209_v13, %v18915_v2  ;;  %v15252_v60 = vsel %vm15214_vm5, %v15210_v38, %v18916_v36  ;;  %v8126_v58 = vcombine.low %v8118_v59, %v8125_v21  ;;  %v18346_v62 = vunpack.i.h.bf16 %v25378_v61 }
 0x3d8   : > { %v15293_v12 = vsel %vm15256_vm6, %v15251_v42, %v18925_v20  ;;  %v15294_v25 = vsel %vm15256_vm6, %v15252_v60, %v18926_v40  ;;  %v18345_v53 = vunpack.i.l.bf16 %v25378_v61  ;;  %v18446_v37 = vunpack.i.h.bf16 %v25379_v8  ;;  %v18939_v52 = vpop.permute.xlu1 %18938 }
 0x3d9   : > { %v18445_v41 = vunpack.i.l.bf16 %v25379_v8  ;;  %v18546_v49 = vunpack.i.h.bf16 %v25380_v28  ;;  %v18545_v43 = vunpack.i.l.bf16 %v25380_v28  ;;  %v15023_v57 = vsel %vm15004_vm0, %v8109_v23, %v18245_v7 }
 0x3da   : > { %v15024_v55 = vsel %vm15004_vm0, %v8126_v58, %v18246_v16  ;;  %v15065_v32 = vsel %vm15046_vm1, %v15023_v57, %v18345_v53  ;;  %v18921_v27 = vunpack.i.h.bf16 %v24176_v35  ;;  %v18920_v15 = vunpack.i.l.bf16 %v24176_v35  ;;  %v223_v57 = vld [vmem:[%s19377_s18 + $0x1a0] sm:$0xff] }
 0x3db   : > { %v18934_v26 = vpop.permute.xlu0 %18933  ;;  %v15066_v54 = vsel %vm15046_vm1, %v15024_v55, %v18346_v62  ;;  %v15107_v34 = vsel %vm15088_vm2, %v15065_v32, %v18445_v41  ;;  %v18931_v63 = vunpack.i.h.bf16 %v18929_v18  ;;  %v18930_v39 = vunpack.i.l.bf16 %v18929_v18 }
 0x3dc   : > { %v18936_v22 = vunpack.i.h.bf16 %v18934_v26  ;;  %v18935_v17 = vunpack.i.l.bf16 %v18934_v26  ;;  %v15108_v33 = vsel %vm15088_vm2, %v15066_v54, %v18446_v37  ;;  %v15149_v24 = vsel %vm15130_vm3, %v15107_v34, %v18545_v43 }
 0x3dd   : > { %v15150_v51 = vsel %vm15130_vm3, %v15108_v33, %v18546_v49  ;;  %v18941_v31 = vunpack.i.h.bf16 %v18939_v52  ;;  %v18940_v1 = vunpack.i.l.bf16 %v18939_v52  ;;  %v15191_v10 = vsel %vm15172_vm4, %v15149_v24, %v18920_v15  ;;  %v19284_v52 = vld.sshfl [vmem:[%s19377_s18 + $0xd8] sm:$0xff pattern:$0x76325410] }
 0x3de   : > { %v15335_v11 = vsel %vm15298_vm7, %v15293_v12, %v18935_v17  ;;  %v15336_v0 = vsel %vm15298_vm7, %v15294_v25, %v18936_v22  ;;  %v15192_v14 = vsel %vm15172_vm4, %v15150_v51, %v18921_v27  ;;  %v15233_v21 = vsel %vm15214_vm5, %v15191_v10, %v18930_v39  ;;  %v222_v25 = vld [vmem:[%s19377_s18 + $0x198] sm:$0xff]  ;;  %v17546_v39 = vld.sshfl [vmem:[%s19377_s18 + $0xd0] sm:$0x3 pattern:$0x76325410] }
 0x3df   : > { %v15358_v45 = vpack.c.bf16 %v15336_v0, %v15335_v11  ;;  %v15234_v40 = vsel %vm15214_vm5, %v15192_v14, %v18931_v63  ;;  %v15275_v16 = vsel %vm15256_vm6, %v15233_v21, %v18940_v1  ;;  %v976_v28 = vcombine.high %v222_v25, %v222_v25  ;;  %v18949_v51 = vpop.permute.xlu1 %18948  ;;  %v25381_v10 = vld [vmem:[#allocation7_spill] sm:$0xff] }
 0x3e0   : > { %v15276_v7 = vsel %vm15256_vm6, %v15234_v40, %v18941_v31  ;;  %v983_v33 = vrot.slane %v222_v25, %v19372_v5  ;;  %v993_v15 = vcombine.high %v223_v57, %v223_v57  ;;  %v1000_v24 = vrot.slane %v223_v57, %v19372_v5  ;;  %v25384_v25 = vld [vmem:[#allocation22_spill] sm:$0xff] }
 0x3e1   : > { %18152 = vmatmul.mubr.msk.bf16.gmra.mrb[28].mxu1 %vm15376_vm11, %v15358_v45  ;;  %v990_v27 = vrot.slane %v976_v28, %v19372_v5  ;;  %v18950_v57 = vunpack.i.l.bf16 %v18949_v51 }
 0x3e2   : > { %18155 = vmatprep.mubr.msk.bf16.mxu1 %vm19334_vm10, %v25310_v50  ;;  %v991_v31 = vcombine.high %v983_v33, %v983_v33 }
 0x3e3   : > { %v992_v1 = vcombine.high %v990_v27, %v990_v27 }
 0x3e4   : > { %v24211_v44 = vpop.f32.mrb[0].mxu0 }
 0x3e5   : > { %v15688_v9 = vcombine.high %v24211_v44, %v24211_v44  ;;  %v15695_v29 = vrot.slane %v24211_v44, %v19372_v5  ;;  %v18081_v6 = vpop.f32.mrb[1].mxu0 }
 0x3e6   : > { %v24219_v59 = vpop.f32.mrb[2].mxu0  ;;  %v663_v6 = vcombine.high %v19284_v52, %v19284_v52 }
 0x3e7   : > { %v15702_v4 = vrot.slane %v15688_v9, %v19372_v5  ;;  %v15703_v56 = vcombine.high %v15695_v29, %v15695_v29  ;;  %v15705_v35 = vcombine.high %v24219_v59, %v24219_v59  ;;  %v15712_v19 = vrot.slane %v24219_v59, %v19372_v5  ;;  %v18082_v30 = vpop.f32.mrb[3].mxu0  ;;  %v18944_v47 = vpop.permute.xlu0 %18943 }
 0x3e8   : > { %v18946_v20 = vunpack.i.h.bf16 %v18944_v47  ;;  %v18945_v48 = vunpack.i.l.bf16 %v18944_v47  ;;  %v8127_v30 = vcombine.low %v17546_v39, %v19284_v52  ;;  %v8128_v14 = vcombine.low %v663_v6, %v25381_v10 }
 0x3e9   : > { %v15704_v46 = vcombine.high %v15702_v4, %v15702_v4  ;;  %v16376_v36 = vcombine.low %v15695_v29, %v15703_v56  ;;  %v15719_v2 = vrot.slane %v15705_v35, %v19372_v5  ;;  %v15720_v3 = vcombine.high %v15712_v19, %v15712_v19  ;;  %v17554_v35 = vld.sshfl [vmem:[%s19377_s18 + $0x190] sm:$0x3 pattern:$0x76325410] }
 0x3ea   : > { %v15317_v26 = vsel %vm15298_vm7, %v15275_v16, %v18945_v48  ;;  %v15318_v42 = vsel %vm15298_vm7, %v15276_v7, %v18946_v20  ;;  %v1008_v56 = vcombine.high %v1000_v24, %v1000_v24  ;;  %v8135_v21 = vrot.slane %v8127_v30, %v19372_v5 }
 0x3eb   : > { %v16377_v13 = vcombine.low %v15702_v4, %v15704_v46  ;;  %v15721_v38 = vcombine.high %v15719_v2, %v15719_v2  ;;  %v16393_v60 = vcombine.low %v15712_v19, %v15720_v3  ;;  %v15349_v18 = vpack.c.bf16 %v15318_v42, %v15317_v26  ;;  %v24282_v19 = vpop.permute.xlu1 %18958  ;;  %v18954_v47 = vpop.permute.xlu0 %18953  ;;  %v25382_v26 = vld [vmem:[#allocation20_spill] sm:$0xff] }
 0x3ec   : > { %v16384_v22 = vrot.slane %v16376_v36, %v19372_v5  ;;  %v1007_v4 = vrot.slane %v993_v15, %v19372_v5  ;;  %v8433_v46 = vcombine.low %v17554_v35, %v983_v33  ;;  %v8434_v36 = vcombine.low %v991_v31, %v990_v27 }
 0x3ed   : > { %v16391_v17 = vrot.slane %v16377_v13, %v19372_v5  ;;  %v16394_v23 = vcombine.low %v15719_v2, %v15721_v38  ;;  %18116 = vmatmul.mubr.msk.bf16.gmra.mrb[36].mxu0 %vm15376_vm11, %v15349_v18  ;;  %v16401_v61 = vrot.slane %v16393_v60, %v19372_v5  ;;  %v8450_v2 = vcombine.low %v992_v1, %v1000_v24  ;;  %v25383_v18 = vld [vmem:[#allocation37_spill] sm:$0xff] }
 0x3ee   : > { %18119 = vmatprep.mubr.msk.bf16.mxu0 %vm19334_vm10, %v25310_v50  ;;  %v8451_v3 = vcombine.low %v1008_v56, %v1007_v4  ;;  %v8142_v40 = vrot.slane %v8128_v14, %v19372_v5  ;;  %v8441_v20 = vrot.slane %v8433_v46, %v19372_v5  ;;  %v8448_v48 = vrot.slane %v8434_v36, %v19372_v5 }
 0x3ef   : > { %v16392_v58 = vcombine.low %v16384_v22, %v16391_v17  ;;  %v24244_v12 = vpop.f32.mrb[4].mxu0  ;;  %v16408_v62 = vrot.slane %v16394_v23, %v19372_v5  ;;  %v8458_v16 = vrot.slane %v8450_v2, %v19372_v5  ;;  %v18250_v42 = vunpack.i.l.bf16 %v25382_v26  ;;  %v25387_v2 = vld [vmem:[#allocation12_spill] sm:$0xff] }
 0x3f0   : > { %v15722_v53 = vcombine.high %v24244_v12, %v24244_v12  ;;  %v18085_v11 = vpop.f32.mrb[5].mxu0  ;;  %v15729_v0 = vrot.slane %v24244_v12, %v19372_v5  ;;  %v8465_v7 = vrot.slane %v8451_v3, %v19372_v5  ;;  %v8143_v60 = vcombine.low %v8135_v21, %v8142_v40 }
 0x3f1   : > { %17169 = vst.msk [vmem:[%s24241_s7] sm:$0xff] %vm17168_vm12, %v16392_v58  ;;  %v24257_v8 = vpop.f32.mrb[6].mxu0  ;;  %v16409_v37 = vcombine.low %v16401_v61, %v16408_v62  ;;  %v18296_v22 = vunpack.i.h.bf16 %v25383_v18  ;;  %v18295_v17 = vunpack.i.l.bf16 %v25383_v18  ;;  %v8449_v23 = vcombine.low %v8441_v20, %v8448_v48  ;;  %v25388_v18 = vld [vmem:[#allocation9_spill] sm:$0xff] }
 0x3f2   : > { %v15736_v41 = vrot.slane %v15722_v53, %v19372_v5  ;;  %v18086_v45 = vpop.f32.mrb[7].mxu0  ;;  %v15737_v49 = vcombine.high %v15729_v0, %v15729_v0  ;;  %v16416_v43 = vrot.slane %v15729_v0, %v19372_v5  ;;  %v24266_v32 = vrot.slane %v24257_v8, %v19372_v5  ;;  %v25385_v0 = vld [vmem:[#allocation36_spill] sm:$0xff] }
 0x3f3   : > { %17170 = vst.msk [vmem:[%s24241_s7 + $0x8] sm:$0xff] %vm17168_vm12, %v16409_v37  ;;  %v24291_v13 = vpop.permute.xlu1 %18968  ;;  %v8466_v58 = vcombine.low %v8458_v16, %v8465_v7  ;;  %v18396_v61 = vunpack.i.h.bf16 %v25384_v25  ;;  %v18395_v62 = vunpack.i.l.bf16 %v25384_v25  ;;  %v18251_v53 = vunpack.i.h.bf16 %v25382_v26 }
 0x3f4   : > { %v15738_v55 = vcombine.high %v15736_v41, %v15736_v41  ;;  %v16417_v54 = vcombine.low %v15737_v49, %v15736_v41  ;;  %17172 = vst.msk [vmem:[%s24241_s7 + $0x10] sm:$0x3] %vm17171_vm13, %v16416_v43  ;;  %v1009_v11 = vcombine.high %v1007_v4, %v1007_v4  ;;  %v18496_v37 = vunpack.i.h.bf16 %v25385_v0  ;;  %v17555_v49 = vld.sshfl [vmem:[%s19377_s18 + $0x1a8] sm:$0x3 pattern:$0x76325410] }
 0x3f5   : > { %v18495_v41 = vunpack.i.l.bf16 %v25385_v0  ;;  %v15025_v28 = vsel %vm15004_vm0, %v8143_v60, %v18250_v42  ;;  %v18951_v43 = vunpack.i.h.bf16 %v18949_v51  ;;  %v15044_v52 = vsel %vm15004_vm0, %v8466_v58, %v18296_v22 }
 0x3f6   : > { %v16418_v34 = vcombine.low %v15738_v55, %v24266_v32  ;;  %v16425_v9 = vrot.slane %v16417_v54, %v19372_v5  ;;  %v15043_v54 = vsel %vm15004_vm0, %v8449_v23, %v18295_v17  ;;  %v18955_v33 = vunpack.i.l.bf16 %v18954_v47 }
 0x3f7   : > { %v15085_v27 = vsel %vm15046_vm1, %v15043_v54, %v18395_v62  ;;  %v15086_v15 = vsel %vm15046_vm1, %v15044_v52, %v18396_v61  ;;  %v18351_v3 = vunpack.i.h.bf16 %v25387_v2  ;;  %v18350_v21 = vunpack.i.l.bf16 %v25387_v2 }
 0x3f8   : > { %v16432_v29 = vrot.slane %v16418_v34, %v19372_v5  ;;  %v18964_v38 = vpop.permute.xlu0 %18963  ;;  %v18956_v34 = vunpack.i.h.bf16 %v18954_v47  ;;  %v15127_v39 = vsel %vm15088_vm2, %v15085_v27, %v18495_v41  ;;  %v15128_v51 = vsel %vm15088_vm2, %v15086_v15, %v18496_v37 }
 0x3f9   : > { %v18966_v24 = vunpack.i.h.bf16 %v18964_v38  ;;  %v15169_v31 = vsel %vm15130_vm3, %v15127_v39, %v18950_v57  ;;  %v15170_v1 = vsel %vm15130_vm3, %v15128_v51, %v18951_v43  ;;  %v18451_v22 = vunpack.i.h.bf16 %v25388_v18  ;;  %v25389_v51 = vld [vmem:[#allocation47_spill] sm:$0xff] }
 0x3fa   : > { %v16433_v63 = vcombine.low %v16425_v9, %v16432_v29  ;;  %v18965_v9 = vunpack.i.l.bf16 %v18964_v38  ;;  %v25386_v29 = vld [vmem:[#allocation11_spill] sm:$0xff]  ;;  %v15211_v30 = vsel %vm15172_vm4, %v15169_v31, %v18955_v33  ;;  %v15212_v10 = vsel %vm15172_vm4, %v15170_v1, %v18956_v34 }
 0x3fb   : > { %v15026_v6 = vsel %vm15004_vm0, %v25386_v29, %v18251_v53  ;;  %v15254_v20 = vsel %vm15214_vm5, %v15212_v10, %v18966_v24  ;;  %v18450_v0 = vunpack.i.l.bf16 %v25388_v18  ;;  %v18961_v43 = vunpack.i.h.bf16 %v24282_v19 }
 0x3fc   : > { %17173 = vst.msk [vmem:[%s24241_s7 + $0x18] sm:$0xff] %vm17168_vm12, %v16433_v63  ;;  %v8467_v63 = vcombine.low %v1009_v11, %v17555_v49  ;;  %v15253_v40 = vsel %vm15214_vm5, %v15211_v30, %v18965_v9  ;;  %v15068_v49 = vsel %vm15046_vm1, %v15026_v6, %v18351_v3  ;;  %v18960_v57 = vunpack.i.l.bf16 %v24282_v19 }
 0x3fd   : > { %v15067_v52 = vsel %vm15046_vm1, %v15025_v28, %v18350_v21  ;;  %v18971_v34 = vunpack.i.h.bf16 %v24291_v13  ;;  %v18970_v33 = vunpack.i.l.bf16 %v24291_v13  ;;  %v15110_v15 = vsel %vm15088_vm2, %v15068_v49, %v18451_v22 }
 0x3fe   : > { %v8474_v11 = vrot.slane %v8467_v63, %v19372_v5  ;;  %v15109_v28 = vsel %vm15088_vm2, %v15067_v52, %v18450_v0  ;;  %v15152_v39 = vsel %vm15130_vm3, %v15110_v15, %v18961_v43 }
 0x3ff   : > { %v24301_v45 = vpop.permute.xlu1 %18978  ;;  %v15151_v63 = vsel %vm15130_vm3, %v15109_v28, %v18960_v57  ;;  %v15194_v31 = vsel %vm15172_vm4, %v15152_v39, %v18971_v34 }
 0x400   : > { %v18981_v24 = vunpack.i.h.bf16 %v24301_v45  ;;  %v18980_v9 = vunpack.i.l.bf16 %v24301_v45  ;;  %v15045_v45 = vsel %vm15004_vm0, %v8474_v11, %v25389_v51 }
 0x402   : > { %v18974_v55 = vpop.permute.xlu0 %18973  ;;  %v15236_v30 = vsel %vm15214_vm5, %v15194_v31, %v18981_v24 }
 0x403   : > { %v18976_v4 = vunpack.i.h.bf16 %v18974_v55  ;;  %v18975_v56 = vunpack.i.l.bf16 %v18974_v55 }
 0x405   : > { %v15295_v17 = vsel %vm15256_vm6, %v15253_v40, %v18975_v56  ;;  %v15296_v23 = vsel %vm15256_vm6, %v15254_v20, %v18976_v4  ;;  %v25391_v40 = vld [vmem:[#allocation55_spill] sm:$0xff] }
 0x40b   : > { %v24319_v14 = vpop.permute.xlu1 %18988 }
 0x40c   : > { %v18991_v29 = vunpack.i.h.bf16 %v24319_v14  ;;  %v18990_v13 = vunpack.i.l.bf16 %v24319_v14 }
 0x40d   : > { %v24315_v35 = vpop.f32.mrb[0].mxu1 }
 0x40e   : > { %v16062_v47 = vcombine.high %v24315_v35, %v24315_v35  ;;  %v24325_v46 = vrot.slane %v24315_v35, %v19372_v5  ;;  %v18125_v36 = vpop.f32.mrb[1].mxu1  ;;  %v18984_v48 = vpop.permute.xlu0 %18983  ;;  %v15278_v21 = vsel %vm15256_vm6, %v15236_v30, %v18991_v29 }
 0x40f   : > { %v24331_v16 = vpop.f32.mrb[2].mxu1  ;;  %v18986_v7 = vunpack.i.h.bf16 %v18984_v48  ;;  %v18985_v38 = vunpack.i.l.bf16 %v18984_v48  ;;  %v11718_v55 = vpop.permute.xlu1 %11717  ;;  %v25390_v36 = vld [vmem:[#allocation21_spill] sm:$0xff] }
 0x410   : > { %v16076_v26 = vrot.slane %v16062_v47, %v19372_v5  ;;  %v16077_v42 = vcombine.high %v24325_v46, %v24325_v46  ;;  %v18126_v60 = vpop.f32.mrb[3].mxu1  ;;  %v16086_v58 = vrot.slane %v24331_v16, %v19372_v5  ;;  %v15087_v2 = vsel %vm15046_vm1, %v15045_v45, %v25390_v36 }
 0x411   : > { %v15337_v25 = vsel %vm15298_vm7, %v15295_v17, %v18985_v38  ;;  %v15338_v61 = vsel %vm15298_vm7, %v15296_v23, %v18986_v7  ;;  %v15129_v20 = vsel %vm15088_vm2, %v15087_v2, %v25391_v40  ;;  %v16079_v39 = vcombine.high %v24331_v16, %v24331_v16 }
 0x412   : > { %v16078_v62 = vcombine.high %v16076_v26, %v16076_v26  ;;  %v16785_v53 = vrot.slane %v16077_v42, %v19372_v5  ;;  %v15359_v37 = vpack.c.bf16 %v15338_v61, %v15337_v25  ;;  %v16094_v41 = vcombine.high %v16086_v58, %v16086_v58 }
 0x413   : > { %v13340_v47 = vpop.permute.xlu1 %13339  ;;  %v15171_v38 = vsel %vm15130_vm3, %v15129_v20, %v11718_v55  ;;  %v16093_v51 = vrot.slane %v16079_v39, %v19372_v5 }
 0x414   : > { %v16786_v54 = vcombine.low %v16076_v26, %v16078_v62  ;;  %17199 = vst.msk [vmem:[%s24241_s7 + $0xe8] sm:$0x3] %vm17171_vm13, %v16785_v53  ;;  %18156 = vmatmul.mubr.msk.bf16.gmra.mrb[32].mxu1 %vm15376_vm11, %v15359_v37  ;;  %v16787_v27 = vcombine.low %v16086_v58, %v16094_v41  ;;  %v15739_v58 = vcombine.high %v24257_v8, %v24257_v8 }
 0x415   : > { %18159 = vmatprep.mubr.msk.bf16.mxu1 %vm19334_vm10, %v25310_v50  ;;  %v15193_v50 = vsel %vm15172_vm4, %v15151_v63, %v18970_v33  ;;  %v15754_v53 = vcombine.high %v24266_v32, %v24266_v32  ;;  %v16095_v45 = vcombine.high %v16093_v51, %v16093_v51 }
 0x416   : > { %v16794_v19 = vrot.slane %v16786_v54, %v19372_v5  ;;  %v16801_v6 = vrot.slane %v16787_v27, %v19372_v5  ;;  %v15235_v56 = vsel %vm15214_vm5, %v15193_v50, %v18980_v9  ;;  %v15753_v62 = vrot.slane %v15739_v58, %v19372_v5 }
 0x417   : > { %v18994_v1 = vpop.permute.xlu0 %18993  ;;  %v15277_v3 = vsel %vm15256_vm6, %v15235_v56, %v18990_v13  ;;  %v16803_v30 = vcombine.low %v16093_v51, %v16095_v45 }
 0x418   : > { %v16802_v4 = vcombine.low %v16794_v19, %v16801_v6  ;;  %v18996_v10 = vunpack.i.h.bf16 %v18994_v1  ;;  %v18995_v14 = vunpack.i.l.bf16 %v18994_v1  ;;  %v14962_v18 = vpop.permute.xlu1 %14961  ;;  %v16434_v0 = vcombine.low %v15754_v53, %v15753_v62 }
 0x419   : > { %v15755_v37 = vcombine.high %v15753_v62, %v15753_v62 }
 0x41a   : > { %17200 = vst.msk [vmem:[%s24241_s7 + $0xf0] sm:$0xff] %vm17168_vm12, %v16802_v4  ;;  %v15319_v48 = vsel %vm15298_vm7, %v15277_v3, %v18995_v14  ;;  %v15320_v7 = vsel %vm15298_vm7, %v15278_v21, %v18996_v10  ;;  %v16442_v33 = vrot.slane %v16434_v0, %v19372_v5 }
 0x41b   : > { %v15350_v26 = vpack.c.bf16 %v15320_v7, %v15319_v48  ;;  %v12529_v42 = vpop.permute.xlu0 %12528 }
 0x41c   : > { %v15213_v60 = vsel %vm15172_vm4, %v15171_v38, %v12529_v42 }
 0x41d   : > { %18120 = vmatmul.mubr.msk.bf16.gmra.mrb[40].mxu0 %vm15376_vm11, %v15350_v26  ;;  %v15255_v22 = vsel %vm15214_vm5, %v15213_v60, %v13340_v47  ;;  %v16811_v26 = vrot.slane %v16803_v30, %v19372_v5 }
 0x41f   : > { %v14151_v17 = vpop.permute.xlu0 %14150 }
 0x420   : > { %v15297_v23 = vsel %vm15256_vm6, %v15255_v22, %v14151_v17 }
 0x421   : > { %v15339_v25 = vsel %vm15298_vm7, %v15297_v23, %v14962_v18 }
 0x422   : > { %v15360_v61 = vpack.c.bf16 %v15339_v25, %v15339_v25 }
 0x424   : > { %18160 = vmatmul.mubr.msk.bf16.gmra.mrb[36].mxu1 %vm15376_vm11, %v15360_v61 }
 0x428   : > { %v24395_v11 = vpop.f32.mrb[8].mxu0 }
 0x429   : > { %v15756_v41 = vcombine.high %v24395_v11, %v24395_v11  ;;  %v15763_v49 = vrot.slane %v24395_v11, %v19372_v5  ;;  %v18089_v43 = vpop.f32.mrb[9].mxu0 }
 0x42a   : > { %v24401_v57 = vpop.f32.mrb[10].mxu0 }
 0x42b   : > { %v15770_v55 = vrot.slane %v15756_v41, %v19372_v5  ;;  %v15771_v54 = vcombine.high %v15763_v49, %v15763_v49  ;;  %v16435_v52 = vcombine.low %v15755_v37, %v15763_v49  ;;  %v18090_v32 = vpop.f32.mrb[11].mxu0  ;;  %v15780_v34 = vrot.slane %v24401_v57, %v19372_v5 }
 0x42c   : > { %v15773_v50 = vcombine.high %v24401_v57, %v24401_v57 }
 0x42d   : > { %v15772_v27 = vcombine.high %v15770_v55, %v15770_v55  ;;  %v16449_v15 = vrot.slane %v16435_v52, %v19372_v5  ;;  %v16457_v24 = vrot.slane %v15771_v54, %v19372_v5  ;;  %v15788_v9 = vcombine.high %v15780_v34, %v15780_v34 }
 0x42e   : > { %v15787_v21 = vrot.slane %v15773_v50, %v19372_v5 }
 0x42f   : > { %v16450_v19 = vcombine.low %v16442_v33, %v16449_v15  ;;  %v16458_v28 = vcombine.low %v15770_v55, %v15772_v27  ;;  %17175 = vst.msk [vmem:[%s24241_s7 + $0x28] sm:$0x3] %vm17171_vm13, %v16457_v24  ;;  %v16459_v29 = vcombine.low %v15780_v34, %v15788_v9 }
 0x430   : > { %v15789_v18 = vcombine.high %v15787_v21, %v15787_v21 }
 0x431   : > { %v16466_v13 = vrot.slane %v16458_v28, %v19372_v5  ;;  %17174 = vst.msk [vmem:[%s24241_s7 + $0x20] sm:$0xff] %vm17168_vm12, %v16450_v19  ;;  %v16473_v6 = vrot.slane %v16459_v29, %v19372_v5 }
 0x432   : > { %v16475_v0 = vcombine.low %v15787_v21, %v15789_v18 }
 0x433   : > { %v16474_v63 = vcombine.low %v16466_v13, %v16473_v6 }
 0x434   : > { %v16483_v24 = vrot.slane %v16475_v0, %v19372_v5 }
 0x435   : > { %17176 = vst.msk [vmem:[%s24241_s7 + $0x30] sm:$0xff] %vm17168_vm12, %v16474_v63 }
 0x444   : > { %v24422_v31 = vpop.f32.mrb[4].mxu1 }
 0x445   : > { %v16096_v1 = vcombine.high %v24422_v31, %v24422_v31  ;;  %v16103_v4 = vrot.slane %v24422_v31, %v19372_v5  ;;  %v18129_v56 = vpop.f32.mrb[5].mxu1 }
 0x446   : > { %v24428_v10 = vpop.f32.mrb[6].mxu1 }
 0x447   : > { %v16110_v14 = vrot.slane %v16096_v1, %v19372_v5  ;;  %v16111_v47 = vcombine.high %v16103_v4, %v16103_v4  ;;  %v16113_v36 = vcombine.high %v24428_v10, %v24428_v10  ;;  %v16120_v2 = vrot.slane %v24428_v10, %v19372_v5  ;;  %v18130_v3 = vpop.f32.mrb[7].mxu1 }
 0x449   : > { %v16804_v40 = vcombine.low %v16103_v4, %v16111_v47  ;;  %v16826_v20 = vrot.slane %v16110_v14, %v19372_v5  ;;  %v16112_v48 = vcombine.high %v16110_v14, %v16110_v14  ;;  %v16127_v7 = vrot.slane %v16113_v36, %v19372_v5 }
 0x44a   : > { %v16128_v38 = vcombine.high %v16120_v2, %v16120_v2 }
 0x44b   : > { %v16818_v42 = vrot.slane %v16804_v40, %v19372_v5  ;;  %17202 = vst.msk [vmem:[%s24241_s7 + $0x100] sm:$0x3] %vm17171_vm13, %v16826_v20  ;;  %v16827_v60 = vcombine.low %v16112_v48, %v16120_v2  ;;  %v16129_v51 = vcombine.high %v16127_v7, %v16127_v7 }
 0x44c   : > { %v16828_v22 = vcombine.low %v16128_v38, %v16127_v7 }
 0x44d   : > { %v16819_v17 = vcombine.low %v16811_v26, %v16818_v42  ;;  %v16835_v23 = vrot.slane %v16827_v60, %v19372_v5  ;;  %v24444_v25 = vpop.f32.mrb[12].mxu0 }
 0x44e   : > { %v16842_v58 = vrot.slane %v16828_v22, %v19372_v5  ;;  %v15790_v61 = vcombine.high %v24444_v25, %v24444_v25  ;;  %v15797_v62 = vrot.slane %v24444_v25, %v19372_v5  ;;  %v18093_v53 = vpop.f32.mrb[13].mxu0 }
 0x44f   : > { %17201 = vst.msk [vmem:[%s24241_s7 + $0xf8] sm:$0xff] %vm17168_vm12, %v16819_v17  ;;  %v24452_v41 = vpop.f32.mrb[14].mxu0 }
 0x450   : > { %v16843_v37 = vcombine.low %v16835_v23, %v16842_v58  ;;  %v15804_v49 = vrot.slane %v15790_v61, %v19372_v5  ;;  %v15805_v43 = vcombine.high %v15797_v62, %v15797_v62  ;;  %v15807_v55 = vcombine.high %v24452_v41, %v24452_v41  ;;  %v18094_v52 = vpop.f32.mrb[15].mxu0 }
 0x451   : > { %v15814_v54 = vrot.slane %v24452_v41, %v19372_v5 }
 0x452   : > { %17203 = vst.msk [vmem:[%s24241_s7 + $0x108] sm:$0xff] %vm17168_vm12, %v16843_v37  ;;  %v16476_v32 = vcombine.low %v15797_v62, %v15805_v43  ;;  %v16498_v34 = vrot.slane %v15804_v49, %v19372_v5  ;;  %v15806_v33 = vcombine.high %v15804_v49, %v15804_v49  ;;  %v15821_v27 = vrot.slane %v15807_v55, %v19372_v5 }
 0x453   : > { %v15822_v15 = vcombine.high %v15814_v54, %v15814_v54 }
 0x454   : > { %v16490_v9 = vrot.slane %v16476_v32, %v19372_v5  ;;  %17178 = vst.msk [vmem:[%s24241_s7 + $0x40] sm:$0x3] %vm17171_vm13, %v16498_v34  ;;  %v16499_v19 = vcombine.low %v15806_v33, %v15814_v54  ;;  %v15823_v61 = vcombine.high %v15821_v27, %v15821_v27 }
 0x455   : > { %v16500_v28 = vcombine.low %v15822_v15, %v15821_v27 }
 0x456   : > { %v16491_v29 = vcombine.low %v16483_v24, %v16490_v9  ;;  %v16507_v13 = vrot.slane %v16499_v19, %v19372_v5 }
 0x457   : > { %v16514_v6 = vrot.slane %v16500_v28, %v19372_v5 }
 0x458   : > { %17177 = vst.msk [vmem:[%s24241_s7 + $0x38] sm:$0xff] %vm17168_vm12, %v16491_v29 }
 0x459   : > { %v16515_v63 = vcombine.low %v16507_v13, %v16514_v6 }
 0x45b   : > { %17179 = vst.msk [vmem:[%s24241_s7 + $0x48] sm:$0xff] %vm17168_vm12, %v16515_v63 }
 0x46b   : > { %v24473_v39 = vpop.f32.mrb[8].mxu1 }
 0x46c   : > { %v16130_v45 = vcombine.high %v24473_v39, %v24473_v39  ;;  %v16137_v50 = vrot.slane %v24473_v39, %v19372_v5  ;;  %v18133_v1 = vpop.f32.mrb[9].mxu1 }
 0x46d   : > { %v24479_v4 = vpop.f32.mrb[10].mxu1 }
 0x46e   : > { %v16144_v56 = vrot.slane %v16130_v45, %v19372_v5  ;;  %v16145_v30 = vcombine.high %v16137_v50, %v16137_v50  ;;  %v16844_v14 = vcombine.low %v16129_v51, %v16137_v50  ;;  %v16147_v47 = vcombine.high %v24479_v4, %v24479_v4  ;;  %v18134_v36 = vpop.f32.mrb[11].mxu1 }
 0x46f   : > { %v16154_v2 = vrot.slane %v24479_v4, %v19372_v5 }
 0x470   : > { %v16146_v3 = vcombine.high %v16144_v56, %v16144_v56  ;;  %v16845_v21 = vcombine.low %v16145_v30, %v16144_v56  ;;  %v16161_v40 = vrot.slane %v16147_v47, %v19372_v5  ;;  %v16852_v48 = vrot.slane %v16844_v14, %v19372_v5 }
 0x471   : > { %v16162_v20 = vcombine.high %v16154_v2, %v16154_v2 }
 0x472   : > { %v16859_v7 = vrot.slane %v16845_v21, %v19372_v5  ;;  %v16867_v38 = vrot.slane %v16146_v3, %v19372_v5  ;;  %v16163_v26 = vcombine.high %v16161_v40, %v16161_v40 }
 0x473   : > { %v16868_v42 = vcombine.low %v16154_v2, %v16162_v20 }
 0x474   : > { %v16860_v60 = vcombine.low %v16852_v48, %v16859_v7  ;;  %17205 = vst.msk [vmem:[%s24241_s7 + $0x118] sm:$0x3] %vm17171_vm13, %v16867_v38  ;;  %v16869_v18 = vcombine.low %v16161_v40, %v16163_v26 }
 0x475   : > { %v16876_v22 = vrot.slane %v16868_v42, %v19372_v5 }
 0x476   : > { %17204 = vst.msk [vmem:[%s24241_s7 + $0x110] sm:$0xff] %vm17168_vm12, %v16860_v60  ;;  %v16883_v17 = vrot.slane %v16869_v18, %v19372_v5 }
 0x477   : > { %v24496_v23 = vpop.f32.mrb[16].mxu0 }
 0x478   : > { %v16884_v58 = vcombine.low %v16876_v22, %v16883_v17  ;;  %v15824_v62 = vcombine.high %v24496_v23, %v24496_v23  ;;  %v15831_v53 = vrot.slane %v24496_v23, %v19372_v5  ;;  %v18097_v0 = vpop.f32.mrb[17].mxu0 }
 0x479   : > { %v24502_v37 = vpop.f32.mrb[18].mxu0 }
 0x47a   : > { %17206 = vst.msk [vmem:[%s24241_s7 + $0x120] sm:$0xff] %vm17168_vm12, %v16884_v58  ;;  %v15838_v49 = vrot.slane %v15824_v62, %v19372_v5  ;;  %v15839_v43 = vcombine.high %v15831_v53, %v15831_v53  ;;  %v16516_v55 = vcombine.low %v15823_v61, %v15831_v53  ;;  %v15841_v54 = vcombine.high %v24502_v37, %v24502_v37  ;;  %v18098_v52 = vpop.f32.mrb[19].mxu0 }
 0x47b   : > { %v15848_v32 = vrot.slane %v24502_v37, %v19372_v5 }
 0x47c   : > { %v15840_v34 = vcombine.high %v15838_v49, %v15838_v49  ;;  %v16517_v33 = vcombine.low %v15839_v43, %v15838_v49  ;;  %v15855_v27 = vrot.slane %v15841_v54, %v19372_v5  ;;  %v16524_v24 = vrot.slane %v16516_v55, %v19372_v5 }
 0x47d   : > { %v15856_v15 = vcombine.high %v15848_v32, %v15848_v32 }
 0x47e   : > { %v16531_v9 = vrot.slane %v16517_v33, %v19372_v5  ;;  %v16539_v19 = vrot.slane %v15840_v34, %v19372_v5  ;;  %v15857_v28 = vcombine.high %v15855_v27, %v15855_v27 }
 0x47f   : > { %v16540_v29 = vcombine.low %v15848_v32, %v15856_v15 }
 0x480   : > { %v24515_v13 = vpop.f32.mrb[12].mxu1  ;;  %v16532_v6 = vcombine.low %v16524_v24, %v16531_v9  ;;  %17181 = vst.msk [vmem:[%s24241_s7 + $0x58] sm:$0x3] %vm17171_vm13, %v16539_v19  ;;  %v16541_v63 = vcombine.low %v15855_v27, %v15857_v28 }
 0x481   : > { %v16164_v51 = vcombine.high %v24515_v13, %v24515_v13  ;;  %v16171_v45 = vrot.slane %v24515_v13, %v19372_v5  ;;  %v18137_v50 = vpop.f32.mrb[13].mxu1  ;;  %v16548_v1 = vrot.slane %v16540_v29, %v19372_v5 }
 0x482   : > { %v24524_v56 = vpop.f32.mrb[14].mxu1  ;;  %17180 = vst.msk [vmem:[%s24241_s7 + $0x50] sm:$0xff] %vm17168_vm12, %v16532_v6  ;;  %v16555_v30 = vrot.slane %v16541_v63, %v19372_v5  ;;  %v24532_v3 = vpop.f32.mrb[20].mxu0 }
 0x483   : > { %v16178_v14 = vrot.slane %v16164_v51, %v19372_v5  ;;  %v16179_v47 = vcombine.high %v16171_v45, %v16171_v45  ;;  %v16181_v36 = vcombine.high %v24524_v56, %v24524_v56  ;;  %v18138_v2 = vpop.f32.mrb[15].mxu1  ;;  %v16188_v21 = vrot.slane %v24524_v56, %v19372_v5  ;;  %v18101_v48 = vpop.f32.mrb[21].mxu0 }
 0x484   : > { %v15858_v40 = vcombine.high %v24532_v3, %v24532_v3  ;;  %v15865_v20 = vrot.slane %v24532_v3, %v19372_v5  ;;  %v16556_v7 = vcombine.low %v16548_v1, %v16555_v30  ;;  %v24541_v60 = vpop.f32.mrb[22].mxu0 }
 0x485   : > { %v16180_v38 = vcombine.high %v16178_v14, %v16178_v14  ;;  %v16885_v26 = vcombine.low %v16171_v45, %v16179_v47  ;;  %v16195_v42 = vrot.slane %v16181_v36, %v19372_v5  ;;  %v16196_v18 = vcombine.high %v16188_v21, %v16188_v21  ;;  %v18102_v61 = vpop.f32.mrb[23].mxu0 }
 0x486   : > { %v16908_v22 = vrot.slane %v16188_v21, %v19372_v5  ;;  %v15872_v17 = vrot.slane %v15858_v40, %v19372_v5  ;;  %v15873_v58 = vcombine.high %v15865_v20, %v15865_v20  ;;  %17182 = vst.msk [vmem:[%s24241_s7 + $0x60] sm:$0xff] %vm17168_vm12, %v16556_v7  ;;  %v15875_v53 = vcombine.high %v24541_v60, %v24541_v60 }
 0x487   : > { %v16886_v62 = vcombine.low %v16178_v14, %v16180_v38  ;;  %v15882_v0 = vrot.slane %v24541_v60, %v19372_v5  ;;  %v16893_v49 = vrot.slane %v16885_v26, %v19372_v5  ;;  %v16909_v43 = vcombine.low %v16196_v18, %v16195_v42 }
 0x488   : > { %17208 = vst.msk [vmem:[%s24241_s7 + $0x130] sm:$0x3] %vm17171_vm13, %v16908_v22  ;;  %v15874_v55 = vcombine.high %v15872_v17, %v15872_v17  ;;  %v16557_v54 = vcombine.low %v15865_v20, %v15873_v58  ;;  %v24554_v52 = vpop.f32.mrb[16].mxu1  ;;  %v15889_v34 = vrot.slane %v15875_v53, %v19372_v5  ;;  %v16197_v19 = vcombine.high %v16195_v42, %v16195_v42 }
 0x489   : > { %v16900_v32 = vrot.slane %v16886_v62, %v19372_v5  ;;  %v15890_v33 = vcombine.high %v15882_v0, %v15882_v0  ;;  %v16580_v27 = vrot.slane %v15882_v0, %v19372_v5  ;;  %v18141_v15 = vpop.f32.mrb[17].mxu1  ;;  %v16917_v24 = vrot.slane %v16909_v43, %v19372_v5 }
 0x48a   : > { %v16558_v9 = vcombine.low %v15872_v17, %v15874_v55  ;;  %v16198_v28 = vcombine.high %v24554_v52, %v24554_v52  ;;  %v24562_v29 = vpop.f32.mrb[18].mxu1  ;;  %v16565_v63 = vrot.slane %v16557_v54, %v19372_v5  ;;  %v16205_v51 = vrot.slane %v24554_v52, %v19372_v5 }
 0x48b   : > { %v16901_v6 = vcombine.low %v16893_v49, %v16900_v32  ;;  %17184 = vst.msk [vmem:[%s24241_s7 + $0x70] sm:$0x3] %vm17171_vm13, %v16580_v27  ;;  %v16215_v45 = vcombine.high %v24562_v29, %v24562_v29  ;;  %v18142_v50 = vpop.f32.mrb[19].mxu1  ;;  %v16581_v30 = vcombine.low %v15890_v33, %v15889_v34  ;;  %v16222_v47 = vrot.slane %v24562_v29, %v19372_v5 }
 0x48c   : > { %v16572_v1 = vrot.slane %v16558_v9, %v19372_v5  ;;  %v16212_v14 = vrot.slane %v16198_v28, %v19372_v5  ;;  %v24575_v36 = vpop.f32.mrb[24].mxu0  ;;  %v16213_v2 = vcombine.high %v16205_v51, %v16205_v51  ;;  %v16910_v21 = vcombine.low %v16197_v19, %v16205_v51 }
 0x48d   : > { %17207 = vst.msk [vmem:[%s24241_s7 + $0x128] sm:$0xff] %vm17168_vm12, %v16901_v6  ;;  %v16229_v40 = vrot.slane %v16215_v45, %v19372_v5  ;;  %v15891_v20 = vcombine.high %v15889_v34, %v15889_v34  ;;  %v18105_v48 = vpop.f32.mrb[25].mxu0  ;;  %v16230_v26 = vcombine.high %v16222_v47, %v16222_v47  ;;  %v15892_v42 = vcombine.high %v24575_v36, %v24575_v36 }
 0x48e   : > { %v16573_v7 = vcombine.low %v16565_v63, %v16572_v1  ;;  %v16214_v38 = vcombine.high %v16212_v14, %v16212_v14  ;;  %v24582_v18 = vpop.f32.mrb[26].mxu0  ;;  %v16924_v22 = vrot.slane %v16910_v21, %v19372_v5  ;;  %v16926_v17 = vcombine.low %v16213_v2, %v16212_v14 }
 0x48f   : > { %v16231_v58 = vcombine.high %v16229_v40, %v16229_v40  ;;  %v15899_v61 = vrot.slane %v24575_v36, %v19372_v5  ;;  %v18106_v62 = vpop.f32.mrb[27].mxu0  ;;  %v16949_v0 = vrot.slane %v16230_v26, %v19372_v5  ;;  %v15906_v49 = vrot.slane %v15892_v42, %v19372_v5 }
 0x490   : > { %17183 = vst.msk [vmem:[%s24241_s7 + $0x68] sm:$0xff] %vm17168_vm12, %v16573_v7  ;;  %v16927_v53 = vcombine.low %v16214_v38, %v16222_v47  ;;  %v15909_v43 = vcombine.high %v24582_v18, %v24582_v18  ;;  %v16925_v55 = vcombine.low %v16917_v24, %v16924_v22  ;;  %v16934_v54 = vrot.slane %v16926_v17, %v19372_v5 }
 0x491   : > { %v16950_v32 = vcombine.low %v16229_v40, %v16231_v58  ;;  %v15907_v34 = vcombine.high %v15899_v61, %v15899_v61  ;;  %17211 = vst.msk [vmem:[%s24241_s7 + $0x148] sm:$0x3] %vm17171_vm13, %v16949_v0  ;;  %v16582_v27 = vcombine.low %v15891_v20, %v15899_v61  ;;  %v15908_v15 = vcombine.high %v15906_v49, %v15906_v49 }
 0x492   : > { %v16941_v33 = vrot.slane %v16927_v53, %v19372_v5  ;;  %v15916_v9 = vrot.slane %v24582_v18, %v19372_v5  ;;  %v16589_v19 = vrot.slane %v16581_v30, %v19372_v5  ;;  %17209 = vst.msk [vmem:[%s24241_s7 + $0x138] sm:$0xff] %vm17168_vm12, %v16925_v55  ;;  %v15923_v24 = vrot.slane %v15909_v43, %v19372_v5 }
 0x493   : > { %v16598_v28 = vcombine.low %v15907_v34, %v15906_v49  ;;  %v16596_v63 = vrot.slane %v16582_v27, %v19372_v5  ;;  %v16958_v1 = vrot.slane %v16950_v32, %v19372_v5 }
 0x494   : > { %v16942_v6 = vcombine.low %v16934_v54, %v16941_v33  ;;  %v15924_v51 = vcombine.high %v15916_v9, %v15916_v9  ;;  %v16599_v45 = vcombine.low %v15908_v15, %v15916_v9  ;;  %v24604_v50 = vpop.f32.mrb[20].mxu1  ;;  %v15925_v14 = vcombine.high %v15923_v24, %v15923_v24 }
 0x495   : > { %v16232_v47 = vcombine.high %v24604_v50, %v24604_v50  ;;  %v16239_v30 = vrot.slane %v24604_v50, %v19372_v5  ;;  %v18145_v2 = vpop.f32.mrb[21].mxu1  ;;  %v16597_v21 = vcombine.low %v16589_v19, %v16596_v63  ;;  %v16606_v40 = vrot.slane %v16598_v28, %v19372_v5  ;;  %v24618_v38 = vpop.f32.mrb[28].mxu0 }
 0x496   : > { %17210 = vst.msk [vmem:[%s24241_s7 + $0x140] sm:$0xff] %vm17168_vm12, %v16942_v6  ;;  %v16613_v20 = vrot.slane %v16599_v45, %v19372_v5  ;;  %v16621_v48 = vrot.slane %v15924_v51, %v19372_v5  ;;  %v24616_v7 = vpop.f32.mrb[22].mxu1  ;;  %v16622_v26 = vcombine.low %v15923_v24, %v15925_v14  ;;  %v18109_v61 = vpop.f32.mrb[29].mxu0  ;;  %v15926_v0 = vcombine.high %v24618_v38, %v24618_v38 }
 0x497   : > { %v16246_v42 = vrot.slane %v16232_v47, %v19372_v5  ;;  %v16247_v22 = vcombine.high %v16239_v30, %v16239_v30  ;;  %v16249_v17 = vcombine.high %v24616_v7, %v24616_v7  ;;  %v18146_v58 = vpop.f32.mrb[23].mxu1  ;;  %17185 = vst.msk [vmem:[%s24241_s7 + $0x78] sm:$0xff] %vm17168_vm12, %v16597_v21  ;;  %v16256_v53 = vrot.slane %v24616_v7, %v19372_v5  ;;  %v24633_v43 = vpop.f32.mrb[30].mxu0 }
 0x498   : > { %v16614_v62 = vcombine.low %v16606_v40, %v16613_v20  ;;  %17187 = vst.msk [vmem:[%s24241_s7 + $0x88] sm:$0x3] %vm17171_vm13, %v16621_v48  ;;  %v15933_v49 = vrot.slane %v24618_v38, %v19372_v5  ;;  %v16630_v55 = vrot.slane %v16622_v26, %v19372_v5  ;;  %v18110_v33 = vpop.f32.mrb[31].mxu0  ;;  %v15940_v15 = vrot.slane %v15926_v0, %v19372_v5 }
 0x499   : > { %v16248_v54 = vcombine.high %v16246_v42, %v16246_v42  ;;  %v16951_v32 = vcombine.low %v16239_v30, %v16247_v22  ;;  %v16263_v34 = vrot.slane %v16249_v17, %v19372_v5  ;;  %v16264_v27 = vcombine.high %v16256_v53, %v16256_v53 }
 0x49a   : > { %17186 = vst.msk [vmem:[%s24241_s7 + $0x80] sm:$0xff] %vm17168_vm12, %v16614_v62  ;;  %v15941_v9 = vcombine.high %v15933_v49, %v15933_v49  ;;  %v15943_v19 = vcombine.high %v24633_v43, %v24633_v43  ;;  %v15950_v63 = vrot.slane %v24633_v43, %v19372_v5  ;;  %v15942_v45 = vcombine.high %v15940_v15, %v15940_v15 }
 0x49b   : > { %v16965_v28 = vrot.slane %v16951_v32, %v19372_v5  ;;  %v16967_v24 = vcombine.low %v16246_v42, %v16248_v54  ;;  %v16990_v6 = vrot.slane %v16263_v34, %v19372_v5  ;;  %v16968_v51 = vcombine.low %v16256_v53, %v16264_v27 }
 0x49c   : > { %v16623_v14 = vcombine.low %v15933_v49, %v15941_v9  ;;  %v15957_v47 = vrot.slane %v15943_v19, %v19372_v5  ;;  %v24647_v30 = vpop.f32.mrb[24].mxu1  ;;  %v15958_v40 = vcombine.high %v15950_v63, %v15950_v63  ;;  %v16265_v20 = vcombine.high %v16263_v34, %v16263_v34 }
 0x49d   : > { %v16966_v2 = vcombine.low %v16958_v1, %v16965_v28  ;;  %v16975_v21 = vrot.slane %v16967_v24, %v19372_v5  ;;  %17214 = vst.msk [vmem:[%s24241_s7 + $0x160] sm:$0x3] %vm17171_vm13, %v16990_v6  ;;  %v18149_v48 = vpop.f32.mrb[25].mxu1  ;;  %v16982_v26 = vrot.slane %v16968_v51, %v19372_v5  ;;  %v16639_v22 = vcombine.low %v15940_v15, %v15942_v45 }
 0x49e   : > { %v16637_v42 = vrot.slane %v16623_v14, %v19372_v5  ;;  %v16662_v17 = vrot.slane %v15957_v47, %v19372_v5  ;;  %v24655_v58 = vpop.f32.mrb[26].mxu1  ;;  %v16640_v1 = vcombine.low %v15950_v63, %v15958_v40  ;;  %v16266_v61 = vcombine.high %v24647_v30, %v24647_v30 }
 0x49f   : > { %17212 = vst.msk [vmem:[%s24241_s7 + $0x150] sm:$0xff] %vm17168_vm12, %v16966_v2  ;;  %v16273_v62 = vrot.slane %v24647_v30, %v19372_v5  ;;  %v16283_v53 = vcombine.high %v24655_v58, %v24655_v58  ;;  %v18150_v0 = vpop.f32.mrb[27].mxu1  ;;  %v16983_v49 = vcombine.low %v16975_v21, %v16982_v26  ;;  %v16647_v32 = vrot.slane %v16639_v22, %v19372_v5 }
 0x4a0   : > { %v16638_v54 = vcombine.low %v16630_v55, %v16637_v42  ;;  %17190 = vst.msk [vmem:[%s24241_s7 + $0xa0] sm:$0x3] %vm17171_vm13, %v16662_v17  ;;  %v16290_v34 = vrot.slane %v24655_v58, %v19372_v5  ;;  %v24670_v33 = vpop.f32.mrb[32].mxu0  ;;  %v16654_v27 = vrot.slane %v16640_v1, %v19372_v5  ;;  %v16280_v15 = vrot.slane %v16266_v61, %v19372_v5 }
 0x4a1   : > { %v16281_v9 = vcombine.high %v16273_v62, %v16273_v62  ;;  %v16991_v19 = vcombine.low %v16265_v20, %v16273_v62  ;;  %v18113_v28 = vpop.f32.mrb[33].mxu0  ;;  %17213 = vst.msk [vmem:[%s24241_s7 + $0x158] sm:$0xff] %vm17168_vm12, %v16983_v49  ;;  %v16297_v55 = vrot.slane %v16283_v53, %v19372_v5  ;;  %v15959_v6 = vcombine.high %v15957_v47, %v15957_v47 }
 0x4a2   : > { %17188 = vst.msk [vmem:[%s24241_s7 + $0x90] sm:$0xff] %vm17168_vm12, %v16638_v54  ;;  %v16298_v24 = vcombine.high %v16290_v34, %v16290_v34  ;;  %v15960_v63 = vcombine.high %v24670_v33, %v24670_v33  ;;  %v24681_v51 = vpop.f32.mrb[34].mxu0  ;;  %v16655_v45 = vcombine.low %v16647_v32, %v16654_v27  ;;  %v16282_v21 = vcombine.high %v16280_v15, %v16280_v15 }
 0x4a3   : > { %v16992_v14 = vcombine.low %v16281_v9, %v16280_v15  ;;  %v16999_v2 = vrot.slane %v16991_v19, %v19372_v5  ;;  %v18114_v40 = vpop.f32.mrb[35].mxu0  ;;  %v16299_v20 = vcombine.high %v16297_v55, %v16297_v55  ;;  %v15967_v26 = vrot.slane %v24670_v33, %v19372_v5 }
 0x4a4   : > { %v17009_v48 = vcombine.low %v16298_v24, %v16297_v55  ;;  %v15974_v42 = vrot.slane %v15960_v63, %v19372_v5  ;;  %17189 = vst.msk [vmem:[%s24241_s7 + $0x98] sm:$0xff] %vm17168_vm12, %v16655_v45  ;;  %v17008_v22 = vcombine.low %v16282_v21, %v16290_v34  ;;  %v15977_v17 = vcombine.high %v24681_v51, %v24681_v51 }
 0x4a5   : > { %v17006_v47 = vrot.slane %v16992_v14, %v19372_v5  ;;  %v15984_v1 = vrot.slane %v24681_v51, %v19372_v5  ;;  %v17031_v62 = vrot.slane %v16299_v20, %v19372_v5  ;;  %v15975_v53 = vcombine.high %v15967_v26, %v15967_v26 }
 0x4a6   : > { %v17023_v61 = vrot.slane %v17009_v48, %v19372_v5  ;;  %v16663_v0 = vcombine.low %v15959_v6, %v15967_v26  ;;  %v17016_v54 = vrot.slane %v17008_v22, %v19372_v5  ;;  %v15976_v32 = vcombine.high %v15974_v42, %v15974_v42 }
 0x4a7   : > { %v17007_v49 = vcombine.low %v16999_v2, %v17006_v47  ;;  %v15991_v27 = vrot.slane %v15977_v17, %v19372_v5  ;;  %17217 = vst.msk [vmem:[%s24241_s7 + $0x178] sm:$0x3] %vm17171_vm13, %v17031_v62  ;;  %v16664_v34 = vcombine.low %v15975_v53, %v15974_v42  ;;  %v15992_v15 = vcombine.high %v15984_v1, %v15984_v1 }
 0x4a8   : > { %v17024_v9 = vcombine.low %v17016_v54, %v17023_v61  ;;  %v16680_v28 = vcombine.low %v15976_v32, %v15984_v1  ;;  %v16671_v55 = vrot.slane %v16663_v0, %v19372_v5 }
 0x4a9   : > { %17215 = vst.msk [vmem:[%s24241_s7 + $0x168] sm:$0xff] %vm17168_vm12, %v17007_v49  ;;  %v15993_v19 = vcombine.high %v15991_v27, %v15991_v27  ;;  %v16678_v24 = vrot.slane %v16664_v34, %v19372_v5  ;;  %v16681_v6 = vcombine.low %v15992_v15, %v15991_v27 }
 0x4aa   : > { %17216 = vst.msk [vmem:[%s24241_s7 + $0x170] sm:$0xff] %vm17168_vm12, %v17024_v9  ;;  %v16688_v63 = vrot.slane %v16680_v28, %v19372_v5 }
 0x4ab   : > { %v16703_v45 = vrot.slane %v15993_v19, %v19372_v5  ;;  %v16679_v14 = vcombine.low %v16671_v55, %v16678_v24  ;;  %v16695_v2 = vrot.slane %v16681_v6, %v19372_v5 }
 0x4ad   : > { %17193 = vst.msk [vmem:[%s24241_s7 + $0xb8] sm:$0x3] %vm17171_vm13, %v16703_v45  ;;  %v16696_v21 = vcombine.low %v16688_v63, %v16695_v2 }
 0x4ae   : > { %17191 = vst.msk [vmem:[%s24241_s7 + $0xa8] sm:$0xff] %vm17168_vm12, %v16679_v14 }
 0x4af   : > { %17192 = vst.msk [vmem:[%s24241_s7 + $0xb0] sm:$0xff] %vm17168_vm12, %v16696_v21 }
 0x4b4   : > { %v24715_v40 = vpop.f32.mrb[28].mxu1 }
 0x4b5   : > { %v16300_v20 = vcombine.high %v24715_v40, %v24715_v40  ;;  %v16307_v48 = vrot.slane %v24715_v40, %v19372_v5  ;;  %v18153_v26 = vpop.f32.mrb[29].mxu1 }
 0x4b6   : > { %v24721_v42 = vpop.f32.mrb[30].mxu1 }
 0x4b7   : > { %v16314_v47 = vrot.slane %v16300_v20, %v19372_v5  ;;  %v16315_v22 = vcombine.high %v16307_v48, %v16307_v48  ;;  %v16317_v17 = vcombine.high %v24721_v42, %v24721_v42  ;;  %v16324_v1 = vrot.slane %v24721_v42, %v19372_v5  ;;  %v18154_v61 = vpop.f32.mrb[31].mxu1 }
 0x4b9   : > { %v16316_v62 = vcombine.high %v16314_v47, %v16314_v47  ;;  %v17032_v53 = vcombine.low %v16307_v48, %v16315_v22  ;;  %v16331_v0 = vrot.slane %v16317_v17, %v19372_v5  ;;  %v16332_v49 = vcombine.high %v16324_v1, %v16324_v1 }
 0x4bb   : > { %v17033_v54 = vcombine.low %v16314_v47, %v16316_v62  ;;  %v16333_v32 = vcombine.high %v16331_v0, %v16331_v0  ;;  %v17049_v27 = vcombine.low %v16324_v1, %v16332_v49  ;;  %v17040_v34 = vrot.slane %v17032_v53, %v19372_v5 }
 0x4bd   : > { %v17047_v15 = vrot.slane %v17033_v54, %v19372_v5  ;;  %v17050_v9 = vcombine.low %v16331_v0, %v16333_v32  ;;  %v17057_v28 = vrot.slane %v17049_v27, %v19372_v5 }
 0x4bf   : > { %v17048_v19 = vcombine.low %v17040_v34, %v17047_v15  ;;  %v17064_v55 = vrot.slane %v17050_v9, %v19372_v5 }
 0x4c0   : > { %v24735_v6 = vpop.f32.mrb[36].mxu0 }
 0x4c1   : > { %17218 = vst.msk [vmem:[%s24241_s7 + $0x180] sm:$0xff] %vm17168_vm12, %v17048_v19  ;;  %v17065_v24 = vcombine.low %v17057_v28, %v17064_v55  ;;  %v15994_v63 = vcombine.high %v24735_v6, %v24735_v6  ;;  %v16001_v45 = vrot.slane %v24735_v6, %v19372_v5  ;;  %v18117_v14 = vpop.f32.mrb[37].mxu0 }
 0x4c2   : > { %v24743_v2 = vpop.f32.mrb[38].mxu0 }
 0x4c3   : > { %17219 = vst.msk [vmem:[%s24241_s7 + $0x188] sm:$0xff] %vm17168_vm12, %v17065_v24  ;;  %v16008_v21 = vrot.slane %v15994_v63, %v19372_v5  ;;  %v16009_v20 = vcombine.high %v16001_v45, %v16001_v45  ;;  %v16011_v48 = vcombine.high %v24743_v2, %v24743_v2  ;;  %v16018_v26 = vrot.slane %v24743_v2, %v19372_v5  ;;  %v18118_v47 = vpop.f32.mrb[39].mxu0 }
 0x4c5   : > { %v16010_v22 = vcombine.high %v16008_v21, %v16008_v21  ;;  %v16704_v17 = vcombine.low %v16001_v45, %v16009_v20  ;;  %v16025_v1 = vrot.slane %v16011_v48, %v19372_v5  ;;  %v16026_v61 = vcombine.high %v16018_v26, %v16018_v26 }
 0x4c7   : > { %v16705_v62 = vcombine.low %v16008_v21, %v16010_v22  ;;  %v16027_v53 = vcombine.high %v16025_v1, %v16025_v1  ;;  %v16721_v0 = vcombine.low %v16018_v26, %v16026_v61  ;;  %v16712_v49 = vrot.slane %v16704_v17, %v19372_v5 }
 0x4c9   : > { %v16719_v54 = vrot.slane %v16705_v62, %v19372_v5  ;;  %v16722_v32 = vcombine.low %v16025_v1, %v16027_v53  ;;  %v16729_v34 = vrot.slane %v16721_v0, %v19372_v5 }
 0x4cb   : > { %v16720_v27 = vcombine.low %v16712_v49, %v16719_v54  ;;  %v16736_v15 = vrot.slane %v16722_v32, %v19372_v5 }
 0x4cd   : > { %17194 = vst.msk [vmem:[%s24241_s7 + $0xc0] sm:$0xff] %vm17168_vm12, %v16720_v27  ;;  %v16737_v9 = vcombine.low %v16729_v34, %v16736_v15 }
 0x4cf   : > { %17195 = vst.msk [vmem:[%s24241_s7 + $0xc8] sm:$0xff] %vm17168_vm12, %v16737_v9 }
 0x4e7   : > { %v24759_v19 = vpop.f32.mrb[32].mxu1 }
 0x4e8   : > { %v16334_v28 = vcombine.high %v24759_v19, %v24759_v19  ;;  %v16341_v55 = vrot.slane %v24759_v19, %v19372_v5  ;;  %v18157_v24 = vpop.f32.mrb[33].mxu1 }
 0x4e9   : > { %v24765_v63 = vpop.f32.mrb[34].mxu1 }
 0x4ea   : > { %v16348_v45 = vrot.slane %v16334_v28, %v19372_v5  ;;  %v16349_v14 = vcombine.high %v16341_v55, %v16341_v55  ;;  %v17072_v21 = vrot.slane %v16341_v55, %v19372_v5  ;;  %v18158_v20 = vpop.f32.mrb[35].mxu1  ;;  %v16358_v47 = vrot.slane %v24765_v63, %v19372_v5 }
 0x4eb   : > { %v16351_v61 = vcombine.high %v24765_v63, %v24765_v63 }
 0x4ec   : > { %v17073_v48 = vcombine.low %v16349_v14, %v16348_v45  ;;  %17220 = vst.msk [vmem:[%s24241_s7 + $0x190] sm:$0x3] %vm17171_vm13, %v17072_v21  ;;  %v16350_v26 = vcombine.high %v16348_v45, %v16348_v45  ;;  %v16366_v24 = vcombine.high %v16358_v47, %v16358_v47 }
 0x4ed   : > { %v16365_v55 = vrot.slane %v16351_v61, %v19372_v5 }
 0x4ee   : > { %v17074_v22 = vcombine.low %v16350_v26, %v16358_v47  ;;  %v17081_v17 = vrot.slane %v17073_v48, %v19372_v5 }
 0x4f0   : > { %v17088_v1 = vrot.slane %v17074_v22, %v19372_v5  ;;  %v24777_v62 = vpop.f32.mrb[40].mxu0 }
 0x4f1   : > { %v16028_v0 = vcombine.high %v24777_v62, %v24777_v62  ;;  %v16035_v49 = vrot.slane %v24777_v62, %v19372_v5  ;;  %v18121_v54 = vpop.f32.mrb[41].mxu0 }
 0x4f2   : > { %v17089_v53 = vcombine.low %v17081_v17, %v17088_v1  ;;  %v24783_v32 = vpop.f32.mrb[42].mxu0  ;;  %v17090_v1 = vcombine.low %v16366_v24, %v16365_v55 }
 0x4f3   : > { %v16042_v27 = vrot.slane %v16028_v0, %v19372_v5  ;;  %v16043_v34 = vcombine.high %v16035_v49, %v16035_v49  ;;  %v16744_v15 = vrot.slane %v16035_v49, %v19372_v5  ;;  %v16045_v9 = vcombine.high %v24783_v32, %v24783_v32  ;;  %v18122_v28 = vpop.f32.mrb[43].mxu0 }
 0x4f4   : > { %17221 = vst.msk [vmem:[%s24241_s7 + $0x198] sm:$0xff] %vm17168_vm12, %v17089_v53  ;;  %v16052_v45 = vrot.slane %v24783_v32, %v19372_v5  ;;  %v16367_v0 = vcombine.high %v16365_v55, %v16365_v55 }
 0x4f5   : > { %v16745_v14 = vcombine.low %v16043_v34, %v16042_v27  ;;  %17196 = vst.msk [vmem:[%s24241_s7 + $0xd0] sm:$0x3] %vm17171_vm13, %v16744_v15  ;;  %v16044_v21 = vcombine.high %v16042_v27, %v16042_v27  ;;  %v16059_v20 = vrot.slane %v16045_v9, %v19372_v5 }
 0x4f6   : > { %v16060_v48 = vcombine.high %v16052_v45, %v16052_v45 }
 0x4f7   : > { %v16061_v26 = vcombine.high %v16059_v20, %v16059_v20  ;;  %v16746_v22 = vcombine.low %v16044_v21, %v16052_v45  ;;  %v24797_v17 = vpop.f32.mrb[36].mxu1  ;;  %v16753_v49 = vrot.slane %v16745_v14, %v19372_v5  ;;  %v17098_v21 = vrot.slane %v17090_v1, %v19372_v5 }
 0x4f8   : > { %v16762_v53 = vcombine.low %v16060_v48, %v16059_v20  ;;  %v16374_v47 = vrot.slane %v24797_v17, %v19372_v5  ;;  %v18161_v61 = vpop.f32.mrb[37].mxu1 }
 0x4f9   : > { %v16760_v54 = vrot.slane %v16746_v22, %v19372_v5  ;;  %v16763_v27 = vcombine.low %v16061_v26, %v24325_v46  ;;  %v15644_v34 = vpop.f32.mrb[38].mxu1  ;;  %v19335_v26 = vmov (!%p18047_p4), 0.0  }
 0x4fa   : > { %v16375_v15 = vcombine.high %v16374_v47, %v16374_v47  ;;  %v17091_v9 = vcombine.low %v16367_v0, %v16374_v47  ;;  %v18162_v28 = vpop.f32.mrb[39].mxu1  ;;  %v16770_v55 = vrot.slane %v16762_v53, %v19372_v5  ;;  %17227 = sbr.rel (%p18047_p4) target bundleno = 1281 (0x501), region = 32  ;;  %17228 = vst.msk [vmem:[#allocation2] sm:$0x3] (!%p18047_p4), %vm17171_vm13, %v19335_v26 }
 0x4fb   : > { %v16761_v24 = vcombine.low %v16753_v49, %v16760_v54  ;;  %v16777_v45 = vrot.slane %v16763_v27, %v19372_v5 }
 0x4fc   : > { %v17105_v14 = vrot.slane %v17091_v9, %v19372_v5  ;;  %v17113_v20 = vrot.slane %v16375_v15, %v19372_v5 }
 0x4fd   : > { %v16778_v48 = vcombine.low %v16770_v55, %v16777_v45  ;;  %17197 = vst.msk [vmem:[%s24241_s7 + $0xd8] sm:$0xff] %vm17168_vm12, %v16761_v24 }
 0x4fe   : > { %v17106_v46 = vcombine.low %v17098_v21, %v17105_v14  ;;  %17223 = vst.msk [vmem:[%s24241_s7 + $0x1a8] sm:$0x3] %vm17171_vm13, %v17113_v20 }
 0x4ff   : > { %17198 = vst.msk [vmem:[%s24241_s7 + $0xe0] sm:$0xff] %vm17168_vm12, %v16778_v48 }
 0x500   : > { %17222 = vst.msk [vmem:[%s24241_s7 + $0x1a0] sm:$0xff] %vm17168_vm12, %v17106_v46 }
 0x501 PF: > { %v17230_v5 = vsel %vm17168_vm12, %v24211_v44, 0.0  ;;  %v17231_v22 = vsel %vm17168_vm12, %v24219_v59, 0.0  ;;  %v17233_v1 = vsel %vm17168_vm12, %v24244_v12, 0.0  ;;  %v17235_v0 = vsel %vm17168_vm12, %v24257_v8, 0.0  ;;  %s19336_s8 = smov [#allocation2]   ;;  %p18173_p5 = scmp.eq.s32.totalorder %s19363_s13, 1 }
 0x502   : > { %v17232_v53 = vadd.f32 %v17231_v22, %v17230_v5  ;;  %v17237_v61 = vsel %vm17168_vm12, %v24395_v11, 0.0  ;;  %v17239_v54 = vsel %vm17168_vm12, %v24401_v57, 0.0  ;;  %v17241_v34 = vsel %vm17168_vm12, %v24444_v25, 0.0  ;;  %s17467_s9 = sshll.u32 %s19336_s8, 4  ;;  %s17468_s9 = int_to_ptr.vmem [resolvable:$true] %s17467_s9 }
 0x503   : > { %v17243_v9 = vsel %vm17168_vm12, %v24452_v41, 0.0  ;;  %v17245_v24 = vsel %vm17168_vm12, %v24496_v23, 0.0  ;;  %v17247_v45 = vsel %vm17168_vm12, %v24502_v37, 0.0  ;;  %v17249_v14 = vsel %vm17168_vm12, %v24532_v3, 0.0  ;;  %s19285_s10 = scalar_lea.vmem %s17468_s9, 32  ;;  %p19292_p9 = scmp.lt.s32.totalorder %s17468_s9, %s17468_s9 }
 0x504   : > { %v17234_v47 = vadd.f32 %v17233_v1, %v17232_v53  ;;  %v17251_v48 = vsel %vm17168_vm12, %v24541_v60, 0.0  ;;  %v17253_v26 = vsel %vm17168_vm12, %v24575_v36, 0.0  ;;  %v17322_v5 = vmul.f32 %v24211_v44, %v24211_v44  ;;  %p19286_p6 = scmp.ne.s32.totalorder %s17468_s9, %s19285_s10  ;;  %p19293_p10 = scmp.lt.s32.totalorder %s19285_s10, %s19285_s10 }
 0x505   : > { %v17323_v22 = vmul.f32 %v24219_v59, %v24219_v59  ;;  %v17324_v1 = vmul.f32 %v24244_v12, %v24244_v12  ;;  %v17326_v44 = vmul.f32 %v24395_v11, %v24395_v11  ;;  %v17261_v11 = vsel %vm17168_vm12, %v24670_v33, 0.0 }
 0x506   : > { %v17236_v49 = vadd.f32 %v17235_v0, %v17234_v47  ;;  %v17255_v0 = vsel %vm17168_vm12, %v24582_v18, 0.0  ;;  %v17325_v47 = vmul.f32 %v24257_v8, %v24257_v8  ;;  %v17327_v8 = vmul.f32 %v24401_v57, %v24401_v57  ;;  %p19287_p7 = pnand %p19286_p6, %p18173_p5  ;;  %p19294_p11 = por %p19293_p10, %p19292_p9 }
 0x507   : > { %v17364_v59 = vsel %vm17168_vm12, %v17323_v22, 0.0  ;;  %v17366_v12 = vsel %vm17168_vm12, %v17324_v1, 0.0  ;;  %v17329_v57 = vmul.f32 %v24452_v41, %v24452_v41  ;;  %v17331_v41 = vmul.f32 %v24502_v37, %v24502_v37 }
 0x508   : > { %v17238_v27 = vadd.f32 %v17237_v61, %v17236_v49  ;;  %v17257_v49 = vsel %vm17168_vm12, %v24618_v38, 0.0  ;;  %v17333_v37 = vmul.f32 %v24541_v60, %v24541_v60  ;;  %v17335_v60 = vmul.f32 %v24582_v18, %v24582_v18  ;;  %p19288_p8 = pneg %p19287_p7 }
 0x509   : > { %v17337_v18 = vmul.f32 %v24633_v43, %v24633_v43  ;;  %vm17309_vm14 = vcmask 60416   ;;  %vm17319_vm15 = vcmask 57344  }
 0x50a   : > { %v17240_v15 = vadd.f32 %v17239_v54, %v17238_v27  ;;  %v17363_v54 = vsel %vm17168_vm12, %v17322_v5, 0.0  ;;  %v17265_v5 = vsel %vm17168_vm12, %v24735_v6, 0.0  ;;  %p19295_p12 = pnand %p19294_p11, %p19288_p8 }
 0x50c   : > { %v17242_v28 = vadd.f32 %v17241_v34, %v17240_v15  ;;  %v17365_v34 = vadd.f32 %v17364_v59, %v17363_v54  ;;  %v17259_v15 = vsel %vm17168_vm12, %v24633_v43, 0.0  ;;  %v17339_v43 = vmul.f32 %v24681_v51, %v24681_v51 }
 0x50e   : > { %v17244_v55 = vadd.f32 %v17243_v9, %v17242_v28  ;;  %v17368_v9 = vsel %vm17168_vm12, %v17325_v47, 0.0  ;;  %v17376_v47 = vsel %vm17168_vm12, %v17329_v57, 0.0 }
 0x510   : > { %v17246_v21 = vadd.f32 %v17245_v24, %v17244_v55  ;;  %v17367_v24 = vadd.f32 %v17366_v12, %v17365_v34  ;;  %v17328_v55 = vmul.f32 %v24444_v25, %v24444_v25  ;;  %v17330_v25 = vmul.f32 %v24496_v23, %v24496_v23 }
 0x511   : > { %v17332_v23 = vmul.f32 %v24532_v3, %v24532_v3  ;;  %v17380_v34 = vsel %vm17168_vm12, %v17331_v41, 0.0  ;;  %v17334_v3 = vmul.f32 %v24575_v36, %v24575_v36  ;;  %v17336_v36 = vmul.f32 %v24618_v38, %v24618_v38 }
 0x512   : > { %v17248_v20 = vadd.f32 %v17247_v45, %v17246_v21  ;;  %v17370_v45 = vsel %vm17168_vm12, %v17326_v44, 0.0  ;;  %v17374_v22 = vsel %vm17168_vm12, %v17328_v55, 0.0  ;;  %v17269_v44 = vsel %vm17168_vm12, %v24777_v62, 0.0 }
 0x513   : > { %v17378_v54 = vsel %vm17168_vm12, %v17330_v25, 0.0  ;;  %v17275_v55 = vsel %vm17168_vm12, %v24331_v16, 0.0  ;;  %v17386_v57 = vsel %vm17168_vm12, %v17334_v3, 0.0  ;;  %v17338_v38 = vmul.f32 %v24670_v33, %v24670_v33 }
 0x514   : > { %v17250_v46 = vadd.f32 %v17249_v14, %v17248_v20  ;;  %v17369_v14 = vadd.f32 %v17368_v9, %v17367_v24  ;;  %v17263_v20 = vsel %vm17168_vm12, %v24681_v51, 0.0  ;;  %v17273_v9 = vsel %vm17168_vm12, %v24315_v35, 0.0 }
 0x515   : > { %v17340_v33 = vmul.f32 %v24735_v6, %v24735_v6  ;;  %v17341_v51 = vmul.f32 %v24743_v2, %v24743_v2  ;;  %v17342_v6 = vmul.f32 %v24777_v62, %v24777_v62  ;;  %v17344_v62 = vmul.f32 %v24315_v35, %v24315_v35 }
 0x516   : > { %v17252_v53 = vadd.f32 %v17251_v48, %v17250_v46  ;;  %v17372_v48 = vsel %vm17168_vm12, %v17327_v8, 0.0  ;;  %v17346_v35 = vmul.f32 %v24422_v31, %v24422_v31 }
 0x518   : > { %v17254_v61 = vadd.f32 %v17253_v26, %v17252_v53  ;;  %v17371_v26 = vadd.f32 %v17370_v45, %v17369_v14  ;;  %v17384_v45 = vsel %vm17168_vm12, %v17333_v37, 0.0  ;;  %v17396_v37 = vsel %vm17168_vm12, %v17339_v43, 0.0 }
 0x51a   : > { %v17256_v27 = vadd.f32 %v17255_v0, %v17254_v61  ;;  %v17373_v53 = vadd.f32 %v17372_v48, %v17371_v26  ;;  %v17267_v0 = vsel %vm17168_vm12, %v24743_v2, 0.0  ;;  %v17279_v26 = vsel %vm17168_vm12, %v24428_v10, 0.0 }
 0x51b   : > { %v17343_v2 = vmul.f32 %v24783_v32, %v24783_v32 }
 0x51c   : > { %v17258_v28 = vadd.f32 %v17257_v49, %v17256_v27  ;;  %v17375_v49 = vadd.f32 %v17374_v22, %v17373_v53  ;;  %v17271_v27 = vsel %vm17168_vm12, %v24783_v32, 0.0  ;;  %v17390_v53 = vsel %vm17168_vm12, %v17336_v36, 0.0 }
 0x51d   : > { %v17295_v36 = vsel %vm17168_vm12, %v24616_v7, 0.0  ;;  %v17345_v32 = vmul.f32 %v24331_v16, %v24331_v16  ;;  %v17347_v16 = vmul.f32 %v24428_v10, %v24428_v10  ;;  %v17349_v10 = vmul.f32 %v24479_v4, %v24479_v4 }
 0x51e   : > { %v17260_v21 = vadd.f32 %v17259_v15, %v17258_v28  ;;  %v17377_v12 = vadd.f32 %v17376_v47, %v17375_v49  ;;  %v17382_v28 = vsel %vm17168_vm12, %v17332_v23, 0.0  ;;  %v17283_v47 = vsel %vm17168_vm12, %v24479_v4, 0.0 }
 0x51f   : > { %v17285_v23 = vsel %vm17168_vm12, %v24515_v13, 0.0  ;;  %v17351_v4 = vmul.f32 %v24524_v56, %v24524_v56 }
 0x520   : > { %v17262_v46 = vadd.f32 %v17261_v11, %v17260_v21  ;;  %v17379_v8 = vadd.f32 %v17378_v54, %v17377_v12  ;;  %v17394_v54 = vsel %vm17168_vm12, %v17338_v38, 0.0 }
 0x522   : > { %v17264_v1 = vadd.f32 %v17263_v20, %v17262_v46  ;;  %v17381_v11 = vadd.f32 %v17380_v34, %v17379_v8  ;;  %v17277_v20 = vsel %vm17168_vm12, %v24422_v31, 0.0  ;;  %v17289_v8 = vsel %vm17168_vm12, %v24554_v52, 0.0 }
 0x523   : > { %v17348_v31 = vmul.f32 %v24473_v39, %v24473_v39 }
 0x524   : > { %v17266_v61 = vadd.f32 %v17265_v5, %v17264_v1  ;;  %v17383_v14 = vadd.f32 %v17382_v28, %v17381_v11  ;;  %v17388_v5 = vsel %vm17168_vm12, %v17335_v60, 0.0  ;;  %v17281_v1 = vsel %vm17168_vm12, %v24473_v39, 0.0 }
 0x525   : > { %v17400_v11 = vsel %vm17168_vm12, %v17341_v51, 0.0  ;;  %v17350_v39 = vmul.f32 %v24515_v13, %v24515_v13  ;;  %v17416_v51 = vsel %vm17168_vm12, %v17349_v10, 0.0  ;;  %v17352_v13 = vmul.f32 %v24554_v52, %v24554_v52 }
 0x526   : > { %v17268_v59 = vadd.f32 %v17267_v0, %v17266_v61  ;;  %v17385_v46 = vadd.f32 %v17384_v45, %v17383_v14  ;;  %v17392_v61 = vsel %vm17168_vm12, %v17337_v18, 0.0  ;;  %v17293_v45 = vsel %vm17168_vm12, %v24604_v50, 0.0 }
 0x527   : > { %v17406_v18 = vsel %vm17168_vm12, %v17344_v62, 0.0  ;;  %v17355_v52 = vmul.f32 %v24616_v7, %v24616_v7  ;;  %v17358_v7 = vmul.f32 %v24715_v40, %v24715_v40 }
 0x528   : > { %v17270_v15 = vadd.f32 %v17269_v44, %v17268_v59  ;;  %v17387_v22 = vadd.f32 %v17386_v57, %v17385_v46  ;;  %v17404_v57 = vsel %vm17168_vm12, %v17343_v2, 0.0  ;;  %v17354_v2 = vmul.f32 %v24604_v50, %v24604_v50 }
 0x529   : > { %v17357_v50 = vmul.f32 %v24655_v58, %v24655_v58 }
 0x52a   : > { %v17272_v24 = vadd.f32 %v17271_v27, %v17270_v15  ;;  %v17389_v41 = vadd.f32 %v17388_v5, %v17387_v22  ;;  %v17287_v27 = vsel %vm17168_vm12, %v24524_v56, 0.0  ;;  %v17299_v22 = vsel %vm17168_vm12, %v24655_v58, 0.0 }
 0x52b   : > { %v17360_v58 = vmul.f32 %v24759_v19, %v24759_v19 }
 0x52c   : > { %v17274_v21 = vadd.f32 %v17273_v9, %v17272_v24  ;;  %v17391_v44 = vadd.f32 %v17390_v53, %v17389_v41  ;;  %v17398_v9 = vsel %vm17168_vm12, %v17340_v33, 0.0  ;;  %v17291_v24 = vsel %vm17168_vm12, %v24562_v29, 0.0 }
 0x52d   : > { %v17410_v41 = vsel %vm17168_vm12, %v17346_v35, 0.0  ;;  %v17305_v33 = vsel %vm17168_vm12, %v24759_v19, 0.0 }
 0x52e   : > { %v17276_v48 = vadd.f32 %v17275_v55, %v17274_v21  ;;  %v17393_v12 = vadd.f32 %v17392_v61, %v17391_v44  ;;  %v17402_v21 = vsel %vm17168_vm12, %v17342_v6, 0.0  ;;  %v17303_v61 = vsel %vm17168_vm12, %v24721_v42, 0.0 }
 0x530   : > { %v17278_v25 = vadd.f32 %v17277_v20, %v17276_v48  ;;  %v17395_v15 = vadd.f32 %v17394_v54, %v17393_v12  ;;  %v17414_v54 = vsel %vm17168_vm12, %v17348_v31, 0.0  ;;  %v17438_v31 = vsel %vm17168_vm12, %v17360_v58, 0.0 }
 0x532   : > { %v17280_v0 = vadd.f32 %v17279_v26, %v17278_v25  ;;  %v17397_v28 = vadd.f32 %v17396_v37, %v17395_v15  ;;  %v17297_v26 = vsel %vm17168_vm12, %v24647_v30, 0.0  ;;  %v17310_v15 = vsel %vm17309_vm14, %v24797_v17, 0.0 }
 0x534   : > { %v17282_v49 = vadd.f32 %v17281_v1, %v17280_v0  ;;  %v17399_v60 = vadd.f32 %v17398_v9, %v17397_v28  ;;  %v17408_v1 = vsel %vm17168_vm12, %v17345_v32, 0.0  ;;  %v17301_v0 = vsel %vm17168_vm12, %v24715_v40, 0.0 }
 0x535   : > { %v17420_v28 = vsel %vm17168_vm12, %v17351_v4, 0.0  ;;  %v17428_v32 = vsel %vm17168_vm12, %v17355_v52, 0.0 }
 0x536   : > { %v17284_v59 = vadd.f32 %v17283_v47, %v17282_v49  ;;  %v17401_v20 = vadd.f32 %v17400_v11, %v17399_v60  ;;  %v17412_v49 = vsel %vm17168_vm12, %v17347_v16, 0.0  ;;  %v17422_v11 = vsel %vm17168_vm12, %v17352_v13, 0.0 }
 0x537   : > { %v17434_v16 = vsel %vm17168_vm12, %v17358_v7, 0.0 }
 0x538   : > { %v17286_v34 = vadd.f32 %v17285_v23, %v17284_v59  ;;  %v17403_v46 = vadd.f32 %v17402_v21, %v17401_v20 }
 0x53a   : > { %v17288_v3 = vadd.f32 %v17287_v27, %v17286_v34  ;;  %v17405_v25 = vadd.f32 %v17404_v57, %v17403_v46  ;;  %v17307_v27 = vsel %vm17168_vm12, %v24765_v63, 0.0 }
 0x53c   : > { %v17290_v55 = vadd.f32 %v17289_v8, %v17288_v3  ;;  %v17407_v53 = vadd.f32 %v17406_v18, %v17405_v25  ;;  %v17418_v8 = vsel %vm17168_vm12, %v17350_v39, 0.0  ;;  %v17353_v3 = vmul.f32 %v24562_v29, %v24562_v29  ;;  %v17229_v18 = vld [vmem:[#allocation2] sm:$0x1]  ;;  %v17321_v39 = vld [vmem:[#allocation2 + $0x1] sm:$0x1] }
 0x53d   : > { %v17356_v29 = vmul.f32 %v24647_v30, %v24647_v30  ;;  %v17359_v30 = vmul.f32 %v24721_v42, %v24721_v42 }
 0x53e   : > { %v17292_v14 = vadd.f32 %v17291_v24, %v17290_v55  ;;  %v17409_v43 = vadd.f32 %v17408_v1, %v17407_v53 }
 0x53f   : > { %v17430_v46 = vsel %vm17168_vm12, %v17356_v29, 0.0  ;;  %v17436_v53 = vsel %vm17168_vm12, %v17359_v30, 0.0 }
 0x540   : > { %v17294_v48 = vadd.f32 %v17293_v45, %v17292_v14  ;;  %v17411_v23 = vadd.f32 %v17410_v41, %v17409_v43  ;;  %v17424_v45 = vsel %vm17168_vm12, %v17353_v3, 0.0  ;;  %v17426_v14 = vsel %vm17168_vm12, %v17354_v2, 0.0 }
 0x542   : > { %v17296_v5 = vadd.f32 %v17295_v36, %v17294_v48  ;;  %v17413_v12 = vadd.f32 %v17412_v49, %v17411_v23 }
 0x544   : > { %v17298_v38 = vadd.f32 %v17297_v26, %v17296_v5  ;;  %v17415_v34 = vadd.f32 %v17414_v54, %v17413_v12  ;;  %v17432_v5 = vsel %vm17168_vm12, %v17357_v50, 0.0 }
 0x546   : > { %v17300_v47 = vadd.f32 %v17299_v22, %v17298_v38  ;;  %v17417_v9 = vadd.f32 %v17416_v51, %v17415_v34  ;;  %v17361_v38 = vmul.f32 %v24765_v63, %v24765_v63 }
 0x548   : > { %v17302_v44 = vadd.f32 %v17301_v0, %v17300_v47  ;;  %v17419_v24 = vadd.f32 %v17418_v8, %v17417_v9  ;;  %v17362_v0 = vmul.f32 %v24797_v17, %v24797_v17  ;;  %v17440_v19 = vsel %vm17168_vm12, %v17361_v38, 0.0 }
 0x54a   : > { %v17304_v59 = vadd.f32 %v17303_v61, %v17302_v44  ;;  %v17421_v60 = vadd.f32 %v17420_v28, %v17419_v24  ;;  %v17442_v43 = vsel %vm17309_vm14, %v17362_v0, 0.0 }
 0x54c   : > { %v17306_v37 = vadd.f32 %v17305_v33, %v17304_v59  ;;  %v17423_v21 = vadd.f32 %v17422_v11, %v17421_v60 }
 0x54e   : > { %v17308_v6 = vadd.f32 %v17307_v27, %v17306_v37  ;;  %v17425_v36 = vadd.f32 %v17424_v45, %v17423_v21 }
 0x550   : > { %v17311_v56 = vadd.f32 %v17310_v15, %v17308_v6  ;;  %v17427_v48 = vadd.f32 %v17426_v14, %v17425_v36 }
 0x552   : > { %v17312_v55 = vrot.slane %v17311_v56, 4  ;;  %v17429_v35 = vadd.f32 %v17428_v32, %v17427_v48 }
 0x554   : > { %v17313_v62 = vadd.f32 %v17312_v55, %v17311_v56  ;;  %v17431_v22 = vadd.f32 %v17430_v46, %v17429_v35 }
 0x556   : > { %v17314_v20 = vrot.slane %v17313_v62, 2  ;;  %v17433_v40 = vadd.f32 %v17432_v5, %v17431_v22 }
 0x558   : > { %v17315_v57 = vadd.f32 %v17314_v20, %v17313_v62  ;;  %v17435_v42 = vadd.f32 %v17434_v16, %v17433_v40 }
 0x55a   : > { %v17316_v26 = vrot.slane %v17315_v57, 1  ;;  %v17437_v41 = vadd.f32 %v17436_v53, %v17435_v42 }
 0x55c   : > { %v17317_v25 = vadd.f32 %v17316_v26, %v17315_v57  ;;  %v17439_v47 = vadd.f32 %v17438_v31, %v17437_v41 }
 0x55e   : > { %v17318_v1 = vadd.f32 %v17317_v25, %v17229_v18  ;;  %v17441_v61 = vadd.f32 %v17440_v19, %v17439_v47 }
 0x560   : > { %17320 = vst.msk [vmem:[#allocation2] sm:$0x1] %vm17319_vm15, %v17318_v1  ;;  %v17443_v10 = vadd.f32 %v17442_v43, %v17441_v61 }
 0x562   : > { %v17444_v63 = vrot.slane %v17443_v10, 4 }
 0x564   : > { %v17445_v49 = vadd.f32 %v17444_v63, %v17443_v10 }
 0x566   : > { %v17446_v44 = vrot.slane %v17445_v49, 2 }
 0x568   : > { %v17447_v23 = vadd.f32 %v17446_v44, %v17445_v49 }
 0x56a   : > { %v17448_v33 = vrot.slane %v17447_v23, 1 }
 0x56c   : > { %v17449_v17 = vadd.f32 %v17448_v33, %v17447_v23 }
 0x56e   : > { %v17450_v54 = vadd.f32 %v17449_v17, %v17321_v39 }
 0x570   : > { %17451 = vst.msk [vmem:[#allocation2 + $0x1] sm:$0x1] %vm17319_vm15, %v17450_v54 }
 0x571   : > { %19298 = shalt.err (!%p19295_p12)
}
 0x572   : > { %s19299_s15 = scalar_lea.hbm %s25055_s3, 32 }
 0x573   : > { %p19300_p13 = scmp.ne.s32.totalorder %s25055_s3, %s19299_s15  ;;  %p19305_p2 = scmp.lt.u32.totalorder %s19299_s15, %s25055_s3 }
 0x575   : > { %p19301_p0 = pnand %p19300_p13, %p18173_p5 }
 0x577   : > { %p19302_p1 = pneg %p19301_p0 }
 0x579   : > { %p19307_p3 = pnand %p19305_p2, %p19302_p1 }
 0x57b   : > { %19310 = shalt.err (!%p19307_p3)
}
 0x57c   : > { %18170 = dma.vmem_to_hbm [thread:$0]  (%p18173_p5), %s17468_s9, 32, %s25055_s3, [#allocation3]  }
 0x57d   : > { %19316 = dma.done.wait (%p18173_p5), [#allocation3], 32  }
 0x57e   : > { %19318 = vsyncadd (%p18173_p5), [#allocation3], 4294967264 }
 0x57f PF: > { %s15_s12 = sadd.s32 1, %s19321_s12  }
 0x580   : > { %p12_p4 = scmp.ge.s32.totalorder %s15_s12, 4  }
 0x582   :  { %14 = sbr.rel (!%p12_p4) target bundleno = 1 (0x1), region = 73 }
 0x589   :  { %17488 = vsyncpa [#allocation3], 1 }
 0x58a   :  { %17490 = vsyncpa [#allocation3 + $0x1], 1 }

</bundles_post_ra>
